<compile_context>
chip_gen: v6e
topology: v6e:2x2x1
jax: 0.10.0
libtpu: 0.0.40
codegen_flags: <defaults>
</compile_context>

<pallas_src>
import math

import jax
import jax.numpy as jnp
import numpy as np
from jax import lax
from jax.experimental import pallas as pl
from jax.experimental.pallas import tpu as pltpu

# (name, cin, cout, kernel, stride) for V1, V2, V4, IT
BLOCK_CFGS = (
    ("block1", 3, 64, 7, 2),
    ("block2", 64, 128, 3, 1),
    ("block3", 128, 256, 3, 1),
    ("block4", 256, 512, 3, 1),
)
NUM_CLASSES = 1000
_LANE = 128


def _round_up(x, m):
    return -(-x // m) * m


# ------------------------- fused CORblock_Z kernel -------------------------

def _make_block_kernel(*, groups, m_rows, row_stride, ho, wo, hop, wop,
                       with_fc):
    """Conv (implicit GEMM, K packed per kh) + bias + ReLU + MaxPool(3,2,1)
    [+ avgpool + fc]."""

    def kernel(*refs):
        if with_fc:
            x_ref, w_ref, b_ref, wfc_ref, bfc_ref, o_ref, fc_ref = refs
        else:
            x_ref, w_ref, b_ref, o_ref = refs
        cout = o_ref.shape[-1]

        # --- conv as implicit GEMM: one MXU dot per kh group, K = k*Cin ---
        acc = None
        for g, offs in enumerate(groups):
            if len(offs) == 1:
                slab = x_ref[0, pl.ds(offs[0], m_rows), :]
            else:
                # lane-concat of the kw tap slices -> (m_rows, k*Cin)
                slab = jnp.concatenate(
                    [x_ref[0, pl.ds(o_, m_rows), :] for o_ in offs], axis=-1)
            part = jnp.dot(slab, w_ref[g], preferred_element_type=jnp.float32)
            acc = part if acc is None else acc + part
        acc = jnp.maximum(acc + b_ref[...], 0.0)          # bias + ReLU (f32)
        # acc[h*row_stride + w, :] == conv_out[h, w, :] for w < wo; columns
        # w >= wo are garbage and are never read by valid pool outputs below.

        # --- fused MaxPool2d(kernel=3, stride=2, padding=1), vectorized ---
        # Row pooling: whole (row_stride, cout) slabs, one max-of-3 per pooled
        # row (zero padding is valid here only because values are post-ReLU).
        rows = [acc[r * row_stride:(r + 1) * row_stride, :] for r in range(ho)]
        zero_row = jnp.zeros_like(rows[0])

        def pooled_row(i):
            r0, r2 = 2 * i - 1, 2 * i + 1
            a = rows[r0] if r0 >= 0 else zero_row
            c = rows[r2] if r2 < ho else zero_row
            return jnp.maximum(jnp.maximum(a, rows[2 * i]), c)

        rowp = jnp.stack([pooled_row(i) for i in range(hop)], axis=0)
        # rowp: (hop, row_stride, cout); valid columns are [0, wo).

        # Column pooling: shifted-slab maxima (left/right neighbours built so
        # garbage columns can never leak into valid outputs).
        zc1 = jnp.zeros((hop, 1, cout), jnp.float32)
        left = jnp.concatenate([zc1, rowp[:, :row_stride - 1, :]], axis=1)
        if wo > 1:
            right = jnp.concatenate(
                [rowp[:, 1:wo, :],
                 jnp.zeros((hop, row_stride - (wo - 1), cout), jnp.float32)],
                axis=1)
        else:
            right = jnp.zeros_like(rowp)
        colmax = jnp.maximum(jnp.maximum(rowp, left), right)

        # Keep even columns (stride-2 downsample): wop full-depth slices.
        cols = [colmax[:, 2 * j:2 * j + 1, :] for j in range(wop)]
        pooled = cols[0] if wop == 1 else jnp.concatenate(cols, axis=1)
        o_ref[0, :, :, :] = pooled.astype(o_ref.dtype)    # (hop, wop, cout)

        # --- fused AdaptiveAvgPool2d((1,1)) + fc (last block only) ---
        if with_fc:
            sp = jnp.sum(pooled, axis=1)                  # (hop, cout)
            sp = jnp.sum(sp, axis=0, keepdims=True)       # (1, cout)
            avg = sp * (1.0 / float(hop * wop))
            logits = jnp.dot(avg.astype(jnp.bfloat16), wfc_ref[...],
                             preferred_element_type=jnp.float32) + bfc_ref[...]
            fc_ref[0, :, :] = logits.astype(fc_ref.dtype)

    return kernel


def corblock_z(x_nhwc, w, b, *, kernel_size, stride, fc=None):
    """One fused CORblock_Z step.  x_nhwc: (N,H,W,Cin) f32, w: (k,k,Cin,Cout)."""
    n, h, wdt, cin = x_nhwc.shape
    k, cout = kernel_size, w.shape[3]
    p = k // 2
    ho = (h + 2 * p - k) // stride + 1
    wo = (wdt + 2 * p - k) // stride + 1
    hop = (ho - 1) // 2 + 1
    wop = (wo - 1) // 2 + 1

    if stride == 1:
        # In-kernel implicit im2col: flatten the zero-padded input to
        # (N, Hp*row_stride, Cin) with the per-image row stride padded to a
        # multiple of 8 (sublane-aligned slab slices).  The kh-th tap group is
        # the k contiguous row-slices starting at kh*row_stride + kw.
        hp, wp = h + 2 * p, wdt + 2 * p
        row_stride = _round_up(wp, 8)
        m_rows = ho * row_stride
        groups = [[kh * row_stride + kw for kw in range(k)] for kh in range(k)]
        r_rows = _round_up(groups[-1][-1] + m_rows, 8)
        xf = jnp.pad(x_nhwc, ((0, 0), (p, p), (p, p + row_stride - wp), (0, 0)))
        xf = xf.reshape(n, hp * row_stride, cin)
        xf = jnp.pad(xf, ((0, 0), (0, r_rows - hp * row_stride), (0, 0)))
        x_in = xf.astype(jnp.bfloat16)
        w_in = w.reshape(k, k * cin, cout).astype(jnp.bfloat16)
    else:
        # Stride-2 7x7 stem (Cin=3): small glue-side im2col, Cin padded to 4
        # and GEMM K padded to a multiple of 128 (zero rows in the weight).
        # TODO(synk): at ImageNet scale build these patches in-kernel to avoid
        # the ~12x HBM inflation of the patch array (v5e feedback item).
        cin_p = 4
        k_flat = k * k * cin_p
        k_pad = _round_up(k_flat, _LANE)
        row_stride = _round_up(wo, 8)
        m_rows = ho * row_stride
        groups = [[0]]
        xp = jnp.pad(x_nhwc, ((0, 0), (p, p), (p, p), (0, cin_p - cin)))
        cols = []
        for kh in range(k):
            for kw in range(k):
                cols.append(xp[:, kh:kh + stride * (ho - 1) + 1:stride,
                               kw:kw + stride * (wo - 1) + 1:stride, :])
        patches = jnp.concatenate(cols, axis=-1)          # (n, ho, wo, k_flat)
        patches = jnp.pad(patches, ((0, 0), (0, 0), (0, row_stride - wo),
                                    (0, k_pad - k_flat)))
        x_in = patches.reshape(n, m_rows, k_pad).astype(jnp.bfloat16)
        w_in = jnp.pad(w, ((0, 0), (0, 0), (0, cin_p - cin), (0, 0)))
        w_in = w_in.reshape(1, k_flat, cout)
        w_in = jnp.pad(w_in, ((0, 0), (0, k_pad - k_flat), (0, 0)))
        w_in = w_in.astype(jnp.bfloat16)

    b_in = b.reshape(1, cout).astype(jnp.float32)
    _, r_dim, k_dim = x_in.shape
    t_dim, kw_dim, _ = w_in.shape

    kernel = _make_block_kernel(groups=groups, m_rows=m_rows,
                                row_stride=row_stride, ho=ho, wo=wo,
                                hop=hop, wop=wop, with_fc=fc is not None)

    in_specs = [
        pl.BlockSpec((1, r_dim, k_dim), lambda i: (i, 0, 0)),
        pl.BlockSpec((t_dim, kw_dim, cout), lambda i: (0, 0, 0)),
        pl.BlockSpec((1, cout), lambda i: (0, 0)),
    ]
    inputs = [x_in, w_in, b_in]
    out_shape = jax.ShapeDtypeStruct((n, hop, wop, cout), jnp.float32)
    out_specs = pl.BlockSpec((1, hop, wop, cout), lambda i: (i, 0, 0, 0))

    if fc is not None:
        wfc, bfc = fc
        nfc = wfc.shape[1]
        in_specs += [pl.BlockSpec((cout, nfc), lambda i: (0, 0)),
                     pl.BlockSpec((1, nfc), lambda i: (0, 0))]
        inputs += [wfc, bfc]
        out_shape = [out_shape, jax.ShapeDtypeStruct((n, 1, nfc), jnp.float32)]
        out_specs = [out_specs, pl.BlockSpec((1, 1, nfc), lambda i: (i, 0, 0))]

    return pl.pallas_call(
        kernel,
        grid=(n,),
        in_specs=in_specs,
        out_specs=out_specs,
        out_shape=out_shape,
        compiler_params=pltpu.CompilerParams(
            dimension_semantics=("parallel",),
            vmem_limit_bytes=32 * 1024 * 1024),
    )(*inputs)


# ------------------------------- parameters -------------------------------

def init_params(key):
    def xavier(k_, shape, fan_in, fan_out):
        a = math.sqrt(6.0 / (fan_in + fan_out))
        return jax.random.uniform(k_, shape, jnp.float32, -a, a)

    keys = jax.random.split(key, len(BLOCK_CFGS) + 1)
    params = {}
    for i, (name, cin, cout, k, _s) in enumerate(BLOCK_CFGS):
        params[name] = {
            "w": xavier(keys[i], (k, k, cin, cout), cin * k * k, cout * k * k),
            "b": jnp.zeros((cout,), jnp.float32),
        }
    params["fc"] = {
        "w": xavier(keys[-1], (512, NUM_CLASSES), 512, NUM_CLASSES),
        "b": jnp.zeros((NUM_CLASSES,), jnp.float32),
    }
    return params


# --------------------------------- forward --------------------------------

def cornet_z_forward(params, x_nchw):
    """Returns [x1, x2, x3, x4, x5] exactly like the PyTorch module (NCHW feats)."""
    x = jnp.transpose(x_nchw, (0, 2, 3, 1)).astype(jnp.float32)   # NCHW -> NHWC
    nfc = _round_up(NUM_CLASSES, _LANE)                           # 1000 -> 1024
    wfc = jnp.pad(params["fc"]["w"],
                  ((0, 0), (0, nfc - NUM_CLASSES))).astype(jnp.bfloat16)
    bfc = jnp.pad(params["fc"]["b"],
                  (0, nfc - NUM_CLASSES)).reshape(1, nfc).astype(jnp.float32)

    feats = []
    fc_raw = None
    for idx, (name, _cin, _cout, k, s) in enumerate(BLOCK_CFGS):
        p = params[name]
        if idx == len(BLOCK_CFGS) - 1:
            x, fc_raw = corblock_z(x, p["w"], p["b"], kernel_size=k, stride=s,
                                   fc=(wfc, bfc))
        else:
            x = corblock_z(x, p["w"], p["b"], kernel_size=k, stride=s)
        feats.append(jnp.transpose(x, (0, 3, 1, 2)))              # NCHW feature map
    logits = fc_raw[:, 0, :NUM_CLASSES]
    return feats + [logits]


# -------------------------- pure-JAX reference -----------------------------

def _reference_forward(params, x_nchw):
    x = jnp.transpose(x_nchw, (0, 2, 3, 1)).astype(jnp.float32)
    feats = []
    for name, _cin, _cout, k, s in BLOCK_CFGS:
        w, b = params[name]["w"], params[name]["b"]
        x = lax.conv_general_dilated(x, w, (s, s), [(k // 2, k // 2)] * 2,
                                     dimension_numbers=("NHWC", "HWIO", "NHWC"))
        x = jnp.maximum(x + b, 0.0)
        x = lax.reduce_window(x, -jnp.inf, lax.max, (1, 3, 3, 1), (1, 2, 2, 1),
                              ((0, 0), (1, 1), (1, 1), (0, 0)))
        feats.append(jnp.transpose(x, (0, 3, 1, 2)))
    pooled = jnp.mean(x, axis=(1, 2))
    logits = pooled @ params["fc"]["w"] + params["fc"]["b"]
    return feats + [logits]


if __name__ == "__main__":
    key = jax.random.PRNGKey(0)
    pkey, xkey = jax.random.split(key)
    params = init_params(pkey)
    x = jax.random.normal(xkey, (2, 3, 32, 32), jnp.float32)  # small NCHW input

    outs = jax.jit(cornet_z_forward)(params, x)
    outs = jax.block_until_ready(outs)

    expected = [(2, 64, 8, 8), (2, 128, 4, 4), (2, 256, 2, 2),
                (2, 512, 1, 1), (2, NUM_CLASSES)]
    assert [tuple(o.shape) for o in outs] == expected, \
        [tuple(o.shape) for o in outs]

    # Loose-tolerance check vs an f32 XLA reference (kernel uses bf16 operands).
    refs = jax.block_until_ready(jax.jit(_reference_forward)(params, x))
    for got, ref in zip(outs, refs):
        np.testing.assert_allclose(np.asarray(got), np.asarray(ref),
                                   rtol=1e-1, atol=1e-1)

    print("KERNEL_OK")
</pallas_src>

<mosaic_0001>
module attributes {stable_mosaic.version = 11 : i64} {
  func.func @kernel(%arg0: i32, %arg1: memref<1x256x256xbf16, #tpu.memory_space<vmem>>, %arg2: memref<1x256x64xbf16, #tpu.memory_space<vmem>>, %arg3: memref<1x64xf32, #tpu.memory_space<vmem>>, %arg4: memref<1x8x8x64xf32, #tpu.memory_space<vmem>>) attributes {dimension_semantics = [#tpu.dimension_semantics<parallel>], iteration_bounds = array<i64: 2>, scalar_prefetch = 0 : i64, scratch_operands = 0 : i64, tpu.core_type = #tpu.core_type<tc>, window_params = [{transform_indices = @transform_0, window_bounds = array<i64: 1, 256, 256>}, {pipeline_mode = #tpu.pipeline_mode<synchronous>, transform_indices = @transform_1, window_bounds = array<i64: 1, 256, 64>}, {pipeline_mode = #tpu.pipeline_mode<synchronous>, transform_indices = @transform_2, window_bounds = array<i64: 1, 64>}, {transform_indices = @transform_3, window_bounds = array<i64: 1, 8, 8, 64>}]} {
    %c0 = arith.constant 0 : index
    %c0_0 = arith.constant 0 : index
    %c0_1 = arith.constant 0 : index
    %0 = vector.load %arg1[%c0, %c0_0, %c0_1] : memref<1x256x256xbf16, #tpu.memory_space<vmem>>, vector<1x256x256xbf16>
    %1 = vector.shape_cast %0 : vector<1x256x256xbf16> to vector<256x256xbf16>
    %c0_2 = arith.constant 0 : index
    %c0_3 = arith.constant 0 : index
    %c0_4 = arith.constant 0 : index
    %2 = vector.load %arg2[%c0_2, %c0_3, %c0_4] : memref<1x256x64xbf16, #tpu.memory_space<vmem>>, vector<1x256x64xbf16>
    %3 = vector.shape_cast %2 : vector<1x256x64xbf16> to vector<256x64xbf16>
    %cst = arith.constant dense<0.000000e+00> : vector<256x64xf32>
    %4 = tpu.matmul %1, %3, %cst {dimension_numbers = #tpu.dot_dimension_numbers<[1], [0], [0], [1], [0, 0, 1, 1], [], []>} : vector<256x256xbf16>, vector<256x64xbf16>, vector<256x64xf32> -> vector<256x64xf32>
    %c0_5 = arith.constant 0 : index
    %c0_6 = arith.constant 0 : index
    %5 = vector.load %arg3[%c0_5, %c0_6] : memref<1x64xf32, #tpu.memory_space<vmem>>, vector<1x64xf32>
    %6 = vector.broadcast %5 : vector<1x64xf32> to vector<256x64xf32>
    %7 = arith.addf %4, %6 : vector<256x64xf32>
    %cst_7 = arith.constant 0.000000e+00 : f32
    %8 = vector.broadcast %cst_7 : f32 to vector<256x64xf32>
    %9 = arith.maximumf %7, %8 : vector<256x64xf32>
    %10 = vector.extract_strided_slice %9 {offsets = [0, 0], sizes = [16, 64], strides = [1, 1]} : vector<256x64xf32> to vector<16x64xf32>
    %11 = vector.extract_strided_slice %9 {offsets = [16, 0], sizes = [16, 64], strides = [1, 1]} : vector<256x64xf32> to vector<16x64xf32>
    %12 = vector.extract_strided_slice %9 {offsets = [32, 0], sizes = [16, 64], strides = [1, 1]} : vector<256x64xf32> to vector<16x64xf32>
    %13 = vector.extract_strided_slice %9 {offsets = [48, 0], sizes = [16, 64], strides = [1, 1]} : vector<256x64xf32> to vector<16x64xf32>
    %14 = vector.extract_strided_slice %9 {offsets = [64, 0], sizes = [16, 64], strides = [1, 1]} : vector<256x64xf32> to vector<16x64xf32>
    %15 = vector.extract_strided_slice %9 {offsets = [80, 0], sizes = [16, 64], strides = [1, 1]} : vector<256x64xf32> to vector<16x64xf32>
    %16 = vector.extract_strided_slice %9 {offsets = [96, 0], sizes = [16, 64], strides = [1, 1]} : vector<256x64xf32> to vector<16x64xf32>
    %17 = vector.extract_strided_slice %9 {offsets = [112, 0], sizes = [16, 64], strides = [1, 1]} : vector<256x64xf32> to vector<16x64xf32>
    %18 = vector.extract_strided_slice %9 {offsets = [128, 0], sizes = [16, 64], strides = [1, 1]} : vector<256x64xf32> to vector<16x64xf32>
    %19 = vector.extract_strided_slice %9 {offsets = [144, 0], sizes = [16, 64], strides = [1, 1]} : vector<256x64xf32> to vector<16x64xf32>
    %20 = vector.extract_strided_slice %9 {offsets = [160, 0], sizes = [16, 64], strides = [1, 1]} : vector<256x64xf32> to vector<16x64xf32>
    %21 = vector.extract_strided_slice %9 {offsets = [176, 0], sizes = [16, 64], strides = [1, 1]} : vector<256x64xf32> to vector<16x64xf32>
    %22 = vector.extract_strided_slice %9 {offsets = [192, 0], sizes = [16, 64], strides = [1, 1]} : vector<256x64xf32> to vector<16x64xf32>
    %23 = vector.extract_strided_slice %9 {offsets = [208, 0], sizes = [16, 64], strides = [1, 1]} : vector<256x64xf32> to vector<16x64xf32>
    %24 = vector.extract_strided_slice %9 {offsets = [224, 0], sizes = [16, 64], strides = [1, 1]} : vector<256x64xf32> to vector<16x64xf32>
    %25 = vector.extract_strided_slice %9 {offsets = [240, 0], sizes = [16, 64], strides = [1, 1]} : vector<256x64xf32> to vector<16x64xf32>
    %cst_8 = arith.constant 0.000000e+00 : f32
    %26 = vector.broadcast %cst_8 : f32 to vector<16x64xf32>
    %27 = arith.maximumf %26, %10 : vector<16x64xf32>
    %28 = arith.maximumf %27, %11 : vector<16x64xf32>
    %29 = arith.maximumf %11, %12 : vector<16x64xf32>
    %30 = arith.maximumf %29, %13 : vector<16x64xf32>
    %31 = arith.maximumf %13, %14 : vector<16x64xf32>
    %32 = arith.maximumf %31, %15 : vector<16x64xf32>
    %33 = arith.maximumf %15, %16 : vector<16x64xf32>
    %34 = arith.maximumf %33, %17 : vector<16x64xf32>
    %35 = arith.maximumf %17, %18 : vector<16x64xf32>
    %36 = arith.maximumf %35, %19 : vector<16x64xf32>
    %37 = arith.maximumf %19, %20 : vector<16x64xf32>
    %38 = arith.maximumf %37, %21 : vector<16x64xf32>
    %39 = arith.maximumf %21, %22 : vector<16x64xf32>
    %40 = arith.maximumf %39, %23 : vector<16x64xf32>
    %41 = arith.maximumf %23, %24 : vector<16x64xf32>
    %42 = arith.maximumf %41, %25 : vector<16x64xf32>
    %43 = vector.shape_cast %28 : vector<16x64xf32> to vector<1x16x64xf32>
    %44 = vector.shape_cast %30 : vector<16x64xf32> to vector<1x16x64xf32>
    %45 = vector.shape_cast %32 : vector<16x64xf32> to vector<1x16x64xf32>
    %46 = vector.shape_cast %34 : vector<16x64xf32> to vector<1x16x64xf32>
    %47 = vector.shape_cast %36 : vector<16x64xf32> to vector<1x16x64xf32>
    %48 = vector.shape_cast %38 : vector<16x64xf32> to vector<1x16x64xf32>
    %49 = vector.shape_cast %40 : vector<16x64xf32> to vector<1x16x64xf32>
    %50 = vector.shape_cast %42 : vector<16x64xf32> to vector<1x16x64xf32>
    %51 = tpu.concatenate %43, %44, %45, %46, %47, %48, %49, %50 in 0 : vector<1x16x64xf32>, vector<1x16x64xf32>, vector<1x16x64xf32>, vector<1x16x64xf32>, vector<1x16x64xf32>, vector<1x16x64xf32>, vector<1x16x64xf32>, vector<1x16x64xf32> -> vector<8x16x64xf32>
    %cst_9 = arith.constant 0.000000e+00 : f32
    %52 = vector.broadcast %cst_9 : f32 to vector<8x1x64xf32>
    %53 = vector.extract_strided_slice %51 {offsets = [0, 0, 0], sizes = [8, 15, 64], strides = [1, 1, 1]} : vector<8x16x64xf32> to vector<8x15x64xf32>
    %54 = tpu.concatenate %52, %53 in 1 : vector<8x1x64xf32>, vector<8x15x64xf32> -> vector<8x16x64xf32>
    %55 = vector.extract_strided_slice %51 {offsets = [0, 1, 0], sizes = [8, 15, 64], strides = [1, 1, 1]} : vector<8x16x64xf32> to vector<8x15x64xf32>
    %cst_10 = arith.constant 0.000000e+00 : f32
    %56 = vector.broadcast %cst_10 : f32 to vector<8x1x64xf32>
    %57 = tpu.concatenate %55, %56 in 1 : vector<8x15x64xf32>, vector<8x1x64xf32> -> vector<8x16x64xf32>
    %58 = arith.maximumf %51, %54 : vector<8x16x64xf32>
    %59 = arith.maximumf %58, %57 : vector<8x16x64xf32>
    %60 = vector.extract_strided_slice %59 {offsets = [0, 0, 0], sizes = [8, 1, 64], strides = [1, 1, 1]} : vector<8x16x64xf32> to vector<8x1x64xf32>
    %61 = vector.extract_strided_slice %59 {offsets = [0, 2, 0], sizes = [8, 1, 64], strides = [1, 1, 1]} : vector<8x16x64xf32> to vector<8x1x64xf32>
    %62 = vector.extract_strided_slice %59 {offsets = [0, 4, 0], sizes = [8, 1, 64], strides = [1, 1, 1]} : vector<8x16x64xf32> to vector<8x1x64xf32>
    %63 = vector.extract_strided_slice %59 {offsets = [0, 6, 0], sizes = [8, 1, 64], strides = [1, 1, 1]} : vector<8x16x64xf32> to vector<8x1x64xf32>
    %64 = vector.extract_strided_slice %59 {offsets = [0, 8, 0], sizes = [8, 1, 64], strides = [1, 1, 1]} : vector<8x16x64xf32> to vector<8x1x64xf32>
    %65 = vector.extract_strided_slice %59 {offsets = [0, 10, 0], sizes = [8, 1, 64], strides = [1, 1, 1]} : vector<8x16x64xf32> to vector<8x1x64xf32>
    %66 = vector.extract_strided_slice %59 {offsets = [0, 12, 0], sizes = [8, 1, 64], strides = [1, 1, 1]} : vector<8x16x64xf32> to vector<8x1x64xf32>
    %67 = vector.extract_strided_slice %59 {offsets = [0, 14, 0], sizes = [8, 1, 64], strides = [1, 1, 1]} : vector<8x16x64xf32> to vector<8x1x64xf32>
    %68 = tpu.concatenate %60, %61, %62, %63, %64, %65, %66, %67 in 1 : vector<8x1x64xf32>, vector<8x1x64xf32>, vector<8x1x64xf32>, vector<8x1x64xf32>, vector<8x1x64xf32>, vector<8x1x64xf32>, vector<8x1x64xf32>, vector<8x1x64xf32> -> vector<8x8x64xf32>
    %c0_11 = arith.constant 0 : index
    %c0_12 = arith.constant 0 : index
    %c0_13 = arith.constant 0 : index
    %c0_14 = arith.constant 0 : index
    %69 = vector.load %arg4[%c0_11, %c0_12, %c0_13, %c0_14] : memref<1x8x8x64xf32, #tpu.memory_space<vmem>>, vector<1x8x8x64xf32>
    %70 = vector.shape_cast %69 : vector<1x8x8x64xf32> to vector<8x8x64xf32>
    %71 = vector.shape_cast %68 : vector<8x8x64xf32> to vector<1x8x8x64xf32>
    tpu.vector_store %arg4[%c0_11, %c0_12, %c0_13, %c0_14], %71 {strides = array<i32>} : memref<1x8x8x64xf32, #tpu.memory_space<vmem>>, vector<1x8x8x64xf32>,
    return
  }
  func.func @transform_0(%arg0: i32) -> (i32, i32, i32) {
    %c0_i32 = arith.constant 0 : i32
    %c0_i32_0 = arith.constant 0 : i32
    %c0_i32_1 = arith.constant 0 : i32
    return %arg0, %c0_i32, %c0_i32_0 : i32, i32, i32
  }
  func.func @transform_1(%arg0: i32) -> (i32, i32, i32) {
    %c0_i32 = arith.constant 0 : i32
    %c0_i32_0 = arith.constant 0 : i32
    %c0_i32_1 = arith.constant 0 : i32
    %c0_i32_2 = arith.constant 0 : i32
    return %c0_i32, %c0_i32_0, %c0_i32_1 : i32, i32, i32
  }
  func.func @transform_2(%arg0: i32) -> (i32, i32) {
    %c0_i32 = arith.constant 0 : i32
    %c0_i32_0 = arith.constant 0 : i32
    %c0_i32_1 = arith.constant 0 : i32
    return %c0_i32, %c0_i32_0 : i32, i32
  }
  func.func @transform_3(%arg0: i32) -> (i32, i32, i32, i32) {
    %c0_i32 = arith.constant 0 : i32
    %c0_i32_0 = arith.constant 0 : i32
    %c0_i32_1 = arith.constant 0 : i32
    %c0_i32_2 = arith.constant 0 : i32
    return %arg0, %c0_i32, %c0_i32_0, %c0_i32_1 : i32, i32, i32, i32
  }
}

module attributes {stable_mosaic.version = 11 : i64} {
  func.func @kernel(%arg0: i32, %arg1: memref<1x168x64xbf16, #tpu.memory_space<vmem>>, %arg2: memref<3x192x128xbf16, #tpu.memory_space<vmem>>, %arg3: memref<1x128xf32, #tpu.memory_space<vmem>>, %arg4: memref<1x4x4x128xf32, #tpu.memory_space<vmem>>) attributes {dimension_semantics = [#tpu.dimension_semantics<parallel>], iteration_bounds = array<i64: 2>, scalar_prefetch = 0 : i64, scratch_operands = 0 : i64, tpu.core_type = #tpu.core_type<tc>, window_params = [{transform_indices = @transform_0, window_bounds = array<i64: 1, 168, 64>}, {pipeline_mode = #tpu.pipeline_mode<synchronous>, transform_indices = @transform_1, window_bounds = array<i64: 3, 192, 128>}, {pipeline_mode = #tpu.pipeline_mode<synchronous>, transform_indices = @transform_2, window_bounds = array<i64: 1, 128>}, {transform_indices = @transform_3, window_bounds = array<i64: 1, 4, 4, 128>}]} {
    %c0 = arith.constant 0 : index
    %c0_0 = arith.constant 0 : index
    %c0_1 = arith.constant 0 : index
    %0 = vector.load %arg1[%c0, %c0_0, %c0_1] : memref<1x168x64xbf16, #tpu.memory_space<vmem>>, vector<1x128x64xbf16>
    %1 = vector.shape_cast %0 : vector<1x128x64xbf16> to vector<128x64xbf16>
    %c0_2 = arith.constant 0 : index
    %c1 = arith.constant 1 : index
    %c0_3 = arith.constant 0 : index
    %2 = vector.load %arg1[%c0_2, %c1, %c0_3] : memref<1x168x64xbf16, #tpu.memory_space<vmem>>, vector<1x128x64xbf16>
    %3 = vector.shape_cast %2 : vector<1x128x64xbf16> to vector<128x64xbf16>
    %c0_4 = arith.constant 0 : index
    %c2 = arith.constant 2 : index
    %c0_5 = arith.constant 0 : index
    %4 = vector.load %arg1[%c0_4, %c2, %c0_5] : memref<1x168x64xbf16, #tpu.memory_space<vmem>>, vector<1x128x64xbf16>
    %5 = vector.shape_cast %4 : vector<1x128x64xbf16> to vector<128x64xbf16>
    %6 = tpu.concatenate %1, %3, %5 in 1 : vector<128x64xbf16>, vector<128x64xbf16>, vector<128x64xbf16> -> vector<128x192xbf16>
    %c0_6 = arith.constant 0 : index
    %c0_7 = arith.constant 0 : index
    %c0_8 = arith.constant 0 : index
    %7 = vector.load %arg2[%c0_6, %c0_7, %c0_8] : memref<3x192x128xbf16, #tpu.memory_space<vmem>>, vector<1x192x128xbf16>
    %8 = vector.shape_cast %7 : vector<1x192x128xbf16> to vector<192x128xbf16>
    %cst = arith.constant dense<0.000000e+00> : vector<128x128xf32>
    %9 = tpu.matmul %6, %8, %cst {dimension_numbers = #tpu.dot_dimension_numbers<[1], [0], [0], [1], [0, 0, 1, 1], [], []>} : vector<128x192xbf16>, vector<192x128xbf16>, vector<128x128xf32> -> vector<128x128xf32>
    %c0_9 = arith.constant 0 : index
    %c16 = arith.constant 16 : index
    %c0_10 = arith.constant 0 : index
    %10 = vector.load %arg1[%c0_9, %c16, %c0_10] : memref<1x168x64xbf16, #tpu.memory_space<vmem>>, vector<1x128x64xbf16>
    %11 = vector.shape_cast %10 : vector<1x128x64xbf16> to vector<128x64xbf16>
    %c0_11 = arith.constant 0 : index
    %c17 = arith.constant 17 : index
    %c0_12 = arith.constant 0 : index
    %12 = vector.load %arg1[%c0_11, %c17, %c0_12] : memref<1x168x64xbf16, #tpu.memory_space<vmem>>, vector<1x128x64xbf16>
    %13 = vector.shape_cast %12 : vector<1x128x64xbf16> to vector<128x64xbf16>
    %c0_13 = arith.constant 0 : index
    %c18 = arith.constant 18 : index
    %c0_14 = arith.constant 0 : index
    %14 = vector.load %arg1[%c0_13, %c18, %c0_14] : memref<1x168x64xbf16, #tpu.memory_space<vmem>>, vector<1x128x64xbf16>
    %15 = vector.shape_cast %14 : vector<1x128x64xbf16> to vector<128x64xbf16>
    %16 = tpu.concatenate %11, %13, %15 in 1 : vector<128x64xbf16>, vector<128x64xbf16>, vector<128x64xbf16> -> vector<128x192xbf16>
    %c1_15 = arith.constant 1 : index
    %c0_16 = arith.constant 0 : index
    %c0_17 = arith.constant 0 : index
    %17 = vector.load %arg2[%c1_15, %c0_16, %c0_17] : memref<3x192x128xbf16, #tpu.memory_space<vmem>>, vector<1x192x128xbf16>
    %18 = vector.shape_cast %17 : vector<1x192x128xbf16> to vector<192x128xbf16>
    %cst_18 = arith.constant dense<0.000000e+00> : vector<128x128xf32>
    %19 = tpu.matmul %16, %18, %cst_18 {dimension_numbers = #tpu.dot_dimension_numbers<[1], [0], [0], [1], [0, 0, 1, 1], [], []>} : vector<128x192xbf16>, vector<192x128xbf16>, vector<128x128xf32> -> vector<128x128xf32>
    %20 = arith.addf %9, %19 : vector<128x128xf32>
    %c0_19 = arith.constant 0 : index
    %c32 = arith.constant 32 : index
    %c0_20 = arith.constant 0 : index
    %21 = vector.load %arg1[%c0_19, %c32, %c0_20] : memref<1x168x64xbf16, #tpu.memory_space<vmem>>, vector<1x128x64xbf16>
    %22 = vector.shape_cast %21 : vector<1x128x64xbf16> to vector<128x64xbf16>
    %c0_21 = arith.constant 0 : index
    %c33 = arith.constant 33 : index
    %c0_22 = arith.constant 0 : index
    %23 = vector.load %arg1[%c0_21, %c33, %c0_22] : memref<1x168x64xbf16, #tpu.memory_space<vmem>>, vector<1x128x64xbf16>
    %24 = vector.shape_cast %23 : vector<1x128x64xbf16> to vector<128x64xbf16>
    %c0_23 = arith.constant 0 : index
    %c34 = arith.constant 34 : index
    %c0_24 = arith.constant 0 : index
    %25 = vector.load %arg1[%c0_23, %c34, %c0_24] : memref<1x168x64xbf16, #tpu.memory_space<vmem>>, vector<1x128x64xbf16>
    %26 = vector.shape_cast %25 : vector<1x128x64xbf16> to vector<128x64xbf16>
    %27 = tpu.concatenate %22, %24, %26 in 1 : vector<128x64xbf16>, vector<128x64xbf16>, vector<128x64xbf16> -> vector<128x192xbf16>
    %c2_25 = arith.constant 2 : index
    %c0_26 = arith.constant 0 : index
    %c0_27 = arith.constant 0 : index
    %28 = vector.load %arg2[%c2_25, %c0_26, %c0_27] : memref<3x192x128xbf16, #tpu.memory_space<vmem>>, vector<1x192x128xbf16>
    %29 = vector.shape_cast %28 : vector<1x192x128xbf16> to vector<192x128xbf16>
    %cst_28 = arith.constant dense<0.000000e+00> : vector<128x128xf32>
    %30 = tpu.matmul %27, %29, %cst_28 {dimension_numbers = #tpu.dot_dimension_numbers<[1], [0], [0], [1], [0, 0, 1, 1], [], []>} : vector<128x192xbf16>, vector<192x128xbf16>, vector<128x128xf32> -> vector<128x128xf32>
    %31 = arith.addf %20, %30 : vector<128x128xf32>
    %c0_29 = arith.constant 0 : index
    %c0_30 = arith.constant 0 : index
    %32 = vector.load %arg3[%c0_29, %c0_30] : memref<1x128xf32, #tpu.memory_space<vmem>>, vector<1x128xf32>
    %33 = vector.broadcast %32 : vector<1x128xf32> to vector<128x128xf32>
    %34 = arith.addf %31, %33 : vector<128x128xf32>
    %cst_31 = arith.constant 0.000000e+00 : f32
    %35 = vector.broadcast %cst_31 : f32 to vector<128x128xf32>
    %36 = arith.maximumf %34, %35 : vector<128x128xf32>
    %37 = vector.extract_strided_slice %36 {offsets = [0, 0], sizes = [16, 128], strides = [1, 1]} : vector<128x128xf32> to vector<16x128xf32>
    %38 = vector.extract_strided_slice %36 {offsets = [16, 0], sizes = [16, 128], strides = [1, 1]} : vector<128x128xf32> to vector<16x128xf32>
    %39 = vector.extract_strided_slice %36 {offsets = [32, 0], sizes = [16, 128], strides = [1, 1]} : vector<128x128xf32> to vector<16x128xf32>
    %40 = vector.extract_strided_slice %36 {offsets = [48, 0], sizes = [16, 128], strides = [1, 1]} : vector<128x128xf32> to vector<16x128xf32>
    %41 = vector.extract_strided_slice %36 {offsets = [64, 0], sizes = [16, 128], strides = [1, 1]} : vector<128x128xf32> to vector<16x128xf32>
    %42 = vector.extract_strided_slice %36 {offsets = [80, 0], sizes = [16, 128], strides = [1, 1]} : vector<128x128xf32> to vector<16x128xf32>
    %43 = vector.extract_strided_slice %36 {offsets = [96, 0], sizes = [16, 128], strides = [1, 1]} : vector<128x128xf32> to vector<16x128xf32>
    %44 = vector.extract_strided_slice %36 {offsets = [112, 0], sizes = [16, 128], strides = [1, 1]} : vector<128x128xf32> to vector<16x128xf32>
    %cst_32 = arith.constant 0.000000e+00 : f32
    %45 = vector.broadcast %cst_32 : f32 to vector<16x128xf32>
    %46 = arith.maximumf %45, %37 : vector<16x128xf32>
    %47 = arith.maximumf %46, %38 : vector<16x128xf32>
    %48 = arith.maximumf %38, %39 : vector<16x128xf32>
    %49 = arith.maximumf %48, %40 : vector<16x128xf32>
    %50 = arith.maximumf %40, %41 : vector<16x128xf32>
    %51 = arith.maximumf %50, %42 : vector<16x128xf32>
    %52 = arith.maximumf %42, %43 : vector<16x128xf32>
    %53 = arith.maximumf %52, %44 : vector<16x128xf32>
    %54 = vector.shape_cast %47 : vector<16x128xf32> to vector<1x16x128xf32>
    %55 = vector.shape_cast %49 : vector<16x128xf32> to vector<1x16x128xf32>
    %56 = vector.shape_cast %51 : vector<16x128xf32> to vector<1x16x128xf32>
    %57 = vector.shape_cast %53 : vector<16x128xf32> to vector<1x16x128xf32>
    %58 = tpu.concatenate %54, %55, %56, %57 in 0 : vector<1x16x128xf32>, vector<1x16x128xf32>, vector<1x16x128xf32>, vector<1x16x128xf32> -> vector<4x16x128xf32>
    %cst_33 = arith.constant 0.000000e+00 : f32
    %59 = vector.broadcast %cst_33 : f32 to vector<4x1x128xf32>
    %60 = vector.extract_strided_slice %58 {offsets = [0, 0, 0], sizes = [4, 15, 128], strides = [1, 1, 1]} : vector<4x16x128xf32> to vector<4x15x128xf32>
    %61 = tpu.concatenate %59, %60 in 1 : vector<4x1x128xf32>, vector<4x15x128xf32> -> vector<4x16x128xf32>
    %62 = vector.extract_strided_slice %58 {offsets = [0, 1, 0], sizes = [4, 7, 128], strides = [1, 1, 1]} : vector<4x16x128xf32> to vector<4x7x128xf32>
    %cst_34 = arith.constant 0.000000e+00 : f32
    %63 = vector.broadcast %cst_34 : f32 to vector<4x9x128xf32>
    %64 = tpu.concatenate %62, %63 in 1 : vector<4x7x128xf32>, vector<4x9x128xf32> -> vector<4x16x128xf32>
    %65 = arith.maximumf %58, %61 : vector<4x16x128xf32>
    %66 = arith.maximumf %65, %64 : vector<4x16x128xf32>
    %67 = vector.extract_strided_slice %66 {offsets = [0, 0, 0], sizes = [4, 1, 128], strides = [1, 1, 1]} : vector<4x16x128xf32> to vector<4x1x128xf32>
    %68 = vector.extract_strided_slice %66 {offsets = [0, 2, 0], sizes = [4, 1, 128], strides = [1, 1, 1]} : vector<4x16x128xf32> to vector<4x1x128xf32>
    %69 = vector.extract_strided_slice %66 {offsets = [0, 4, 0], sizes = [4, 1, 128], strides = [1, 1, 1]} : vector<4x16x128xf32> to vector<4x1x128xf32>
    %70 = vector.extract_strided_slice %66 {offsets = [0, 6, 0], sizes = [4, 1, 128], strides = [1, 1, 1]} : vector<4x16x128xf32> to vector<4x1x128xf32>
    %71 = tpu.concatenate %67, %68, %69, %70 in 1 : vector<4x1x128xf32>, vector<4x1x128xf32>, vector<4x1x128xf32>, vector<4x1x128xf32> -> vector<4x4x128xf32>
    %c0_35 = arith.constant 0 : index
    %c0_36 = arith.constant 0 : index
    %c0_37 = arith.constant 0 : index
    %c0_38 = arith.constant 0 : index
    %72 = vector.load %arg4[%c0_35, %c0_36, %c0_37, %c0_38] : memref<1x4x4x128xf32, #tpu.memory_space<vmem>>, vector<1x4x4x128xf32>
    %73 = vector.shape_cast %72 : vector<1x4x4x128xf32> to vector<4x4x128xf32>
    %74 = vector.shape_cast %71 : vector<4x4x128xf32> to vector<1x4x4x128xf32>
    tpu.vector_store %arg4[%c0_35, %c0_36, %c0_37, %c0_38], %74 {strides = array<i32>} : memref<1x4x4x128xf32, #tpu.memory_space<vmem>>, vector<1x4x4x128xf32>,
    return
  }
  func.func @transform_0(%arg0: i32) -> (i32, i32, i32) {
    %c0_i32 = arith.constant 0 : i32
    %c0_i32_0 = arith.constant 0 : i32
    %c0_i32_1 = arith.constant 0 : i32
    return %arg0, %c0_i32, %c0_i32_0 : i32, i32, i32
  }
  func.func @transform_1(%arg0: i32) -> (i32, i32, i32) {
    %c0_i32 = arith.constant 0 : i32
    %c0_i32_0 = arith.constant 0 : i32
    %c0_i32_1 = arith.constant 0 : i32
    %c0_i32_2 = arith.constant 0 : i32
    return %c0_i32, %c0_i32_0, %c0_i32_1 : i32, i32, i32
  }
  func.func @transform_2(%arg0: i32) -> (i32, i32) {
    %c0_i32 = arith.constant 0 : i32
    %c0_i32_0 = arith.constant 0 : i32
    %c0_i32_1 = arith.constant 0 : i32
    return %c0_i32, %c0_i32_0 : i32, i32
  }
  func.func @transform_3(%arg0: i32) -> (i32, i32, i32, i32) {
    %c0_i32 = arith.constant 0 : i32
    %c0_i32_0 = arith.constant 0 : i32
    %c0_i32_1 = arith.constant 0 : i32
    %c0_i32_2 = arith.constant 0 : i32
    return %arg0, %c0_i32, %c0_i32_0, %c0_i32_1 : i32, i32, i32, i32
  }
}

module attributes {stable_mosaic.version = 11 : i64} {
  func.func @kernel(%arg0: i32, %arg1: memref<1x56x128xbf16, #tpu.memory_space<vmem>>, %arg2: memref<3x384x256xbf16, #tpu.memory_space<vmem>>, %arg3: memref<1x256xf32, #tpu.memory_space<vmem>>, %arg4: memref<1x2x2x256xf32, #tpu.memory_space<vmem>>) attributes {dimension_semantics = [#tpu.dimension_semantics<parallel>], iteration_bounds = array<i64: 2>, scalar_prefetch = 0 : i64, scratch_operands = 0 : i64, tpu.core_type = #tpu.core_type<tc>, window_params = [{transform_indices = @transform_0, window_bounds = array<i64: 1, 56, 128>}, {pipeline_mode = #tpu.pipeline_mode<synchronous>, transform_indices = @transform_1, window_bounds = array<i64: 3, 384, 256>}, {pipeline_mode = #tpu.pipeline_mode<synchronous>, transform_indices = @transform_2, window_bounds = array<i64: 1, 256>}, {transform_indices = @transform_3, window_bounds = array<i64: 1, 2, 2, 256>}]} {
    %c0 = arith.constant 0 : index
    %c0_0 = arith.constant 0 : index
    %c0_1 = arith.constant 0 : index
    %0 = vector.load %arg1[%c0, %c0_0, %c0_1] : memref<1x56x128xbf16, #tpu.memory_space<vmem>>, vector<1x32x128xbf16>
    %1 = vector.shape_cast %0 : vector<1x32x128xbf16> to vector<32x128xbf16>
    %c0_2 = arith.constant 0 : index
    %c1 = arith.constant 1 : index
    %c0_3 = arith.constant 0 : index
    %2 = vector.load %arg1[%c0_2, %c1, %c0_3] : memref<1x56x128xbf16, #tpu.memory_space<vmem>>, vector<1x32x128xbf16>
    %3 = vector.shape_cast %2 : vector<1x32x128xbf16> to vector<32x128xbf16>
    %c0_4 = arith.constant 0 : index
    %c2 = arith.constant 2 : index
    %c0_5 = arith.constant 0 : index
    %4 = vector.load %arg1[%c0_4, %c2, %c0_5] : memref<1x56x128xbf16, #tpu.memory_space<vmem>>, vector<1x32x128xbf16>
    %5 = vector.shape_cast %4 : vector<1x32x128xbf16> to vector<32x128xbf16>
    %6 = tpu.concatenate %1, %3, %5 in 1 : vector<32x128xbf16>, vector<32x128xbf16>, vector<32x128xbf16> -> vector<32x384xbf16>
    %c0_6 = arith.constant 0 : index
    %c0_7 = arith.constant 0 : index
    %c0_8 = arith.constant 0 : index
    %7 = vector.load %arg2[%c0_6, %c0_7, %c0_8] : memref<3x384x256xbf16, #tpu.memory_space<vmem>>, vector<1x384x256xbf16>
    %8 = vector.shape_cast %7 : vector<1x384x256xbf16> to vector<384x256xbf16>
    %cst = arith.constant dense<0.000000e+00> : vector<32x256xf32>
    %9 = tpu.matmul %6, %8, %cst {dimension_numbers = #tpu.dot_dimension_numbers<[1], [0], [0], [1], [0, 0, 1, 1], [], []>} : vector<32x384xbf16>, vector<384x256xbf16>, vector<32x256xf32> -> vector<32x256xf32>
    %c0_9 = arith.constant 0 : index
    %c8 = arith.constant 8 : index
    %c0_10 = arith.constant 0 : index
    %10 = vector.load %arg1[%c0_9, %c8, %c0_10] : memref<1x56x128xbf16, #tpu.memory_space<vmem>>, vector<1x32x128xbf16>
    %11 = vector.shape_cast %10 : vector<1x32x128xbf16> to vector<32x128xbf16>
    %c0_11 = arith.constant 0 : index
    %c9 = arith.constant 9 : index
    %c0_12 = arith.constant 0 : index
    %12 = vector.load %arg1[%c0_11, %c9, %c0_12] : memref<1x56x128xbf16, #tpu.memory_space<vmem>>, vector<1x32x128xbf16>
    %13 = vector.shape_cast %12 : vector<1x32x128xbf16> to vector<32x128xbf16>
    %c0_13 = arith.constant 0 : index
    %c10 = arith.constant 10 : index
    %c0_14 = arith.constant 0 : index
    %14 = vector.load %arg1[%c0_13, %c10, %c0_14] : memref<1x56x128xbf16, #tpu.memory_space<vmem>>, vector<1x32x128xbf16>
    %15 = vector.shape_cast %14 : vector<1x32x128xbf16> to vector<32x128xbf16>
    %16 = tpu.concatenate %11, %13, %15 in 1 : vector<32x128xbf16>, vector<32x128xbf16>, vector<32x128xbf16> -> vector<32x384xbf16>
    %c1_15 = arith.constant 1 : index
    %c0_16 = arith.constant 0 : index
    %c0_17 = arith.constant 0 : index
    %17 = vector.load %arg2[%c1_15, %c0_16, %c0_17] : memref<3x384x256xbf16, #tpu.memory_space<vmem>>, vector<1x384x256xbf16>
    %18 = vector.shape_cast %17 : vector<1x384x256xbf16> to vector<384x256xbf16>
    %cst_18 = arith.constant dense<0.000000e+00> : vector<32x256xf32>
    %19 = tpu.matmul %16, %18, %cst_18 {dimension_numbers = #tpu.dot_dimension_numbers<[1], [0], [0], [1], [0, 0, 1, 1], [], []>} : vector<32x384xbf16>, vector<384x256xbf16>, vector<32x256xf32> -> vector<32x256xf32>
    %20 = arith.addf %9, %19 : vector<32x256xf32>
    %c0_19 = arith.constant 0 : index
    %c16 = arith.constant 16 : index
    %c0_20 = arith.constant 0 : index
    %21 = vector.load %arg1[%c0_19, %c16, %c0_20] : memref<1x56x128xbf16, #tpu.memory_space<vmem>>, vector<1x32x128xbf16>
    %22 = vector.shape_cast %21 : vector<1x32x128xbf16> to vector<32x128xbf16>
    %c0_21 = arith.constant 0 : index
    %c17 = arith.constant 17 : index
    %c0_22 = arith.constant 0 : index
    %23 = vector.load %arg1[%c0_21, %c17, %c0_22] : memref<1x56x128xbf16, #tpu.memory_space<vmem>>, vector<1x32x128xbf16>
    %24 = vector.shape_cast %23 : vector<1x32x128xbf16> to vector<32x128xbf16>
    %c0_23 = arith.constant 0 : index
    %c18 = arith.constant 18 : index
    %c0_24 = arith.constant 0 : index
    %25 = vector.load %arg1[%c0_23, %c18, %c0_24] : memref<1x56x128xbf16, #tpu.memory_space<vmem>>, vector<1x32x128xbf16>
    %26 = vector.shape_cast %25 : vector<1x32x128xbf16> to vector<32x128xbf16>
    %27 = tpu.concatenate %22, %24, %26 in 1 : vector<32x128xbf16>, vector<32x128xbf16>, vector<32x128xbf16> -> vector<32x384xbf16>
    %c2_25 = arith.constant 2 : index
    %c0_26 = arith.constant 0 : index
    %c0_27 = arith.constant 0 : index
    %28 = vector.load %arg2[%c2_25, %c0_26, %c0_27] : memref<3x384x256xbf16, #tpu.memory_space<vmem>>, vector<1x384x256xbf16>
    %29 = vector.shape_cast %28 : vector<1x384x256xbf16> to vector<384x256xbf16>
    %cst_28 = arith.constant dense<0.000000e+00> : vector<32x256xf32>
    %30 = tpu.matmul %27, %29, %cst_28 {dimension_numbers = #tpu.dot_dimension_numbers<[1], [0], [0], [1], [0, 0, 1, 1], [], []>} : vector<32x384xbf16>, vector<384x256xbf16>, vector<32x256xf32> -> vector<32x256xf32>
    %31 = arith.addf %20, %30 : vector<32x256xf32>
    %c0_29 = arith.constant 0 : index
    %c0_30 = arith.constant 0 : index
    %32 = vector.load %arg3[%c0_29, %c0_30] : memref<1x256xf32, #tpu.memory_space<vmem>>, vector<1x256xf32>
    %33 = vector.broadcast %32 : vector<1x256xf32> to vector<32x256xf32>
    %34 = arith.addf %31, %33 : vector<32x256xf32>
    %cst_31 = arith.constant 0.000000e+00 : f32
    %35 = vector.broadcast %cst_31 : f32 to vector<32x256xf32>
    %36 = arith.maximumf %34, %35 : vector<32x256xf32>
    %37 = vector.extract_strided_slice %36 {offsets = [0, 0], sizes = [8, 256], strides = [1, 1]} : vector<32x256xf32> to vector<8x256xf32>
    %38 = vector.extract_strided_slice %36 {offsets = [8, 0], sizes = [8, 256], strides = [1, 1]} : vector<32x256xf32> to vector<8x256xf32>
    %39 = vector.extract_strided_slice %36 {offsets = [16, 0], sizes = [8, 256], strides = [1, 1]} : vector<32x256xf32> to vector<8x256xf32>
    %40 = vector.extract_strided_slice %36 {offsets = [24, 0], sizes = [8, 256], strides = [1, 1]} : vector<32x256xf32> to vector<8x256xf32>
    %cst_32 = arith.constant 0.000000e+00 : f32
    %41 = vector.broadcast %cst_32 : f32 to vector<8x256xf32>
    %42 = arith.maximumf %41, %37 : vector<8x256xf32>
    %43 = arith.maximumf %42, %38 : vector<8x256xf32>
    %44 = arith.maximumf %38, %39 : vector<8x256xf32>
    %45 = arith.maximumf %44, %40 : vector<8x256xf32>
    %46 = vector.shape_cast %43 : vector<8x256xf32> to vector<1x8x256xf32>
    %47 = vector.shape_cast %45 : vector<8x256xf32> to vector<1x8x256xf32>
    %48 = tpu.concatenate %46, %47 in 0 : vector<1x8x256xf32>, vector<1x8x256xf32> -> vector<2x8x256xf32>
    %cst_33 = arith.constant 0.000000e+00 : f32
    %49 = vector.broadcast %cst_33 : f32 to vector<2x1x256xf32>
    %50 = vector.extract_strided_slice %48 {offsets = [0, 0, 0], sizes = [2, 7, 256], strides = [1, 1, 1]} : vector<2x8x256xf32> to vector<2x7x256xf32>
    %51 = tpu.concatenate %49, %50 in 1 : vector<2x1x256xf32>, vector<2x7x256xf32> -> vector<2x8x256xf32>
    %52 = vector.extract_strided_slice %48 {offsets = [0, 1, 0], sizes = [2, 3, 256], strides = [1, 1, 1]} : vector<2x8x256xf32> to vector<2x3x256xf32>
    %cst_34 = arith.constant 0.000000e+00 : f32
    %53 = vector.broadcast %cst_34 : f32 to vector<2x5x256xf32>
    %54 = tpu.concatenate %52, %53 in 1 : vector<2x3x256xf32>, vector<2x5x256xf32> -> vector<2x8x256xf32>
    %55 = arith.maximumf %48, %51 : vector<2x8x256xf32>
    %56 = arith.maximumf %55, %54 : vector<2x8x256xf32>
    %57 = vector.extract_strided_slice %56 {offsets = [0, 0, 0], sizes = [2, 1, 256], strides = [1, 1, 1]} : vector<2x8x256xf32> to vector<2x1x256xf32>
    %58 = vector.extract_strided_slice %56 {offsets = [0, 2, 0], sizes = [2, 1, 256], strides = [1, 1, 1]} : vector<2x8x256xf32> to vector<2x1x256xf32>
    %59 = tpu.concatenate %57, %58 in 1 : vector<2x1x256xf32>, vector<2x1x256xf32> -> vector<2x2x256xf32>
    %c0_35 = arith.constant 0 : index
    %c0_36 = arith.constant 0 : index
    %c0_37 = arith.constant 0 : index
    %c0_38 = arith.constant 0 : index
    %60 = vector.load %arg4[%c0_35, %c0_36, %c0_37, %c0_38] : memref<1x2x2x256xf32, #tpu.memory_space<vmem>>, vector<1x2x2x256xf32>
    %61 = vector.shape_cast %60 : vector<1x2x2x256xf32> to vector<2x2x256xf32>
    %62 = vector.shape_cast %59 : vector<2x2x256xf32> to vector<1x2x2x256xf32>
    tpu.vector_store %arg4[%c0_35, %c0_36, %c0_37, %c0_38], %62 {strides = array<i32>} : memref<1x2x2x256xf32, #tpu.memory_space<vmem>>, vector<1x2x2x256xf32>,
    return
  }
  func.func @transform_0(%arg0: i32) -> (i32, i32, i32) {
    %c0_i32 = arith.constant 0 : i32
    %c0_i32_0 = arith.constant 0 : i32
    %c0_i32_1 = arith.constant 0 : i32
    return %arg0, %c0_i32, %c0_i32_0 : i32, i32, i32
  }
  func.func @transform_1(%arg0: i32) -> (i32, i32, i32) {
    %c0_i32 = arith.constant 0 : i32
    %c0_i32_0 = arith.constant 0 : i32
    %c0_i32_1 = arith.constant 0 : i32
    %c0_i32_2 = arith.constant 0 : i32
    return %c0_i32, %c0_i32_0, %c0_i32_1 : i32, i32, i32
  }
  func.func @transform_2(%arg0: i32) -> (i32, i32) {
    %c0_i32 = arith.constant 0 : i32
    %c0_i32_0 = arith.constant 0 : i32
    %c0_i32_1 = arith.constant 0 : i32
    return %c0_i32, %c0_i32_0 : i32, i32
  }
  func.func @transform_3(%arg0: i32) -> (i32, i32, i32, i32) {
    %c0_i32 = arith.constant 0 : i32
    %c0_i32_0 = arith.constant 0 : i32
    %c0_i32_1 = arith.constant 0 : i32
    %c0_i32_2 = arith.constant 0 : i32
    return %arg0, %c0_i32, %c0_i32_0, %c0_i32_1 : i32, i32, i32, i32
  }
}

module attributes {stable_mosaic.version = 11 : i64} {
  func.func @kernel(%arg0: i32, %arg1: memref<1x40x256xbf16, #tpu.memory_space<vmem>>, %arg2: memref<3x768x512xbf16, #tpu.memory_space<vmem>>, %arg3: memref<1x512xf32, #tpu.memory_space<vmem>>, %arg4: memref<512x1024xbf16, #tpu.memory_space<vmem>>, %arg5: memref<1x1024xf32, #tpu.memory_space<vmem>>, %arg6: memref<1x1x1x512xf32, #tpu.memory_space<vmem>>, %arg7: memref<1x1x1024xf32, #tpu.memory_space<vmem>>) attributes {dimension_semantics = [#tpu.dimension_semantics<parallel>], iteration_bounds = array<i64: 2>, scalar_prefetch = 0 : i64, scratch_operands = 0 : i64, tpu.core_type = #tpu.core_type<tc>, window_params = [{transform_indices = @transform_0, window_bounds = array<i64: 1, 40, 256>}, {pipeline_mode = #tpu.pipeline_mode<synchronous>, transform_indices = @transform_1, window_bounds = array<i64: 3, 768, 512>}, {pipeline_mode = #tpu.pipeline_mode<synchronous>, transform_indices = @transform_2, window_bounds = array<i64: 1, 512>}, {pipeline_mode = #tpu.pipeline_mode<synchronous>, transform_indices = @transform_3, window_bounds = array<i64: 512, 1024>}, {pipeline_mode = #tpu.pipeline_mode<synchronous>, transform_indices = @transform_4, window_bounds = array<i64: 1, 1024>}, {transform_indices = @transform_5, window_bounds = array<i64: 1, 1, 1, 512>}, {transform_indices = @transform_6, window_bounds = array<i64: 1, 1, 1024>}]} {
    %c0 = arith.constant 0 : index
    %c0_0 = arith.constant 0 : index
    %c0_1 = arith.constant 0 : index
    %0 = vector.load %arg1[%c0, %c0_0, %c0_1] : memref<1x40x256xbf16, #tpu.memory_space<vmem>>, vector<1x16x256xbf16>
    %1 = vector.shape_cast %0 : vector<1x16x256xbf16> to vector<16x256xbf16>
    %c0_2 = arith.constant 0 : index
    %c1 = arith.constant 1 : index
    %c0_3 = arith.constant 0 : index
    %2 = vector.load %arg1[%c0_2, %c1, %c0_3] : memref<1x40x256xbf16, #tpu.memory_space<vmem>>, vector<1x16x256xbf16>
    %3 = vector.shape_cast %2 : vector<1x16x256xbf16> to vector<16x256xbf16>
    %c0_4 = arith.constant 0 : index
    %c2 = arith.constant 2 : index
    %c0_5 = arith.constant 0 : index
    %4 = vector.load %arg1[%c0_4, %c2, %c0_5] : memref<1x40x256xbf16, #tpu.memory_space<vmem>>, vector<1x16x256xbf16>
    %5 = vector.shape_cast %4 : vector<1x16x256xbf16> to vector<16x256xbf16>
    %6 = tpu.concatenate %1, %3, %5 in 1 : vector<16x256xbf16>, vector<16x256xbf16>, vector<16x256xbf16> -> vector<16x768xbf16>
    %c0_6 = arith.constant 0 : index
    %c0_7 = arith.constant 0 : index
    %c0_8 = arith.constant 0 : index
    %7 = vector.load %arg2[%c0_6, %c0_7, %c0_8] : memref<3x768x512xbf16, #tpu.memory_space<vmem>>, vector<1x768x512xbf16>
    %8 = vector.shape_cast %7 : vector<1x768x512xbf16> to vector<768x512xbf16>
    %cst = arith.constant dense<0.000000e+00> : vector<16x512xf32>
    %9 = tpu.matmul %6, %8, %cst {dimension_numbers = #tpu.dot_dimension_numbers<[1], [0], [0], [1], [0, 0, 1, 1], [], []>} : vector<16x768xbf16>, vector<768x512xbf16>, vector<16x512xf32> -> vector<16x512xf32>
    %c0_9 = arith.constant 0 : index
    %c8 = arith.constant 8 : index
    %c0_10 = arith.constant 0 : index
    %10 = vector.load %arg1[%c0_9, %c8, %c0_10] : memref<1x40x256xbf16, #tpu.memory_space<vmem>>, vector<1x16x256xbf16>
    %11 = vector.shape_cast %10 : vector<1x16x256xbf16> to vector<16x256xbf16>
    %c0_11 = arith.constant 0 : index
    %c9 = arith.constant 9 : index
    %c0_12 = arith.constant 0 : index
    %12 = vector.load %arg1[%c0_11, %c9, %c0_12] : memref<1x40x256xbf16, #tpu.memory_space<vmem>>, vector<1x16x256xbf16>
    %13 = vector.shape_cast %12 : vector<1x16x256xbf16> to vector<16x256xbf16>
    %c0_13 = arith.constant 0 : index
    %c10 = arith.constant 10 : index
    %c0_14 = arith.constant 0 : index
    %14 = vector.load %arg1[%c0_13, %c10, %c0_14] : memref<1x40x256xbf16, #tpu.memory_space<vmem>>, vector<1x16x256xbf16>
    %15 = vector.shape_cast %14 : vector<1x16x256xbf16> to vector<16x256xbf16>
    %16 = tpu.concatenate %11, %13, %15 in 1 : vector<16x256xbf16>, vector<16x256xbf16>, vector<16x256xbf16> -> vector<16x768xbf16>
    %c1_15 = arith.constant 1 : index
    %c0_16 = arith.constant 0 : index
    %c0_17 = arith.constant 0 : index
    %17 = vector.load %arg2[%c1_15, %c0_16, %c0_17] : memref<3x768x512xbf16, #tpu.memory_space<vmem>>, vector<1x768x512xbf16>
    %18 = vector.shape_cast %17 : vector<1x768x512xbf16> to vector<768x512xbf16>
    %cst_18 = arith.constant dense<0.000000e+00> : vector<16x512xf32>
    %19 = tpu.matmul %16, %18, %cst_18 {dimension_numbers = #tpu.dot_dimension_numbers<[1], [0], [0], [1], [0, 0, 1, 1], [], []>} : vector<16x768xbf16>, vector<768x512xbf16>, vector<16x512xf32> -> vector<16x512xf32>
    %20 = arith.addf %9, %19 : vector<16x512xf32>
    %c0_19 = arith.constant 0 : index
    %c16 = arith.constant 16 : index
    %c0_20 = arith.constant 0 : index
    %21 = vector.load %arg1[%c0_19, %c16, %c0_20] : memref<1x40x256xbf16, #tpu.memory_space<vmem>>, vector<1x16x256xbf16>
    %22 = vector.shape_cast %21 : vector<1x16x256xbf16> to vector<16x256xbf16>
    %c0_21 = arith.constant 0 : index
    %c17 = arith.constant 17 : index
    %c0_22 = arith.constant 0 : index
    %23 = vector.load %arg1[%c0_21, %c17, %c0_22] : memref<1x40x256xbf16, #tpu.memory_space<vmem>>, vector<1x16x256xbf16>
    %24 = vector.shape_cast %23 : vector<1x16x256xbf16> to vector<16x256xbf16>
    %c0_23 = arith.constant 0 : index
    %c18 = arith.constant 18 : index
    %c0_24 = arith.constant 0 : index
    %25 = vector.load %arg1[%c0_23, %c18, %c0_24] : memref<1x40x256xbf16, #tpu.memory_space<vmem>>, vector<1x16x256xbf16>
    %26 = vector.shape_cast %25 : vector<1x16x256xbf16> to vector<16x256xbf16>
    %27 = tpu.concatenate %22, %24, %26 in 1 : vector<16x256xbf16>, vector<16x256xbf16>, vector<16x256xbf16> -> vector<16x768xbf16>
    %c2_25 = arith.constant 2 : index
    %c0_26 = arith.constant 0 : index
    %c0_27 = arith.constant 0 : index
    %28 = vector.load %arg2[%c2_25, %c0_26, %c0_27] : memref<3x768x512xbf16, #tpu.memory_space<vmem>>, vector<1x768x512xbf16>
    %29 = vector.shape_cast %28 : vector<1x768x512xbf16> to vector<768x512xbf16>
    %cst_28 = arith.constant dense<0.000000e+00> : vector<16x512xf32>
    %30 = tpu.matmul %27, %29, %cst_28 {dimension_numbers = #tpu.dot_dimension_numbers<[1], [0], [0], [1], [0, 0, 1, 1], [], []>} : vector<16x768xbf16>, vector<768x512xbf16>, vector<16x512xf32> -> vector<16x512xf32>
    %31 = arith.addf %20, %30 : vector<16x512xf32>
    %c0_29 = arith.constant 0 : index
    %c0_30 = arith.constant 0 : index
    %32 = vector.load %arg3[%c0_29, %c0_30] : memref<1x512xf32, #tpu.memory_space<vmem>>, vector<1x512xf32>
    %33 = vector.broadcast %32 : vector<1x512xf32> to vector<16x512xf32>
    %34 = arith.addf %31, %33 : vector<16x512xf32>
    %cst_31 = arith.constant 0.000000e+00 : f32
    %35 = vector.broadcast %cst_31 : f32 to vector<16x512xf32>
    %36 = arith.maximumf %34, %35 : vector<16x512xf32>
    %37 = vector.extract_strided_slice %36 {offsets = [0, 0], sizes = [8, 512], strides = [1, 1]} : vector<16x512xf32> to vector<8x512xf32>
    %38 = vector.extract_strided_slice %36 {offsets = [8, 0], sizes = [8, 512], strides = [1, 1]} : vector<16x512xf32> to vector<8x512xf32>
    %cst_32 = arith.constant 0.000000e+00 : f32
    %39 = vector.broadcast %cst_32 : f32 to vector<8x512xf32>
    %40 = arith.maximumf %39, %37 : vector<8x512xf32>
    %41 = arith.maximumf %40, %38 : vector<8x512xf32>
    %42 = vector.shape_cast %41 : vector<8x512xf32> to vector<1x8x512xf32>
    %cst_33 = arith.constant 0.000000e+00 : f32
    %43 = vector.broadcast %cst_33 : f32 to vector<1x1x512xf32>
    %44 = vector.extract_strided_slice %42 {offsets = [0, 0, 0], sizes = [1, 7, 512], strides = [1, 1, 1]} : vector<1x8x512xf32> to vector<1x7x512xf32>
    %45 = tpu.concatenate %43, %44 in 1 : vector<1x1x512xf32>, vector<1x7x512xf32> -> vector<1x8x512xf32>
    %46 = vector.extract_strided_slice %42 {offsets = [0, 1, 0], sizes = [1, 1, 512], strides = [1, 1, 1]} : vector<1x8x512xf32> to vector<1x1x512xf32>
    %cst_34 = arith.constant 0.000000e+00 : f32
    %47 = vector.broadcast %cst_34 : f32 to vector<1x7x512xf32>
    %48 = tpu.concatenate %46, %47 in 1 : vector<1x1x512xf32>, vector<1x7x512xf32> -> vector<1x8x512xf32>
    %49 = arith.maximumf %42, %45 : vector<1x8x512xf32>
    %50 = arith.maximumf %49, %48 : vector<1x8x512xf32>
    %51 = vector.extract_strided_slice %50 {offsets = [0, 0, 0], sizes = [1, 1, 512], strides = [1, 1, 1]} : vector<1x8x512xf32> to vector<1x1x512xf32>
    %c0_35 = arith.constant 0 : index
    %c0_36 = arith.constant 0 : index
    %c0_37 = arith.constant 0 : index
    %c0_38 = arith.constant 0 : index
    %52 = vector.load %arg6[%c0_35, %c0_36, %c0_37, %c0_38] : memref<1x1x1x512xf32, #tpu.memory_space<vmem>>, vector<1x1x1x512xf32>
    %53 = vector.shape_cast %52 : vector<1x1x1x512xf32> to vector<1x1x512xf32>
    %54 = vector.shape_cast %51 : vector<1x1x512xf32> to vector<1x1x1x512xf32>
    tpu.vector_store %arg6[%c0_35, %c0_36, %c0_37, %c0_38], %54 {strides = array<i32>} : memref<1x1x1x512xf32, #tpu.memory_space<vmem>>, vector<1x1x1x512xf32>,
    %cst_39 = arith.constant dense<0.000000e+00> : vector<1x512xf32>
    %55 = vector.multi_reduction <add>, %51, %cst_39 [1] : vector<1x1x512xf32> to vector<1x512xf32>
    %cst_40 = arith.constant dense<0.000000e+00> : vector<512xf32>
    %56 = vector.multi_reduction <add>, %55, %cst_40 [0] : vector<1x512xf32> to vector<512xf32>
    %57 = vector.shape_cast %56 : vector<512xf32> to vector<1x512xf32>
    %cst_41 = arith.constant 1.000000e+00 : f32
    %58 = vector.broadcast %cst_41 : f32 to vector<1x512xf32>
    %59 = arith.mulf %57, %58 : vector<1x512xf32>
    %60 = arith.truncf %59 : vector<1x512xf32> to vector<1x512xbf16>
    %c0_42 = arith.constant 0 : index
    %c0_43 = arith.constant 0 : index
    %61 = vector.load %arg4[%c0_42, %c0_43] : memref<512x1024xbf16, #tpu.memory_space<vmem>>, vector<512x1024xbf16>
    %cst_44 = arith.constant dense<0.000000e+00> : vector<1x1024xf32>
    %62 = tpu.matmul %60, %61, %cst_44 {dimension_numbers = #tpu.dot_dimension_numbers<[1], [0], [0], [1], [0, 0, 1, 1], [], []>} : vector<1x512xbf16>, vector<512x1024xbf16>, vector<1x1024xf32> -> vector<1x1024xf32>
    %c0_45 = arith.constant 0 : index
    %c0_46 = arith.constant 0 : index
    %63 = vector.load %arg5[%c0_45, %c0_46] : memref<1x1024xf32, #tpu.memory_space<vmem>>, vector<1x1024xf32>
    %64 = arith.addf %62, %63 : vector<1x1024xf32>
    %c0_47 = arith.constant 0 : index
    %c0_48 = arith.constant 0 : index
    %c0_49 = arith.constant 0 : index
    %65 = vector.load %arg7[%c0_47, %c0_48, %c0_49] : memref<1x1x1024xf32, #tpu.memory_space<vmem>>, vector<1x1x1024xf32>
    %66 = vector.shape_cast %65 : vector<1x1x1024xf32> to vector<1x1024xf32>
    %67 = vector.shape_cast %64 : vector<1x1024xf32> to vector<1x1x1024xf32>
    tpu.vector_store %arg7[%c0_47, %c0_48, %c0_49], %67 {strides = array<i32>} : memref<1x1x1024xf32, #tpu.memory_space<vmem>>, vector<1x1x1024xf32>,
    return
  }
  func.func @transform_0(%arg0: i32) -> (i32, i32, i32) {
    %c0_i32 = arith.constant 0 : i32
    %c0_i32_0 = arith.constant 0 : i32
    %c0_i32_1 = arith.constant 0 : i32
    return %arg0, %c0_i32, %c0_i32_0 : i32, i32, i32
  }
  func.func @transform_1(%arg0: i32) -> (i32, i32, i32) {
    %c0_i32 = arith.constant 0 : i32
    %c0_i32_0 = arith.constant 0 : i32
    %c0_i32_1 = arith.constant 0 : i32
    %c0_i32_2 = arith.constant 0 : i32
    return %c0_i32, %c0_i32_0, %c0_i32_1 : i32, i32, i32
  }
  func.func @transform_2(%arg0: i32) -> (i32, i32) {
    %c0_i32 = arith.constant 0 : i32
    %c0_i32_0 = arith.constant 0 : i32
    %c0_i32_1 = arith.constant 0 : i32
    return %c0_i32, %c0_i32_0 : i32, i32
  }
  func.func @transform_3(%arg0: i32) -> (i32, i32) {
    %c0_i32 = arith.constant 0 : i32
    %c0_i32_0 = arith.constant 0 : i32
    %c0_i32_1 = arith.constant 0 : i32
    return %c0_i32, %c0_i32_0 : i32, i32
  }
  func.func @transform_4(%arg0: i32) -> (i32, i32) {
    %c0_i32 = arith.constant 0 : i32
    %c0_i32_0 = arith.constant 0 : i32
    %c0_i32_1 = arith.constant 0 : i32
    return %c0_i32, %c0_i32_0 : i32, i32
  }
  func.func @transform_5(%arg0: i32) -> (i32, i32, i32, i32) {
    %c0_i32 = arith.constant 0 : i32
    %c0_i32_0 = arith.constant 0 : i32
    %c0_i32_1 = arith.constant 0 : i32
    %c0_i32_2 = arith.constant 0 : i32
    return %arg0, %c0_i32, %c0_i32_0, %c0_i32_1 : i32, i32, i32, i32
  }
  func.func @transform_6(%arg0: i32) -> (i32, i32, i32) {
    %c0_i32 = arith.constant 0 : i32
    %c0_i32_0 = arith.constant 0 : i32
    %c0_i32_1 = arith.constant 0 : i32
    return %arg0, %c0_i32, %c0_i32_0 : i32, i32, i32
  }
}

</mosaic_0001>

<bundles_post_ra>
// kernel: cornet_z_forward.4
= control target key start
LH: loop header
LB: loop body
LE: loop exit
PB: predicated region body
PF: predicated region fallthrough
CT: control target
= control target key end

     0   :  { %s1413_s12 = smov 0   ;;  %s1750_s0 = inlined_call_operand.vmem [shape: bf16[2,256,256], index: 0, kind: input, shape index: {}]   ;;  %s1751_s1 = inlined_call_operand.vmem [shape: bf16[1,256,64], index: 1, kind: input, shape index: {}]   ;;  %s1752_s2 = inlined_call_operand.vmem [shape: f32[1,64], index: 2, kind: input, shape index: {}]   ;;  %s1753_s3 = inlined_call_operand.vmem [shape: f32[2,8,8,64], index: 3, kind: output, shape index: {}]  }
   0x1 LB: > { %s1123_s13 = sadd.s32 4294967295, %s1391_s12   ;;  %p1127_p0 = scmp.ge.s32.totalorder %s1391_s12, 1  ;;  %s1391_s12 = sphi %s1413_s12, %s13_s12  }
   0x2   : > { %p137_p1 = scmp.lt.s32.totalorder %s1391_s12, 3 }
   0x4   : > { %p138_p2 = pnand %p1127_p0, %p137_p1 }
   0x5   : > { %p161_p3 = scmp.lt.s32.totalorder (!%p138_p2), %s1123_s13, 1 }
   0x6   : > { %141 = sbr.rel (%p138_p2) target bundleno = 341 (0x155), region = 32 }
   0xb   : > { %v1321_v0 = vld [vmem:[%s1751_s1 + $0x78] sm:$0xff]   ;;  %v1323_v2 = vld [vmem:[%s1751_s1 + $0x70] sm:$0xff]   ;;  %v1325_v4 = vld [vmem:[%s1751_s1 + $0x68] sm:$0xff]   ;;  %s1755_s13 = smov (!%p161_p3, %s1123_s13), 1  ;;  %vm740_vm0 = vcmask 1040384   ;;  %vm789_vm1 = vcmask 1046528  }
   0xc   : > { %v1322_v1 = vld [vmem:[%s1751_s1 + $0x38] sm:$0xff]   ;;  %1185 = vmatprep.subr.bf16.mxu0 %v1321_v0  ;;  %1297 = vmatprep.subr.bf16.mxu1 %v1321_v0  ;;  %v1324_v3 = vld [vmem:[%s1751_s1 + $0x30] sm:$0xff]   ;;  %v1326_v5 = vld [vmem:[%s1751_s1 + $0x28] sm:$0xff]   ;;  %s1183_s30 = sshll.u32 %s1755_s13, 8  ;;  %vm1006_vm2 = vcmask 1041408   ;;  %vm1015_vm3 = vcmask 1042432  }
   0xd   : > { %1186 = vmatpush3.bf16.msra.mxu0 %v1322_v1  ;;  %1305 = vmatpush3.bf16.msra.mxu1 %v1322_v1  ;;  %v1327_v6 = vld [vmem:[%s1751_s1 + $0x60] sm:$0xff]   ;;  %v1329_v8 = vld [vmem:[%s1751_s1 + $0x58] sm:$0xff]   ;;  %s1454_s8 = scalar_lea.vmem %s1750_s0, %s1183_s30  ;;  %v1331_v10 = vld [vmem:[%s1751_s1 + $0x50] sm:$0xff]   ;;  %vm1024_vm4 = vcmask 1043456   ;;  %vm1033_vm5 = vcmask 1044480   ;;  %vm1042_vm6 = vcmask 1045504  }
   0xe   : > { %1187 = vmatprep.subr.bf16.mxu0 %v1323_v2  ;;  %1298 = vmatprep.subr.bf16.mxu1 %v1323_v2  ;;  %v1328_v7 = vld [vmem:[%s1751_s1 + $0x20] sm:$0xff]   ;;  %v1330_v9 = vld [vmem:[%s1751_s1 + $0x18] sm:$0xff]   ;;  %v1332_v13 = vld [vmem:[%s1751_s1 + $0x10] sm:$0xff]   ;;  %vm1059_vm7 = vcmask 523264   ;;  %s1184_s27 = sshll.u32 %s1755_s13, 6 }
   0xf   : > { %v1339_v11 = vld [vmem:[%s1454_s8 + $0x4] ss:$8 sps:$4 sm:$0xff]   ;;  %v1337_v18 = vld [vmem:[%s1454_s8] ss:$8 sps:$4 sm:$0xff]   ;;  %v1343_v20 = vld [vmem:[%s1454_s8 + $0x14] ss:$8 sps:$4 sm:$0xff]   ;;  %s1579_s29 = scalar_lea.vmem %s1753_s3, %s1184_s27 }
  0x10   : > { %v1342_v12 = vld [vmem:[%s1454_s8 + $0x84] ss:$8 sps:$4 sm:$0xff]   ;;  %531 = vmatprep.mubr.bf16.mxu0 %v1339_v11  ;;  %v1340_v19 = vld [vmem:[%s1454_s8 + $0x80] ss:$8 sps:$4 sm:$0xff]   ;;  %v1345_v21 = vld [vmem:[%s1454_s8 + $0x94] ss:$8 sps:$4 sm:$0xff]  }
  0x11   : > { %1188 = vmatpush3.bf16.msra.mxu0 %v1324_v3  ;;  %1306 = vmatpush3.bf16.msra.mxu1 %v1324_v3  ;;  %v1333_v14 = vld [vmem:[%s1751_s1 + $0x48] sm:$0xff]   ;;  %v1335_v16 = vld [vmem:[%s1751_s1 + $0x40] sm:$0xff]   ;;  %v1347_v22 = vld [vmem:[%s1454_s8 + $0x10] ss:$8 sps:$4 sm:$0xff]  }
  0x12   : > { %1189 = vmatprep.subr.bf16.mxu0 %v1325_v4  ;;  %1299 = vmatprep.subr.bf16.mxu1 %v1325_v4  ;;  %v1334_v15 = vld [vmem:[%s1751_s1 + $0x8] sm:$0xff]   ;;  %v1336_v17 = vld [vmem:[%s1751_s1] sm:$0xff]   ;;  %v1348_v23 = vld [vmem:[%s1454_s8 + $0x90] ss:$8 sps:$4 sm:$0xff]  }
  0x13   : > { %595 = vmatprep.mubr.bf16.mxu1 %v1342_v12  ;;  %v1349_v24 = vld [vmem:[%s1454_s8 + $0x24] ss:$8 sps:$4 sm:$0xff]   ;;  %v1353_v26 = vld [vmem:[%s1454_s8 + $0x20] ss:$8 sps:$4 sm:$0xff]   ;;  %v1355_v28 = vld [vmem:[%s1454_s8 + $0x34] ss:$8 sps:$4 sm:$0xff]  }
  0x14   : > { %v1351_v25 = vld [vmem:[%s1454_s8 + $0xa4] ss:$8 sps:$4 sm:$0xff]   ;;  %v1354_v27 = vld [vmem:[%s1454_s8 + $0xa0] ss:$8 sps:$4 sm:$0xff]   ;;  %v1357_v29 = vld [vmem:[%s1454_s8 + $0xb4] ss:$8 sps:$4 sm:$0xff]  }
  0x15   : > { %1190 = vmatpush3.bf16.msra.mxu0 %v1326_v5  ;;  %1307 = vmatpush3.bf16.msra.mxu1 %v1326_v5  ;;  %v1359_v30 = vld [vmem:[%s1454_s8 + $0x30] ss:$8 sps:$4 sm:$0xff]   ;;  %v1361_v32 = vld [vmem:[%s1454_s8 + $0x44] ss:$8 sps:$4 sm:$0xff]   ;;  %v1365_v34 = vld [vmem:[%s1454_s8 + $0x40] ss:$8 sps:$4 sm:$0xff]  }
  0x16   : > { %1191 = vmatprep.subr.bf16.mxu0 %v1327_v6  ;;  %1300 = vmatprep.subr.bf16.mxu1 %v1327_v6  ;;  %v1360_v31 = vld [vmem:[%s1454_s8 + $0xb0] ss:$8 sps:$4 sm:$0xff]   ;;  %v1363_v33 = vld [vmem:[%s1454_s8 + $0xc4] ss:$8 sps:$4 sm:$0xff]   ;;  %v1366_v35 = vld [vmem:[%s1454_s8 + $0xc0] ss:$8 sps:$4 sm:$0xff]  }
  0x17   : > { %v1367_v36 = vld [vmem:[%s1454_s8 + $0x54] ss:$8 sps:$4 sm:$0xff]   ;;  %v1371_v38 = vld [vmem:[%s1454_s8 + $0x50] ss:$8 sps:$4 sm:$0xff]   ;;  %v1373_v40 = vld [vmem:[%s1454_s8 + $0x64] ss:$8 sps:$4 sm:$0xff]  }
  0x18   : > { %v1369_v37 = vld [vmem:[%s1454_s8 + $0xd4] ss:$8 sps:$4 sm:$0xff]   ;;  %v1372_v39 = vld [vmem:[%s1454_s8 + $0xd0] ss:$8 sps:$4 sm:$0xff]   ;;  %v1375_v41 = vld [vmem:[%s1454_s8 + $0xe4] ss:$8 sps:$4 sm:$0xff]  }
  0x19   : > { %1192 = vmatpush3.bf16.msra.mxu0 %v1328_v7  ;;  %1308 = vmatpush3.bf16.msra.mxu1 %v1328_v7  ;;  %v1377_v42 = vld [vmem:[%s1454_s8 + $0x60] ss:$8 sps:$4 sm:$0xff]   ;;  %v1379_v44 = vld [vmem:[%s1454_s8 + $0x74] ss:$8 sps:$4 sm:$0xff]   ;;  %v1383_v46 = vld [vmem:[%s1454_s8 + $0x70] ss:$8 sps:$4 sm:$0xff]  }
  0x1a   : > { %1193 = vmatprep.subr.bf16.mxu0 %v1329_v8  ;;  %1301 = vmatprep.subr.bf16.mxu1 %v1329_v8  ;;  %v1378_v43 = vld [vmem:[%s1454_s8 + $0xe0] ss:$8 sps:$4 sm:$0xff]   ;;  %v1381_v45 = vld [vmem:[%s1454_s8 + $0xf4] ss:$8 sps:$4 sm:$0xff]   ;;  %v1384_v47 = vld [vmem:[%s1454_s8 + $0xf0] ss:$8 sps:$4 sm:$0xff]  }
  0x1b   : > { %v1512_v54 = vld [vmem:[%s1752_s2] ss:$0 sm:$0xff] }
  0x1d   : > { %1194 = vmatpush3.bf16.msra.mxu0 %v1330_v9  ;;  %1309 = vmatpush3.bf16.msra.mxu1 %v1330_v9 }
  0x1e   : > { %1195 = vmatprep.subr.bf16.mxu0 %v1331_v10  ;;  %1302 = vmatprep.subr.bf16.mxu1 %v1331_v10 }
  0x21   : > { %1196 = vmatpush3.bf16.msra.mxu0 %v1332_v13  ;;  %1310 = vmatpush3.bf16.msra.mxu1 %v1332_v13 }
  0x22   : > { %1197 = vmatprep.subr.bf16.mxu0 %v1333_v14  ;;  %1303 = vmatprep.subr.bf16.mxu1 %v1333_v14 }
  0x25   : > { %1198 = vmatpush3.bf16.msra.mxu0 %v1334_v15  ;;  %1311 = vmatpush3.bf16.msra.mxu1 %v1334_v15 }
  0x26   : > { %1199 = vmatprep.subr.bf16.mxu0 %v1335_v16  ;;  %1304 = vmatprep.subr.bf16.mxu1 %v1335_v16 }
  0x29   : > { %1200 = vmatpush3.bf16.msra.mxu0 %v1336_v17  ;;  %1312 = vmatpush3.bf16.msra.mxu1 %v1336_v17 }
  0x2c   : > { %532 = vmatmul.mubr.bf16.vlgmr.msra.gmra.mxu0 %v1337_v18  ;;  %596 = vmatmul.mubr.bf16.vlgmr.msra.gmra.mxu1 %v1340_v19 }
  0x2d   : > { %539 = vmatprep.mubr.bf16.mxu0 %v1343_v20  ;;  %603 = vmatprep.mubr.bf16.mxu1 %v1345_v21 }
  0x34   : > { %540 = vmatmul.mubr.bf16.gmra.mxu0 %v1347_v22  ;;  %604 = vmatmul.mubr.bf16.gmra.mxu1 %v1348_v23 }
  0x35   : > { %547 = vmatprep.mubr.bf16.mxu0 %v1349_v24  ;;  %611 = vmatprep.mubr.bf16.mxu1 %v1351_v25 }
  0x3c   : > { %548 = vmatmul.mubr.bf16.gmra.mxu0 %v1353_v26  ;;  %612 = vmatmul.mubr.bf16.gmra.mxu1 %v1354_v27 }
  0x3d   : > { %555 = vmatprep.mubr.bf16.mxu0 %v1355_v28  ;;  %619 = vmatprep.mubr.bf16.mxu1 %v1357_v29 }
  0x44   : > { %556 = vmatmul.mubr.bf16.gmra.mxu0 %v1359_v30  ;;  %620 = vmatmul.mubr.bf16.gmra.mxu1 %v1360_v31 }
  0x45   : > { %563 = vmatprep.mubr.bf16.mxu0 %v1361_v32  ;;  %627 = vmatprep.mubr.bf16.mxu1 %v1363_v33 }
  0x4c   : > { %564 = vmatmul.mubr.bf16.gmra.mxu0 %v1365_v34  ;;  %628 = vmatmul.mubr.bf16.gmra.mxu1 %v1366_v35 }
  0x4d   : > { %571 = vmatprep.mubr.bf16.mxu0 %v1367_v36  ;;  %635 = vmatprep.mubr.bf16.mxu1 %v1369_v37 }
  0x54   : > { %572 = vmatmul.mubr.bf16.gmra.mxu0 %v1371_v38  ;;  %636 = vmatmul.mubr.bf16.gmra.mxu1 %v1372_v39 }
  0x55   : > { %579 = vmatprep.mubr.bf16.mxu0 %v1373_v40  ;;  %643 = vmatprep.mubr.bf16.mxu1 %v1375_v41 }
  0x5c   : > { %580 = vmatmul.mubr.bf16.gmra.mxu0 %v1377_v42  ;;  %644 = vmatmul.mubr.bf16.gmra.mxu1 %v1378_v43 }
  0x5d   : > { %587 = vmatprep.mubr.bf16.mxu0 %v1379_v44  ;;  %651 = vmatprep.mubr.bf16.mxu1 %v1381_v45 }
  0x64   : > { %588 = vmatmul.mubr.bf16.gmra.mxu0 %v1383_v46  ;;  %652 = vmatmul.mubr.bf16.gmra.mxu1 %v1384_v47 }
  0xec   : > { %v1201_v48 = vpop.f32.mrf.mxu0  ;;  %v1249_v49 = vpop.f32.mrf.mxu1 }
  0xee   : > { %v1202_v50 = vpop.f32.mrf.mxu0  ;;  %v1250_v51 = vpop.f32.mrf.mxu1 }
  0xef   : > { %v1203_v52 = vadd.f32 %v1202_v50, %v1201_v48  ;;  %v1251_v53 = vadd.f32 %v1250_v51, %v1249_v49 }
  0xf0   : > { %v1204_v55 = vpop.f32.mrf.mxu0  ;;  %v1252_v56 = vpop.f32.mrf.mxu1 }
  0xf1   : > { %v534_v59 = vadd.f32 %v1203_v52, %v1512_v54  ;;  %v1535_v41 = vadd.f32 %v1251_v53, %v1512_v54 }
  0xf2   : > { %v1205_v57 = vpop.f32.mrf.mxu0  ;;  %v1253_v58 = vpop.f32.mrf.mxu1 }
  0xf3   : > { %v1206_v60 = vadd.f32 %v1205_v57, %v1204_v55  ;;  %v1515_v61 = vadd.f32 %v1253_v58, %v1252_v56  ;;  %v660_v2 = vmax.f32 %v534_v59, 0.0 }
  0xf4   : > { %v1207_v62 = vpop.f32.mrf.mxu0  ;;  %v1255_v63 = vpop.f32.mrf.mxu1 }
  0xf5   : > { %v537_v3 = vadd.f32 %v1206_v60, %v1512_v54  ;;  %v692_v10 = vmax.f32 %v660_v2, 0.0 }
  0xf6   : > { %v1208_v0 = vpop.f32.mrf.mxu0  ;;  %v1256_v1 = vpop.f32.mrf.mxu1 }
  0xf7   : > { %v1209_v4 = vadd.f32 %v1208_v0, %v1207_v62  ;;  %v661_v11 = vmax.f32 %v537_v3, 0.0  ;;  %v1257_v18 = vadd.f32 %v1256_v1, %v1255_v63 }
  0xf8   : > { %v1210_v5 = vpop.f32.mrf.mxu0  ;;  %v1258_v6 = vpop.f32.mrf.mxu1 }
  0xf9   : > { %v1519_v7 = vadd.f32 %v1209_v4, %v1512_v54  ;;  %v693_v21 = vmax.f32 %v661_v11, 0.0  ;;  %v1530_v32 = vadd.f32 %v1257_v18, %v1512_v54 }
  0xfa   : > { %v1211_v8 = vpop.f32.mrf.mxu0  ;;  %v1259_v9 = vpop.f32.mrf.mxu1 }
  0xfb   : > { %v662_v12 = vmax.f32 %v1519_v7, 0.0  ;;  %v1212_v13 = vadd.f32 %v1211_v8, %v1210_v5  ;;  %v1260_v24 = vadd.f32 %v1259_v9, %v1258_v6  ;;  %v678_v51 = vmax.f32 %v1530_v32, 0.0 }
  0xfc   : > { %v1213_v14 = vpop.f32.mrf.mxu0  ;;  %v1261_v15 = vpop.f32.mrf.mxu1 }
  0xfd   : > { %v694_v16 = vmax.f32 %v692_v10, %v662_v12  ;;  %v1525_v17 = vadd.f32 %v1212_v13, %v1512_v54  ;;  %v1538_v43 = vadd.f32 %v1260_v24, %v1512_v54 }
  0xfe   : > { %v1214_v19 = vpop.f32.mrf.mxu0  ;;  %v1262_v20 = vpop.f32.mrf.mxu1 }
  0xff   : > { %v741_v22 = vrot.slane %v694_v16, 7  ;;  %v663_v23 = vmax.f32 %v1525_v17, 0.0  ;;  %v1215_v25 = vadd.f32 %v1214_v19, %v1213_v14  ;;  %v1263_v26 = vadd.f32 %v1262_v20, %v1261_v15 }
 0x100   : > { %v1216_v27 = vpop.f32.mrf.mxu0  ;;  %v1264_v28 = vpop.f32.mrf.mxu1  ;;  %v790_v31 = vrot.slane %v694_v16, 1  ;;  %v679_v2 = vmax.f32 %v1538_v43, 0.0 }
 0x101   : > { %v781_v29 = vsel %vm740_vm0, 0.0, %v741_v22  ;;  %v695_v30 = vmax.f32 %v693_v21, %v663_v23  ;;  %v550_v33 = vadd.f32 %v1215_v25, %v1512_v54  ;;  %v614_v34 = vadd.f32 %v1263_v26, %v1512_v54 }
 0x102   : > { %v1217_v35 = vpop.f32.mrf.mxu0  ;;  %v1265_v36 = vpop.f32.mrf.mxu1  ;;  %v838_v42 = vmax.f32 %v694_v16, %v781_v29 }
 0x103   : > { %v742_v37 = vrot.slane %v695_v30, 7  ;;  %v791_v38 = vrot.slane %v695_v30, 1  ;;  %v1218_v39 = vadd.f32 %v1217_v35, %v1216_v27  ;;  %v1266_v40 = vadd.f32 %v1265_v36, %v1264_v28 }
 0x104   : > { %v664_v44 = vmax.f32 %v550_v33, 0.0  ;;  %v1219_v45 = vpop.f32.mrf.mxu0  ;;  %v1267_v46 = vpop.f32.mrf.mxu1  ;;  %v680_v49 = vmax.f32 %v614_v34, 0.0 }
 0x105   : > { %v743_v47 = vsel %vm740_vm0, %v741_v22, %v742_v37  ;;  %v792_v48 = vsel %vm789_vm1, %v790_v31, %v791_v38  ;;  %v553_v50 = vadd.f32 %v1218_v39, %v1512_v54  ;;  %v830_v52 = vsel %vm789_vm1, %v791_v38, 0.0 }
 0x106   : > { %v839_v53 = vmax.f32 %v695_v30, %v743_v47  ;;  %v854_v55 = vmax.f32 %v838_v42, %v792_v48  ;;  %v1220_v56 = vpop.f32.mrf.mxu0  ;;  %v1268_v57 = vpop.f32.mrf.mxu1  ;;  %v617_v59 = vadd.f32 %v1266_v40, %v1512_v54  ;;  %v696_v5 = vmax.f32 %v662_v12, %v664_v44 }
 0x107   : > { %v665_v58 = vmax.f32 %v553_v50, 0.0  ;;  %v1221_v60 = vadd.f32 %v1220_v56, %v1219_v45  ;;  %v1269_v62 = vadd.f32 %v1268_v57, %v1267_v46  ;;  %v712_v6 = vmax.f32 %v678_v51, %v680_v49 }
 0x108   : > { %v855_v63 = vmax.f32 %v839_v53, %v830_v52  ;;  %v878_v0 = vrot.slane %v854_v55, 1  ;;  %v894_v1 = vrot.slane %v854_v55, 2  ;;  %v1222_v3 = vpop.f32.mrf.mxu0  ;;  %v1270_v4 = vpop.f32.mrf.mxu1  ;;  %v910_v10 = vrot.slane %v854_v55, 3 }
 0x109   : > { %v1552_v8 = vadd.f32 %v1221_v60, %v1512_v54  ;;  %v1555_v9 = vadd.f32 %v1269_v62, %v1512_v54  ;;  %v697_v13 = vmax.f32 %v663_v23, %v665_v58  ;;  %v681_v14 = vmax.f32 %v617_v59, 0.0 }
 0x10a   : > { %v934_v11 = vrot.slane %v855_v63, 4  ;;  %v1223_v15 = vpop.f32.mrf.mxu0  ;;  %v1271_v16 = vpop.f32.mrf.mxu1  ;;  %v950_v17 = vrot.slane %v855_v63, 5  ;;  %v998_v18 = vsel %vm740_vm0, %v854_v55, %v878_v0  ;;  %v966_v19 = vrot.slane %v855_v63, 6 }
 0x10b   : > { %v666_v7 = vmax.f32 %v1552_v8, 0.0  ;;  %v682_v12 = vmax.f32 %v1555_v9, 0.0  ;;  %v1007_v20 = vsel %vm1006_vm2, %v998_v18, %v894_v1  ;;  %v1224_v21 = vadd.f32 %v1223_v15, %v1222_v3 }
 0x10c   : > { %v1272_v22 = vadd.f32 %v1271_v16, %v1270_v4  ;;  %v1225_v24 = vpop.f32.mrf.mxu0  ;;  %v1273_v25 = vpop.f32.mrf.mxu1  ;;  %v982_v26 = vrot.slane %v855_v63, 7  ;;  %v1016_v23 = vsel %vm1015_vm3, %v1007_v20, %v910_v10  ;;  %v713_v30 = vmax.f32 %v679_v2, %v681_v14 }
 0x10d   : > { %v698_v27 = vmax.f32 %v696_v5, %v666_v7  ;;  %v714_v28 = vmax.f32 %v712_v6, %v682_v12  ;;  %v1025_v29 = vsel %vm1024_vm4, %v1016_v23, %v934_v11  ;;  %v1571_v31 = vadd.f32 %v1224_v21, %v1512_v54 }
 0x10e   : > { %v1574_v33 = vadd.f32 %v1272_v22, %v1512_v54  ;;  %v1226_v34 = vpop.f32.mrf.mxu0  ;;  %v1274_v35 = vpop.f32.mrf.mxu1  ;;  %v1034_v36 = vsel %vm1033_vm5, %v1025_v29, %v950_v17 }
 0x10f   : > { %v744_v37 = vrot.slane %v698_v27, 7  ;;  %v793_v38 = vrot.slane %v698_v27, 1  ;;  %v756_v39 = vrot.slane %v714_v28, 7  ;;  %v1043_v40 = vsel %vm1042_vm6, %v1034_v36, %v966_v19 }
 0x110   : > { %v805_v42 = vrot.slane %v714_v28, 1  ;;  %v667_v44 = vmax.f32 %v1571_v31, 0.0  ;;  %v683_v45 = vmax.f32 %v1574_v33, 0.0  ;;  %v1228_v46 = vpop.f32.mrf.mxu0  ;;  %v1276_v47 = vpop.f32.mrf.mxu1  ;;  %v1051_v48 = vsel %vm789_vm1, %v1043_v40, %v982_v26 }
 0x111   : > { %v782_v49 = vsel %vm740_vm0, 0.0, %v744_v37  ;;  %v786_v50 = vsel %vm740_vm0, 0.0, %v756_v39  ;;  %v1227_v52 = vadd.f32 %v1226_v34, %v1225_v24  ;;  %1060 = vst.msk [vmem:[%s1579_s29] sm:$0xff] %vm1059_vm7, %v1051_v48  ;;  %v1275_v62 = vadd.f32 %v1274_v35, %v1273_v25 }
 0x112   : > { %v840_v53 = vmax.f32 %v698_v27, %v782_v49  ;;  %v848_v55 = vmax.f32 %v714_v28, %v786_v50  ;;  %v699_v56 = vmax.f32 %v697_v13, %v667_v44  ;;  %v715_v57 = vmax.f32 %v713_v30, %v683_v45  ;;  %v1229_v58 = vpop.f32.mrf.mxu0  ;;  %v1277_v59 = vpop.f32.mrf.mxu1 }
 0x113   : > { %v566_v60 = vadd.f32 %v1227_v52, %v1512_v54  ;;  %v1230_v63 = vadd.f32 %v1229_v58, %v1228_v46  ;;  %v1278_v0 = vadd.f32 %v1277_v59, %v1276_v47  ;;  %v630_v14 = vadd.f32 %v1275_v62, %v1512_v54 }
 0x114   : > { %v745_v1 = vrot.slane %v699_v56, 7  ;;  %v794_v3 = vrot.slane %v699_v56, 1  ;;  %v757_v4 = vrot.slane %v715_v57, 7  ;;  %v806_v5 = vrot.slane %v715_v57, 1  ;;  %v1231_v6 = vpop.f32.mrf.mxu0  ;;  %v1279_v10 = vpop.f32.mrf.mxu1 }
 0x115   : > { %v668_v11 = vmax.f32 %v566_v60, 0.0  ;;  %v569_v13 = vadd.f32 %v1230_v63, %v1512_v54  ;;  %v633_v15 = vadd.f32 %v1278_v0, %v1512_v54  ;;  %v684_v29 = vmax.f32 %v630_v14, 0.0 }
 0x116   : > { %v746_v16 = vsel %vm740_vm0, %v744_v37, %v745_v1  ;;  %v795_v17 = vsel %vm789_vm1, %v793_v38, %v794_v3  ;;  %v831_v18 = vsel %vm789_vm1, %v794_v3, 0.0  ;;  %v758_v19 = vsel %vm740_vm0, %v756_v39, %v757_v4  ;;  %v1232_v20 = vpop.f32.mrf.mxu0  ;;  %v1280_v21 = vpop.f32.mrf.mxu1 }
 0x117   : > { %v841_v22 = vmax.f32 %v699_v56, %v746_v16  ;;  %v856_v24 = vmax.f32 %v840_v53, %v795_v17  ;;  %v807_v25 = vsel %vm789_vm1, %v805_v42, %v806_v5  ;;  %v835_v26 = vsel %vm789_vm1, %v806_v5, 0.0 }
 0x118   : > { %v849_v23 = vmax.f32 %v715_v57, %v758_v19  ;;  %v864_v27 = vmax.f32 %v848_v55, %v807_v25  ;;  %v1606_v28 = vmax.f32 %v666_v7, %v668_v11  ;;  %v1234_v30 = vpop.f32.mrf.mxu0  ;;  %v1282_v34 = vpop.f32.mrf.mxu1  ;;  %v716_v63 = vmax.f32 %v682_v12, %v684_v29 }
 0x119   : > { %v857_v35 = vmax.f32 %v841_v22, %v831_v18  ;;  %v879_v36 = vrot.slane %v856_v24, 1  ;;  %v895_v37 = vrot.slane %v856_v24, 2  ;;  %v911_v38 = vrot.slane %v856_v24, 3 }
 0x11a   : > { %v865_v39 = vmax.f32 %v849_v23, %v835_v26  ;;  %v883_v40 = vrot.slane %v864_v27, 1  ;;  %v899_v46 = vrot.slane %v864_v27, 2  ;;  %v915_v47 = vrot.slane %v864_v27, 3  ;;  %v1235_v42 = vpop.f32.mrf.mxu0  ;;  %v1283_v48 = vpop.f32.mrf.mxu1 }
 0x11b   : > { %v935_v49 = vrot.slane %v857_v35, 4  ;;  %v951_v50 = vrot.slane %v857_v35, 5  ;;  %v967_v52 = vrot.slane %v857_v35, 6  ;;  %v983_v53 = vrot.slane %v857_v35, 7 }
 0x11c   : > { %v999_v8 = vsel %vm740_vm0, %v856_v24, %v879_v36  ;;  %v939_v7 = vrot.slane %v865_v39, 4  ;;  %v955_v55 = vrot.slane %v865_v39, 5  ;;  %v971_v56 = vrot.slane %v865_v39, 6  ;;  %v1237_v57 = vpop.f32.mrf.mxu0  ;;  %v1285_v58 = vpop.f32.mrf.mxu1 }
 0x11d   : > { %v1008_v59 = vsel %vm1006_vm2, %v999_v8, %v895_v37  ;;  %v987_v60 = vrot.slane %v865_v39, 7  ;;  %v1003_v62 = vsel %vm740_vm0, %v864_v27, %v883_v40  ;;  %v669_v3 = vmax.f32 %v569_v13, 0.0 }
 0x11e   : > { %v1017_v0 = vsel %vm1015_vm3, %v1008_v59, %v911_v38  ;;  %v1012_v1 = vsel %vm1006_vm2, %v1003_v62, %v899_v46  ;;  %v685_v4 = vmax.f32 %v633_v15, 0.0  ;;  %v1238_v5 = vpop.f32.mrf.mxu0  ;;  %v1286_v11 = vpop.f32.mrf.mxu1  ;;  %v1233_v17 = vadd.f32 %v1232_v20, %v1231_v6 }
 0x11f   : > { %v1026_v14 = vsel %vm1024_vm4, %v1017_v0, %v935_v49  ;;  %v1021_v16 = vsel %vm1015_vm3, %v1012_v1, %v915_v47  ;;  %v1281_v18 = vadd.f32 %v1280_v21, %v1279_v10  ;;  %v701_v12 = vmax.f32 %v667_v44, %v669_v3 }
 0x120   : > { %v1035_v19 = vsel %vm1033_vm5, %v1026_v14, %v951_v50  ;;  %v1030_v9 = vsel %vm1024_vm4, %v1021_v16, %v939_v7  ;;  %v717_v13 = vmax.f32 %v683_v45, %v685_v4  ;;  %v1240_v15 = vpop.f32.mrf.mxu0  ;;  %v1288_v22 = vpop.f32.mrf.mxu1  ;;  %v574_v6 = vadd.f32 %v1233_v17, %v1512_v54 }
 0x121   : > { %v1044_v24 = vsel %vm1042_vm6, %v1035_v19, %v967_v52  ;;  %v1039_v25 = vsel %vm1033_vm5, %v1030_v9, %v955_v55  ;;  %v638_v10 = vadd.f32 %v1281_v18, %v1512_v54  ;;  %v1236_v31 = vadd.f32 %v1235_v42, %v1234_v30 }
 0x122   : > { %v1052_v20 = vsel %vm789_vm1, %v1044_v24, %v983_v53  ;;  %v1048_v21 = vsel %vm1042_vm6, %v1039_v25, %v971_v56  ;;  %v1284_v44 = vadd.f32 %v1283_v48, %v1282_v34  ;;  %v1241_v26 = vpop.f32.mrf.mxu0  ;;  %v1289_v33 = vpop.f32.mrf.mxu1  ;;  %v670_v23 = vmax.f32 %v574_v6, 0.0 }
 0x123   : > { %1061 = vst.msk [vmem:[%s1579_s29 + $0x8] sm:$0xff] %vm1059_vm7, %v1052_v20  ;;  %v1056_v45 = vsel %vm789_vm1, %v1048_v21, %v987_v60  ;;  %v686_v27 = vmax.f32 %v638_v10, 0.0  ;;  %v1239_v29 = vadd.f32 %v1238_v5, %v1237_v57  ;;  %v1635_v35 = vadd.f32 %v1236_v31, %v1512_v54 }
 0x124   : > { %1065 = vst.msk [vmem:[%s1579_s29 + $0x28] sm:$0xff] %vm1059_vm7, %v1056_v45  ;;  %v1638_v36 = vadd.f32 %v1284_v44, %v1512_v54  ;;  %v1287_v37 = vadd.f32 %v1286_v11, %v1285_v58  ;;  %v1242_v30 = vadd.f32 %v1241_v26, %v1240_v15  ;;  %v702_v34 = vmax.f32 %v1606_v28, %v670_v23  ;;  %v1648_v49 = vpop.f32.mrf.mxu0  ;;  %v1291_v50 = vpop.f32.mrf.mxu1 }
 0x125   : > { %v718_v38 = vmax.f32 %v716_v63, %v686_v27  ;;  %v582_v39 = vadd.f32 %v1239_v29, %v1512_v54  ;;  %v1290_v40 = vadd.f32 %v1289_v33, %v1288_v22  ;;  %v671_v46 = vmax.f32 %v1635_v35, 0.0 }
 0x126   : > { %v687_v47 = vmax.f32 %v1638_v36, 0.0  ;;  %v646_v42 = vadd.f32 %v1287_v37, %v1512_v54  ;;  %v1646_v48 = vadd.f32 %v1242_v30, %v1512_v54  ;;  %v676_v52 = vmax.f32 %v1535_v41, 0.0  ;;  %v1244_v3 = vpop.f32.mrf.mxu0  ;;  %v1292_v4 = vpop.f32.mrf.mxu1 }
 0x127   : > { %v1653_v28 = vadd.f32 %v1515_v61, %v1512_v54  ;;  %v747_v53 = vrot.slane %v702_v34, 7  ;;  %v759_v8 = vrot.slane %v718_v38, 7  ;;  %v703_v7 = vmax.f32 %v701_v12, %v671_v46 }
 0x128   : > { %v719_v55 = vmax.f32 %v717_v13, %v687_v47  ;;  %v672_v56 = vmax.f32 %v582_v39, 0.0  ;;  %v688_v57 = vmax.f32 %v646_v42, 0.0  ;;  %v796_v59 = vrot.slane %v702_v34, 1  ;;  %v1246_v20 = vpop.f32.mrf.mxu0  ;;  %v1294_v21 = vpop.f32.mrf.mxu1 }
 0x129   : > { %v783_v58 = vsel %vm740_vm0, 0.0, %v747_v53  ;;  %v787_v60 = vsel %vm740_vm0, 0.0, %v759_v8  ;;  %v808_v62 = vrot.slane %v718_v38, 1  ;;  %v748_v63 = vrot.slane %v703_v7, 7 }
 0x12a   : > { %v797_v0 = vrot.slane %v703_v7, 1  ;;  %v673_v61 = vmax.f32 %v1646_v48, 0.0  ;;  %v1663_v1 = vadd.f32 %v1290_v40, %v1512_v54  ;;  %v842_v5 = vmax.f32 %v702_v34, %v783_v58 }
 0x12b   : > { %v850_v11 = vmax.f32 %v718_v38, %v787_v60  ;;  %v760_v14 = vrot.slane %v719_v55, 7  ;;  %v809_v16 = vrot.slane %v719_v55, 1  ;;  %v749_v17 = vsel %vm740_vm0, %v747_v53, %v748_v63 }
 0x12c   : > { %v798_v18 = vsel %vm789_vm1, %v796_v59, %v797_v0  ;;  %v704_v19 = vmax.f32 %v670_v23, %v672_v56  ;;  %v720_v9 = vmax.f32 %v686_v27, %v688_v57  ;;  %v843_v12 = vmax.f32 %v703_v7, %v749_v17  ;;  %v1295_v7 = vpop.f32.mrf.mxu1 }
 0x12d   : > { %v858_v13 = vmax.f32 %v842_v5, %v798_v18  ;;  %v761_v15 = vsel %vm740_vm0, %v759_v8, %v760_v14  ;;  %v810_v22 = vsel %vm789_vm1, %v808_v62, %v809_v16  ;;  %v832_v24 = vsel %vm789_vm1, %v797_v0, 0.0  ;;  %v1247_v8 = vpop.f32.mrf.mxu0 }
 0x12e   : > { %v836_v25 = vsel %vm789_vm1, %v809_v16, 0.0  ;;  %v851_v6 = vmax.f32 %v719_v55, %v761_v15  ;;  %v866_v10 = vmax.f32 %v850_v11, %v810_v22  ;;  %v859_v31 = vmax.f32 %v843_v12, %v832_v24 }
 0x12f   : > { %v880_v44 = vrot.slane %v858_v13, 1  ;;  %v896_v26 = vrot.slane %v858_v13, 2  ;;  %v689_v33 = vmax.f32 %v1663_v1, 0.0  ;;  %v912_v45 = vrot.slane %v858_v13, 3 }
 0x130   : > { %v867_v23 = vmax.f32 %v851_v6, %v836_v25  ;;  %v884_v27 = vrot.slane %v866_v10, 1  ;;  %v900_v29 = vrot.slane %v866_v10, 2  ;;  %v936_v37 = vrot.slane %v859_v31, 4 }
 0x131   : > { %v952_v30 = vrot.slane %v859_v31, 5  ;;  %v968_v34 = vrot.slane %v859_v31, 6  ;;  %v916_v38 = vrot.slane %v866_v10, 3  ;;  %v984_v39 = vrot.slane %v859_v31, 7 }
 0x132   : > { %v1000_v40 = vsel %vm740_vm0, %v858_v13, %v880_v44  ;;  %v940_v42 = vrot.slane %v867_v23, 4  ;;  %v956_v53 = vrot.slane %v867_v23, 5  ;;  %v972_v56 = vrot.slane %v867_v23, 6 }
 0x133   : > { %v1009_v55 = vsel %vm1006_vm2, %v1000_v40, %v896_v26  ;;  %v988_v57 = vrot.slane %v867_v23, 7  ;;  %v1004_v58 = vsel %vm740_vm0, %v866_v10, %v884_v27  ;;  %v1245_v62 = vadd.f32 %v1244_v3, %v1648_v49 }
 0x134   : > { %v1018_v59 = vsel %vm1015_vm3, %v1009_v55, %v912_v45  ;;  %v1013_v60 = vsel %vm1006_vm2, %v1004_v58, %v900_v29  ;;  %v1293_v63 = vadd.f32 %v1292_v4, %v1291_v50  ;;  %v1248_v5 = vadd.f32 %v1247_v8, %v1246_v20 }
 0x135   : > { %v1027_v0 = vsel %vm1024_vm4, %v1018_v59, %v936_v37  ;;  %v1022_v1 = vsel %vm1015_vm3, %v1013_v60, %v916_v38  ;;  %v1296_v11 = vadd.f32 %v1295_v7, %v1294_v21  ;;  %v590_v17 = vadd.f32 %v1245_v62, %v1512_v54 }
 0x136   : > { %v1036_v14 = vsel %vm1033_vm5, %v1027_v0, %v952_v30  ;;  %v1031_v16 = vsel %vm1024_vm4, %v1022_v1, %v940_v42  ;;  %v654_v18 = vadd.f32 %v1293_v63, %v1512_v54  ;;  %v593_v50 = vadd.f32 %v1248_v5, %v1512_v54 }
 0x137   : > { %v1045_v12 = vsel %vm1042_vm6, %v1036_v14, %v968_v34  ;;  %v1040_v49 = vsel %vm1033_vm5, %v1031_v16, %v956_v53  ;;  %v657_v3 = vadd.f32 %v1296_v11, %v1512_v54  ;;  %v674_v15 = vmax.f32 %v590_v17, 0.0 }
 0x138   : > { %v1053_v4 = vsel %vm789_vm1, %v1045_v12, %v984_v39  ;;  %v1049_v13 = vsel %vm1042_vm6, %v1040_v49, %v972_v56  ;;  %v690_v22 = vmax.f32 %v654_v18, 0.0  ;;  %v677_v24 = vmax.f32 %v1653_v28, 0.0 }
 0x139   : > { %1062 = vst.msk [vmem:[%s1579_s29 + $0x10] sm:$0xff] %vm1059_vm7, %v1053_v4  ;;  %v1057_v25 = vsel %vm789_vm1, %v1049_v13, %v988_v57  ;;  %v705_v6 = vmax.f32 %v671_v46, %v673_v61  ;;  %v675_v10 = vmax.f32 %v593_v50, 0.0  ;;  %v706_v54 = vmax.f32 %v704_v19, %v674_v15 }
 0x13a   : > { %1066 = vst.msk [vmem:[%s1579_s29 + $0x30] sm:$0xff] %vm1059_vm7, %v1057_v25  ;;  %v708_v20 = vmax.f32 %v674_v15, %v676_v52  ;;  %v722_v21 = vmax.f32 %v720_v9, %v690_v22  ;;  %v691_v31 = vmax.f32 %v657_v3, 0.0  ;;  %v721_v26 = vmax.f32 %v687_v47, %v689_v33 }
 0x13b   : > { %v707_v44 = vmax.f32 %v705_v6, %v675_v10  ;;  %v709_v28 = vmax.f32 %v675_v10, %v677_v24  ;;  %v750_v45 = vrot.slane %v706_v54, 7  ;;  %v799_v52 = vrot.slane %v706_v54, 1 }
 0x13c   : > { %v710_v48 = vmax.f32 %v708_v20, %v678_v51  ;;  %v762_v35 = vrot.slane %v722_v21, 7  ;;  %v723_v9 = vmax.f32 %v721_v26, %v691_v31  ;;  %v811_v56 = vrot.slane %v722_v21, 1 }
 0x13d   : > { %v711_v46 = vmax.f32 %v709_v28, %v679_v2  ;;  %v751_v61 = vrot.slane %v707_v44, 7  ;;  %v800_v19 = vrot.slane %v707_v44, 1  ;;  %v784_v41 = vsel %vm740_vm0, 0.0, %v750_v45 }
 0x13e   : > { %v753_v23 = vrot.slane %v710_v48, 7  ;;  %v802_v27 = vrot.slane %v710_v48, 1  ;;  %v844_v29 = vmax.f32 %v706_v54, %v784_v41  ;;  %v788_v51 = vsel %vm740_vm0, 0.0, %v762_v35 }
 0x13f   : > { %v752_v36 = vsel %vm740_vm0, %v750_v45, %v751_v61  ;;  %v754_v47 = vrot.slane %v711_v46, 7  ;;  %v801_v33 = vsel %vm789_vm1, %v799_v52, %v800_v19  ;;  %v803_v43 = vrot.slane %v711_v46, 1 }
 0x140   : > { %v785_v32 = vsel %vm740_vm0, 0.0, %v753_v23  ;;  %v845_v30 = vmax.f32 %v707_v44, %v752_v36  ;;  %v860_v34 = vmax.f32 %v844_v29, %v801_v33  ;;  %v833_v39 = vsel %vm789_vm1, %v800_v19, 0.0 }
 0x141   : > { %v846_v2 = vmax.f32 %v710_v48, %v785_v32  ;;  %v755_v37 = vsel %vm740_vm0, %v753_v23, %v754_v47  ;;  %v804_v38 = vsel %vm789_vm1, %v802_v27, %v803_v43  ;;  %v763_v42 = vrot.slane %v723_v9, 7 }
 0x142   : > { %v847_v40 = vmax.f32 %v711_v46, %v755_v37  ;;  %v834_v53 = vsel %vm789_vm1, %v803_v43, 0.0  ;;  %v861_v8 = vmax.f32 %v845_v30, %v833_v39  ;;  %v881_v55 = vrot.slane %v860_v34, 1 }
 0x143   : > { %v862_v7 = vmax.f32 %v846_v2, %v804_v38  ;;  %v897_v58 = vrot.slane %v860_v34, 2  ;;  %v812_v59 = vrot.slane %v723_v9, 1  ;;  %v852_v60 = vmax.f32 %v722_v21, %v788_v51 }
 0x144   : > { %v863_v57 = vmax.f32 %v847_v40, %v834_v53  ;;  %v913_v0 = vrot.slane %v860_v34, 3  ;;  %v937_v5 = vrot.slane %v861_v8, 4  ;;  %v764_v14 = vsel %vm740_vm0, %v762_v35, %v763_v42 }
 0x145   : > { %v882_v62 = vrot.slane %v862_v7, 1  ;;  %v898_v63 = vrot.slane %v862_v7, 2  ;;  %v914_v1 = vrot.slane %v862_v7, 3  ;;  %v953_v16 = vrot.slane %v861_v8, 5 }
 0x146   : > { %v938_v11 = vrot.slane %v863_v57, 4  ;;  %v954_v17 = vrot.slane %v863_v57, 5  ;;  %v969_v18 = vrot.slane %v861_v8, 6  ;;  %v1001_v12 = vsel %vm740_vm0, %v860_v34, %v881_v55 }
 0x147   : > { %v970_v49 = vrot.slane %v863_v57, 6  ;;  %v1002_v50 = vsel %vm740_vm0, %v862_v7, %v882_v62  ;;  %v1010_v3 = vsel %vm1006_vm2, %v1001_v12, %v897_v58  ;;  %v813_v4 = vsel %vm789_vm1, %v811_v56, %v812_v59 }
 0x148   : > { %v1011_v13 = vsel %vm1006_vm2, %v1002_v50, %v898_v63  ;;  %v1019_v15 = vsel %vm1015_vm3, %v1010_v3, %v913_v0  ;;  %v853_v22 = vmax.f32 %v723_v9, %v764_v14  ;;  %v868_v24 = vmax.f32 %v852_v60, %v813_v4 }
 0x149   : > { %v985_v25 = vrot.slane %v861_v8, 7  ;;  %v1020_v6 = vsel %vm1015_vm3, %v1011_v13, %v914_v1  ;;  %v1028_v10 = vsel %vm1024_vm4, %v1019_v15, %v937_v5  ;;  %v837_v54 = vsel %vm789_vm1, %v812_v59, 0.0 }
 0x14a   : > { %v1029_v20 = vsel %vm1024_vm4, %v1020_v6, %v938_v11  ;;  %v1037_v21 = vsel %vm1033_vm5, %v1028_v10, %v953_v16  ;;  %v869_v31 = vmax.f32 %v853_v22, %v837_v54  ;;  %v885_v44 = vrot.slane %v868_v24, 1 }
 0x14b   : > { %v986_v28 = vrot.slane %v863_v57, 7  ;;  %v1038_v26 = vsel %vm1033_vm5, %v1029_v20, %v954_v17  ;;  %v1046_v48 = vsel %vm1042_vm6, %v1037_v21, %v969_v18  ;;  %v901_v45 = vrot.slane %v868_v24, 2 }
 0x14c   : > { %v1047_v35 = vsel %vm1042_vm6, %v1038_v26, %v970_v49  ;;  %v1054_v46 = vsel %vm789_vm1, %v1046_v48, %v985_v25  ;;  %v941_v61 = vrot.slane %v869_v31, 4  ;;  %v917_v23 = vrot.slane %v868_v24, 3 }
 0x14d   : > { %v1055_v19 = vsel %vm789_vm1, %v1047_v35, %v986_v28  ;;  %1063 = vst.msk [vmem:[%s1579_s29 + $0x18] sm:$0xff] %vm1059_vm7, %v1054_v46  ;;  %v1005_v41 = vsel %vm740_vm0, %v868_v24, %v885_v44  ;;  %v957_v9 = vrot.slane %v869_v31, 5  ;;  %v973_v29 = vrot.slane %v869_v31, 6 }
 0x14e   : > { %1064 = vst.msk [vmem:[%s1579_s29 + $0x20] sm:$0xff] %vm1059_vm7, %v1055_v19  ;;  %v1014_v52 = vsel %vm1006_vm2, %v1005_v41, %v901_v45  ;;  %v989_v47 = vrot.slane %v869_v31, 7 }
 0x14f   : > { %v1023_v27 = vsel %vm1015_vm3, %v1014_v52, %v917_v23 }
 0x150   : > { %v1032_v36 = vsel %vm1024_vm4, %v1023_v27, %v941_v61 }
 0x151   : > { %v1041_v32 = vsel %vm1033_vm5, %v1032_v36, %v957_v9 }
 0x152   : > { %v1050_v51 = vsel %vm1042_vm6, %v1041_v32, %v973_v29 }
 0x153   : > { %v1058_v33 = vsel %vm789_vm1, %v1050_v51, %v989_v47 }
 0x154   : > { %1067 = vst.msk [vmem:[%s1579_s29 + $0x38] sm:$0xff] %vm1059_vm7, %v1058_v33 }
 0x155 PF: > { %s13_s12 = sadd.s32 1, %s1391_s12  }
 0x156   : > { %p10_p4 = scmp.ge.s32.totalorder %s13_s12, 4  }
 0x158   :  { %12 = sbr.rel (!%p10_p4) target bundleno = 1 (0x1), region = 62 }

// kernel: cornet_z_forward.5
= control target key start
LH: loop header
LB: loop body
LE: loop exit
PB: predicated region body
PF: predicated region fallthrough
CT: control target
= control target key end

     0   :  { %s1656_s12 = smov 0   ;;  %s2167_s0 = inlined_call_operand.vmem [shape: bf16[2,168,64], index: 0, kind: input, shape index: {}]   ;;  %s2168_s1 = inlined_call_operand.vmem [shape: bf16[3,192,128], index: 1, kind: input, shape index: {}]   ;;  %s2169_s2 = inlined_call_operand.vmem [shape: f32[1,128], index: 2, kind: input, shape index: {}]   ;;  %s2170_s3 = inlined_call_operand.vmem [shape: f32[2,4,4,128], index: 3, kind: output, shape index: {}]  }
   0x1 LB: > { %s1389_s13 = sadd.s32 4294967295, %s1632_s12   ;;  %p1393_p0 = scmp.ge.s32.totalorder %s1632_s12, 1  ;;  %s1632_s12 = sphi %s1656_s12, %s13_s12  }
   0x2   : > { %p137_p1 = scmp.lt.s32.totalorder %s1632_s12, 3 }
   0x4   : > { %p138_p2 = pnand %p1393_p0, %p137_p1 }
   0x5   : > { %p161_p3 = scmp.lt.s32.totalorder (!%p138_p2), %s1389_s13, 1  ;;  %s1635_s30 = smov (!%p138_p2), 64  }
   0x6   : > { %141 = sbr.rel (%p138_p2) target bundleno = 448 (0x1c0), region = 32 }
   0xb   : > { %v1582_v0 = vld [vmem:[%s2168_s1 + $0x98] sm:$0xff]   ;;  %v1634_v1 = vmov 0   ;;  %s2172_s13 = smov (!%p161_p3, %s1389_s13), 1  ;;  %v1585_v3 = vld [vmem:[%s2168_s1 + $0x90] sm:$0xff]   ;;  %vm233_vm0 = vsmask.f32 7424 }
   0xc   : > { %553 = vmatprep.subr.bf16.mxu0 %v1634_v1  ;;  %723 = vmatprep.subr.bf16.mxu1 %v1634_v1  ;;  %v1583_v2 = vld [vmem:[%s2168_s1 + $0x38] sm:$0xff]   ;;  %s1556_s20 = smul.u32 84, %s2172_s13  ;;  %v1586_v4 = vld [vmem:[%s2168_s1 + $0x30] sm:$0xff]   ;;  %v1588_v5 = vld [vmem:[%s2168_s1 + $0x88] sm:$0xff]   ;;  %vm321_vm1 = vcmask 1046528   ;;  %vm339_vm2 = vcmask 523264  }
   0xd   : > { %554 = vmatpush1.bf16.msra.mxu0 %v1582_v0  ;;  %724 = vmatpush1.bf16.msra.mxu1 %v1583_v2  ;;  %v1589_v6 = vld [vmem:[%s2168_s1 + $0x28] sm:$0xff]   ;;  %vm1262_vm3 = vcmask 1040384   ;;  %s1531_s19 = sshll.u32 %s2172_s13, 4  ;;  %vm1320_vm4 = vcmask 1041408   ;;  %vm1325_vm5 = vcmask 1042432  }
   0xe   : > { %555 = vmatprep.subr.bf16.mxu0 %v1634_v1  ;;  %725 = vmatprep.subr.bf16.mxu1 %v1634_v1  ;;  %s1689_s27 = scalar_lea.vmem %s2167_s0, %s1556_s20  ;;  %s2134_s21 = scalar_lea.vmem %s2170_s3, %s1531_s19 }
   0xf   : > { %v174_v7 = vld [vmem:[%s1689_s27 + $0x8] sm:$0xf]  ;;  %v1696_v8 = vld [vmem:[%s1689_s27 + $0xc] sm:$0xf]  ;;  %v1703_v10 = vld [vmem:[%s1689_s27 + $0x10] sm:$0xff]  }
  0x10   : > { %v1700_v9 = vcombine.low %v174_v7, %v1696_v8  ;;  %v172_v11 = vld [vmem:[%s1689_s27] sm:$0xf]  ;;  %v1707_v12 = vld [vmem:[%s1689_s27 + $0x4] sm:$0xf]  ;;  %v250_v15 = vshll.u32 %v1703_v10, 16  ;;  %v1717_v17 = vld [vmem:[%s1689_s27 + $0x18] sm:$0xff]  }
  0x11   : > { %556 = vmatpush1.bf16.msra.mxu0 %v1585_v3  ;;  %726 = vmatpush1.bf16.msra.mxu1 %v1586_v4  ;;  %v1714_v16 = vcombine.low %v172_v11, %v1707_v12  ;;  %v254_v18 = vshrl.u32 %v1703_v10, 16  ;;  %v1721_v19 = vld [vmem:[%s1689_s27 + $0x20] sm:$0xff]   ;;  %v258_v24 = vshll.u32 %v1717_v17, 16  ;;  %v262_v25 = vshrl.u32 %v1717_v17, 16  ;;  %v1730_v27 = vld [vmem:[%s1689_s27 + $0x28] sm:$0xff]   ;;  %v1734_v29 = vld [vmem:[%s1689_s27 + $0x30] sm:$0xff]  }
  0x12   : > { %557 = vmatprep.subr.bf16.mxu0 %v1634_v1  ;;  %727 = vmatprep.subr.bf16.mxu1 %v1634_v1  ;;  %v242_v13 = vshll.u32 %v1700_v9, 16  ;;  %v246_v14 = vshrl.u32 %v1700_v9, 16  ;;  %v252_v21 = vrot.slane %v250_v15, 1  ;;  %v266_v26 = vshll.u32 %v1721_v19, 16  ;;  %v1738_v33 = vld [vmem:[%s1689_s27 + $0x38] sm:$0xff]   ;;  %v1748_v46 = vld [vmem:[%s1689_s27 + $0x40] sm:$0xff]  }
  0x13   : > { %v235_v22 = vshrl.u32 %v1714_v16, 16  ;;  %v237_v23 = vshll.u32 %v1714_v16, 16  ;;  %v270_v28 = vshrl.u32 %v1721_v19, 16  ;;  %v260_v34 = vrot.slane %v258_v24, 1  ;;  %v812_v58 = vld [vmem:[%s1689_s27 + $0x10] sm:$0xf] }
  0x14   : > { %v244_v20 = vrot.slane %v242_v13, 1  ;;  %v256_v32 = vor.u32 %v254_v18, %v252_v21  ;;  %v268_v35 = vrot.slane %v266_v26, 1  ;;  %v274_v36 = vshll.u32 %v1730_v27, 16  ;;  %v1755_v51 = vld [vmem:[%s1689_s27 + $0x48] ss:$0 sps:$4 sm:$0x11]  }
  0x15   : > { %558 = vmatpush1.bf16.msra.mxu0 %v1588_v5  ;;  %728 = vmatpush1.bf16.msra.mxu1 %v1589_v6  ;;  %v239_v31 = vrot.slane %v237_v23, 1  ;;  %v278_v37 = vshrl.u32 %v1730_v27, 16  ;;  %v282_v40 = vshll.u32 %v1734_v29, 16  ;;  %v286_v41 = vshrl.u32 %v1734_v29, 16  ;;  %v1765_v59 = vld [vmem:[%s1689_s27 + $0x18] sm:$0xff]   ;;  %v1779_v3 = vld [vmem:[%s1689_s27 + $0x30] sm:$0xff]  }
  0x16   : > { %559 = vmatprep.subr.bf16.mxu0 %v1634_v1  ;;  %729 = vmatprep.subr.bf16.mxu1 %v1634_v1  ;;  %v248_v30 = vor.u32 %v246_v14, %v244_v20  ;;  %v261_v42 = vsel %vm233_vm0, %v256_v32, %v260_v34  ;;  %v264_v43 = vor.u32 %v262_v25, %v260_v34  ;;  %v276_v45 = vrot.slane %v274_v36, 1  ;;  %v1760_v55 = vld [vmem:[%s1689_s27 + $0x40] ss:$0 sps:$4 sm:$0x11]   ;;  %v1771_v63 = vld [vmem:[%s1689_s27 + $0x14] sm:$0xf] }
  0x17   : > { %v240_v39 = vor.u32 %v239_v31, %v235_v22  ;;  %v272_v44 = vor.u32 %v270_v28, %v268_v35  ;;  %306 = vrot.lane.b32.xlu1 %v261_v42, %s1635_s30  ;;  %v284_v48 = vrot.slane %v282_v40, 1  ;;  %v290_v49 = vshll.u32 %v1738_v33, 16  ;;  %v1785_v13 = vld [vmem:[%s1689_s27 + $0x38] sm:$0xff]   ;;  %v1795_v26 = vld [vmem:[%s1689_s27 + $0x20] sm:$0xff]   ;;  %v1804_v32 = vld [vmem:[%s1689_s27 + $0x28] sm:$0xff]  }
  0x18   : > { %v253_v38 = vsel %vm233_vm0, %v248_v30, %v252_v21  ;;  %v294_v50 = vshrl.u32 %v1738_v33, 16  ;;  %v269_v52 = vsel %vm233_vm0, %v264_v43, %v268_v35  ;;  %v280_v53 = vor.u32 %v278_v37, %v276_v45  ;;  %v1798_v28 = vld [vmem:[%s1689_s27 + $0x40] sm:$0xff]  }
  0x19   : > { %304 = vrot.lane.b32.xlu0 %v253_v38, %s1635_s30  ;;  %v245_v47 = vsel %vm233_vm0, %v240_v39, %v244_v20  ;;  %v401_v54 = vshll.u32 %v1748_v46, 16  ;;  %v292_v56 = vrot.slane %v290_v49, 1  ;;  %v405_v57 = vshrl.u32 %v1748_v46, 16  ;;  %v1591_v35 = vld [vmem:[%s2168_s1 + $0x80] sm:$0xff]   ;;  %v1825_v49 = vld [vmem:[%s1689_s27 + $0x48] sm:$0xff]  }
  0x1a   : > { %v288_v60 = vor.u32 %v286_v41, %v284_v48  ;;  %v409_v61 = vshll.u32 %v1755_v51, 16  ;;  %v298_v62 = vshll.u32 %v1760_v55, 16  ;;  %v277_v0 = vsel %vm233_vm0, %v272_v44, %v276_v45  ;;  %560 = vmatpush1.bf16.msra.mxu0 %v1591_v35  ;;  %v1592_v44 = vld [vmem:[%s2168_s1 + $0x20] sm:$0xff]  }
  0x1b   : > { %308 = vrot.lane.b32.xlu1 %v269_v52, %s1635_s30  ;;  %v1776_v2 = vcombine.low %v812_v58, %v1771_v63  ;;  %v285_v4 = vsel %vm233_vm0, %v280_v53, %v284_v48  ;;  %v296_v5 = vor.u32 %v294_v50, %v292_v56  ;;  %v403_v6 = vrot.slane %v401_v54, 1  ;;  %561 = vmatprep.subr.bf16.mxu0 %v1634_v1  ;;  %v1594_v53 = vld [vmem:[%s2168_s1 + $0x78] sm:$0xff]  }
  0x1c   : > { %v881_v11 = vshll.u32 %v1765_v59, 16  ;;  %v905_v14 = vshll.u32 %v1779_v3, 16  ;;  %v293_v15 = vsel %vm233_vm0, %v288_v60, %v292_v56  ;;  %v411_v20 = vrot.slane %v409_v61, 1  ;;  %730 = vmatpush1.bf16.msra.mxu1 %v1592_v44  ;;  %v1595_v60 = vld [vmem:[%s2168_s1 + $0x18] sm:$0xff]   ;;  %v1596_v61 = vld [vmem:[%s2168_s1 + $0x70] sm:$0xff]  }
  0x1d   : > { %302 = vrot.lane.b32.xlu0 %v245_v47, %s1635_s30  ;;  %v876_v7 = vshll.u32 %v1776_v2, 16  ;;  %v407_v18 = vor.u32 %v405_v57, %v403_v6  ;;  %v300_v21 = vrot.slane %v298_v62, 1  ;;  %v874_v22 = vshrl.u32 %v1776_v2, 16  ;;  %731 = vmatprep.subr.bf16.mxu1 %v1634_v1 }
  0x1e   : > { %v909_v24 = vshrl.u32 %v1779_v3, 16  ;;  %v913_v25 = vshll.u32 %v1785_v13, 16  ;;  %v404_v30 = vsel %vm233_vm0, %v296_v5, %v403_v6  ;;  %v1801_v31 = vrot.slane %v905_v14, 1  ;;  %562 = vmatpush1.bf16.msra.mxu0 %v1594_v53 }
  0x1f   : > { %312 = vrot.lane.b32.xlu1 %v285_v4, %s1635_s30  ;;  %v878_v23 = vrot.slane %v876_v7, 1  ;;  %v883_v34 = vrot.slane %v881_v11, 1  ;;  %v885_v37 = vshrl.u32 %v1765_v59, 16  ;;  %v889_v38 = vshll.u32 %v1795_v26, 16  ;;  %563 = vmatprep.subr.bf16.mxu0 %v1634_v1  ;;  %v1597_v7 = vld [vmem:[%s2168_s1 + $0x10] sm:$0xff]  }
  0x20   : > { %v915_v36 = vrot.slane %v913_v25, 1  ;;  %v917_v39 = vshrl.u32 %v1785_v13, 16  ;;  %v412_v40 = vsel %vm233_vm0, %v407_v18, %v411_v20  ;;  %v301_v41 = vsel %vm233_vm0, %v296_v5, %v300_v21  ;;  %732 = vmatpush1.bf16.msra.mxu1 %v1595_v60  ;;  %v1851_v11 = vld [vmem:[%s1689_s27 + $0x50] ss:$0 sps:$4 sm:$0x11]   ;;  %v1609_v60 = vld [vmem:[%s2168_s1 + $0xa0] sm:$0xff]  }
  0x21   : > { %310 = vrot.lane.b32.xlu0 %v277_v0, %s1635_s30  ;;  %v879_v42 = vor.u32 %v878_v23, %v874_v22  ;;  %v921_v43 = vshll.u32 %v1798_v28, 16  ;;  %v911_v45 = vor.u32 %v909_v24, %v1801_v31  ;;  %v893_v47 = vshrl.u32 %v1795_v26, 16  ;;  %733 = vmatprep.subr.bf16.mxu1 %v1634_v1  ;;  %v1599_v23 = vld [vmem:[%s2168_s1 + $0x68] sm:$0xff]  }
  0x22   : > { %v897_v48 = vshll.u32 %v1804_v32, 16  ;;  %v925_v50 = vshrl.u32 %v1798_v28, 16  ;;  %v891_v52 = vrot.slane %v889_v38, 1  ;;  %v887_v56 = vor.u32 %v885_v37, %v883_v34  ;;  %564 = vmatpush1.bf16.msra.mxu0 %v1596_v61  ;;  %v1600_v24 = vld [vmem:[%s2168_s1 + $0x8] sm:$0xff]   ;;  %v1611_v61 = vld [vmem:[%s2168_s1 + $0x40] sm:$0xff]  }
  0x23   : > { %413 = vrot.lane.b32.xlu1 %v404_v30, %s1635_s30  ;;  %v884_v54 = vsel %vm233_vm0, %v879_v42, %v883_v34  ;;  %v923_v57 = vrot.slane %v921_v43, 1  ;;  %v929_v58 = vshll.u32 %v1825_v49, 16  ;;  %v916_v62 = vsel %vm233_vm0, %v911_v45, %v915_v36  ;;  %565 = vmatprep.subr.bf16.mxu0 %v1634_v1  ;;  %v1603_v43 = vld [vmem:[%s2168_s1 + $0xb8] sm:$0xff]  }
  0x24   : > { %v919_v0 = vor.u32 %v917_v39, %v915_v36  ;;  %v899_v4 = vrot.slane %v897_v48, 1  ;;  %v901_v6 = vshrl.u32 %v1804_v32, 16  ;;  %v933_v14 = vshrl.u32 %v1825_v49, 16  ;;  %734 = vmatpush1.bf16.msra.mxu1 %v1597_v7  ;;  %v1601_v39 = vld [vmem:[%s2168_s1 + $0x60] sm:$0xff]   ;;  %v1604_v45 = vld [vmem:[%s2168_s1 + $0x58] sm:$0xff]  }
  0x25   : > { %314 = vrot.lane.b32.xlu0 %v293_v15, %s1635_s30  ;;  %v931_v5 = vrot.slane %v929_v58, 1  ;;  %v892_v15 = vsel %vm233_vm0, %v887_v56, %v891_v52  ;;  %v895_v18 = vor.u32 %v893_v47, %v891_v52  ;;  %v927_v21 = vor.u32 %v925_v50, %v923_v57  ;;  %735 = vmatprep.subr.bf16.mxu1 %v1634_v1  ;;  %v391_v47 = vld [vmem:[%s1689_s27 + $0x8] sm:$0xe]  ;;  %v189_v48 = vld [vmem:[%s1689_s27] sm:$0xe]  ;;  %v1605_v50 = vld [vmem:[%s2168_s1 + $0xb0] sm:$0xff]  }
  0x26   : > { %v924_v20 = vsel %vm233_vm0, %v919_v0, %v923_v57  ;;  %v937_v22 = vshll.u32 %v1851_v11, 16  ;;  %v903_v30 = vor.u32 %v901_v6, %v899_v4  ;;  %v1870_v34 = vrot.slane %v1703_v10, 1  ;;  %566 = vmatpush1.bf16.msra.mxu0 %v1599_v23  ;;  %v1608_v58 = vld [vmem:[%s2168_s1 + $0x48] sm:$0xff]  }
  0x27   : > { %316 = vrot.lane.b32.xlu1 %v301_v41, %s1635_s30  ;;  %v900_v25 = vsel %vm233_vm0, %v895_v18, %v899_v4  ;;  %v323_v35 = vrot.slane %v1700_v9, 1  ;;  %v932_v36 = vsel %vm233_vm0, %v927_v21, %v931_v5  ;;  %v935_v37 = vor.u32 %v933_v14, %v931_v5  ;;  %567 = vmatprep.subr.bf16.mxu0 %v1634_v1  ;;  %v1612_v5 = vld [vmem:[%s2168_s1 + $0xf8] sm:$0xff]   ;;  %v1615_v23 = vld [vmem:[%s2168_s1 + $0xe8] sm:$0xff]  }
  0x28   : > { %v939_v38 = vrot.slane %v937_v22, 1  ;;  %736 = vmatpush1.bf16.msra.mxu1 %v1600_v24  ;;  %v908_v42 = vsel %vm233_vm0, %v903_v30, %v1801_v31  ;;  %v1409_v31 = vcombine.low %v391_v47, %v1696_v8  ;;  %v1406_v53 = vcombine.low %v189_v48, %v1707_v12  ;;  %v1607_v12 = vld [vmem:[%s2168_s1 + $0xa8] sm:$0xff]  }
  0x29   : > { %415 = vrot.lane.b32.xlu0 %v412_v40, %s1635_s30  ;;  %v1602_v40 = vld [vmem:[%s2168_s1] sm:$0xff]   ;;  %v1883_v41 = vsel %vm321_vm1, %v323_v35, %v1870_v34  ;;  %737 = vmatprep.subr.bf16.mxu1 %v1634_v1  ;;  %v327_v4 = vrot.slane %v1717_v17, 1  ;;  %v329_v22 = vrot.slane %v1721_v19, 1 }
  0x2a   : > { %v940_v44 = vsel %vm233_vm0, %v935_v37, %v939_v38  ;;  %568 = vmatpush1.bf16.msra.mxu0 %v1601_v39  ;;  %v420_v52 = vrot.slane %v1409_v31, 1  ;;  %v322_v56 = vrot.slane %v1406_v53, 1  ;;  %v333_v37 = vrot.slane %v1734_v29, 1  ;;  %v1622_v31 = vld [vmem:[%s2168_s1 + $0x110] sm:$0xff]  }
  0x2b   : > { %949 = vrot.lane.b32.xlu1 %v916_v62, %s1635_s30  ;;  %577 = vmatprep.subr.bf16.mxu0 %v1634_v1  ;;  %v1935_v62 = vld [vmem:[%s1689_s27 + $0x10] sm:$0xe]  ;;  %v328_v7 = vsel %vm321_vm1, %v1870_v34, %v327_v4 }
  0x2c   : > { %738 = vmatpush1.bf16.msra.mxu1 %v1602_v40  ;;  %v421_v8 = vsel %vm321_vm1, %v420_v52, %v1870_v34  ;;  %v324_v57 = vsel %vm321_vm1, %v322_v56, %v323_v35  ;;  %v1483_v0 = vcombine.low %v1935_v62, %v1771_v63  ;;  %v1617_v35 = vld [vmem:[%s2168_s1 + $0xd8] sm:$0xff]   ;;  %v1619_v40 = vld [vmem:[%s2168_s1 + $0xc8] sm:$0xff]  }
  0x2d   : > { %941 = vrot.lane.b32.xlu0 %v884_v54, %s1635_s30  ;;  %747 = vmatprep.subr.bf16.mxu1 %v1634_v1  ;;  %v1606_v54 = vld [vmem:[%s2168_s1 + $0x50] sm:$0xff]   ;;  %v1623_v52 = vld [vmem:[%s2168_s1 + $0x108] sm:$0xff]  }
  0x2e   : > { %578 = vmatpush2.bf16.msra.mxu0 %v1603_v43  ;;  %1446 = vmatprep.mubr.msk.bf16.mxu0 %vm339_vm2, %v421_v8 }
  0x2f   : > { %951 = vrot.lane.b32.xlu1 %v924_v20, %s1635_s30  ;;  %579 = vmatprep.subr.bf16.mxu0 %v1634_v1 }
  0x30   : > { %748 = vmatpush2.bf16.msra.mxu1 %v1604_v45  ;;  %1466 = vmatprep.mubr.msk.bf16.mxu1 %vm339_vm2, %v324_v57  ;;  %v1621_v45 = vld [vmem:[%s2168_s1 + $0x118] sm:$0xff]  }
  0x31   : > { %943 = vrot.lane.b32.xlu0 %v892_v15, %s1635_s30  ;;  %749 = vmatprep.subr.bf16.mxu1 %v1634_v1  ;;  %v1614_v15 = vld [vmem:[%s2168_s1 + $0xf0] sm:$0xff]  }
  0x32   : > { %580 = vmatpush2.bf16.msra.mxu0 %v1605_v50 }
  0x33   : > { %953 = vrot.lane.b32.xlu1 %v932_v36, %s1635_s30  ;;  %581 = vmatprep.subr.bf16.mxu0 %v1634_v1 }
  0x34   : > { %750 = vmatpush2.bf16.msra.mxu1 %v1606_v54  ;;  %v1624_v54 = vld [vmem:[%s2168_s1 + $0x100] sm:$0xff]  }
  0x35   : > { %945 = vrot.lane.b32.xlu0 %v900_v25, %s1635_s30  ;;  %751 = vmatprep.subr.bf16.mxu1 %v1634_v1  ;;  %v331_v25 = vrot.slane %v1730_v27, 1 }
  0x36   : > { %582 = vmatpush2.bf16.msra.mxu0 %v1607_v12 }
  0x37   : > { %955 = vrot.lane.b32.xlu1 %v940_v44, %s1635_s30  ;;  %583 = vmatprep.subr.bf16.mxu0 %v1634_v1  ;;  %v332_v34 = vsel %vm321_vm1, %v329_v22, %v331_v25  ;;  %v334_v39 = vsel %vm321_vm1, %v331_v25, %v333_v37 }
  0x38   : > { %752 = vmatpush2.bf16.msra.mxu1 %v1608_v58  ;;  %v960_v58 = vrot.slane %v1483_v0, 1 }
  0x39   : > { %947 = vrot.lane.b32.xlu0 %v908_v42, %s1635_s30  ;;  %753 = vmatprep.subr.bf16.mxu1 %v1634_v1  ;;  %v1620_v42 = vld [vmem:[%s2168_s1 + $0xc0] sm:$0xff]  }
  0x3a   : > { %584 = vmatpush2.bf16.msra.mxu0 %v1609_v60  ;;  %v961_v60 = vrot.slane %v1765_v59, 1 }
  0x3b   : > { %1122 = vmatprep.subr.bf16.mxu0 %v1634_v1 }
  0x3c   : > { %754 = vmatpush2.bf16.msra.mxu1 %v1611_v61  ;;  %v962_v61 = vsel %vm321_vm1, %v960_v58, %v961_v60 }
  0x3d   : > { %1532 = vmatprep.subr.bf16.mxu1 %v1634_v1 }
  0x89   : > { %v307_v20 = vpop.permute.xlu1 %306 }
  0x8b   : > { %v305_v6 = vpop.permute.xlu0 %304 }
  0x8c   : > { %v344_v14 = vsel %vm339_vm2, %v1700_v9, %v305_v6  ;;  %v347_v9 = vsel %vm339_vm2, %v1703_v10, %v307_v20  ;;  %v1616_v10 = vld [vmem:[%s2168_s1 + $0xe0] sm:$0xff]  }
  0x8d   : > { %586 = vmatmul.mubr.bf16.vlgmr.msra.gmra.mxu0 %v344_v14  ;;  %v309_v24 = vpop.permute.xlu1 %308 }
  0x8e   : > { %1123 = vmatpush1.bf16.msra.mxu0 %v1612_v5  ;;  %1447 = vmatprep.mubr.msk.bf16.mxu0 %vm339_vm2, %v328_v7  ;;  %v350_v30 = vsel %vm339_vm2, %v1717_v17, %v309_v24  ;;  %v1618_v17 = vld [vmem:[%s2168_s1 + $0xd0] sm:$0xff]  }
  0x8f   : > { %v303_v18 = vpop.permute.xlu0 %302  ;;  %1124 = vmatprep.subr.bf16.mxu0 %v1634_v1 }
  0x90   : > { %v341_v21 = vsel %vm339_vm2, %v1714_v16, %v303_v18  ;;  %v330_v16 = vsel %vm321_vm1, %v327_v4, %v329_v22  ;;  %v967_v4 = vrot.slane %v1779_v3, 1 }
  0x91   : > { %756 = vmatmul.mubr.bf16.vlgmr.msra.gmra.mxu1 %v341_v21  ;;  %v965_v21 = vrot.slane %v1804_v32, 1 }
  0x92   : > { %1544 = vmatpush1.bf16.msra.mxu1 %v1612_v5  ;;  %1125 = vmatpush1.bf16.msra.mxu0 %v1614_v15  ;;  %v969_v5 = vrot.slane %v1785_v13, 1 }
  0x93   : > { %1533 = vmatprep.subr.bf16.mxu1 %v1634_v1  ;;  %1467 = vmatprep.mubr.msk.bf16.mxu1 %vm339_vm2, %v1883_v41  ;;  %v311_v36 = vpop.permute.xlu0 %310  ;;  %v313_v41 = vpop.permute.xlu1 %312  ;;  %v968_v25 = vsel %vm321_vm1, %v965_v21, %v967_v4 }
  0x94   : > { %1126 = vmatprep.subr.bf16.mxu0 %v1634_v1  ;;  %v353_v38 = vsel %vm339_vm2, %v1721_v19, %v311_v36  ;;  %v335_v19 = vrot.slane %v1738_v33, 1  ;;  %v356_v43 = vsel %vm339_vm2, %v1730_v27, %v313_v41  ;;  %v422_v27 = vrot.slane %v1748_v46, 1 }
  0x95   : > { %593 = vmatmul.mubr.bf16.gmra.mxu0 %v347_v9  ;;  %v970_v0 = vsel %vm321_vm1, %v967_v4, %v969_v5 }
  0x96   : > { %1545 = vmatpush1.bf16.msra.mxu1 %v1614_v15  ;;  %1127 = vmatpush1.bf16.msra.mxu0 %v1615_v23  ;;  %v336_v44 = vsel %vm321_vm1, %v333_v37, %v335_v19  ;;  %v423_v50 = vsel %vm321_vm1, %v335_v19, %v422_v27  ;;  %v971_v15 = vrot.slane %v1798_v28, 1 }
  0x97   : > { %1534 = vmatprep.subr.bf16.mxu1 %v1634_v1  ;;  %1448 = vmatprep.mubr.msk.bf16.mxu0 %vm339_vm2, %v330_v16  ;;  %v315_v47 = vpop.permute.xlu0 %314  ;;  %v414_v53 = vpop.permute.xlu1 %413 }
  0x98   : > { %1128 = vmatprep.subr.bf16.mxu0 %v1634_v1  ;;  %v359_v48 = vsel %vm339_vm2, %v1734_v29, %v315_v47  ;;  %v424_v29 = vrot.slane %v1755_v51, 1  ;;  %v427_v8 = vsel %vm339_vm2, %v1738_v33, %v414_v53  ;;  %v337_v51 = vrot.slane %v1760_v55, 1 }
  0x99   : > { %763 = vmatmul.mubr.bf16.gmra.mxu1 %v344_v14  ;;  %v972_v20 = vsel %vm321_vm1, %v969_v5, %v971_v15 }
  0x9a   : > { %1546 = vmatpush1.bf16.msra.mxu1 %v1615_v23  ;;  %1129 = vmatpush1.bf16.msra.mxu0 %v1616_v10  ;;  %v425_v56 = vsel %vm321_vm1, %v422_v27, %v424_v29  ;;  %v338_v57 = vsel %vm321_vm1, %v335_v19, %v337_v51  ;;  %v973_v23 = vrot.slane %v1825_v49, 1 }
  0x9b   : > { %1468 = vmatprep.mubr.msk.bf16.mxu1 %vm339_vm2, %v328_v7  ;;  %1535 = vmatprep.subr.bf16.mxu1 %v1634_v1  ;;  %v416_v12 = vpop.permute.xlu0 %415 }
  0x9c   : > { %1130 = vmatprep.subr.bf16.mxu0 %v1634_v1  ;;  %v430_v55 = vsel %vm339_vm2, %v1748_v46, %v416_v12  ;;  %v963_v46 = vrot.slane %v1795_v26, 1 }
  0x9d   : > { %600 = vmatmul.mubr.bf16.gmra.mxu0 %v350_v30 }
  0x9e   : > { %1547 = vmatpush1.bf16.msra.mxu1 %v1616_v10  ;;  %1449 = vmatprep.mubr.msk.bf16.mxu0 %vm339_vm2, %v332_v34  ;;  %v964_v14 = vsel %vm321_vm1, %v961_v60, %v963_v46  ;;  %v974_v10 = vsel %vm321_vm1, %v971_v15, %v973_v23 }
  0x9f   : > { %1131 = vmatpush1.bf16.msra.mxu0 %v1617_v35  ;;  %1536 = vmatprep.subr.bf16.mxu1 %v1634_v1  ;;  %v942_v62 = vpop.permute.xlu0 %941 }
  0xa0   : > { %1132 = vmatprep.subr.bf16.mxu0 %v1634_v1  ;;  %v978_v6 = vsel %vm339_vm2, %v1776_v2, %v942_v62 }
  0xa1   : > { %770 = vmatmul.mubr.bf16.gmra.mxu1 %v347_v9  ;;  %v966_v9 = vsel %vm321_vm1, %v963_v46, %v965_v21 }
  0xa2   : > { %1548 = vmatpush1.bf16.msra.mxu1 %v1617_v35  ;;  %1469 = vmatprep.mubr.msk.bf16.mxu1 %vm339_vm2, %v330_v16 }
  0xa3   : > { %1133 = vmatpush1.bf16.msra.mxu0 %v1618_v17  ;;  %1537 = vmatprep.subr.bf16.mxu1 %v1634_v1  ;;  %v944_v18 = vpop.permute.xlu0 %943 }
  0xa4   : > { %1134 = vmatprep.subr.bf16.mxu0 %v1634_v1  ;;  %v981_v2 = vsel %vm339_vm2, %v1765_v59, %v944_v18 }
  0xa5   : > { %607 = vmatmul.mubr.bf16.gmra.mxu0 %v353_v38 }
  0xa6   : > { %1450 = vmatprep.mubr.msk.bf16.mxu0 %vm339_vm2, %v334_v39  ;;  %1549 = vmatpush1.bf16.msra.mxu1 %v1618_v17 }
  0xa7   : > { %1135 = vmatpush1.bf16.msra.mxu0 %v1619_v40  ;;  %1538 = vmatprep.subr.bf16.mxu1 %v1634_v1  ;;  %v946_v16 = vpop.permute.xlu0 %945 }
  0xa8   : > { %1136 = vmatprep.subr.bf16.mxu0 %v1634_v1  ;;  %v984_v59 = vsel %vm339_vm2, %v1795_v26, %v946_v16 }
  0xa9   : > { %777 = vmatmul.mubr.bf16.gmra.mxu1 %v350_v30  ;;  %v975_v30 = vrot.slane %v1851_v11, 1 }
  0xaa   : > { %1470 = vmatprep.mubr.msk.bf16.mxu1 %vm339_vm2, %v332_v34  ;;  %1550 = vmatpush1.bf16.msra.mxu1 %v1619_v40 }
  0xab   : > { %1137 = vmatpush1.bf16.msra.mxu0 %v1620_v42  ;;  %1539 = vmatprep.subr.bf16.mxu1 %v1634_v1  ;;  %v948_v34 = vpop.permute.xlu0 %947  ;;  %v976_v35 = vsel %vm321_vm1, %v973_v23, %v975_v30 }
  0xac   : > { %1146 = vmatprep.subr.bf16.mxu0 %v1634_v1  ;;  %v987_v26 = vsel %vm339_vm2, %v1804_v32, %v948_v34 }
  0xad   : > { %614 = vmatmul.mubr.bf16.gmra.mxu0 %v356_v43 }
  0xae   : > { %1451 = vmatprep.mubr.msk.bf16.mxu0 %vm339_vm2, %v336_v44  ;;  %1551 = vmatpush1.bf16.msra.mxu1 %v1620_v42 }
  0xaf   : > { %1147 = vmatpush2.bf16.msra.mxu0 %v1621_v45  ;;  %1540 = vmatprep.subr.bf16.mxu1 %v1634_v1 }
  0xb0   : > { %1148 = vmatprep.subr.bf16.mxu0 %v1634_v1 }
  0xb1   : > { %784 = vmatmul.mubr.bf16.gmra.mxu1 %v353_v38 }
  0xb2   : > { %1471 = vmatprep.mubr.msk.bf16.mxu1 %vm339_vm2, %v334_v39  ;;  %1552 = vmatpush2.bf16.msra.mxu1 %v1621_v45 }
  0xb3   : > { %1149 = vmatpush2.bf16.msra.mxu0 %v1622_v31  ;;  %1541 = vmatprep.subr.bf16.mxu1 %v1634_v1 }
  0xb4   : > { %1150 = vmatprep.subr.bf16.mxu0 %v1634_v1 }
  0xb5   : > { %621 = vmatmul.mubr.bf16.gmra.mxu0 %v359_v48 }
  0xb6   : > { %1452 = vmatprep.mubr.msk.bf16.mxu0 %vm339_vm2, %v423_v50  ;;  %1553 = vmatpush2.bf16.msra.mxu1 %v1622_v31 }
  0xb7   : > { %1151 = vmatpush2.bf16.msra.mxu0 %v1623_v52  ;;  %1542 = vmatprep.subr.bf16.mxu1 %v1634_v1 }
  0xb8   : > { %1152 = vmatprep.subr.bf16.mxu0 %v1634_v1 }
  0xb9   : > { %791 = vmatmul.mubr.bf16.gmra.mxu1 %v356_v43 }
  0xba   : > { %1472 = vmatprep.mubr.msk.bf16.mxu1 %vm339_vm2, %v336_v44  ;;  %1554 = vmatpush2.bf16.msra.mxu1 %v1623_v52 }
  0xbb   : > { %1153 = vmatpush2.bf16.msra.mxu0 %v1624_v54  ;;  %1543 = vmatprep.subr.bf16.mxu1 %v1634_v1  ;;  %v317_v1 = vpop.permute.xlu1 %316 }
  0xbc   : > { %v362_v63 = vsel %vm339_vm2, %v1738_v33, %v317_v1 }
  0xbd   : > { %628 = vmatmul.mubr.bf16.gmra.mxu0 %v427_v8 }
  0xbe   : > { %1453 = vmatprep.mubr.msk.bf16.mxu0 %vm339_vm2, %v425_v56  ;;  %1555 = vmatpush2.bf16.msra.mxu1 %v1624_v54 }
  0xbf   : > { %v950_v7 = vpop.permute.xlu1 %949 }
  0xc0   : > { %v990_v33 = vsel %vm339_vm2, %v1779_v3, %v950_v7 }
  0xc1   : > { %798 = vmatmul.mubr.bf16.gmra.mxu1 %v359_v48 }
  0xc2   : > { %1473 = vmatprep.mubr.msk.bf16.mxu1 %vm339_vm2, %v338_v57 }
  0xc3   : > { %v952_v22 = vpop.permute.xlu1 %951 }
  0xc4   : > { %v993_v3 = vsel %vm339_vm2, %v1785_v13, %v952_v22 }
  0xc5   : > { %635 = vmatmul.mubr.bf16.gmra.mxu0 %v430_v55 }
  0xc6   : > { %1520 = vmatprep.mubr.msk.bf16.mxu0 %vm339_vm2, %v962_v61 }
  0xc7   : > { %v954_v24 = vpop.permute.xlu1 %953 }
  0xc8   : > { %v996_v13 = vsel %vm339_vm2, %v1798_v28, %v954_v24 }
  0xc9   : > { %805 = vmatmul.mubr.bf16.gmra.mxu1 %v362_v63 }
  0xca   : > { %1524 = vmatprep.mubr.msk.bf16.mxu1 %vm339_vm2, %v970_v0 }
  0xcb   : > { %v956_v36 = vpop.permute.xlu1 %955 }
  0xcc   : > { %v999_v11 = vsel %vm339_vm2, %v1825_v49, %v956_v36 }
  0xcd   : > { %1155 = vmatmul.mubr.bf16.vlgmr.msra.gmra.mxu0 %v978_v6 }
  0xce   : > { %1521 = vmatprep.mubr.msk.bf16.mxu0 %vm339_vm2, %v964_v14 }
  0xd1   : > { %1183 = vmatmul.mubr.bf16.vlgmr.msra.gmra.mxu1 %v990_v33 }
  0xd2   : > { %1525 = vmatprep.mubr.msk.bf16.mxu1 %vm339_vm2, %v972_v20 }
  0xd5   : > { %1162 = vmatmul.mubr.bf16.gmra.mxu0 %v981_v2 }
  0xd6   : > { %1522 = vmatprep.mubr.msk.bf16.mxu0 %vm339_vm2, %v966_v9 }
  0xd9   : > { %1190 = vmatmul.mubr.bf16.gmra.mxu1 %v993_v3 }
  0xda   : > { %1526 = vmatprep.mubr.msk.bf16.mxu1 %vm339_vm2, %v974_v10 }
  0xdd   : > { %1169 = vmatmul.mubr.bf16.gmra.mxu0 %v984_v59 }
  0xde   : > { %1523 = vmatprep.mubr.msk.bf16.mxu0 %vm339_vm2, %v968_v25 }
  0xe1   : > { %1197 = vmatmul.mubr.bf16.gmra.mxu1 %v996_v13 }
  0xe2   : > { %1527 = vmatprep.mubr.msk.bf16.mxu1 %vm339_vm2, %v976_v35 }
  0xe5   : > { %1176 = vmatmul.mubr.bf16.gmra.mxu0 %v987_v26 }
  0xe9   : > { %1204 = vmatmul.mubr.bf16.gmra.mxu1 %v999_v11 }
 0x14d   : > { %v587_v17 = vpop.f32.mrf.mxu0 }
 0x14f   : > { %v589_v37 = vpop.f32.mrf.mxu0 }
 0x151   : > { %v590_v28 = vpop.f32.mrf.mxu0  ;;  %v757_v38 = vpop.f32.mrf.mxu1 }
 0x152   : > { %v758_v39 = vadd.f32 %v757_v38, %v587_v17  ;;  %v2115_v38 = vld [vmem:[%s2169_s2] ss:$0 sm:$0xff] }
 0x153   : > { %v591_v40 = vpop.f32.mrf.mxu0  ;;  %v759_v41 = vpop.f32.mrf.mxu1 }
 0x155   : > { %v2094_v19 = vpop.f32.mrf.mxu0  ;;  %v760_v42 = vpop.f32.mrf.mxu1 }
 0x157   : > { %v596_v43 = vpop.f32.mrf.mxu0  ;;  %v761_v32 = vpop.f32.mrf.mxu1 }
 0x159   : > { %v597_v44 = vpop.f32.mrf.mxu0  ;;  %v2096_v45 = vpop.f32.mrf.mxu1 }
 0x15b   : > { %v598_v47 = vpop.f32.mrf.mxu0  ;;  %v766_v27 = vpop.f32.mrf.mxu1 }
 0x15c   : > { %v765_v27 = vadd.f32 %v2096_v45, %v2094_v19 }
 0x15d   : > { %v601_v31 = vpop.f32.mrf.mxu0  ;;  %v767_v49 = vpop.f32.mrf.mxu1 }
 0x15f   : > { %v603_v48 = vpop.f32.mrf.mxu0  ;;  %v768_v50 = vpop.f32.mrf.mxu1 }
 0x161   : > { %v604_v52 = vpop.f32.mrf.mxu0  ;;  %v771_v53 = vpop.f32.mrf.mxu1 }
 0x162   : > { %v2098_v29 = vadd.f32 %v771_v53, %v601_v31 }
 0x163   : > { %v605_v54 = vpop.f32.mrf.mxu0  ;;  %v773_v8 = vpop.f32.mrf.mxu1 }
 0x165   : > { %v2100_v56 = vpop.f32.mrf.mxu0  ;;  %v774_v51 = vpop.f32.mrf.mxu1 }
 0x167   : > { %v610_v12 = vpop.f32.mrf.mxu0  ;;  %v775_v57 = vpop.f32.mrf.mxu1 }
 0x169   : > { %v611_v58 = vpop.f32.mrf.mxu0  ;;  %v2102_v60 = vpop.f32.mrf.mxu1 }
 0x16b   : > { %v612_v55 = vpop.f32.mrf.mxu0  ;;  %v780_v1 = vpop.f32.mrf.mxu1 }
 0x16d   : > { %v2104_v61 = vpop.f32.mrf.mxu0  ;;  %v781_v4 = vpop.f32.mrf.mxu1 }
 0x16f   : > { %v617_v5 = vpop.f32.mrf.mxu0  ;;  %v782_v63 = vpop.f32.mrf.mxu1 }
 0x171   : > { %v618_v62 = vpop.f32.mrf.mxu0  ;;  %v785_v0 = vpop.f32.mrf.mxu1 }
 0x173   : > { %v619_v46 = vpop.f32.mrf.mxu0  ;;  %v787_v6 = vpop.f32.mrf.mxu1 }
 0x174   : > { %v786_v46 = vadd.f32 %v785_v0, %v2104_v61  ;;  %v779_v61 = vadd.f32 %v2102_v60, %v2100_v56 }
 0x175   : > { %v2106_v7 = vpop.f32.mrf.mxu0  ;;  %v788_v14 = vpop.f32.mrf.mxu1 }
 0x177   : > { %v624_v15 = vpop.f32.mrf.mxu0  ;;  %v789_v33 = vpop.f32.mrf.mxu1 }
 0x179   : > { %v625_v18 = vpop.f32.mrf.mxu0  ;;  %v792_v20 = vpop.f32.mrf.mxu1 }
 0x17b   : > { %v626_v21 = vpop.f32.mrf.mxu0  ;;  %v794_v2 = vpop.f32.mrf.mxu1 }
 0x17c   : > { %v793_v21 = vadd.f32 %v792_v20, %v2106_v7 }
 0x17d   : > { %v629_v22 = vpop.f32.mrf.mxu0  ;;  %v795_v9 = vpop.f32.mrf.mxu1 }
 0x17f   : > { %v631_v23 = vpop.f32.mrf.mxu0  ;;  %v796_v3 = vpop.f32.mrf.mxu1 }
 0x181   : > { %v632_v16 = vpop.f32.mrf.mxu0  ;;  %v799_v10 = vpop.f32.mrf.mxu1 }
 0x182   : > { %v800_v14 = vadd.f32 %v799_v10, %v629_v22 }
 0x183   : > { %v633_v59 = vpop.f32.mrf.mxu0  ;;  %v801_v24 = vpop.f32.mrf.mxu1 }
 0x185   : > { %v2108_v25 = vpop.f32.mrf.mxu0  ;;  %v802_v30 = vpop.f32.mrf.mxu1 }
 0x187   : > { %v638_v13 = vpop.f32.mrf.mxu0  ;;  %v803_v34 = vpop.f32.mrf.mxu1 }
 0x189   : > { %v639_v35 = vpop.f32.mrf.mxu0  ;;  %v2110_v26 = vpop.f32.mrf.mxu1 }
 0x18b   : > { %v640_v36 = vpop.f32.mrf.mxu0  ;;  %v808_v11 = vpop.f32.mrf.mxu1 }
 0x18c   : > { %v807_v11 = vadd.f32 %v2110_v26, %v2108_v25 }
 0x18d   : > { %v809_v17 = vpop.f32.mrf.mxu1  ;;  %v1156_v37 = vpop.f32.mrf.mxu0 }
 0x18e   : > { %v1211_v28 = vadd.f32 %v1156_v37, %v758_v39 }
 0x18f   : > { %v810_v40 = vpop.f32.mrf.mxu1  ;;  %v1158_v41 = vpop.f32.mrf.mxu0 }
 0x190   : > { %v1226_v32 = vadd.f32 %v2115_v38, %v1211_v28 }
 0x191   : > { %v1159_v42 = vpop.f32.mrf.mxu0  ;;  %v1184_v43 = vpop.f32.mrf.mxu1 }
 0x192   : > { %v1234_v48 = vmax.f32 %v1226_v32, 0.0  ;;  %v1215_v2 = vadd.f32 %v1184_v43, %v786_v46 }
 0x193   : > { %v1160_v44 = vpop.f32.mrf.mxu0  ;;  %v1186_v47 = vpop.f32.mrf.mxu1 }
 0x194   : > { %v1242_v51 = vmax.f32 %v1234_v48, 0.0  ;;  %v1230_v7 = vadd.f32 %v2115_v38, %v1215_v2 }
 0x195   : > { %v1163_v31 = vpop.f32.mrf.mxu0  ;;  %v1187_v49 = vpop.f32.mrf.mxu1 }
 0x196   : > { %v1212_v39 = vadd.f32 %v1163_v31, %v765_v27  ;;  %v1238_v43 = vmax.f32 %v1230_v7, 0.0 }
 0x197   : > { %v1165_v50 = vpop.f32.mrf.mxu0  ;;  %v1188_v52 = vpop.f32.mrf.mxu1 }
 0x198   : > { %v1227_v53 = vadd.f32 %v2115_v38, %v1212_v39 }
 0x199   : > { %v1166_v54 = vpop.f32.mrf.mxu0  ;;  %v1191_v8 = vpop.f32.mrf.mxu1 }
 0x19a   : > { %v1235_v12 = vmax.f32 %v1227_v53, 0.0  ;;  %v1216_v0 = vadd.f32 %v1191_v8, %v793_v21 }
 0x19b   : > { %v1167_v57 = vpop.f32.mrf.mxu0  ;;  %v1193_v58 = vpop.f32.mrf.mxu1 }
 0x19c   : > { %v1243_v55 = vmax.f32 %v1242_v51, %v1235_v12  ;;  %v1231_v37 = vadd.f32 %v2115_v38, %v1216_v0 }
 0x19d   : > { %v1170_v1 = vpop.f32.mrf.mxu0  ;;  %v1194_v4 = vpop.f32.mrf.mxu1 }
 0x19e   : > { %v1254_v5 = vrot.slane %v1243_v55, 7  ;;  %v1267_v19 = vrot.slane %v1243_v55, 1  ;;  %v1213_v45 = vadd.f32 %v1170_v1, %v2098_v29  ;;  %v1239_v48 = vmax.f32 %v1231_v37, 0.0 }
 0x19f   : > { %v1172_v63 = vpop.f32.mrf.mxu0  ;;  %v1195_v62 = vpop.f32.mrf.mxu1 }
 0x1a0   : > { %v1263_v6 = vsel %vm1262_vm3, 0.0, %v1254_v5  ;;  %v1276_v9 = vsel %vm321_vm1, %v1267_v19, 0.0  ;;  %v1228_v23 = vadd.f32 %v2115_v38, %v1213_v45 }
 0x1a1   : > { %v1280_v15 = vmax.f32 %v1243_v55, %v1263_v6  ;;  %v1173_v33 = vpop.f32.mrf.mxu0  ;;  %v1198_v18 = vpop.f32.mrf.mxu1 }
 0x1a2   : > { %v1217_v29 = vadd.f32 %v1198_v18, %v800_v14  ;;  %v1236_v20 = vmax.f32 %v1228_v23, 0.0 }
 0x1a3   : > { %v1284_v3 = vmax.f32 %v1280_v15, %v1276_v9  ;;  %v1174_v16 = vpop.f32.mrf.mxu0  ;;  %v1200_v59 = vpop.f32.mrf.mxu1 }
 0x1a4   : > { %v1232_v60 = vadd.f32 %v2115_v38, %v1217_v29  ;;  %v1244_v32 = vmax.f32 %v1235_v12, %v1236_v20 }
 0x1a5   : > { %v1292_v22 = vrot.slane %v1284_v3, 1  ;;  %v1300_v10 = vrot.slane %v1284_v3, 2  ;;  %v1177_v24 = vpop.f32.mrf.mxu0  ;;  %v1201_v30 = vpop.f32.mrf.mxu1  ;;  %v1308_v34 = vrot.slane %v1284_v3, 3 }
 0x1a6   : > { %v1214_v13 = vadd.f32 %v1177_v24, %v779_v61  ;;  %v1240_v27 = vmax.f32 %v1232_v60, 0.0 }
 0x1a7   : > { %v1316_v56 = vsel %vm1262_vm3, %v1284_v3, %v1292_v22  ;;  %v1179_v35 = vpop.f32.mrf.mxu0  ;;  %v1202_v36 = vpop.f32.mrf.mxu1 }
 0x1a8   : > { %v1321_v17 = vsel %vm1320_vm4, %v1316_v56, %v1300_v10  ;;  %v1229_v28 = vadd.f32 %v2115_v38, %v1214_v13  ;;  %v1248_v51 = vmax.f32 %v1239_v48, %v1240_v27 }
 0x1a9   : > { %v1326_v40 = vsel %vm1325_vm5, %v1321_v17, %v1308_v34  ;;  %v1180_v41 = vpop.f32.mrf.mxu0  ;;  %v1205_v42 = vpop.f32.mrf.mxu1 }
 0x1aa   : > { %1330 = vst [vmem:[%s2134_s21] sm:$0xf] %v1326_v40  ;;  %v1237_v44 = vmax.f32 %v1229_v28, 0.0  ;;  %v1218_v47 = vadd.f32 %v1205_v42, %v807_v11 }
 0x1ab   : > { %v1181_v31 = vpop.f32.mrf.mxu0  ;;  %v1207_v49 = vpop.f32.mrf.mxu1 }
 0x1ac   : > { %v1245_v25 = vmax.f32 %v1244_v32, %v1237_v44  ;;  %v1246_v26 = vmax.f32 %v1237_v44, %v1238_v43  ;;  %v1233_v39 = vadd.f32 %v2115_v38, %v1218_v47 }
 0x1ad   : > { %v1208_v50 = vpop.f32.mrf.mxu1 }
 0x1ae   : > { %v1247_v52 = vmax.f32 %v1246_v26, %v1239_v48  ;;  %v1255_v53 = vrot.slane %v1245_v25, 7  ;;  %v1268_v54 = vrot.slane %v1245_v25, 1  ;;  %v1241_v8 = vmax.f32 %v1233_v39, 0.0 }
 0x1af   : > { %v1209_v57 = vpop.f32.mrf.mxu1 }
 0x1b0   : > { %v1256_v58 = vrot.slane %v1247_v52, 7  ;;  %v1264_v12 = vsel %vm1262_vm3, 0.0, %v1255_v53  ;;  %v1269_v55 = vrot.slane %v1247_v52, 1  ;;  %v1249_v4 = vmax.f32 %v1248_v51, %v1241_v8 }
 0x1b1   : > { %v1281_v1 = vmax.f32 %v1245_v25, %v1264_v12  ;;  %v1277_v19 = vsel %vm321_vm1, %v1268_v54, 0.0 }
 0x1b2   : > { %v1265_v5 = vsel %vm1262_vm3, 0.0, %v1256_v58  ;;  %v1257_v38 = vrot.slane %v1249_v4, 7  ;;  %v1278_v62 = vsel %vm321_vm1, %v1269_v55, 0.0  ;;  %v1270_v15 = vrot.slane %v1249_v4, 1 }
 0x1b3   : > { %v1282_v45 = vmax.f32 %v1247_v52, %v1265_v5  ;;  %v1285_v63 = vmax.f32 %v1281_v1, %v1277_v19 }
 0x1b4   : > { %v1266_v33 = vsel %vm1262_vm3, 0.0, %v1257_v38  ;;  %v1279_v61 = vsel %vm321_vm1, %v1270_v15, 0.0 }
 0x1b5   : > { %v1286_v46 = vmax.f32 %v1282_v45, %v1278_v62  ;;  %v1293_v6 = vrot.slane %v1285_v63, 1  ;;  %v1301_v14 = vrot.slane %v1285_v63, 2  ;;  %v1309_v2 = vrot.slane %v1285_v63, 3 }
 0x1b6   : > { %v1283_v3 = vmax.f32 %v1249_v4, %v1266_v33 }
 0x1b7   : > { %v1294_v18 = vrot.slane %v1286_v46, 1  ;;  %v1302_v21 = vrot.slane %v1286_v46, 2  ;;  %v1317_v9 = vsel %vm1262_vm3, %v1285_v63, %v1293_v6  ;;  %v1310_v29 = vrot.slane %v1286_v46, 3 }
 0x1b8   : > { %v1322_v23 = vsel %vm1320_vm4, %v1317_v9, %v1301_v14  ;;  %v1287_v22 = vmax.f32 %v1283_v3, %v1279_v61 }
 0x1b9   : > { %v1318_v16 = vsel %vm1262_vm3, %v1286_v46, %v1294_v18  ;;  %v1327_v59 = vsel %vm1325_vm5, %v1322_v23, %v1309_v2 }
 0x1ba   : > { %v1323_v0 = vsel %vm1320_vm4, %v1318_v16, %v1302_v21  ;;  %1331 = vst [vmem:[%s2134_s21 + $0x4] sm:$0xf] %v1327_v59  ;;  %v1295_v24 = vrot.slane %v1287_v22, 1  ;;  %v1303_v30 = vrot.slane %v1287_v22, 2  ;;  %v1311_v7 = vrot.slane %v1287_v22, 3 }
 0x1bb   : > { %v1328_v10 = vsel %vm1325_vm5, %v1323_v0, %v1310_v29 }
 0x1bc   : > { %1332 = vst [vmem:[%s2134_s21 + $0x8] sm:$0xf] %v1328_v10  ;;  %v1319_v20 = vsel %vm1262_vm3, %v1287_v22, %v1295_v24 }
 0x1bd   : > { %v1324_v13 = vsel %vm1320_vm4, %v1319_v20, %v1303_v30 }
 0x1be   : > { %v1329_v34 = vsel %vm1325_vm5, %v1324_v13, %v1311_v7 }
 0x1bf   : > { %1333 = vst [vmem:[%s2134_s21 + $0xc] sm:$0xf] %v1329_v34 }
 0x1c0 PF: > { %s13_s12 = sadd.s32 1, %s1632_s12  }
 0x1c1   : > { %p10_p4 = scmp.ge.s32.totalorder %s13_s12, 4  }
 0x1c3   :  { %12 = sbr.rel (!%p10_p4) target bundleno = 1 (0x1), region = 64 }

// kernel: cornet_z_forward.6
= control target key start
LH: loop header
LB: loop body
LE: loop exit
PB: predicated region body
PF: predicated region fallthrough
CT: control target
= control target key end

     0   :  { %s2222_s12 = smov 0   ;;  %s2809_s0 = inlined_call_operand.vmem [shape: bf16[2,56,128], index: 0, kind: input, shape index: {}]   ;;  %s2810_s1 = inlined_call_operand.vmem [shape: bf16[3,384,256], index: 1, kind: input, shape index: {}]   ;;  %s2811_s2 = inlined_call_operand.vmem [shape: f32[1,256], index: 2, kind: input, shape index: {}]   ;;  %s2812_s3 = inlined_call_operand.vmem [shape: f32[2,2,2,256], index: 3, kind: output, shape index: {}]  }
   0x1 LB: > { %s1688_s13 = sadd.s32 4294967295, %s2199_s12   ;;  %p1692_p0 = scmp.ge.s32.totalorder %s2199_s12, 1  ;;  %s2199_s12 = sphi %s2222_s12, %s13_s12  }
   0x2   : > { %p137_p1 = scmp.lt.s32.totalorder %s2199_s12, 3 }
   0x4   : > { %p138_p2 = pnand %p1692_p0, %p137_p1 }
   0x5   : > { %p161_p3 = scmp.lt.s32.totalorder (!%p138_p2), %s1688_s13, 1 }
   0x6   : > { %141 = sbr.rel (%p138_p2) target bundleno = 403 (0x193), region = 32 }
   0xb   : > { %v1964_v0 = vld [vmem:[%s2810_s1 + $0x1f4] ss:$8 sps:$4 sm:$0xff]   ;;  %v2201_v2 = vmov 0   ;;  %v1968_v3 = vld [vmem:[%s2810_s1 + $0x1f0] ss:$8 sps:$4 sm:$0xff]   ;;  %s2814_s13 = smov (!%p161_p3, %s1688_s13), 1 }
   0xc   : > { %v1966_v1 = vld [vmem:[%s2810_s1 + $0x2f4] ss:$8 sps:$4 sm:$0xff]   ;;  %693 = vmatprep.mubr.bf16.mxu1 %v2201_v2  ;;  %608 = vmatprep.subr.bf16.mxu0 %v1964_v0  ;;  %v1969_v4 = vld [vmem:[%s2810_s1 + $0x2f0] ss:$8 sps:$4 sm:$0xff]   ;;  %v1970_v5 = vld [vmem:[%s2810_s1 + $0x1e4] ss:$8 sps:$4 sm:$0xff]  }
   0xd   : > { %661 = vmatprep.subr.bf16.mxu1 %v1966_v1  ;;  %609 = vmatpush1.bf16.msra.mxu0 %v1968_v3  ;;  %v1972_v6 = vld [vmem:[%s2810_s1 + $0x2e4] ss:$8 sps:$4 sm:$0xff]   ;;  %v1974_v7 = vld [vmem:[%s2810_s1 + $0x1e0] ss:$8 sps:$4 sm:$0xff]   ;;  %v1976_v9 = vld [vmem:[%s2810_s1 + $0x1d4] ss:$8 sps:$4 sm:$0xff]  }
   0xe   : > { %662 = vmatpush1.bf16.msra.mxu1 %v1969_v4  ;;  %610 = vmatprep.subr.bf16.mxu0 %v1970_v5  ;;  %v1975_v8 = vld [vmem:[%s2810_s1 + $0x2e0] ss:$8 sps:$4 sm:$0xff]   ;;  %v1978_v10 = vld [vmem:[%s2810_s1 + $0x2d4] ss:$8 sps:$4 sm:$0xff]   ;;  %v1980_v11 = vld [vmem:[%s2810_s1 + $0x1d0] ss:$8 sps:$4 sm:$0xff]  }
   0xf   : > { %663 = vmatprep.subr.bf16.mxu1 %v1972_v6  ;;  %v1981_v12 = vld [vmem:[%s2810_s1 + $0x2d0] ss:$8 sps:$4 sm:$0xff]   ;;  %v1982_v13 = vld [vmem:[%s2810_s1 + $0x1c4] ss:$8 sps:$4 sm:$0xff]   ;;  %v1986_v15 = vld [vmem:[%s2810_s1 + $0x1c0] ss:$8 sps:$4 sm:$0xff]  }
  0x10   : > { %v1984_v14 = vld [vmem:[%s2810_s1 + $0x2c4] ss:$8 sps:$4 sm:$0xff]   ;;  %v1987_v16 = vld [vmem:[%s2810_s1 + $0x2c0] ss:$8 sps:$4 sm:$0xff]   ;;  %v1988_v17 = vld [vmem:[%s2810_s1 + $0x1b4] ss:$8 sps:$4 sm:$0xff]  }
  0x11   : > { %611 = vmatpush1.bf16.msra.mxu0 %v1974_v7  ;;  %v1990_v18 = vld [vmem:[%s2810_s1 + $0x2b4] ss:$8 sps:$4 sm:$0xff]   ;;  %v1992_v19 = vld [vmem:[%s2810_s1 + $0x1b0] ss:$8 sps:$4 sm:$0xff]   ;;  %v1994_v21 = vld [vmem:[%s2810_s1 + $0x1a4] ss:$8 sps:$4 sm:$0xff]  }
  0x12   : > { %664 = vmatpush1.bf16.msra.mxu1 %v1975_v8  ;;  %612 = vmatprep.subr.bf16.mxu0 %v1976_v9  ;;  %v1993_v20 = vld [vmem:[%s2810_s1 + $0x2b0] ss:$8 sps:$4 sm:$0xff]   ;;  %v1996_v22 = vld [vmem:[%s2810_s1 + $0x2a4] ss:$8 sps:$4 sm:$0xff]   ;;  %s1954_s6 = smul.u32 28, %s2814_s13  ;;  %vm219_vm0 = vcmask 1046528  }
  0x13   : > { %665 = vmatprep.subr.bf16.mxu1 %v1978_v10  ;;  %v1998_v23 = vld [vmem:[%s2810_s1 + $0x1a0] ss:$8 sps:$4 sm:$0xff]   ;;  %v2000_v25 = vld [vmem:[%s2810_s1 + $0x194] ss:$8 sps:$4 sm:$0xff]   ;;  %v2004_v27 = vld [vmem:[%s2810_s1 + $0x190] ss:$8 sps:$4 sm:$0xff]  }
  0x14   : > { %v1999_v24 = vld [vmem:[%s2810_s1 + $0x2a0] ss:$8 sps:$4 sm:$0xff]   ;;  %v2002_v26 = vld [vmem:[%s2810_s1 + $0x294] ss:$8 sps:$4 sm:$0xff]   ;;  %s2319_s19 = scalar_lea.vmem %s2809_s0, %s1954_s6  ;;  %v2005_v28 = vld [vmem:[%s2810_s1 + $0x290] ss:$8 sps:$4 sm:$0xff]  }
  0x15   : > { %613 = vmatpush1.bf16.msra.mxu0 %v1980_v11  ;;  %v2006_v29 = vld [vmem:[%s2810_s1 + $0x184] ss:$8 sps:$4 sm:$0xff]   ;;  %v2334_v31 = vld [vmem:[%s2319_s19 + $0x8] sm:$0xf]  ;;  %v2340_v33 = vld [vmem:[%s2319_s19 + $0x10] sm:$0xf] }
  0x16   : > { %666 = vmatpush1.bf16.msra.mxu1 %v1981_v12  ;;  %614 = vmatprep.subr.bf16.mxu0 %v1982_v13  ;;  %v2008_v30 = vld [vmem:[%s2810_s1 + $0x284] ss:$8 sps:$4 sm:$0xff]   ;;  %v2010_v37 = vld [vmem:[%s2810_s1 + $0x180] ss:$8 sps:$4 sm:$0xff]   ;;  %v2012_v39 = vld [vmem:[%s2810_s1 + $0x274] ss:$8 sps:$4 sm:$0xff]  }
  0x17   : > { %667 = vmatprep.subr.bf16.mxu1 %v1984_v14  ;;  %v2337_v32 = vld [vmem:[%s2319_s19 + $0xc] sm:$0xf]  ;;  %v277_v34 = vld [vmem:[%s2319_s19 + $0x4] sm:$0xe]  ;;  %v2011_v38 = vld [vmem:[%s2810_s1 + $0x280] ss:$8 sps:$4 sm:$0xff]  }
  0x18   : > { %v2345_v35 = vcombine.low %v2337_v32, %v2340_v33  ;;  %v1703_v36 = vcombine.low %v277_v34, %v2334_v31  ;;  %v2016_v42 = vld [vmem:[%s2810_s1 + $0x74] ss:$8 sps:$4 sm:$0xff]   ;;  %v2014_v43 = vld [vmem:[%s2810_s1 + $0x70] ss:$8 sps:$4 sm:$0xff]   ;;  %v2021_v46 = vld [vmem:[%s2810_s1 + $0x264] ss:$8 sps:$4 sm:$0xff]  }
  0x19   : > { %615 = vmatpush1.bf16.msra.mxu0 %v1986_v15  ;;  %v2017_v44 = vld [vmem:[%s2810_s1 + $0x270] ss:$8 sps:$4 sm:$0xff]   ;;  %v2025_v47 = vld [vmem:[%s2810_s1 + $0x64] ss:$8 sps:$4 sm:$0xff]   ;;  %v2023_v48 = vld [vmem:[%s2810_s1 + $0x60] ss:$8 sps:$4 sm:$0xff]  }
  0x1a   : > { %668 = vmatpush1.bf16.msra.mxu1 %v1987_v16  ;;  %616 = vmatprep.subr.bf16.mxu0 %v1988_v17  ;;  %v312_v40 = vrot.slane %v1703_v36, 1  ;;  %v313_v41 = vrot.slane %v2345_v35, 1  ;;  %v2026_v49 = vld [vmem:[%s2810_s1 + $0x260] ss:$8 sps:$4 sm:$0xff]   ;;  %v2027_v50 = vld [vmem:[%s2810_s1 + $0x254] ss:$8 sps:$4 sm:$0xff]  }
  0x1b   : > { %669 = vmatprep.subr.bf16.mxu1 %v1990_v18  ;;  %v2031_v51 = vld [vmem:[%s2810_s1 + $0x54] ss:$8 sps:$4 sm:$0xff]   ;;  %v2029_v52 = vld [vmem:[%s2810_s1 + $0x50] ss:$8 sps:$4 sm:$0xff]   ;;  %v2033_v54 = vld [vmem:[%s2810_s1 + $0x244] ss:$8 sps:$4 sm:$0xff]  }
  0x1c   : > { %v314_v45 = vsel %vm219_vm0, %v312_v40, %v313_v41  ;;  %v2032_v53 = vld [vmem:[%s2810_s1 + $0x250] ss:$8 sps:$4 sm:$0xff]   ;;  %v2037_v55 = vld [vmem:[%s2810_s1 + $0x44] ss:$8 sps:$4 sm:$0xff]   ;;  %v2035_v56 = vld [vmem:[%s2810_s1 + $0x40] ss:$8 sps:$4 sm:$0xff]  }
  0x1d   : > { %617 = vmatpush1.bf16.msra.mxu0 %v1992_v19  ;;  %v2038_v57 = vld [vmem:[%s2810_s1 + $0x240] ss:$8 sps:$4 sm:$0xff]   ;;  %v2408_v58 = vld [vmem:[%s2319_s19 + $0x4] sm:$0xf]  ;;  %v295_v59 = vshll.u32 %v2345_v35, 16  ;;  %vm1567_vm2 = vcmask 1040384  }
  0x1e   : > { %670 = vmatpush1.bf16.msra.mxu1 %v1993_v20  ;;  %618 = vmatprep.subr.bf16.mxu0 %v1994_v21  ;;  %v2039_v60 = vld [vmem:[%s2810_s1 + $0x234] ss:$8 sps:$4 sm:$0xff]   ;;  %v1700_v62 = vcombine.low %v2408_v58, %v2334_v31  ;;  %v2041_v63 = vld [vmem:[%s2810_s1 + $0x30] ss:$8 sps:$4 sm:$0xff]   ;;  %v2045_v5 = vld [vmem:[%s2810_s1 + $0x224] ss:$8 sps:$4 sm:$0xff]  }
  0x1f   : > { %671 = vmatprep.subr.bf16.mxu1 %v1996_v22  ;;  %v2043_v61 = vld [vmem:[%s2810_s1 + $0x34] ss:$8 sps:$4 sm:$0xff]   ;;  %v2044_v3 = vld [vmem:[%s2810_s1 + $0x230] ss:$8 sps:$4 sm:$0xff]   ;;  %v297_v4 = vrot.slane %v295_v59, 1  ;;  %v299_v20 = vshrl.u32 %v2345_v35, 16 }
  0x20   : > { %v288_v0 = vshrl.u32 %v1700_v62, 16  ;;  %v290_v1 = vshll.u32 %v1700_v62, 16  ;;  %v2049_v6 = vld [vmem:[%s2810_s1 + $0x24] ss:$8 sps:$4 sm:$0xff]   ;;  %vm193_vm1 = vsmask.f32 7424 }
  0x21   : > { %619 = vmatpush1.bf16.msra.mxu0 %v1998_v23  ;;  %v2047_v8 = vld [vmem:[%s2810_s1 + $0x20] ss:$8 sps:$4 sm:$0xff]   ;;  %v2051_v11 = vld [vmem:[%s2810_s1 + $0x214] ss:$8 sps:$4 sm:$0xff]   ;;  %v2053_v14 = vld [vmem:[%s2810_s1 + $0x10] ss:$8 sps:$4 sm:$0xff]  }
  0x22   : > { %672 = vmatpush1.bf16.msra.mxu1 %v1999_v24  ;;  %620 = vmatprep.subr.bf16.mxu0 %v2000_v25  ;;  %v292_v7 = vrot.slane %v290_v1, 1  ;;  %v2050_v10 = vld [vmem:[%s2810_s1 + $0x220] ss:$8 sps:$4 sm:$0xff]   ;;  %v2055_v12 = vld [vmem:[%s2810_s1 + $0x14] ss:$8 sps:$4 sm:$0xff]   ;;  %vm1580_vm3 = vcmask 1042432  }
  0x23   : > { %673 = vmatprep.subr.bf16.mxu1 %v2002_v26  ;;  %v2056_v15 = vld [vmem:[%s2810_s1 + $0x210] ss:$8 sps:$4 sm:$0xff]   ;;  %v2057_v16 = vld [vmem:[%s2810_s1 + $0x204] ss:$8 sps:$4 sm:$0xff]   ;;  %v2059_v19 = vld [vmem:[%s2810_s1] ss:$8 sps:$4 sm:$0xff]  }
  0x24   : > { %v293_v9 = vor.u32 %v292_v7, %v288_v0  ;;  %v2061_v17 = vld [vmem:[%s2810_s1 + $0x4] ss:$8 sps:$4 sm:$0xff]   ;;  %v2094_v18 = vld [vmem:[%s2319_s19 + $0x14] ss:$0 sps:$4 sm:$0x11]   ;;  %s1953_s16 = sshll.u32 %s2814_s13, 3 }
  0x25   : > { %621 = vmatpush1.bf16.msra.mxu0 %v2004_v27  ;;  %v2062_v21 = vld [vmem:[%s2810_s1 + $0x200] ss:$8 sps:$4 sm:$0xff]   ;;  %v303_v22 = vshll.u32 %v2094_v18, 16  ;;  %v315_v23 = vrot.slane %v2094_v18, 1  ;;  %v2066_v24 = vld [vmem:[%s2810_s1 + $0xf4] ss:$8 sps:$4 sm:$0xff]   ;;  %v2475_v27 = vcombine.low %v2334_v31, %v2337_v32  ;;  %s170_s20 = scalar_lea.vmem %s2812_s3, %s1953_s16 }
  0x26   : > { %674 = vmatpush1.bf16.msra.mxu1 %v2005_v28  ;;  %622 = vmatprep.subr.bf16.mxu0 %v2006_v29  ;;  %v298_v13 = vsel %vm193_vm1, %v293_v9, %v297_v4  ;;  %v2069_v25 = vld [vmem:[%s2810_s1 + $0x174] ss:$8 sps:$4 sm:$0xff]   ;;  %v2064_v28 = vld [vmem:[%s2810_s1 + $0xf0] ss:$8 sps:$4 sm:$0xff]   ;;  %v301_v29 = vor.u32 %v299_v20, %v297_v4  ;;  %v2072_v36 = vld [vmem:[%s2810_s1 + $0xe4] ss:$8 sps:$4 sm:$0xff]  }
  0x27   : > { %675 = vmatprep.subr.bf16.mxu1 %v2008_v30  ;;  %640 = vmatprep.mubr.bf16.mxu0 %v298_v13  ;;  %v316_v26 = vsel %vm219_vm0, %v313_v41, %v315_v23  ;;  %v305_v30 = vrot.slane %v303_v22, 1  ;;  %v2067_v34 = vld [vmem:[%s2810_s1 + $0x170] ss:$8 sps:$4 sm:$0xff]   ;;  %v2075_v31 = vld [vmem:[%s2810_s1 + $0x164] ss:$8 sps:$4 sm:$0xff]   ;;  %v202_v41 = vshll.u32 %v2475_v27, 16 }
  0x28   : > { %v2070_v32 = vld [vmem:[%s2810_s1 + $0xe0] ss:$8 sps:$4 sm:$0xff]   ;;  %v2091_v59 = vld [vmem:[%s2810_s1 + $0x130] ss:$8 sps:$4 sm:$0xff]   ;;  %v2103_v0 = vld [vmem:[%s2810_s1 + $0x94] ss:$8 sps:$4 sm:$0xff]  }
  0x29   : > { %623 = vmatpush1.bf16.msra.mxu0 %v2010_v37  ;;  %v172_v37 = vld [vmem:[%s2319_s19] sm:$0xf]  ;;  %v2106_v1 = vld [vmem:[%s2810_s1 + $0x114] ss:$8 sps:$4 sm:$0xff]   ;;  %v2109_v9 = vld [vmem:[%s2810_s1 + $0x84] ss:$8 sps:$4 sm:$0xff]  }
  0x2a   : > { %676 = vmatpush1.bf16.msra.mxu1 %v2011_v38  ;;  %624 = vmatprep.subr.bf16.mxu0 %v2012_v39  ;;  %v2073_v38 = vld [vmem:[%s2810_s1 + $0x160] ss:$8 sps:$4 sm:$0xff]   ;;  %v306_v39 = vsel %vm193_vm1, %v301_v29, %v305_v30  ;;  %v2498_v40 = vcombine.low %v172_v37, %v2408_v58  ;;  %v2121_v4 = vld [vmem:[%s2319_s19 + $0x10] ss:$0 sps:$4 sm:$0x11]  }
  0x2b   : > { %954 = vmatprep.subr.bf16.mxu1 %v2016_v42  ;;  %v2078_v42 = vld [vmem:[%s2810_s1 + $0xd4] ss:$8 sps:$4 sm:$0xff]   ;;  %v2110_v13 = vld [vmem:[%s2810_s1 + $0x100] ss:$8 sps:$4 sm:$0xff]   ;;  %v2115_v20 = vld [vmem:[%s2810_s1 + $0x370] ss:$8 sps:$4 sm:$0xff]  }
  0x2c   : > { %v2139_v18 = vld [vmem:[%s2810_s1 + $0x474] ss:$8 sps:$4 sm:$0xff]   ;;  %v2118_v23 = vld [vmem:[%s2810_s1 + $0x360] ss:$8 sps:$4 sm:$0xff]   ;;  %v2611_v29 = vld [vmem:[%s2319_s19 + $0xc] sm:$0xf] }
  0x2d   : > { %694 = vmatmul.mubr.bf16.vlgmr.msra.gmra.mxu1 %v314_v45  ;;  %625 = vmatpush2.bf16.msra.mxu0 %v2017_v44  ;;  %v195_v44 = vshrl.u32 %v2498_v40, 16  ;;  %v197_v45 = vshll.u32 %v2498_v40, 16  ;;  %v2615_v30 = vld [vmem:[%s2319_s19 + $0x10] sm:$0xff]  }
  0x2e   : > { %955 = vmatpush1.bf16.msra.mxu1 %v2014_v43  ;;  %626 = vmatprep.subr.bf16.mxu0 %v2021_v46  ;;  %v2081_v43 = vld [vmem:[%s2810_s1 + $0x154] ss:$8 sps:$4 sm:$0xff]   ;;  %v2076_v46 = vld [vmem:[%s2810_s1 + $0xd0] ss:$8 sps:$4 sm:$0xff]  }
  0x2f   : > { %956 = vmatprep.subr.bf16.mxu1 %v2025_v47  ;;  %703 = vmatprep.mubr.bf16.mxu1 %v2201_v2  ;;  %v199_v47 = vrot.slane %v197_v45, 1  ;;  %v2122_v37 = vld [vmem:[%s2810_s1 + $0x350] ss:$8 sps:$4 sm:$0xff]  }
  0x31   : > { %627 = vmatpush2.bf16.msra.mxu0 %v2026_v49  ;;  %v2079_v49 = vld [vmem:[%s2810_s1 + $0x150] ss:$8 sps:$4 sm:$0xff]  }
  0x32   : > { %957 = vmatpush1.bf16.msra.mxu1 %v2023_v48  ;;  %628 = vmatprep.subr.bf16.mxu0 %v2027_v50  ;;  %v204_v48 = vrot.slane %v202_v41, 1  ;;  %v2084_v50 = vld [vmem:[%s2810_s1 + $0xc4] ss:$8 sps:$4 sm:$0xff]  }
  0x33   : > { %958 = vmatprep.subr.bf16.mxu1 %v2031_v51  ;;  %v2087_v51 = vld [vmem:[%s2810_s1 + $0x144] ss:$8 sps:$4 sm:$0xff]  }
  0x35   : > { %629 = vmatpush2.bf16.msra.mxu0 %v2032_v53  ;;  %704 = vmatmul.mubr.bf16.gmra.mxu1 %v316_v26  ;;  %v2145_v26 = vld [vmem:[%s2810_s1 + $0x464] ss:$8 sps:$4 sm:$0xff]  }
  0x36   : > { %959 = vmatpush1.bf16.msra.mxu1 %v2029_v52  ;;  %630 = vmatprep.subr.bf16.mxu0 %v2033_v54  ;;  %v200_v52 = vor.u32 %v199_v47, %v195_v44  ;;  %v2082_v54 = vld [vmem:[%s2810_s1 + $0xc0] ss:$8 sps:$4 sm:$0xff]   ;;  %v2157_v44 = vld [vmem:[%s2810_s1 + $0x444] ss:$8 sps:$4 sm:$0xff]  }
  0x37   : > { %960 = vmatprep.subr.bf16.mxu1 %v2037_v55  ;;  %v2085_v55 = vld [vmem:[%s2810_s1 + $0x140] ss:$8 sps:$4 sm:$0xff]  }
  0x38   : > { %v205_v53 = vsel %vm193_vm1, %v200_v52, %v204_v48  ;;  %v2125_v47 = vld [vmem:[%s2810_s1 + $0x340] ss:$8 sps:$4 sm:$0xff]  }
  0x39   : > { %631 = vmatpush2.bf16.msra.mxu0 %v2038_v57  ;;  %986 = vmatprep.mubr.bf16.mxu1 %v205_v53  ;;  %v2088_v57 = vld [vmem:[%s2810_s1 + $0xb0] ss:$8 sps:$4 sm:$0xff]  }
  0x3a   : > { %961 = vmatpush1.bf16.msra.mxu1 %v2035_v56  ;;  %632 = vmatprep.subr.bf16.mxu0 %v2039_v60  ;;  %v2090_v56 = vld [vmem:[%s2810_s1 + $0xb4] ss:$8 sps:$4 sm:$0xff]   ;;  %v2097_v60 = vld [vmem:[%s2810_s1 + $0xa4] ss:$8 sps:$4 sm:$0xff]   ;;  %v2128_v53 = vld [vmem:[%s2810_s1 + $0x330] ss:$8 sps:$4 sm:$0xff]  }
  0x3b   : > { %962 = vmatprep.subr.bf16.mxu1 %v2043_v61  ;;  %v2100_v61 = vld [vmem:[%s2810_s1 + $0x124] ss:$8 sps:$4 sm:$0xff]  }
  0x3d   : > { %633 = vmatpush2.bf16.msra.mxu0 %v2044_v3  ;;  %v177_v3 = vld [vmem:[%s2319_s19] sm:$0xe] }
  0x3e   : > { %963 = vmatpush1.bf16.msra.mxu1 %v2041_v63  ;;  %634 = vmatprep.subr.bf16.mxu0 %v2045_v5  ;;  %v2098_v63 = vld [vmem:[%s2810_s1 + $0x120] ss:$8 sps:$4 sm:$0xff]   ;;  %v2101_v5 = vld [vmem:[%s2810_s1 + $0x90] ss:$8 sps:$4 sm:$0xff]   ;;  %v1699_v7 = vcombine.low %v177_v3, %v2408_v58  ;;  %v2181_v3 = vld [vmem:[%s2810_s1 + $0x404] ss:$8 sps:$4 sm:$0xff]  }
  0x3f   : > { %964 = vmatprep.subr.bf16.mxu1 %v2049_v6  ;;  %v2104_v6 = vld [vmem:[%s2810_s1 + $0x110] ss:$8 sps:$4 sm:$0xff]   ;;  %v2107_v58 = vld [vmem:[%s2810_s1 + $0x80] ss:$8 sps:$4 sm:$0xff]  }
  0x41   : > { %635 = vmatpush2.bf16.msra.mxu0 %v2050_v10  ;;  %v2112_v10 = vld [vmem:[%s2810_s1 + $0x104] ss:$8 sps:$4 sm:$0xff]  }
  0x42   : > { %965 = vmatpush1.bf16.msra.mxu1 %v2047_v8  ;;  %636 = vmatprep.subr.bf16.mxu0 %v2051_v11  ;;  %v206_v8 = vshrl.u32 %v2475_v27, 16  ;;  %v210_v11 = vshll.u32 %v2121_v4, 16 }
  0x43   : > { %966 = vmatprep.subr.bf16.mxu1 %v2055_v12  ;;  %v221_v12 = vrot.slane %v2475_v27, 1 }
  0x45   : > { %637 = vmatpush2.bf16.msra.mxu0 %v2056_v15  ;;  %v2117_v15 = vld [vmem:[%s2810_s1 + $0x374] ss:$8 sps:$4 sm:$0xff]  }
  0x46   : > { %967 = vmatpush1.bf16.msra.mxu1 %v2053_v14  ;;  %638 = vmatprep.subr.bf16.mxu0 %v2057_v16  ;;  %v220_v14 = vrot.slane %v1699_v7, 1  ;;  %v208_v16 = vor.u32 %v206_v8, %v204_v48  ;;  %v2130_v48 = vld [vmem:[%s2810_s1 + $0x334] ss:$8 sps:$4 sm:$0xff]   ;;  %v1110_v8 = vrot.slane %v2615_v30, 1 }
  0x47   : > { %968 = vmatprep.subr.bf16.mxu1 %v2061_v17  ;;  %v212_v17 = vrot.slane %v210_v11, 1 }
  0x49   : > { %639 = vmatpush2.bf16.msra.mxu0 %v2062_v21  ;;  %v2120_v21 = vld [vmem:[%s2810_s1 + $0x364] ss:$8 sps:$4 sm:$0xff]   ;;  %v213_v22 = vsel %vm193_vm1, %v208_v16, %v212_v17 }
  0x4a   : > { %969 = vmatpush1.bf16.msra.mxu1 %v2059_v19  ;;  %1007 = vmatprep.subr.bf16.mxu0 %v2069_v25  ;;  %v222_v19 = vsel %vm219_vm0, %v220_v14, %v221_v12  ;;  %v2124_v25 = vld [vmem:[%s2810_s1 + $0x354] ss:$8 sps:$4 sm:$0xff]   ;;  %v2166_v16 = vld [vmem:[%s2810_s1 + $0x3c4] ss:$8 sps:$4 sm:$0xff]  }
  0x4b   : > { %970 = vmatprep.subr.bf16.mxu1 %v2066_v24  ;;  %v2137_v24 = vld [vmem:[%s2810_s1 + $0x470] ss:$8 sps:$4 sm:$0xff]  }
  0x4c   : > { %641 = vmatmul.mubr.bf16.vlgmr.msra.gmra.mxu0 %v1700_v62  ;;  %v2095_v62 = vld [vmem:[%s2810_s1 + $0xa0] ss:$8 sps:$4 sm:$0xff]  }
  0x4d   : > { %1008 = vmatpush1.bf16.msra.mxu0 %v2067_v34  ;;  %650 = vmatprep.mubr.bf16.mxu0 %v306_v39  ;;  %v2143_v34 = vld [vmem:[%s2810_s1 + $0x460] ss:$8 sps:$4 sm:$0xff]   ;;  %v2151_v39 = vld [vmem:[%s2810_s1 + $0x454] ss:$8 sps:$4 sm:$0xff]  }
  0x4e   : > { %971 = vmatpush2.bf16.msra.mxu1 %v2064_v28  ;;  %1009 = vmatprep.subr.bf16.mxu0 %v2075_v31  ;;  %v223_v28 = vrot.slane %v2121_v4, 1  ;;  %v2140_v4 = vld [vmem:[%s2810_s1 + $0x300] ss:$8 sps:$4 sm:$0xff]  }
  0x4f   : > { %972 = vmatprep.subr.bf16.mxu1 %v2072_v36  ;;  %v1061_v36 = vld [vmem:[%s2319_s19 + $0x8] sm:$0xf] }
  0x50   : > { %v1849_v31 = vcombine.low %v1061_v36, %v2611_v29 }
  0x51   : > { %1010 = vmatpush1.bf16.msra.mxu0 %v2073_v38  ;;  %v224_v38 = vsel %vm219_vm0, %v221_v12, %v223_v28  ;;  %v2191_v12 = vld [vmem:[%s2319_s19 + $0x18] ss:$0 sps:$4 sm:$0x11]   ;;  %v2187_v28 = vld [vmem:[%s2810_s1 + $0x380] ss:$8 sps:$4 sm:$0xff]  }
  0x52   : > { %973 = vmatpush2.bf16.msra.mxu1 %v2070_v32  ;;  %1011 = vmatprep.subr.bf16.mxu0 %v2081_v43  ;;  %v1092_v32 = vshll.u32 %v2615_v30, 16  ;;  %v1085_v41 = vshrl.u32 %v1849_v31, 16  ;;  %v2149_v43 = vld [vmem:[%s2810_s1 + $0x450] ss:$8 sps:$4 sm:$0xff]   ;;  %v1112_v14 = vrot.slane %v2191_v12, 1 }
  0x53   : > { %974 = vmatprep.subr.bf16.mxu1 %v2078_v42  ;;  %v1087_v42 = vshll.u32 %v1849_v31, 16  ;;  %v1060_v31 = vld [vmem:[%s2319_s19 + $0x14] sm:$0xf] }
  0x54   : > { %651 = vmatmul.mubr.bf16.gmra.mxu0 %v2345_v35  ;;  %v2093_v35 = vld [vmem:[%s2810_s1 + $0x134] ss:$8 sps:$4 sm:$0xff]   ;;  %v1113_v17 = vsel %vm219_vm0, %v1110_v8, %v1112_v14 }
  0x55   : > { %1012 = vmatpush1.bf16.msra.mxu0 %v2079_v49  ;;  %1039 = vmatprep.mubr.bf16.mxu0 %v2201_v2  ;;  %v1089_v45 = vrot.slane %v1087_v42, 1 }
  0x56   : > { %975 = vmatpush2.bf16.msra.mxu1 %v2076_v46  ;;  %1013 = vmatprep.subr.bf16.mxu0 %v2087_v51  ;;  %v2640_v46 = vrot.slane %v1092_v32, 1  ;;  %v2163_v51 = vld [vmem:[%s2810_s1 + $0x434] ss:$8 sps:$4 sm:$0xff]   ;;  %v1848_v32 = vcombine.low %v2340_v33, %v1060_v31 }
  0x57   : > { %976 = vmatprep.subr.bf16.mxu1 %v2084_v50  ;;  %v1090_v49 = vor.u32 %v1089_v45, %v1085_v41  ;;  %v2155_v50 = vld [vmem:[%s2810_s1 + $0x440] ss:$8 sps:$4 sm:$0xff]  }
  0x59   : > { %1014 = vmatpush1.bf16.msra.mxu0 %v2085_v55  ;;  %v1095_v52 = vsel %vm193_vm1, %v1090_v49, %v2640_v46  ;;  %v2161_v55 = vld [vmem:[%s2810_s1 + $0x430] ss:$8 sps:$4 sm:$0xff]  }
  0x5a   : > { %977 = vmatpush2.bf16.msra.mxu1 %v2082_v54  ;;  %1015 = vmatprep.subr.bf16.mxu0 %v2093_v35  ;;  %v2133_v54 = vld [vmem:[%s2810_s1 + $0x324] ss:$8 sps:$4 sm:$0xff]   ;;  %v2131_v35 = vld [vmem:[%s2810_s1 + $0x320] ss:$8 sps:$4 sm:$0xff]  }
  0x5b   : > { %978 = vmatprep.subr.bf16.mxu1 %v2090_v56  ;;  %v2169_v56 = vld [vmem:[%s2810_s1 + $0x424] ss:$8 sps:$4 sm:$0xff]  }
  0x5d   : > { %1016 = vmatpush1.bf16.msra.mxu0 %v2091_v59  ;;  %v2167_v59 = vld [vmem:[%s2810_s1 + $0x420] ss:$8 sps:$4 sm:$0xff]  }
  0x5e   : > { %979 = vmatpush2.bf16.msra.mxu1 %v2088_v57  ;;  %1017 = vmatprep.subr.bf16.mxu0 %v2100_v61  ;;  %v2136_v57 = vld [vmem:[%s2810_s1 + $0x314] ss:$8 sps:$4 sm:$0xff]   ;;  %v1066_v61 = vld [vmem:[%s2319_s19 + $0x8] sm:$0xe] }
  0x5f   : > { %980 = vmatprep.subr.bf16.mxu1 %v2097_v60  ;;  %v2175_v60 = vld [vmem:[%s2810_s1 + $0x414] ss:$8 sps:$4 sm:$0xff]  }
  0x61   : > { %1018 = vmatpush1.bf16.msra.mxu0 %v2098_v63  ;;  %v2142_v63 = vld [vmem:[%s2810_s1 + $0x304] ss:$8 sps:$4 sm:$0xff]  }
  0x62   : > { %981 = vmatpush2.bf16.msra.mxu1 %v2095_v62  ;;  %1019 = vmatprep.subr.bf16.mxu0 %v2106_v1  ;;  %v2134_v62 = vld [vmem:[%s2810_s1 + $0x310] ss:$8 sps:$4 sm:$0xff]   ;;  %v1852_v1 = vcombine.low %v1066_v61, %v2611_v29 }
  0x63   : > { %982 = vmatprep.subr.bf16.mxu1 %v2103_v0  ;;  %v2173_v0 = vld [vmem:[%s2810_s1 + $0x410] ss:$8 sps:$4 sm:$0xff]  }
  0x64   : > { %v1109_v7 = vrot.slane %v1852_v1, 1 }
  0x65   : > { %1020 = vmatpush1.bf16.msra.mxu0 %v2104_v6  ;;  %v2179_v6 = vld [vmem:[%s2810_s1 + $0x400] ss:$8 sps:$4 sm:$0xff]  }
  0x66   : > { %983 = vmatpush2.bf16.msra.mxu1 %v2101_v5  ;;  %1021 = vmatprep.subr.bf16.mxu0 %v2112_v10  ;;  %v2148_v5 = vld [vmem:[%s2810_s1 + $0x3f4] ss:$8 sps:$4 sm:$0xff]   ;;  %v2154_v10 = vld [vmem:[%s2810_s1 + $0x3e4] ss:$8 sps:$4 sm:$0xff]   ;;  %v1111_v11 = vsel %vm219_vm0, %v1109_v7, %v1110_v8 }
  0x67   : > { %984 = vmatprep.subr.bf16.mxu1 %v2109_v9  ;;  %v2146_v9 = vld [vmem:[%s2810_s1 + $0x3f0] ss:$8 sps:$4 sm:$0xff]  }
  0x69   : > { %1022 = vmatpush1.bf16.msra.mxu0 %v2110_v13  ;;  %v2160_v13 = vld [vmem:[%s2810_s1 + $0x3d4] ss:$8 sps:$4 sm:$0xff]  }
  0x6a   : > { %985 = vmatpush2.bf16.msra.mxu1 %v2107_v58  ;;  %1405 = vmatprep.subr.bf16.mxu0 %v2117_v15  ;;  %v2152_v58 = vld [vmem:[%s2810_s1 + $0x3e0] ss:$8 sps:$4 sm:$0xff]   ;;  %v2158_v15 = vld [vmem:[%s2810_s1 + $0x3d0] ss:$8 sps:$4 sm:$0xff]  }
  0x6b   : > { %1458 = vmatprep.subr.bf16.mxu1 %v2139_v18  ;;  %v2164_v18 = vld [vmem:[%s2810_s1 + $0x3c0] ss:$8 sps:$4 sm:$0xff]  }
  0x6c   : > { %1040 = vmatmul.mubr.bf16.vlgmr.msra.gmra.mxu0 %v222_v19  ;;  %v2170_v19 = vld [vmem:[%s2810_s1 + $0x3b0] ss:$8 sps:$4 sm:$0xff]  }
  0x6d   : > { %987 = vmatmul.mubr.bf16.vlgmr.msra.gmra.mxu1 %v2498_v40  ;;  %1406 = vmatpush1.bf16.msra.mxu0 %v2115_v20  ;;  %v2127_v40 = vld [vmem:[%s2810_s1 + $0x344] ss:$8 sps:$4 sm:$0xff]  }
  0x6e   : > { %996 = vmatprep.mubr.bf16.mxu1 %v213_v22  ;;  %1407 = vmatprep.subr.bf16.mxu0 %v2120_v21  ;;  %v2178_v20 = vld [vmem:[%s2810_s1 + $0x3a4] ss:$8 sps:$4 sm:$0xff]   ;;  %v2176_v21 = vld [vmem:[%s2810_s1 + $0x3a0] ss:$8 sps:$4 sm:$0xff]   ;;  %v2184_v22 = vld [vmem:[%s2810_s1 + $0x394] ss:$8 sps:$4 sm:$0xff]  }
  0x6f   : > { %1049 = vmatprep.mubr.bf16.mxu0 %v2201_v2  ;;  %1459 = vmatpush1.bf16.msra.mxu1 %v2137_v24  ;;  %v2189_v24 = vld [vmem:[%s2810_s1 + $0x384] ss:$8 sps:$4 sm:$0xff]  }
  0x70   : > { %1460 = vmatprep.subr.bf16.mxu1 %v2145_v26  ;;  %v1100_v26 = vshll.u32 %v2191_v12, 16  ;;  %v1519_v12 = vld [vmem:[%s2811_s2] sm:$0x3] }
  0x71   : > { %1408 = vmatpush1.bf16.msra.mxu0 %v2118_v23  ;;  %v2182_v23 = vld [vmem:[%s2810_s1 + $0x390] ss:$8 sps:$4 sm:$0xff]  }
  0x72   : > { %1409 = vmatprep.subr.bf16.mxu0 %v2124_v25  ;;  %v1096_v25 = vshrl.u32 %v2615_v30, 16 }
  0x73   : > { %1461 = vmatpush1.bf16.msra.mxu1 %v2143_v34  ;;  %v1102_v34 = vrot.slane %v1100_v26, 1 }
  0x74   : > { %1050 = vmatmul.mubr.bf16.gmra.mxu0 %v224_v38  ;;  %1462 = vmatprep.subr.bf16.mxu1 %v2151_v39  ;;  %v1098_v29 = vor.u32 %v1096_v25, %v2640_v46 }
  0x75   : > { %997 = vmatmul.mubr.bf16.gmra.mxu1 %v2475_v27  ;;  %1410 = vmatpush1.bf16.msra.mxu0 %v2122_v37 }
  0x76   : > { %1411 = vmatprep.subr.bf16.mxu0 %v2127_v40  ;;  %1490 = vmatprep.mubr.bf16.mxu1 %v2201_v2  ;;  %v1103_v36 = vsel %vm193_vm1, %v1098_v29, %v1102_v34 }
  0x77   : > { %1463 = vmatpush1.bf16.msra.mxu1 %v2149_v43  ;;  %1437 = vmatprep.mubr.bf16.mxu0 %v1095_v52 }
  0x78   : > { %1464 = vmatprep.subr.bf16.mxu1 %v2157_v44 }
  0x79   : > { %1412 = vmatpush1.bf16.msra.mxu0 %v2125_v47 }
  0x7a   : > { %1413 = vmatprep.subr.bf16.mxu0 %v2130_v48 }
  0x7b   : > { %1465 = vmatpush1.bf16.msra.mxu1 %v2155_v50 }
  0x7c   : > { %1466 = vmatprep.subr.bf16.mxu1 %v2163_v51 }
  0x7d   : > { %1414 = vmatpush1.bf16.msra.mxu0 %v2128_v53 }
  0x7e   : > { %1415 = vmatprep.subr.bf16.mxu0 %v2133_v54 }
  0x7f   : > { %1467 = vmatpush1.bf16.msra.mxu1 %v2161_v55 }
  0x80   : > { %1468 = vmatprep.subr.bf16.mxu1 %v2169_v56 }
  0x81   : > { %1416 = vmatpush1.bf16.msra.mxu0 %v2131_v35 }
  0x82   : > { %1417 = vmatprep.subr.bf16.mxu0 %v2136_v57 }
  0x83   : > { %1469 = vmatpush1.bf16.msra.mxu1 %v2167_v59 }
  0x84   : > { %1470 = vmatprep.subr.bf16.mxu1 %v2175_v60 }
  0x85   : > { %1418 = vmatpush1.bf16.msra.mxu0 %v2134_v62 }
  0x86   : > { %1419 = vmatprep.subr.bf16.mxu0 %v2142_v63 }
  0x87   : > { %1471 = vmatpush1.bf16.msra.mxu1 %v2173_v0  ;;  %v1521_v0 = vlaneseq }
  0x88   : > { %1472 = vmatprep.subr.bf16.mxu1 %v2181_v3 }
  0x89   : > { %1420 = vmatpush1.bf16.msra.mxu0 %v2140_v4  ;;  %v1522_v4 = vshrl.u32 %v1521_v0, 7 }
  0x8a   : > { %1421 = vmatprep.subr.bf16.mxu0 %v2148_v5 }
  0x8b   : > { %1473 = vmatpush1.bf16.msra.mxu1 %v2179_v6 }
  0x8d   : > { %1422 = vmatpush2.bf16.msra.mxu0 %v2146_v9 }
  0x8e   : > { %1423 = vmatprep.subr.bf16.mxu0 %v2154_v10  ;;  %1491 = vmatmul.mubr.bf16.vlgmr.msra.gmra.mxu1 %v1111_v11  ;;  %v1523_v10 = vsub.s32 0, %v1522_v4 }
  0x8f   : > { %1500 = vmatprep.mubr.bf16.mxu1 %v2201_v2  ;;  %v2172_v2 = vld [vmem:[%s2810_s1 + $0x3b4] ss:$8 sps:$4 sm:$0xff]  }
  0x91   : > { %1424 = vmatpush2.bf16.msra.mxu0 %v2152_v58 }
  0x92   : > { %1425 = vmatprep.subr.bf16.mxu0 %v2160_v13 }
  0x95   : > { %1426 = vmatpush2.bf16.msra.mxu0 %v2158_v15  ;;  %v1527_v15 = vsub.s32 1, %v1522_v4 }
  0x96   : > { %1427 = vmatprep.subr.bf16.mxu0 %v2166_v16  ;;  %1501 = vmatmul.mubr.bf16.gmra.mxu1 %v1113_v17 }
  0x97   : > { %v2775_v26 = vrot.slane %v1519_v12, %v1527_v15 }
  0x99   : > { %1428 = vmatpush2.bf16.msra.mxu0 %v2164_v18 }
  0x9a   : > { %1429 = vmatprep.subr.bf16.mxu0 %v2172_v2 }
  0x9d   : > { %1430 = vmatpush2.bf16.msra.mxu0 %v2170_v19 }
  0x9e   : > { %1431 = vmatprep.subr.bf16.mxu0 %v2178_v20  ;;  %v2773_v20 = vrot.slane %v1519_v12, %v1523_v10 }
  0xa1   : > { %1432 = vmatpush2.bf16.msra.mxu0 %v2176_v21 }
  0xa2   : > { %1433 = vmatprep.subr.bf16.mxu0 %v2184_v22 }
  0xa5   : > { %1434 = vmatpush2.bf16.msra.mxu0 %v2182_v23 }
  0xa6   : > { %1435 = vmatprep.subr.bf16.mxu0 %v2189_v24 }
  0xa9   : > { %1436 = vmatpush2.bf16.msra.mxu0 %v2187_v28 }
  0xac   : > { %1438 = vmatmul.mubr.bf16.vlgmr.msra.gmra.mxu0 %v2475_v27 }
  0xad   : > { %1447 = vmatprep.mubr.bf16.mxu0 %v1103_v36 }
  0xb4   : > { %1448 = vmatmul.mubr.bf16.gmra.mxu0 %v1848_v32 }
  0xed   : > { %v695_v30 = vpop.f32.mrf.mxu1 }
  0xef   : > { %v697_v37 = vpop.f32.mrf.mxu1 }
  0xf1   : > { %v699_v38 = vpop.f32.mrf.mxu1 }
  0xf3   : > { %v701_v39 = vpop.f32.mrf.mxu1 }
  0xf5   : > { %v705_v40 = vpop.f32.mrf.mxu1 }
  0xf7   : > { %v707_v42 = vpop.f32.mrf.mxu1 }
  0xf9   : > { %v2760_v44 = vpop.f32.mrf.mxu1 }
  0xfb   : > { %v2762_v46 = vpop.f32.mrf.mxu1 }
 0x10c   : > { %v642_v41 = vpop.f32.mrf.mxu0 }
 0x10d   : > { %v696_v6 = vadd.f32 %v695_v30, %v642_v41 }
 0x10e   : > { %v644_v43 = vpop.f32.mrf.mxu0 }
 0x10f   : > { %v698_v8 = vadd.f32 %v697_v37, %v644_v43 }
 0x110   : > { %v646_v45 = vpop.f32.mrf.mxu0 }
 0x111   : > { %v700_v58 = vadd.f32 %v699_v38, %v646_v45 }
 0x112   : > { %v648_v47 = vpop.f32.mrf.mxu0 }
 0x113   : > { %v702_v16 = vadd.f32 %v701_v39, %v648_v47 }
 0x114   : > { %v652_v48 = vpop.f32.mrf.mxu0 }
 0x115   : > { %v706_v29 = vadd.f32 %v705_v40, %v652_v48 }
 0x116   : > { %v654_v50 = vpop.f32.mrf.mxu0 }
 0x117   : > { %v708_v34 = vadd.f32 %v707_v42, %v654_v50 }
 0x118   : > { %v656_v51 = vpop.f32.mrf.mxu0 }
 0x11a   : > { %v658_v53 = vpop.f32.mrf.mxu0 }
 0x11b   : > { %v712_v42 = vadd.f32 %v2762_v46, %v658_v53 }
 0x12c   : > { %v1041_v54 = vpop.f32.mrf.mxu0 }
 0x12d   : > { %v988_v27 = vpop.f32.mrf.mxu1 }
 0x12e   : > { %v1043_v56 = vpop.f32.mrf.mxu0  ;;  %v989_v9 = vadd.f32 %v988_v27, %v696_v6 }
 0x12f   : > { %v990_v49 = vpop.f32.mrf.mxu1 }
 0x130   : > { %v1045_v57 = vpop.f32.mrf.mxu0  ;;  %v991_v13 = vadd.f32 %v990_v49, %v698_v8  ;;  %v1042_v18 = vadd.f32 %v1041_v54, %v989_v9 }
 0x131   : > { %v992_v33 = vpop.f32.mrf.mxu1 }
 0x132   : > { %v1047_v60 = vpop.f32.mrf.mxu0  ;;  %v993_v2 = vadd.f32 %v992_v33, %v700_v58  ;;  %v1044_v23 = vadd.f32 %v1043_v56, %v991_v13 }
 0x133   : > { %v994_v52 = vpop.f32.mrf.mxu1 }
 0x134   : > { %v1051_v62 = vpop.f32.mrf.mxu0  ;;  %v995_v21 = vadd.f32 %v994_v52, %v702_v16  ;;  %v1046_v31 = vadd.f32 %v1045_v57, %v993_v2  ;;  %v710_v52 = vadd.f32 %v2760_v44, %v656_v51 }
 0x135   : > { %v998_v55 = vpop.f32.mrf.mxu1 }
 0x136   : > { %v1053_v1 = vpop.f32.mrf.mxu0  ;;  %v1048_v38 = vadd.f32 %v1047_v60, %v995_v21  ;;  %v999_v39 = vadd.f32 %v998_v55, %v706_v29 }
 0x137   : > { %v1000_v35 = vpop.f32.mrf.mxu1 }
 0x138   : > { %v2766_v5 = vpop.f32.mrf.mxu0  ;;  %v1001_v41 = vadd.f32 %v1000_v35, %v708_v34  ;;  %v1052_v56 = vadd.f32 %v1051_v62, %v999_v39 }
 0x139   : > { %v1002_v59 = vpop.f32.mrf.mxu1 }
 0x13a   : > { %v2768_v11 = vpop.f32.mrf.mxu0  ;;  %v1003_v57 = vadd.f32 %v1002_v59, %v710_v52  ;;  %v1054_v55 = vadd.f32 %v1053_v1, %v1001_v41 }
 0x13b   : > { %v2764_v61 = vpop.f32.mrf.mxu1 }
 0x13c   : > { %v1005_v44 = vadd.f32 %v2764_v61, %v712_v42  ;;  %v1056_v59 = vadd.f32 %v2766_v5, %v1003_v57 }
 0x14e   : > { %v1492_v63 = vpop.f32.mrf.mxu1 }
 0x150   : > { %v1494_v3 = vpop.f32.mrf.mxu1 }
 0x152   : > { %v1496_v7 = vpop.f32.mrf.mxu1 }
 0x154   : > { %v1498_v14 = vpop.f32.mrf.mxu1 }
 0x156   : > { %v1502_v28 = vpop.f32.mrf.mxu1 }
 0x158   : > { %v1504_v49 = vpop.f32.mrf.mxu1 }
 0x15a   : > { %v1506_v4 = vpop.f32.mrf.mxu1 }
 0x16c   : > { %v1439_v17 = vpop.f32.mrf.mxu0 }
 0x16d   : > { %v1493_v19 = vadd.f32 %v1492_v63, %v1439_v17 }
 0x16e   : > { %v1441_v22 = vpop.f32.mrf.mxu0 }
 0x16f   : > { %v1511_v24 = vadd.f32 %v1493_v19, %v1042_v18  ;;  %v1495_v25 = vadd.f32 %v1494_v3, %v1441_v22  ;;  %v1058_v18 = vadd.f32 %v2768_v11, %v1005_v44 }
 0x170   : > { %v1443_v36 = vpop.f32.mrf.mxu0 }
 0x171   : > { %v1531_v32 = vadd.f32 %v2773_v20, %v1511_v24  ;;  %v1512_v30 = vadd.f32 %v1495_v25, %v1044_v23  ;;  %v1497_v37 = vadd.f32 %v1496_v7, %v1443_v36 }
 0x172   : > { %v1445_v43 = vpop.f32.mrf.mxu0 }
 0x173   : > { %v1539_v45 = vmax.f32 %v1531_v32, 0.0  ;;  %v1532_v47 = vadd.f32 %v2775_v26, %v1512_v30  ;;  %v1513_v27 = vadd.f32 %v1497_v37, %v1046_v31  ;;  %v1499_v33 = vadd.f32 %v1498_v14, %v1445_v43  ;;  %v1508_v14 = vpop.f32.mrf.mxu1 }
 0x174   : > { %v1449_v40 = vpop.f32.mrf.mxu0 }
 0x175   : > { %v1540_v48 = vmax.f32 %v1532_v47, 0.0  ;;  %v1533_v50 = vadd.f32 %v2773_v20, %v1513_v27  ;;  %v1514_v54 = vadd.f32 %v1499_v33, %v1048_v38  ;;  %v1503_v35 = vadd.f32 %v1502_v28, %v1449_v40 }
 0x176   : > { %v1451_v60 = vpop.f32.mrf.mxu0  ;;  %v1547_v63 = vmax.f32 %v1539_v45, 0.0 }
 0x177   : > { %v1541_v0 = vmax.f32 %v1533_v50, 0.0  ;;  %v1534_v3 = vadd.f32 %v2775_v26, %v1514_v54  ;;  %v1505_v6 = vadd.f32 %v1504_v49, %v1451_v60  ;;  %v1548_v51 = vmax.f32 %v1540_v48, 0.0 }
 0x178   : > { %v1515_v7 = vadd.f32 %v1503_v35, %v1052_v56  ;;  %v1453_v46 = vpop.f32.mrf.mxu0 }
 0x179   : > { %v1549_v53 = vmax.f32 %v1547_v63, %v1541_v0  ;;  %v1542_v8 = vmax.f32 %v1534_v3, 0.0  ;;  %v1516_v9 = vadd.f32 %v1505_v6, %v1054_v55  ;;  %v1507_v10 = vadd.f32 %v1506_v4, %v1453_v46 }
 0x17a   : > { %v1535_v62 = vadd.f32 %v2773_v20, %v1515_v7  ;;  %v1455_v1 = vpop.f32.mrf.mxu0 }
 0x17b   : > { %v1559_v12 = vrot.slane %v1549_v53, 7  ;;  %v1572_v58 = vrot.slane %v1549_v53, 1  ;;  %v1550_v13 = vmax.f32 %v1548_v51, %v1542_v8  ;;  %v1536_v15 = vadd.f32 %v2775_v26, %v1516_v9 }
 0x17c   : > { %v1543_v61 = vmax.f32 %v1535_v62, 0.0  ;;  %v1517_v16 = vadd.f32 %v1507_v10, %v1056_v59  ;;  %v1509_v17 = vadd.f32 %v1508_v14, %v1455_v1 }
 0x17d   : > { %v1568_v2 = vsel %vm1567_vm2, 0.0, %v1559_v12  ;;  %v1560_v19 = vrot.slane %v1550_v13, 7  ;;  %v1573_v5 = vrot.slane %v1550_v13, 1  ;;  %v1581_v23 = vsel %vm1580_vm3, %v1572_v58, 0.0 }
 0x17e   : > { %v1585_v21 = vmax.f32 %v1549_v53, %v1568_v2  ;;  %v1537_v22 = vadd.f32 %v2773_v20, %v1517_v16  ;;  %v1544_v25 = vmax.f32 %v1536_v15, 0.0  ;;  %v1518_v28 = vadd.f32 %v1509_v17, %v1058_v18 }
 0x17f   : > { %v1569_v24 = vsel %vm1567_vm2, 0.0, %v1560_v19  ;;  %v1551_v36 = vmax.f32 %v1541_v0, %v1543_v61  ;;  %v1582_v11 = vsel %vm1580_vm3, %v1573_v5, 0.0 }
 0x180   : > { %v1589_v29 = vmax.f32 %v1585_v21, %v1581_v23  ;;  %v1586_v34 = vmax.f32 %v1550_v13, %v1569_v24  ;;  %v1545_v31 = vmax.f32 %v1537_v22, 0.0  ;;  %v1538_v32 = vadd.f32 %v2775_v26, %v1518_v28 }
 0x181   : > { %v1552_v39 = vmax.f32 %v1542_v8, %v1544_v25 }
 0x182   : > { %v1597_v30 = vrot.slane %v1589_v29, 1  ;;  %v1590_v37 = vmax.f32 %v1586_v34, %v1582_v11  ;;  %v1553_v38 = vmax.f32 %v1551_v36, %v1545_v31  ;;  %v1546_v20 = vmax.f32 %v1538_v32, 0.0 }
 0x184   : > { %v1598_v41 = vrot.slane %v1590_v37, 1  ;;  %v1561_v43 = vrot.slane %v1553_v38, 7  ;;  %v1574_v45 = vrot.slane %v1553_v38, 1  ;;  %v1554_v47 = vmax.f32 %v1552_v39, %v1546_v20 }
 0x185   : > { %v1605_v27 = vsel %vm1567_vm2, %v1589_v29, %v1597_v30 }
 0x186   : > { %v1606_v49 = vsel %vm1567_vm2, %v1590_v37, %v1598_v41  ;;  %v1570_v26 = vsel %vm1567_vm2, 0.0, %v1561_v43  ;;  %v1562_v40 = vrot.slane %v1554_v47, 7  ;;  %v1575_v42 = vrot.slane %v1554_v47, 1 }
 0x187   : > { %v1613_v33 = vcombine.low %v1605_v27, %v1606_v49  ;;  %v1587_v52 = vmax.f32 %v1553_v38, %v1570_v26  ;;  %v1583_v48 = vsel %vm1580_vm3, %v1574_v45, 0.0 }
 0x188   : > { %v1571_v54 = vsel %vm1567_vm2, 0.0, %v1562_v40  ;;  %v1584_v57 = vsel %vm1580_vm3, %v1575_v42, 0.0 }
 0x189   : > { %1949 = vst.sshfl [vmem:[%s170_s20] sm:$0x33 pattern:$0x76325410] %v1613_v33  ;;  %v1591_v50 = vmax.f32 %v1587_v52, %v1583_v48  ;;  %v1588_v56 = vmax.f32 %v1554_v47, %v1571_v54 }
 0x18b   : > { %v1599_v55 = vrot.slane %v1591_v50, 1  ;;  %v1592_v35 = vmax.f32 %v1588_v56, %v1584_v57 }
 0x18d   : > { %v1600_v60 = vrot.slane %v1592_v35, 1  ;;  %v1607_v63 = vsel %vm1567_vm2, %v1591_v50, %v1599_v55 }
 0x18f   : > { %v1608_v0 = vsel %vm1567_vm2, %v1592_v35, %v1600_v60 }
 0x190   : > { %v1621_v3 = vcombine.low %v1607_v63, %v1608_v0 }
 0x192   : > { %1950 = vst.sshfl [vmem:[%s170_s20 + $0x4] sm:$0x33 pattern:$0x76325410] %v1621_v3 }
 0x193 PF: > { %s13_s12 = sadd.s32 1, %s2199_s12  }
 0x194   : > { %p10_p4 = scmp.ge.s32.totalorder %s13_s12, 4  }
 0x196   :  { %12 = sbr.rel (!%p10_p4) target bundleno = 1 (0x1), region = 64 }

// kernel: cornet_z_forward.7
= control target key start
LH: loop header
LB: loop body
LE: loop exit
PB: predicated region body
PF: predicated region fallthrough
CT: control target
= control target key end

     0   :  { %12 = vsyncpa [#allocation3], 0  ;;  %s12194_s0 = inlined_call_operand.vmem [shape: bf16[2,40,256], index: 0, kind: input, shape index: {}]   ;;  %s12195_s1 = inlined_call_operand.vmem [shape: bf16[3,768,512], index: 1, kind: input, shape index: {}]   ;;  %s12196_s2 = inlined_call_operand.vmem [shape: f32[1,512], index: 2, kind: input, shape index: {}]   ;;  %s12197_s3 = inlined_call_operand.vmem [shape: bf16[512,1024], index: 3, kind: input, shape index: {}]   ;;  %s12198_s4 = inlined_call_operand.vmem [shape: f32[1,1024], index: 4, kind: input, shape index: {}]   ;;  %s12199_s5 = inlined_call_operand.hbm [shape: f32[2,1,1,512], index: 5, kind: output, shape index: {0}]   ;;  %s12200_s6 = inlined_call_operand.vmem [shape: f32[2,1,1024], index: 6, kind: output, shape index: {1}]  }
   0x1   :  { %14 = vsyncpa [#allocation3 + $0x1], 0  ;;  %s9154_s21 = smov 0   ;;  %s9156_s22 = smov 0  }
   0x2   :  { %s9158_s23 = smov 0   ;;  %s9160_s24 = smov 0  }
   0x3 LB: > { %s9175_s25 = sadd.s32 4294967295, %s9115_s24   ;;  %s6878_s26 = sadd.s32 4294967294, %s9115_s24   ;;  %s9115_s24 = sphi %s9160_s24, %s12206_s24   ;;  %s9111_s23 = sphi %s9158_s23, %s12205_s23   ;;  %s9107_s22 = sphi %s9156_s22, %s12204_s22   ;;  %s9103_s21 = sphi %s9154_s21, %s12203_s21  }
   0x4   : > { %s9179_s27 = sadd.s32 1, %s9115_s24   ;;  %s137_s28 = sadd.s32 1, %s9111_s23 }
   0x5   : > { %s134_s29 = ssub.s32 %s9115_s24, %s9179_s27  ;;  %p147_p0 = scmp.ne.s32.totalorder %s9111_s23, %s9107_s22 }
   0x6   : > { %p135_p1 = scmp.eq.s32.totalorder %s134_s29, 0  ;;  %p148_p2 = scmp.eq.s32.totalorder %s9175_s25, 1 }
   0x7   : > { %p153_p3 = scmp.ne.s32.totalorder %s9107_s22, %s9103_s21  ;;  %p154_p4 = scmp.eq.s32.totalorder %s6878_s26, 1 }
   0x8   : > { %s9190_s30 = scalar_select %p135_p1, %s9111_s23, %s137_s28  }
   0x9   : > { %p9192_p5 = por %p148_p2, %p147_p0  ;;  %p9196_p6 = por %p154_p4, %p153_p3 }
   0xa   : > { %p6881_p7 = scmp.ge.s32.totalorder %s9115_s24, 1  ;;  %p218_p8 = scmp.lt.s32.totalorder %s9115_s24, 3 }
   0xc   : > { %p219_p9 = pnand %p6881_p7, %p218_p8 }
   0xd   : > { %p252_p10 = scmp.lt.s32.totalorder (!%p219_p9), %s9175_s25, 1  ;;  %s243_s19 = sand.u32 (!%p219_p9), 1, %s9107_s22  }
   0xe   : > { %222 = sbr.rel (%p219_p9) target bundleno = 1218 (0x4c2), region = 40  ;;  %s11631_s9 = sshll.u32 (!%p219_p9), %s243_s19, 2 }
   0xf   : > { %s245_s15 = scalar_lea.vmem (!%p219_p9), [#allocation2], %s11631_s9  ;;  %s8126_s16 = sshll.u32 (!%p219_p9), %s9175_s25, 6 }
  0x10   : > { %s6792_s17 = sshll.u32 (!%p219_p9), %s245_s15, 4  ;;  %s6790_s20 = scalar_lea.hbm (!%p219_p9), %s12199_s5, %s8126_s16  ;;  %s6793_s17 = int_to_ptr.vmem [resolvable:$true] %s6792_s17 }
  0x11   : > { %s6774_s28 = scalar_lea.sflag (!%p219_p9), [#allocation3], %s243_s19  ;;  %s9055_s29 = scalar_lea.vmem (!%p219_p9), %s6793_s17, 64 }
  0x12   : > { %p9056_p11 = scmp.ne.s32.totalorder (!%p219_p9), %s6793_s17, %s9055_s29  ;;  %s9118_s10 = smov (!%p219_p9), [#allocation2]  }
  0x13   : > { %v8168_v0 = vld [vmem:[%s12195_s1 + $0x6e4] ss:$16 sps:$4 sm:$0xff]   ;;  %v8172_v2 = vld [vmem:[%s12195_s1 + $0x6e0] ss:$16 sps:$4 sm:$0xff]   ;;  %s9312_s26 = scalar_select %p252_p10, %s9175_s25, 1  ;;  %vm312_vm1 = vcmask 1046528  }
  0x14   : > { %v8170_v1 = vld [vmem:[%s12195_s1 + $0x8e4] ss:$16 sps:$4 sm:$0xff]   ;;  %1720 = vmatprep.subr.bf16.mxu0 %v8168_v0  ;;  %v8173_v3 = vld [vmem:[%s12195_s1 + $0x8e0] ss:$16 sps:$4 sm:$0xff]   ;;  %vm280_vm0 = vsmask.f32 7424  ;;  %p9057_p12 = pnand %p9056_p11, %p9192_p5 }
  0x15   : > { %1763 = vmatprep.subr.bf16.mxu1 %v8170_v1  ;;  %v8174_v4 = vld [vmem:[%s12195_s1 + $0x6c4] ss:$16 sps:$4 sm:$0xff]   ;;  %1721 = vmatpush1.bf16.msra.mxu0 %v8172_v2  ;;  %v8178_v6 = vld [vmem:[%s12195_s1 + $0x6c0] ss:$16 sps:$4 sm:$0xff]   ;;  %s8127_s13 = smul.u32 40, %s9312_s26  ;;  %vm4737_vm2 = vcmask 1040384  }
  0x16   : > { %1764 = vmatpush1.bf16.msra.mxu1 %v8173_v3  ;;  %v8176_v5 = vld [vmem:[%s12195_s1 + $0x8c4] ss:$16 sps:$4 sm:$0xff]   ;;  %1722 = vmatprep.subr.bf16.mxu0 %v8174_v4  ;;  %v8179_v7 = vld [vmem:[%s12195_s1 + $0x8c0] ss:$16 sps:$4 sm:$0xff]   ;;  %p9058_p13 = pneg %p9057_p12  ;;  %s9059_s11 = sshll.u32 %s9118_s10, 4  ;;  %s9060_s11 = int_to_ptr.vmem [resolvable:$false] %s9059_s11 }
  0x17   : > { %1765 = vmatprep.subr.bf16.mxu1 %v8176_v5  ;;  %v8180_v8 = vld [vmem:[%s12195_s1 + $0x6a4] ss:$16 sps:$4 sm:$0xff]   ;;  %v8184_v10 = vld [vmem:[%s12195_s1 + $0x6a0] ss:$16 sps:$4 sm:$0xff]   ;;  %s9342_s12 = scalar_lea.vmem %s12194_s0, %s8127_s13  ;;  %p9062_p0 = scmp.lt.s32.totalorder %s6793_s17, %s9060_s11 }
  0x18   : > { %v8182_v9 = vld [vmem:[%s12195_s1 + $0x8a4] ss:$16 sps:$4 sm:$0xff]   ;;  %v8185_v11 = vld [vmem:[%s12195_s1 + $0x8a0] ss:$16 sps:$4 sm:$0xff]   ;;  %v262_v47 = vld [vmem:[%s9342_s12 + $0x8] sm:$0xff] }
  0x19   : > { %1723 = vmatpush1.bf16.msra.mxu0 %v8178_v6  ;;  %v8186_v12 = vld [vmem:[%s12195_s1 + $0x684] ss:$16 sps:$4 sm:$0xff]   ;;  %v8190_v14 = vld [vmem:[%s12195_s1 + $0x680] ss:$16 sps:$4 sm:$0xff]   ;;  %v514_v49 = vld [vmem:[%s9342_s12 + $0x18] sm:$0x11] }
  0x1a   : > { %1766 = vmatpush1.bf16.msra.mxu1 %v8179_v7  ;;  %1724 = vmatprep.subr.bf16.mxu0 %v8180_v8  ;;  %v8188_v13 = vld [vmem:[%s12195_s1 + $0x884] ss:$16 sps:$4 sm:$0xff]   ;;  %v8191_v15 = vld [vmem:[%s12195_s1 + $0x880] ss:$16 sps:$4 sm:$0xff]   ;;  %v9367_v53 = vcombine.high %v514_v49, %v514_v49  ;;  %v9400_v5 = vcombine.low %v514_v49, %v514_v49  ;;  %v9518_v49 = vld [vmem:[%s9342_s12 + $0x8] sm:$0xee] }
  0x1b   : > { %1767 = vmatprep.subr.bf16.mxu1 %v8182_v9  ;;  %v8192_v16 = vld [vmem:[%s12195_s1 + $0x664] ss:$16 sps:$4 sm:$0xff]   ;;  %v8196_v18 = vld [vmem:[%s12195_s1 + $0x660] ss:$16 sps:$4 sm:$0xff]  }
  0x1c   : > { %v8194_v17 = vld [vmem:[%s12195_s1 + $0x864] ss:$16 sps:$4 sm:$0xff]   ;;  %v8197_v19 = vld [vmem:[%s12195_s1 + $0x860] ss:$16 sps:$4 sm:$0xff]   ;;  %v548_v57 = vshll.u32 %v9367_v53, 16 }
  0x1d   : > { %1725 = vmatpush1.bf16.msra.mxu0 %v8184_v10  ;;  %v8198_v20 = vld [vmem:[%s12195_s1 + $0x644] ss:$16 sps:$4 sm:$0xff]   ;;  %v8202_v22 = vld [vmem:[%s12195_s1 + $0x640] ss:$16 sps:$4 sm:$0xff]  }
  0x1e   : > { %1768 = vmatpush1.bf16.msra.mxu1 %v8185_v11  ;;  %1726 = vmatprep.subr.bf16.mxu0 %v8186_v12  ;;  %v8200_v21 = vld [vmem:[%s12195_s1 + $0x844] ss:$16 sps:$4 sm:$0xff]   ;;  %v8203_v23 = vld [vmem:[%s12195_s1 + $0x840] ss:$16 sps:$4 sm:$0xff]   ;;  %v550_v61 = vrot.slane %v548_v57, 1 }
  0x1f   : > { %1769 = vmatprep.subr.bf16.mxu1 %v8188_v13  ;;  %v8204_v24 = vld [vmem:[%s12195_s1 + $0x624] ss:$16 sps:$4 sm:$0xff]   ;;  %v8208_v26 = vld [vmem:[%s12195_s1 + $0x620] ss:$16 sps:$4 sm:$0xff]   ;;  %v536_v13 = vshll.u32 %v9400_v5, 16 }
  0x20   : > { %v8206_v25 = vld [vmem:[%s12195_s1 + $0x824] ss:$16 sps:$4 sm:$0xff]   ;;  %v8209_v27 = vld [vmem:[%s12195_s1 + $0x820] ss:$16 sps:$4 sm:$0xff]  }
  0x21   : > { %1727 = vmatpush1.bf16.msra.mxu0 %v8190_v14  ;;  %v8210_v28 = vld [vmem:[%s12195_s1 + $0x604] ss:$16 sps:$4 sm:$0xff]   ;;  %v8214_v30 = vld [vmem:[%s12195_s1 + $0x600] ss:$16 sps:$4 sm:$0xff]  }
  0x22   : > { %1770 = vmatpush1.bf16.msra.mxu1 %v8191_v15  ;;  %1728 = vmatprep.subr.bf16.mxu0 %v8192_v16  ;;  %v8212_v29 = vld [vmem:[%s12195_s1 + $0x804] ss:$16 sps:$4 sm:$0xff]   ;;  %v8215_v31 = vld [vmem:[%s12195_s1 + $0x800] ss:$16 sps:$4 sm:$0xff]  }
  0x23   : > { %1771 = vmatprep.subr.bf16.mxu1 %v8194_v17  ;;  %v8216_v32 = vld [vmem:[%s12195_s1 + $0x7e4] ss:$16 sps:$4 sm:$0xff]   ;;  %v8220_v34 = vld [vmem:[%s12195_s1 + $0x7e0] ss:$16 sps:$4 sm:$0xff]  }
  0x24   : > { %v8218_v33 = vld [vmem:[%s12195_s1 + $0x9e4] ss:$16 sps:$4 sm:$0xff]   ;;  %v8221_v35 = vld [vmem:[%s12195_s1 + $0x9e0] ss:$16 sps:$4 sm:$0xff]  }
  0x25   : > { %1729 = vmatpush1.bf16.msra.mxu0 %v8196_v18  ;;  %v8222_v36 = vld [vmem:[%s12195_s1 + $0x7c4] ss:$16 sps:$4 sm:$0xff]   ;;  %v8226_v38 = vld [vmem:[%s12195_s1 + $0x7c0] ss:$16 sps:$4 sm:$0xff]  }
  0x26   : > { %1772 = vmatpush1.bf16.msra.mxu1 %v8197_v19  ;;  %1730 = vmatprep.subr.bf16.mxu0 %v8198_v20  ;;  %v8224_v37 = vld [vmem:[%s12195_s1 + $0x9c4] ss:$16 sps:$4 sm:$0xff]   ;;  %v8227_v39 = vld [vmem:[%s12195_s1 + $0x9c0] ss:$16 sps:$4 sm:$0xff]   ;;  %v538_v19 = vrot.slane %v536_v13, 1 }
  0x27   : > { %1773 = vmatprep.subr.bf16.mxu1 %v8200_v21  ;;  %v8228_v40 = vld [vmem:[%s12195_s1 + $0x7a4] ss:$16 sps:$4 sm:$0xff]   ;;  %v8232_v42 = vld [vmem:[%s12195_s1 + $0x7a0] ss:$16 sps:$4 sm:$0xff]   ;;  %v8273_v21 = vld [vmem:[%s12195_s1 + $0x6ec] ss:$16 sps:$4 sm:$0xff]  }
  0x28   : > { %v8230_v41 = vld [vmem:[%s12195_s1 + $0x9a4] ss:$16 sps:$4 sm:$0xff]   ;;  %v8233_v43 = vld [vmem:[%s12195_s1 + $0x9a0] ss:$16 sps:$4 sm:$0xff]   ;;  %v8337_v13 = vld [vmem:[%s12195_s1 + $0x788] ss:$16 sps:$4 sm:$0xff]  }
  0x29   : > { %1731 = vmatpush1.bf16.msra.mxu0 %v8202_v22  ;;  %v8234_v44 = vld [vmem:[%s12195_s1 + $0x784] ss:$16 sps:$4 sm:$0xff]   ;;  %v8238_v46 = vld [vmem:[%s12195_s1 + $0x780] ss:$16 sps:$4 sm:$0xff]  }
  0x2a   : > { %1774 = vmatpush1.bf16.msra.mxu1 %v8203_v23  ;;  %1732 = vmatprep.subr.bf16.mxu0 %v8204_v24  ;;  %v8236_v45 = vld [vmem:[%s12195_s1 + $0x984] ss:$16 sps:$4 sm:$0xff]   ;;  %v8239_v50 = vld [vmem:[%s12195_s1 + $0x980] ss:$16 sps:$4 sm:$0xff]   ;;  %v8271_v24 = vld [vmem:[%s12195_s1 + $0x6e8] ss:$16 sps:$4 sm:$0xff]  }
  0x2b   : > { %1775 = vmatprep.subr.bf16.mxu1 %v8206_v25  ;;  %v9355_v48 = vld [vmem:[%s9342_s12 + $0x10] sm:$0xff] }
  0x2c   : > { %v8240_v51 = vld [vmem:[%s12195_s1 + $0x764] ss:$16 sps:$4 sm:$0xff]   ;;  %v9365_v52 = vcombine.high %v262_v47, %v9355_v48  ;;  %v8244_v58 = vld [vmem:[%s12195_s1 + $0x760] ss:$16 sps:$4 sm:$0xff]   ;;  %v9383_v62 = vcombine.low %v262_v47, %v9355_v48 }
  0x2d   : > { %1733 = vmatpush1.bf16.msra.mxu0 %v8208_v26  ;;  %v8242_v54 = vld [vmem:[%s12195_s1 + $0x964] ss:$16 sps:$4 sm:$0xff]   ;;  %v8245_v59 = vld [vmem:[%s12195_s1 + $0x960] ss:$16 sps:$4 sm:$0xff]   ;;  %v8279_v26 = vld [vmem:[%s12195_s1 + $0x6cc] ss:$16 sps:$4 sm:$0xff]  }
  0x2e   : > { %1776 = vmatpush1.bf16.msra.mxu1 %v8209_v27  ;;  %1734 = vmatprep.subr.bf16.mxu0 %v8210_v28  ;;  %v541_v55 = vshrl.u32 %v9365_v52, 16  ;;  %v543_v56 = vshll.u32 %v9365_v52, 16  ;;  %v8246_v63 = vld [vmem:[%s12195_s1 + $0x744] ss:$16 sps:$4 sm:$0xff]   ;;  %v8250_v2 = vld [vmem:[%s12195_s1 + $0x740] ss:$16 sps:$4 sm:$0xff]  }
  0x2f   : > { %1777 = vmatprep.subr.bf16.mxu1 %v8212_v29  ;;  %1752 = vmatprep.mubr.bf16.mxu0 %v9365_v52  ;;  %v8248_v0 = vld [vmem:[%s12195_s1 + $0x944] ss:$16 sps:$4 sm:$0xff]   ;;  %v8251_v3 = vld [vmem:[%s12195_s1 + $0x940] ss:$16 sps:$4 sm:$0xff]   ;;  %v531_v6 = vshll.u32 %v9383_v62, 16  ;;  %v529_v11 = vshrl.u32 %v9383_v62, 16 }
  0x30   : > { %v545_v60 = vrot.slane %v543_v56, 1  ;;  %v8252_v7 = vld [vmem:[%s12195_s1 + $0x724] ss:$16 sps:$4 sm:$0xff]   ;;  %v8256_v9 = vld [vmem:[%s12195_s1 + $0x720] ss:$16 sps:$4 sm:$0xff]  }
  0x31   : > { %1735 = vmatpush1.bf16.msra.mxu0 %v8214_v30  ;;  %v8254_v8 = vld [vmem:[%s12195_s1 + $0x924] ss:$16 sps:$4 sm:$0xff]   ;;  %v8257_v10 = vld [vmem:[%s12195_s1 + $0x920] ss:$16 sps:$4 sm:$0xff]   ;;  %v533_v12 = vrot.slane %v531_v6, 1 }
  0x32   : > { %1778 = vmatpush1.bf16.msra.mxu1 %v8215_v31  ;;  %1736 = vmatprep.subr.bf16.mxu0 %v8216_v32  ;;  %v546_v1 = vor.u32 %v545_v60, %v541_v55  ;;  %v8258_v14 = vld [vmem:[%s12195_s1 + $0x704] ss:$16 sps:$4 sm:$0xff]   ;;  %v8262_v16 = vld [vmem:[%s12195_s1 + $0x700] ss:$16 sps:$4 sm:$0xff]   ;;  %v8277_v28 = vld [vmem:[%s12195_s1 + $0x6c8] ss:$16 sps:$4 sm:$0xff]  }
  0x33   : > { %1779 = vmatprep.subr.bf16.mxu1 %v8218_v33  ;;  %v8260_v15 = vld [vmem:[%s12195_s1 + $0x904] ss:$16 sps:$4 sm:$0xff]   ;;  %v8263_v17 = vld [vmem:[%s12195_s1 + $0x900] ss:$16 sps:$4 sm:$0xff]   ;;  %v534_v18 = vor.u32 %v533_v12, %v529_v11  ;;  %v8285_v30 = vld [vmem:[%s12195_s1 + $0x6ac] ss:$16 sps:$4 sm:$0xff]  }
  0x34   : > { %v9398_v4 = vsel %vm280_vm0, %v546_v1, %v550_v61  ;;  %v8270_v20 = vld [vmem:[%s12195_s1 + $0xae4] ss:$16 sps:$4 sm:$0xff]   ;;  %v8268_v23 = vld [vmem:[%s12195_s1 + $0xae0] ss:$16 sps:$4 sm:$0xff]   ;;  %v8283_v32 = vld [vmem:[%s12195_s1 + $0x6a8] ss:$16 sps:$4 sm:$0xff]  }
  0x35   : > { %1737 = vmatpush2.bf16.msra.mxu0 %v8220_v34  ;;  %1795 = vmatprep.mubr.bf16.mxu1 %v9398_v4  ;;  %v9437_v22 = vsel %vm280_vm0, %v534_v18, %v538_v19  ;;  %v8276_v25 = vld [vmem:[%s12195_s1 + $0xac4] ss:$16 sps:$4 sm:$0xff]   ;;  %v8274_v27 = vld [vmem:[%s12195_s1 + $0xac0] ss:$16 sps:$4 sm:$0xff]   ;;  %v8291_v34 = vld [vmem:[%s12195_s1 + $0x68c] ss:$16 sps:$4 sm:$0xff]  }
  0x36   : > { %1780 = vmatpush2.bf16.msra.mxu1 %v8221_v35  ;;  %1738 = vmatprep.subr.bf16.mxu0 %v8222_v36  ;;  %v8282_v29 = vld [vmem:[%s12195_s1 + $0xaa4] ss:$16 sps:$4 sm:$0xff]   ;;  %v8280_v31 = vld [vmem:[%s12195_s1 + $0xaa0] ss:$16 sps:$4 sm:$0xff]   ;;  %v8289_v36 = vld [vmem:[%s12195_s1 + $0x688] ss:$16 sps:$4 sm:$0xff]  }
  0x37   : > { %1781 = vmatprep.subr.bf16.mxu1 %v8224_v37  ;;  %v8288_v33 = vld [vmem:[%s12195_s1 + $0xa84] ss:$16 sps:$4 sm:$0xff]   ;;  %v8286_v35 = vld [vmem:[%s12195_s1 + $0xa80] ss:$16 sps:$4 sm:$0xff]   ;;  %v8315_v55 = vld [vmem:[%s12195_s1 + $0x60c] ss:$16 sps:$4 sm:$0xff]  }
  0x38   : > { %v8294_v37 = vld [vmem:[%s12195_s1 + $0xa64] ss:$16 sps:$4 sm:$0xff]   ;;  %v8304_v47 = vld [vmem:[%s12195_s1 + $0xa20] ss:$16 sps:$4 sm:$0xff]   ;;  %v8321_v60 = vld [vmem:[%s12195_s1 + $0x7ec] ss:$16 sps:$4 sm:$0xff]  }
  0x39   : > { %1739 = vmatpush2.bf16.msra.mxu0 %v8226_v38  ;;  %v8297_v38 = vld [vmem:[%s12195_s1 + $0x66c] ss:$16 sps:$4 sm:$0xff]   ;;  %v8310_v57 = vld [vmem:[%s12195_s1 + $0xa00] ss:$16 sps:$4 sm:$0xff]   ;;  %v8330_v6 = vld [vmem:[%s12195_s1 + $0xba4] ss:$16 sps:$4 sm:$0xff]  }
  0x3a   : > { %1782 = vmatpush2.bf16.msra.mxu1 %v8227_v39  ;;  %1740 = vmatprep.subr.bf16.mxu0 %v8228_v40  ;;  %v8292_v39 = vld [vmem:[%s12195_s1 + $0xa60] ss:$16 sps:$4 sm:$0xff]   ;;  %v8295_v40 = vld [vmem:[%s12195_s1 + $0x668] ss:$16 sps:$4 sm:$0xff]   ;;  %v8327_v1 = vld [vmem:[%s12195_s1 + $0x7cc] ss:$16 sps:$4 sm:$0xff]  }
  0x3b   : > { %1783 = vmatprep.subr.bf16.mxu1 %v8230_v41  ;;  %v8300_v41 = vld [vmem:[%s12195_s1 + $0xa44] ss:$16 sps:$4 sm:$0xff]   ;;  %v8316_v61 = vld [vmem:[%s12195_s1 + $0xbe0] ss:$16 sps:$4 sm:$0xff]   ;;  %v8339_v11 = vld [vmem:[%s12195_s1 + $0x78c] ss:$16 sps:$4 sm:$0xff]  }
  0x3c   : > { %v8334_v12 = vld [vmem:[%s12195_s1 + $0xb80] ss:$16 sps:$4 sm:$0xff]   ;;  %v8348_v18 = vld [vmem:[%s12195_s1 + $0xb44] ss:$16 sps:$4 sm:$0xff]   ;;  %v8351_v19 = vld [vmem:[%s12195_s1 + $0x74c] ss:$16 sps:$4 sm:$0xff]  }
  0x3d   : > { %1741 = vmatpush2.bf16.msra.mxu0 %v8232_v42  ;;  %v8303_v42 = vld [vmem:[%s12195_s1 + $0x64c] ss:$16 sps:$4 sm:$0xff]  }
  0x3e   : > { %1784 = vmatpush2.bf16.msra.mxu1 %v8233_v43  ;;  %1742 = vmatprep.subr.bf16.mxu0 %v8234_v44  ;;  %v8298_v43 = vld [vmem:[%s12195_s1 + $0xa40] ss:$16 sps:$4 sm:$0xff]   ;;  %v8301_v44 = vld [vmem:[%s12195_s1 + $0x648] ss:$16 sps:$4 sm:$0xff]  }
  0x3f   : > { %1785 = vmatprep.subr.bf16.mxu1 %v8236_v45  ;;  %v8306_v45 = vld [vmem:[%s12195_s1 + $0xa24] ss:$16 sps:$4 sm:$0xff]  }
  0x41   : > { %1743 = vmatpush2.bf16.msra.mxu0 %v8238_v46  ;;  %v8309_v46 = vld [vmem:[%s12195_s1 + $0x62c] ss:$16 sps:$4 sm:$0xff]  }
  0x42   : > { %1786 = vmatpush2.bf16.msra.mxu1 %v8239_v50  ;;  %1744 = vmatprep.subr.bf16.mxu0 %v8240_v51  ;;  %v8307_v50 = vld [vmem:[%s12195_s1 + $0x628] ss:$16 sps:$4 sm:$0xff]   ;;  %v8312_v51 = vld [vmem:[%s12195_s1 + $0xa04] ss:$16 sps:$4 sm:$0xff]  }
  0x43   : > { %1787 = vmatprep.subr.bf16.mxu1 %v8242_v54  ;;  %v563_v54 = vrot.slane %v9367_v53, 1  ;;  %v8318_v53 = vld [vmem:[%s12195_s1 + $0xbe4] ss:$16 sps:$4 sm:$0xff]  }
  0x45   : > { %1745 = vmatpush2.bf16.msra.mxu0 %v8244_v58  ;;  %v8313_v58 = vld [vmem:[%s12195_s1 + $0x608] ss:$16 sps:$4 sm:$0xff]  }
  0x46   : > { %1788 = vmatpush2.bf16.msra.mxu1 %v8245_v59  ;;  %1746 = vmatprep.subr.bf16.mxu0 %v8246_v63  ;;  %v8319_v63 = vld [vmem:[%s12195_s1 + $0x7e8] ss:$16 sps:$4 sm:$0xff]  }
  0x47   : > { %1789 = vmatprep.subr.bf16.mxu1 %v8248_v0  ;;  %v8324_v0 = vld [vmem:[%s12195_s1 + $0xbc4] ss:$16 sps:$4 sm:$0xff]  }
  0x49   : > { %1747 = vmatpush2.bf16.msra.mxu0 %v8250_v2  ;;  %v8322_v2 = vld [vmem:[%s12195_s1 + $0xbc0] ss:$16 sps:$4 sm:$0xff]  }
  0x4a   : > { %1790 = vmatpush2.bf16.msra.mxu1 %v8251_v3  ;;  %1748 = vmatprep.subr.bf16.mxu0 %v8252_v7  ;;  %v8325_v3 = vld [vmem:[%s12195_s1 + $0x7c8] ss:$16 sps:$4 sm:$0xff]   ;;  %v8333_v7 = vld [vmem:[%s12195_s1 + $0x7ac] ss:$16 sps:$4 sm:$0xff]  }
  0x4b   : > { %1791 = vmatprep.subr.bf16.mxu1 %v8254_v8  ;;  %v8328_v8 = vld [vmem:[%s12195_s1 + $0xba0] ss:$16 sps:$4 sm:$0xff]  }
  0x4d   : > { %1749 = vmatpush2.bf16.msra.mxu0 %v8256_v9  ;;  %v8331_v9 = vld [vmem:[%s12195_s1 + $0x7a8] ss:$16 sps:$4 sm:$0xff]  }
  0x4e   : > { %1792 = vmatpush2.bf16.msra.mxu1 %v8257_v10  ;;  %1750 = vmatprep.subr.bf16.mxu0 %v8258_v14  ;;  %v8336_v10 = vld [vmem:[%s12195_s1 + $0xb84] ss:$16 sps:$4 sm:$0xff]  }
  0x4f   : > { %1793 = vmatprep.subr.bf16.mxu1 %v8260_v15  ;;  %v8342_v14 = vld [vmem:[%s12195_s1 + $0xb64] ss:$16 sps:$4 sm:$0xff]   ;;  %v8345_v15 = vld [vmem:[%s12195_s1 + $0x76c] ss:$16 sps:$4 sm:$0xff]  }
  0x51   : > { %1751 = vmatpush2.bf16.msra.mxu0 %v8262_v16  ;;  %v8340_v16 = vld [vmem:[%s12195_s1 + $0xb60] ss:$16 sps:$4 sm:$0xff]  }
  0x52   : > { %1794 = vmatpush2.bf16.msra.mxu1 %v8263_v17  ;;  %1806 = vmatprep.subr.bf16.mxu0 %v8270_v20  ;;  %v8343_v17 = vld [vmem:[%s12195_s1 + $0x768] ss:$16 sps:$4 sm:$0xff]   ;;  %v8346_v20 = vld [vmem:[%s12195_s1 + $0xb40] ss:$16 sps:$4 sm:$0xff]  }
  0x53   : > { %1849 = vmatprep.subr.bf16.mxu1 %v8273_v21  ;;  %v8349_v21 = vld [vmem:[%s12195_s1 + $0x748] ss:$16 sps:$4 sm:$0xff]  }
  0x54   : > { %1753 = vmatmul.mubr.bf16.vlgmr.msra.gmra.mxu0 %v9383_v62 }
  0x55   : > { %1796 = vmatmul.mubr.bf16.vlgmr.msra.gmra.mxu1 %v9437_v22  ;;  %1807 = vmatpush1.bf16.msra.mxu0 %v8268_v23  ;;  %v8354_v23 = vld [vmem:[%s12195_s1 + $0xb24] ss:$16 sps:$4 sm:$0xff]  }
  0x56   : > { %1850 = vmatpush1.bf16.msra.mxu1 %v8271_v24  ;;  %1808 = vmatprep.subr.bf16.mxu0 %v8276_v25  ;;  %v8357_v24 = vld [vmem:[%s12195_s1 + $0x72c] ss:$16 sps:$4 sm:$0xff]   ;;  %v8352_v25 = vld [vmem:[%s12195_s1 + $0xb20] ss:$16 sps:$4 sm:$0xff]  }
  0x57   : > { %1851 = vmatprep.subr.bf16.mxu1 %v8279_v26  ;;  %1881 = vmatprep.mubr.bf16.mxu1 %v9365_v52  ;;  %v6896_v52 = vcombine.high %v9518_v49, %v9355_v48  ;;  %v8355_v26 = vld [vmem:[%s12195_s1 + $0x728] ss:$16 sps:$4 sm:$0xff]  }
  0x59   : > { %1809 = vmatpush1.bf16.msra.mxu0 %v8274_v27  ;;  %v562_v56 = vrot.slane %v6896_v52, 1  ;;  %v8360_v27 = vld [vmem:[%s12195_s1 + $0xb04] ss:$16 sps:$4 sm:$0xff]   ;;  %v8398_v52 = vld [vmem:[%s12195_s1 + $0x84c] ss:$16 sps:$4 sm:$0xff]  }
  0x5a   : > { %1852 = vmatpush1.bf16.msra.mxu1 %v8277_v28  ;;  %1810 = vmatprep.subr.bf16.mxu0 %v8282_v29  ;;  %v6895_v28 = vcombine.low %v9518_v49, %v9355_v48  ;;  %v8363_v29 = vld [vmem:[%s12195_s1 + $0x70c] ss:$16 sps:$4 sm:$0xff]  }
  0x5b   : > { %1853 = vmatprep.subr.bf16.mxu1 %v8285_v30  ;;  %v9542_v59 = vsel %vm312_vm1, %v562_v56, %v563_v54  ;;  %v8358_v30 = vld [vmem:[%s12195_s1 + $0xb00] ss:$16 sps:$4 sm:$0xff]   ;;  %v8368_v48 = vld [vmem:[%s12195_s1 + $0x8ec] ss:$16 sps:$4 sm:$0xff]   ;;  %v8399_v56 = vld [vmem:[%s12195_s1 + $0xa48] ss:$16 sps:$4 sm:$0xff]  }
  0x5c   : > { %1838 = vmatprep.mubr.bf16.mxu0 %v9542_v59  ;;  %v8395_v49 = vld [vmem:[%s12195_s1 + $0xa6c] ss:$16 sps:$4 sm:$0xff]  }
  0x5d   : > { %1811 = vmatpush1.bf16.msra.mxu0 %v8280_v31  ;;  %v560_v31 = vrot.slane %v9400_v5, 1  ;;  %v8366_v5 = vld [vmem:[%s12195_s1 + $0x8e8] ss:$16 sps:$4 sm:$0xff]   ;;  %v8401_v54 = vld [vmem:[%s12195_s1 + $0xa4c] ss:$16 sps:$4 sm:$0xff]  }
  0x5e   : > { %1854 = vmatpush1.bf16.msra.mxu1 %v8283_v32  ;;  %1812 = vmatprep.subr.bf16.mxu0 %v8288_v33  ;;  %v8361_v32 = vld [vmem:[%s12195_s1 + $0x708] ss:$16 sps:$4 sm:$0xff]   ;;  %v559_v33 = vrot.slane %v6895_v28, 1 }
  0x5f   : > { %1855 = vmatprep.subr.bf16.mxu1 %v8291_v34  ;;  %v8371_v34 = vld [vmem:[%s12195_s1 + $0xaec] ss:$16 sps:$4 sm:$0xff]   ;;  %v8447_v28 = vld [vmem:[%s12195_s1 + $0xb48] ss:$16 sps:$4 sm:$0xff]  }
  0x61   : > { %1813 = vmatpush1.bf16.msra.mxu0 %v8286_v35  ;;  %v9651_v35 = vsel %vm312_vm1, %v559_v33, %v560_v31  ;;  %v8455_v33 = vld [vmem:[%s12195_s1 + $0xb2c] ss:$16 sps:$4 sm:$0xff]  }
  0x62   : > { %1856 = vmatpush1.bf16.msra.mxu1 %v8289_v36  ;;  %1814 = vmatprep.subr.bf16.mxu0 %v8294_v37  ;;  %v8369_v36 = vld [vmem:[%s12195_s1 + $0xae8] ss:$16 sps:$4 sm:$0xff]   ;;  %v8374_v37 = vld [vmem:[%s12195_s1 + $0x8cc] ss:$16 sps:$4 sm:$0xff]  }
  0x63   : > { %1857 = vmatprep.subr.bf16.mxu1 %v8297_v38  ;;  %v8377_v38 = vld [vmem:[%s12195_s1 + $0xacc] ss:$16 sps:$4 sm:$0xff]  }
  0x65   : > { %1815 = vmatpush1.bf16.msra.mxu0 %v8292_v39  ;;  %v8372_v39 = vld [vmem:[%s12195_s1 + $0x8c8] ss:$16 sps:$4 sm:$0xff]  }
  0x66   : > { %1858 = vmatpush1.bf16.msra.mxu1 %v8295_v40  ;;  %1816 = vmatprep.subr.bf16.mxu0 %v8300_v41  ;;  %v8375_v40 = vld [vmem:[%s12195_s1 + $0xac8] ss:$16 sps:$4 sm:$0xff]   ;;  %v8380_v41 = vld [vmem:[%s12195_s1 + $0x8ac] ss:$16 sps:$4 sm:$0xff]  }
  0x67   : > { %1859 = vmatprep.subr.bf16.mxu1 %v8303_v42  ;;  %v8378_v42 = vld [vmem:[%s12195_s1 + $0x8a8] ss:$16 sps:$4 sm:$0xff]  }
  0x69   : > { %1817 = vmatpush1.bf16.msra.mxu0 %v8298_v43  ;;  %v8381_v43 = vld [vmem:[%s12195_s1 + $0xaa8] ss:$16 sps:$4 sm:$0xff]  }
  0x6a   : > { %1860 = vmatpush1.bf16.msra.mxu1 %v8301_v44  ;;  %1818 = vmatprep.subr.bf16.mxu0 %v8306_v45  ;;  %v8386_v44 = vld [vmem:[%s12195_s1 + $0x88c] ss:$16 sps:$4 sm:$0xff]   ;;  %v8384_v45 = vld [vmem:[%s12195_s1 + $0x888] ss:$16 sps:$4 sm:$0xff]  }
  0x6b   : > { %1861 = vmatprep.subr.bf16.mxu1 %v8309_v46  ;;  %v8387_v46 = vld [vmem:[%s12195_s1 + $0xa88] ss:$16 sps:$4 sm:$0xff]  }
  0x6d   : > { %1819 = vmatpush1.bf16.msra.mxu0 %v8304_v47  ;;  %v8392_v47 = vld [vmem:[%s12195_s1 + $0x86c] ss:$16 sps:$4 sm:$0xff]  }
  0x6e   : > { %1862 = vmatpush1.bf16.msra.mxu1 %v8307_v50  ;;  %1820 = vmatprep.subr.bf16.mxu0 %v8312_v51  ;;  %v8390_v50 = vld [vmem:[%s12195_s1 + $0x868] ss:$16 sps:$4 sm:$0xff]  }
  0x6f   : > { %1863 = vmatprep.subr.bf16.mxu1 %v8315_v55  ;;  %v8393_v51 = vld [vmem:[%s12195_s1 + $0xa68] ss:$16 sps:$4 sm:$0xff]  }
  0x70   : > { %v8396_v55 = vld [vmem:[%s12195_s1 + $0x848] ss:$16 sps:$4 sm:$0xff]  }
  0x71   : > { %1821 = vmatpush1.bf16.msra.mxu0 %v8310_v57  ;;  %v8404_v57 = vld [vmem:[%s12195_s1 + $0x82c] ss:$16 sps:$4 sm:$0xff]  }
  0x72   : > { %1864 = vmatpush1.bf16.msra.mxu1 %v8313_v58  ;;  %1822 = vmatprep.subr.bf16.mxu0 %v8318_v53  ;;  %v8407_v58 = vld [vmem:[%s12195_s1 + $0xa2c] ss:$16 sps:$4 sm:$0xff]   ;;  %v8402_v53 = vld [vmem:[%s12195_s1 + $0x828] ss:$16 sps:$4 sm:$0xff]  }
  0x73   : > { %1865 = vmatprep.subr.bf16.mxu1 %v8321_v60  ;;  %v8410_v60 = vld [vmem:[%s12195_s1 + $0x80c] ss:$16 sps:$4 sm:$0xff]  }
  0x75   : > { %1823 = vmatpush2.bf16.msra.mxu0 %v8316_v61  ;;  %v8413_v61 = vld [vmem:[%s12195_s1 + $0xa0c] ss:$16 sps:$4 sm:$0xff]  }
  0x76   : > { %1866 = vmatpush2.bf16.msra.mxu1 %v8319_v63  ;;  %1824 = vmatprep.subr.bf16.mxu0 %v8324_v0  ;;  %v8408_v63 = vld [vmem:[%s12195_s1 + $0x808] ss:$16 sps:$4 sm:$0xff]  }
  0x77   : > { %1867 = vmatprep.subr.bf16.mxu1 %v8327_v1  ;;  %v8411_v0 = vld [vmem:[%s12195_s1 + $0xa08] ss:$16 sps:$4 sm:$0xff]   ;;  %v8416_v1 = vld [vmem:[%s12195_s1 + $0x9ec] ss:$16 sps:$4 sm:$0xff]  }
  0x79   : > { %1825 = vmatpush2.bf16.msra.mxu0 %v8322_v2  ;;  %v8419_v2 = vld [vmem:[%s12195_s1 + $0xbec] ss:$16 sps:$4 sm:$0xff]  }
  0x7a   : > { %1868 = vmatpush2.bf16.msra.mxu1 %v8325_v3  ;;  %1826 = vmatprep.subr.bf16.mxu0 %v8330_v6  ;;  %v8414_v3 = vld [vmem:[%s12195_s1 + $0x9e8] ss:$16 sps:$4 sm:$0xff]  }
  0x7b   : > { %1869 = vmatprep.subr.bf16.mxu1 %v8333_v7  ;;  %v8417_v6 = vld [vmem:[%s12195_s1 + $0xbe8] ss:$16 sps:$4 sm:$0xff]   ;;  %v8422_v7 = vld [vmem:[%s12195_s1 + $0x9cc] ss:$16 sps:$4 sm:$0xff]  }
  0x7d   : > { %1827 = vmatpush2.bf16.msra.mxu0 %v8328_v8  ;;  %v8425_v8 = vld [vmem:[%s12195_s1 + $0xbcc] ss:$16 sps:$4 sm:$0xff]  }
  0x7e   : > { %1870 = vmatpush2.bf16.msra.mxu1 %v8331_v9  ;;  %1828 = vmatprep.subr.bf16.mxu0 %v8336_v10  ;;  %v8420_v9 = vld [vmem:[%s12195_s1 + $0x9c8] ss:$16 sps:$4 sm:$0xff]  }
  0x7f   : > { %1871 = vmatprep.subr.bf16.mxu1 %v8339_v11  ;;  %v8423_v10 = vld [vmem:[%s12195_s1 + $0xbc8] ss:$16 sps:$4 sm:$0xff]   ;;  %v8428_v11 = vld [vmem:[%s12195_s1 + $0x9ac] ss:$16 sps:$4 sm:$0xff]  }
  0x81   : > { %1829 = vmatpush2.bf16.msra.mxu0 %v8334_v12  ;;  %v8431_v12 = vld [vmem:[%s12195_s1 + $0xbac] ss:$16 sps:$4 sm:$0xff]  }
  0x82   : > { %1872 = vmatpush2.bf16.msra.mxu1 %v8337_v13  ;;  %1830 = vmatprep.subr.bf16.mxu0 %v8342_v14  ;;  %v8426_v13 = vld [vmem:[%s12195_s1 + $0x9a8] ss:$16 sps:$4 sm:$0xff]  }
  0x83   : > { %1873 = vmatprep.subr.bf16.mxu1 %v8345_v15  ;;  %v8429_v14 = vld [vmem:[%s12195_s1 + $0xba8] ss:$16 sps:$4 sm:$0xff]   ;;  %v8434_v15 = vld [vmem:[%s12195_s1 + $0x98c] ss:$16 sps:$4 sm:$0xff]  }
  0x85   : > { %1831 = vmatpush2.bf16.msra.mxu0 %v8340_v16  ;;  %v8437_v16 = vld [vmem:[%s12195_s1 + $0xb8c] ss:$16 sps:$4 sm:$0xff]  }
  0x86   : > { %1874 = vmatpush2.bf16.msra.mxu1 %v8343_v17  ;;  %1832 = vmatprep.subr.bf16.mxu0 %v8348_v18  ;;  %v8432_v17 = vld [vmem:[%s12195_s1 + $0x988] ss:$16 sps:$4 sm:$0xff]  }
  0x87   : > { %1875 = vmatprep.subr.bf16.mxu1 %v8351_v19  ;;  %v8435_v18 = vld [vmem:[%s12195_s1 + $0xb88] ss:$16 sps:$4 sm:$0xff]   ;;  %v8440_v19 = vld [vmem:[%s12195_s1 + $0x96c] ss:$16 sps:$4 sm:$0xff]  }
  0x89   : > { %1833 = vmatpush2.bf16.msra.mxu0 %v8346_v20  ;;  %v8443_v20 = vld [vmem:[%s12195_s1 + $0xb6c] ss:$16 sps:$4 sm:$0xff]  }
  0x8a   : > { %1876 = vmatpush2.bf16.msra.mxu1 %v8349_v21  ;;  %1834 = vmatprep.subr.bf16.mxu0 %v8354_v23  ;;  %v8438_v21 = vld [vmem:[%s12195_s1 + $0x968] ss:$16 sps:$4 sm:$0xff]  }
  0x8b   : > { %1877 = vmatprep.subr.bf16.mxu1 %v8357_v24  ;;  %v8441_v23 = vld [vmem:[%s12195_s1 + $0xb68] ss:$16 sps:$4 sm:$0xff]   ;;  %v8446_v24 = vld [vmem:[%s12195_s1 + $0x94c] ss:$16 sps:$4 sm:$0xff]  }
  0x8d   : > { %1835 = vmatpush2.bf16.msra.mxu0 %v8352_v25  ;;  %v9808_v25 = vld [vmem:[%s9342_s12] sm:$0xff] }
  0x8e   : > { %1878 = vmatpush2.bf16.msra.mxu1 %v8355_v26  ;;  %1836 = vmatprep.subr.bf16.mxu0 %v8360_v27  ;;  %v8449_v26 = vld [vmem:[%s12195_s1 + $0xb4c] ss:$16 sps:$4 sm:$0xff]   ;;  %v8444_v27 = vld [vmem:[%s12195_s1 + $0x948] ss:$16 sps:$4 sm:$0xff]  }
  0x8f   : > { %1879 = vmatprep.subr.bf16.mxu1 %v8363_v29  ;;  %v8452_v29 = vld [vmem:[%s12195_s1 + $0x92c] ss:$16 sps:$4 sm:$0xff]  }
  0x91   : > { %1837 = vmatpush2.bf16.msra.mxu0 %v8358_v30  ;;  %v9823_v30 = vld [vmem:[%s9342_s12 + $0x8] sm:$0xff] }
  0x92   : > { %1880 = vmatpush2.bf16.msra.mxu1 %v8361_v32  ;;  %1892 = vmatprep.subr.bf16.mxu0 %v8368_v48  ;;  %v9827_v31 = vcombine.high %v9808_v25, %v9823_v30  ;;  %v9830_v32 = vld [vmem:[%s9342_s12 + $0x10] sm:$0x11]  ;;  %v8450_v48 = vld [vmem:[%s12195_s1 + $0x928] ss:$16 sps:$4 sm:$0xff]  }
  0x93   : > { %1935 = vmatprep.subr.bf16.mxu1 %v8371_v34  ;;  %v8453_v34 = vld [vmem:[%s12195_s1 + $0xb28] ss:$16 sps:$4 sm:$0xff]  }
  0x94   : > { %1839 = vmatmul.mubr.bf16.vlgmr.msra.gmra.mxu0 %v9651_v35 }
  0x95   : > { %1882 = vmatmul.mubr.bf16.vlgmr.msra.gmra.mxu1 %v9383_v62  ;;  %1893 = vmatpush1.bf16.msra.mxu0 %v8366_v5  ;;  %v8383_v62 = vld [vmem:[%s12195_s1 + $0xaac] ss:$16 sps:$4 sm:$0xff]   ;;  %v9843_v5 = vcombine.high %v9830_v32, %v9830_v32 }
  0x96   : > { %1936 = vmatpush1.bf16.msra.mxu1 %v8369_v36  ;;  %1894 = vmatprep.subr.bf16.mxu0 %v8374_v37  ;;  %v296_v36 = vshll.u32 %v9827_v31, 16  ;;  %v8458_v37 = vld [vmem:[%s12195_s1 + $0x90c] ss:$16 sps:$4 sm:$0xff]  }
  0x97   : > { %1937 = vmatprep.subr.bf16.mxu1 %v8377_v38  ;;  %1924 = vmatprep.mubr.bf16.mxu0 %v9398_v4  ;;  %v8389_v4 = vld [vmem:[%s12195_s1 + $0xa8c] ss:$16 sps:$4 sm:$0xff]  }
  0x98   : > { %1967 = vmatprep.mubr.bf16.mxu1 %v9542_v59  ;;  %v8405_v59 = vld [vmem:[%s12195_s1 + $0xa28] ss:$16 sps:$4 sm:$0xff]   ;;  %v8461_v38 = vld [vmem:[%s12195_s1 + $0xb0c] ss:$16 sps:$4 sm:$0xff]  }
  0x99   : > { %1895 = vmatpush1.bf16.msra.mxu0 %v8372_v39  ;;  %v8456_v39 = vld [vmem:[%s12195_s1 + $0x908] ss:$16 sps:$4 sm:$0xff]  }
  0x9a   : > { %1938 = vmatpush1.bf16.msra.mxu1 %v8375_v40  ;;  %1896 = vmatprep.subr.bf16.mxu0 %v8380_v41  ;;  %v8459_v40 = vld [vmem:[%s12195_s1 + $0xb08] ss:$16 sps:$4 sm:$0xff]   ;;  %v294_v41 = vshrl.u32 %v9827_v31, 16 }
  0x9b   : > { %1939 = vmatprep.subr.bf16.mxu1 %v8383_v62  ;;  %v298_v62 = vrot.slane %v296_v36, 1  ;;  %v8536_v36 = vld [vmem:[%s12195_s1 + $0x164] ss:$16 sps:$4 sm:$0xff]  }
  0x9d   : > { %1897 = vmatpush1.bf16.msra.mxu0 %v8378_v42  ;;  %v301_v42 = vshll.u32 %v9843_v5, 16 }
  0x9e   : > { %1940 = vmatpush1.bf16.msra.mxu1 %v8381_v43  ;;  %1898 = vmatprep.subr.bf16.mxu0 %v8386_v44  ;;  %v8464_v43 = vld [vmem:[%s12195_s1 + $0xe4] ss:$16 sps:$4 sm:$0xff]  }
  0x9f   : > { %1941 = vmatprep.subr.bf16.mxu1 %v8389_v4  ;;  %v8467_v44 = vld [vmem:[%s12195_s1 + $0x2e4] ss:$16 sps:$4 sm:$0xff]   ;;  %v8462_v4 = vld [vmem:[%s12195_s1 + $0xe0] ss:$16 sps:$4 sm:$0xff]  }
  0xa1   : > { %1899 = vmatpush1.bf16.msra.mxu0 %v8384_v45  ;;  %v8465_v45 = vld [vmem:[%s12195_s1 + $0x2e0] ss:$16 sps:$4 sm:$0xff]  }
  0xa2   : > { %1942 = vmatpush1.bf16.msra.mxu1 %v8387_v46  ;;  %1900 = vmatprep.subr.bf16.mxu0 %v8392_v47  ;;  %v299_v46 = vor.u32 %v298_v62, %v294_v41  ;;  %v303_v47 = vrot.slane %v301_v42, 1  ;;  %v8542_v41 = vld [vmem:[%s12195_s1 + $0x144] ss:$16 sps:$4 sm:$0xff]   ;;  %v8540_v42 = vld [vmem:[%s12195_s1 + $0x140] ss:$16 sps:$4 sm:$0xff]  }
  0xa3   : > { %1943 = vmatprep.subr.bf16.mxu1 %v8395_v49  ;;  %v8470_v49 = vld [vmem:[%s12195_s1 + $0xc4] ss:$16 sps:$4 sm:$0xff]  }
  0xa4   : > { %v8545_v62 = vld [vmem:[%s12195_s1 + $0x344] ss:$16 sps:$4 sm:$0xff]  }
  0xa5   : > { %1901 = vmatpush1.bf16.msra.mxu0 %v8390_v50  ;;  %v8473_v50 = vld [vmem:[%s12195_s1 + $0x2c4] ss:$16 sps:$4 sm:$0xff]  }
  0xa6   : > { %1944 = vmatpush1.bf16.msra.mxu1 %v8393_v51  ;;  %1902 = vmatprep.subr.bf16.mxu0 %v8398_v52  ;;  %v8468_v51 = vld [vmem:[%s12195_s1 + $0xc0] ss:$16 sps:$4 sm:$0xff]  }
  0xa7   : > { %1945 = vmatprep.subr.bf16.mxu1 %v8401_v54  ;;  %v8471_v52 = vld [vmem:[%s12195_s1 + $0x2c0] ss:$16 sps:$4 sm:$0xff]   ;;  %v9887_v54 = vsel %vm280_vm0, %v299_v46, %v303_v47 }
  0xa8   : > { %v8546_v46 = vld [vmem:[%s12195_s1 + $0x120] ss:$16 sps:$4 sm:$0xff]  }
  0xa9   : > { %1903 = vmatpush1.bf16.msra.mxu0 %v8396_v55  ;;  %v8476_v55 = vld [vmem:[%s12195_s1 + $0xa4] ss:$16 sps:$4 sm:$0xff]  }
  0xaa   : > { %1946 = vmatpush1.bf16.msra.mxu1 %v8399_v56  ;;  %1904 = vmatprep.subr.bf16.mxu0 %v8404_v57  ;;  %v8477_v56 = vld [vmem:[%s12195_s1 + $0x2a0] ss:$16 sps:$4 sm:$0xff]   ;;  %v8482_v57 = vld [vmem:[%s12195_s1 + $0x84] ss:$16 sps:$4 sm:$0xff]  }
  0xab   : > { %1947 = vmatprep.subr.bf16.mxu1 %v8407_v58  ;;  %v8485_v58 = vld [vmem:[%s12195_s1 + $0x284] ss:$16 sps:$4 sm:$0xff]  }
  0xad   : > { %1905 = vmatpush1.bf16.msra.mxu0 %v8402_v53  ;;  %v8480_v53 = vld [vmem:[%s12195_s1 + $0x80] ss:$16 sps:$4 sm:$0xff]  }
  0xae   : > { %1948 = vmatpush1.bf16.msra.mxu1 %v8405_v59  ;;  %1906 = vmatprep.subr.bf16.mxu0 %v8410_v60  ;;  %v8483_v59 = vld [vmem:[%s12195_s1 + $0x280] ss:$16 sps:$4 sm:$0xff]   ;;  %v8488_v60 = vld [vmem:[%s12195_s1 + $0x64] ss:$16 sps:$4 sm:$0xff]  }
  0xaf   : > { %1949 = vmatprep.subr.bf16.mxu1 %v8413_v61  ;;  %v8491_v61 = vld [vmem:[%s12195_s1 + $0x264] ss:$16 sps:$4 sm:$0xff]  }
  0xb1   : > { %1907 = vmatpush1.bf16.msra.mxu0 %v8408_v63  ;;  %v8486_v63 = vld [vmem:[%s12195_s1 + $0x60] ss:$16 sps:$4 sm:$0xff]  }
  0xb2   : > { %1950 = vmatpush1.bf16.msra.mxu1 %v8411_v0  ;;  %1908 = vmatprep.subr.bf16.mxu0 %v8416_v1  ;;  %v8489_v0 = vld [vmem:[%s12195_s1 + $0x260] ss:$16 sps:$4 sm:$0xff]   ;;  %v8494_v1 = vld [vmem:[%s12195_s1 + $0x44] ss:$16 sps:$4 sm:$0xff]  }
  0xb3   : > { %1951 = vmatprep.subr.bf16.mxu1 %v8419_v2  ;;  %v8497_v2 = vld [vmem:[%s12195_s1 + $0x244] ss:$16 sps:$4 sm:$0xff]  }
  0xb5   : > { %1909 = vmatpush2.bf16.msra.mxu0 %v8414_v3  ;;  %v8492_v3 = vld [vmem:[%s12195_s1 + $0x40] ss:$16 sps:$4 sm:$0xff]  }
  0xb6   : > { %1952 = vmatpush2.bf16.msra.mxu1 %v8417_v6  ;;  %1910 = vmatprep.subr.bf16.mxu0 %v8422_v7  ;;  %v8495_v6 = vld [vmem:[%s12195_s1 + $0x240] ss:$16 sps:$4 sm:$0xff]   ;;  %v8500_v7 = vld [vmem:[%s12195_s1 + $0x24] ss:$16 sps:$4 sm:$0xff]  }
  0xb7   : > { %1953 = vmatprep.subr.bf16.mxu1 %v8425_v8  ;;  %v8503_v8 = vld [vmem:[%s12195_s1 + $0x224] ss:$16 sps:$4 sm:$0xff]  }
  0xb9   : > { %1911 = vmatpush2.bf16.msra.mxu0 %v8420_v9  ;;  %v8498_v9 = vld [vmem:[%s12195_s1 + $0x20] ss:$16 sps:$4 sm:$0xff]  }
  0xba   : > { %1954 = vmatpush2.bf16.msra.mxu1 %v8423_v10  ;;  %1912 = vmatprep.subr.bf16.mxu0 %v8428_v11  ;;  %v8501_v10 = vld [vmem:[%s12195_s1 + $0x220] ss:$16 sps:$4 sm:$0xff]   ;;  %v8506_v11 = vld [vmem:[%s12195_s1 + $0x4] ss:$16 sps:$4 sm:$0xff]  }
  0xbb   : > { %1955 = vmatprep.subr.bf16.mxu1 %v8431_v12  ;;  %v8509_v12 = vld [vmem:[%s12195_s1 + $0x204] ss:$16 sps:$4 sm:$0xff]  }
  0xbd   : > { %1913 = vmatpush2.bf16.msra.mxu0 %v8426_v13  ;;  %v8504_v13 = vld [vmem:[%s12195_s1] ss:$16 sps:$4 sm:$0xff]  }
  0xbe   : > { %1956 = vmatpush2.bf16.msra.mxu1 %v8429_v14  ;;  %1914 = vmatprep.subr.bf16.mxu0 %v8434_v15  ;;  %v8507_v14 = vld [vmem:[%s12195_s1 + $0x200] ss:$16 sps:$4 sm:$0xff]   ;;  %v8512_v15 = vld [vmem:[%s12195_s1 + $0x1e4] ss:$16 sps:$4 sm:$0xff]  }
  0xbf   : > { %1957 = vmatprep.subr.bf16.mxu1 %v8437_v16  ;;  %v8515_v16 = vld [vmem:[%s12195_s1 + $0x3e4] ss:$16 sps:$4 sm:$0xff]  }
  0xc1   : > { %1915 = vmatpush2.bf16.msra.mxu0 %v8432_v17  ;;  %v8510_v17 = vld [vmem:[%s12195_s1 + $0x1e0] ss:$16 sps:$4 sm:$0xff]  }
  0xc2   : > { %1958 = vmatpush2.bf16.msra.mxu1 %v8435_v18  ;;  %1916 = vmatprep.subr.bf16.mxu0 %v8440_v19  ;;  %v8513_v18 = vld [vmem:[%s12195_s1 + $0x3e0] ss:$16 sps:$4 sm:$0xff]   ;;  %v8518_v19 = vld [vmem:[%s12195_s1 + $0x1c4] ss:$16 sps:$4 sm:$0xff]  }
  0xc3   : > { %1959 = vmatprep.subr.bf16.mxu1 %v8443_v20  ;;  %v8521_v20 = vld [vmem:[%s12195_s1 + $0x3c4] ss:$16 sps:$4 sm:$0xff]  }
  0xc5   : > { %1917 = vmatpush2.bf16.msra.mxu0 %v8438_v21  ;;  %v8516_v21 = vld [vmem:[%s12195_s1 + $0x1c0] ss:$16 sps:$4 sm:$0xff]  }
  0xc6   : > { %1960 = vmatpush2.bf16.msra.mxu1 %v8441_v23  ;;  %1918 = vmatprep.subr.bf16.mxu0 %v8446_v24  ;;  %v8519_v23 = vld [vmem:[%s12195_s1 + $0x3c0] ss:$16 sps:$4 sm:$0xff]   ;;  %v8524_v24 = vld [vmem:[%s12195_s1 + $0x1a4] ss:$16 sps:$4 sm:$0xff]  }
  0xc7   : > { %1961 = vmatprep.subr.bf16.mxu1 %v8449_v26  ;;  %v8527_v26 = vld [vmem:[%s12195_s1 + $0x3a4] ss:$16 sps:$4 sm:$0xff]  }
  0xc9   : > { %1919 = vmatpush2.bf16.msra.mxu0 %v8444_v27  ;;  %v8522_v27 = vld [vmem:[%s12195_s1 + $0x1a0] ss:$16 sps:$4 sm:$0xff]  }
  0xca   : > { %1962 = vmatpush2.bf16.msra.mxu1 %v8447_v28  ;;  %1920 = vmatprep.subr.bf16.mxu0 %v8452_v29  ;;  %v8525_v28 = vld [vmem:[%s12195_s1 + $0x3a0] ss:$16 sps:$4 sm:$0xff]   ;;  %v8530_v29 = vld [vmem:[%s12195_s1 + $0x184] ss:$16 sps:$4 sm:$0xff]  }
  0xcb   : > { %1963 = vmatprep.subr.bf16.mxu1 %v8455_v33  ;;  %v8533_v33 = vld [vmem:[%s12195_s1 + $0x384] ss:$16 sps:$4 sm:$0xff]  }
  0xcd   : > { %1921 = vmatpush2.bf16.msra.mxu0 %v8450_v48  ;;  %v8528_v48 = vld [vmem:[%s12195_s1 + $0x180] ss:$16 sps:$4 sm:$0xff]  }
  0xce   : > { %1964 = vmatpush2.bf16.msra.mxu1 %v8453_v34  ;;  %1922 = vmatprep.subr.bf16.mxu0 %v8458_v37  ;;  %v8531_v34 = vld [vmem:[%s12195_s1 + $0x380] ss:$16 sps:$4 sm:$0xff]   ;;  %v8539_v37 = vld [vmem:[%s12195_s1 + $0x364] ss:$16 sps:$4 sm:$0xff]  }
  0xcf   : > { %1965 = vmatprep.subr.bf16.mxu1 %v8461_v38  ;;  %v8534_v38 = vld [vmem:[%s12195_s1 + $0x160] ss:$16 sps:$4 sm:$0xff]  }
  0xd1   : > { %1923 = vmatpush2.bf16.msra.mxu0 %v8456_v39  ;;  %v8537_v39 = vld [vmem:[%s12195_s1 + $0x360] ss:$16 sps:$4 sm:$0xff]  }
  0xd2   : > { %1966 = vmatpush2.bf16.msra.mxu1 %v8459_v40  ;;  %2938 = vmatprep.subr.bf16.mxu0 %v8464_v43  ;;  %v10025_v40 = vcombine.low %v9808_v25, %v9823_v30  ;;  %v8543_v25 = vld [vmem:[%s12195_s1 + $0x340] ss:$16 sps:$4 sm:$0xff]   ;;  %v10041_v43 = vcombine.low %v9830_v32, %v9830_v32 }
  0xd3   : > { %2981 = vmatprep.subr.bf16.mxu1 %v8467_v44  ;;  %v8549_v32 = vld [vmem:[%s12195_s1 + $0x320] ss:$16 sps:$4 sm:$0xff]  }
  0xd4   : > { %1925 = vmatmul.mubr.bf16.vlgmr.msra.gmra.mxu0 %v9437_v22  ;;  %v8479_v22 = vld [vmem:[%s12195_s1 + $0x2a4] ss:$16 sps:$4 sm:$0xff]   ;;  %v284_v44 = vshll.u32 %v10025_v40, 16  ;;  %v282_v47 = vshrl.u32 %v10025_v40, 16 }
  0xd5   : > { %1968 = vmatmul.mubr.bf16.vlgmr.msra.gmra.mxu1 %v9651_v35  ;;  %2939 = vmatpush1.bf16.msra.mxu0 %v8462_v4  ;;  %v8474_v35 = vld [vmem:[%s12195_s1 + $0xa0] ss:$16 sps:$4 sm:$0xff]   ;;  %v8548_v4 = vld [vmem:[%s12195_s1 + $0x124] ss:$16 sps:$4 sm:$0xff]  }
  0xd6   : > { %2982 = vmatpush1.bf16.msra.mxu1 %v8465_v45  ;;  %2940 = vmatprep.subr.bf16.mxu0 %v8470_v49  ;;  %v8551_v45 = vld [vmem:[%s12195_s1 + $0x324] ss:$16 sps:$4 sm:$0xff]   ;;  %v286_v49 = vrot.slane %v284_v44, 1  ;;  %v8627_v44 = vld [vmem:[%s12195_s1 + $0x1ac] ss:$16 sps:$4 sm:$0xff]  }
  0xd7   : > { %2983 = vmatprep.subr.bf16.mxu1 %v8473_v50  ;;  %2970 = vmatprep.mubr.bf16.mxu0 %v9827_v31  ;;  %v289_v50 = vshll.u32 %v10041_v43, 16 }
  0xd8   : > { %3013 = vmatprep.mubr.bf16.mxu1 %v9887_v54 }
  0xd9   : > { %2941 = vmatpush1.bf16.msra.mxu0 %v8468_v51  ;;  %v10059_v51 = vld [vmem:[%s9342_s12] sm:$0xee] }
  0xda   : > { %2984 = vmatpush1.bf16.msra.mxu1 %v8471_v52  ;;  %2942 = vmatprep.subr.bf16.mxu0 %v8476_v55  ;;  %v8554_v52 = vld [vmem:[%s12195_s1 + $0x104] ss:$16 sps:$4 sm:$0xff]  }
  0xdb   : > { %2985 = vmatprep.subr.bf16.mxu1 %v8479_v22  ;;  %v8557_v55 = vld [vmem:[%s12195_s1 + $0x304] ss:$16 sps:$4 sm:$0xff]   ;;  %v8552_v22 = vld [vmem:[%s12195_s1 + $0x100] ss:$16 sps:$4 sm:$0xff]  }
  0xdd   : > { %2943 = vmatpush1.bf16.msra.mxu0 %v8474_v35  ;;  %v6890_v35 = vcombine.high %v10059_v51, %v9823_v30  ;;  %v8562_v30 = vld [vmem:[%s12195_s1 + $0x4e0] ss:$16 sps:$4 sm:$0xff]  }
  0xde   : > { %2986 = vmatpush1.bf16.msra.mxu1 %v8477_v56  ;;  %2944 = vmatprep.subr.bf16.mxu0 %v8482_v57  ;;  %v8555_v56 = vld [vmem:[%s12195_s1 + $0x300] ss:$16 sps:$4 sm:$0xff]   ;;  %v287_v57 = vor.u32 %v286_v49, %v282_v47  ;;  %v8631_v49 = vld [vmem:[%s12195_s1 + $0x188] ss:$16 sps:$4 sm:$0xff]  }
  0xdf   : > { %2987 = vmatprep.subr.bf16.mxu1 %v8485_v58  ;;  %v291_v58 = vrot.slane %v289_v50, 1  ;;  %v8628_v47 = vld [vmem:[%s12195_s1 + $0x580] ss:$16 sps:$4 sm:$0xff]   ;;  %v8636_v50 = vld [vmem:[%s12195_s1 + $0x564] ss:$16 sps:$4 sm:$0xff]  }
  0xe1   : > { %2945 = vmatpush1.bf16.msra.mxu0 %v8480_v53  ;;  %v8564_v53 = vld [vmem:[%s12195_s1 + $0x4e4] ss:$16 sps:$4 sm:$0xff]  }
  0xe2   : > { %2988 = vmatpush1.bf16.msra.mxu1 %v8483_v59  ;;  %2946 = vmatprep.subr.bf16.mxu0 %v8488_v60  ;;  %v8567_v59 = vld [vmem:[%s12195_s1 + $0xec] ss:$16 sps:$4 sm:$0xff]   ;;  %v316_v60 = vrot.slane %v6890_v35, 1  ;;  %v8642_v35 = vld [vmem:[%s12195_s1 + $0x544] ss:$16 sps:$4 sm:$0xff]  }
  0xe3   : > { %2989 = vmatprep.subr.bf16.mxu1 %v8491_v61  ;;  %v317_v61 = vrot.slane %v9843_v5, 1  ;;  %v8568_v5 = vld [vmem:[%s12195_s1 + $0x4c0] ss:$16 sps:$4 sm:$0xff]  }
  0xe5   : > { %2947 = vmatpush1.bf16.msra.mxu0 %v8486_v63  ;;  %v10086_v63 = vsel %vm280_vm0, %v287_v57, %v291_v58  ;;  %v8640_v57 = vld [vmem:[%s12195_s1 + $0x540] ss:$16 sps:$4 sm:$0xff]   ;;  %v8643_v58 = vld [vmem:[%s12195_s1 + $0x148] ss:$16 sps:$4 sm:$0xff]  }
  0xe6   : > { %2990 = vmatpush1.bf16.msra.mxu1 %v8489_v0  ;;  %2948 = vmatprep.subr.bf16.mxu0 %v8494_v1  ;;  %v8565_v0 = vld [vmem:[%s12195_s1 + $0xe8] ss:$16 sps:$4 sm:$0xff]   ;;  %v8570_v1 = vld [vmem:[%s12195_s1 + $0x4c4] ss:$16 sps:$4 sm:$0xff]  }
  0xe7   : > { %2991 = vmatprep.subr.bf16.mxu1 %v8497_v2  ;;  %v8573_v2 = vld [vmem:[%s12195_s1 + $0xcc] ss:$16 sps:$4 sm:$0xff]  }
  0xe9   : > { %2949 = vmatpush1.bf16.msra.mxu0 %v8492_v3  ;;  %v10103_v3 = vsel %vm312_vm1, %v316_v60, %v317_v61  ;;  %v8649_v60 = vld [vmem:[%s12195_s1 + $0x128] ss:$16 sps:$4 sm:$0xff]  }
  0xea   : > { %2992 = vmatpush1.bf16.msra.mxu1 %v8495_v6  ;;  %2950 = vmatprep.subr.bf16.mxu0 %v8500_v7  ;;  %v8571_v6 = vld [vmem:[%s12195_s1 + $0xc8] ss:$16 sps:$4 sm:$0xff]   ;;  %v8576_v7 = vld [vmem:[%s12195_s1 + $0x4a4] ss:$16 sps:$4 sm:$0xff]  }
  0xeb   : > { %2993 = vmatprep.subr.bf16.mxu1 %v8503_v8  ;;  %v8579_v8 = vld [vmem:[%s12195_s1 + $0xac] ss:$16 sps:$4 sm:$0xff]  }
  0xec   : > { %v9053_v61 = vld [vmem:[%s9342_s12 + $0x8] sm:$0xff] }
  0xed   : > { %2951 = vmatpush1.bf16.msra.mxu0 %v8498_v9  ;;  %v8574_v9 = vld [vmem:[%s12195_s1 + $0x4a0] ss:$16 sps:$4 sm:$0xff]  }
  0xee   : > { %2994 = vmatpush1.bf16.msra.mxu1 %v8501_v10  ;;  %2952 = vmatprep.subr.bf16.mxu0 %v8506_v11  ;;  %v8577_v10 = vld [vmem:[%s12195_s1 + $0xa8] ss:$16 sps:$4 sm:$0xff]   ;;  %v8582_v11 = vld [vmem:[%s12195_s1 + $0x484] ss:$16 sps:$4 sm:$0xff]  }
  0xef   : > { %2995 = vmatprep.subr.bf16.mxu1 %v8509_v12  ;;  %v8580_v12 = vld [vmem:[%s12195_s1 + $0x480] ss:$16 sps:$4 sm:$0xff]  }
  0xf1   : > { %2953 = vmatpush1.bf16.msra.mxu0 %v8504_v13  ;;  %v8583_v13 = vld [vmem:[%s12195_s1 + $0x88] ss:$16 sps:$4 sm:$0xff]  }
  0xf2   : > { %2996 = vmatpush1.bf16.msra.mxu1 %v8507_v14  ;;  %2954 = vmatprep.subr.bf16.mxu0 %v8512_v15  ;;  %v8588_v14 = vld [vmem:[%s12195_s1 + $0x464] ss:$16 sps:$4 sm:$0xff]   ;;  %v8591_v15 = vld [vmem:[%s12195_s1 + $0x6c] ss:$16 sps:$4 sm:$0xff]  }
  0xf3   : > { %2997 = vmatprep.subr.bf16.mxu1 %v8515_v16  ;;  %v8586_v16 = vld [vmem:[%s12195_s1 + $0x460] ss:$16 sps:$4 sm:$0xff]  }
  0xf5   : > { %2955 = vmatpush2.bf16.msra.mxu0 %v8510_v17  ;;  %v8589_v17 = vld [vmem:[%s12195_s1 + $0x68] ss:$16 sps:$4 sm:$0xff]  }
  0xf6   : > { %2998 = vmatpush2.bf16.msra.mxu1 %v8513_v18  ;;  %2956 = vmatprep.subr.bf16.mxu0 %v8518_v19  ;;  %v8594_v18 = vld [vmem:[%s12195_s1 + $0x444] ss:$16 sps:$4 sm:$0xff]   ;;  %v8597_v19 = vld [vmem:[%s12195_s1 + $0x4c] ss:$16 sps:$4 sm:$0xff]  }
  0xf7   : > { %2999 = vmatprep.subr.bf16.mxu1 %v8521_v20  ;;  %v8592_v20 = vld [vmem:[%s12195_s1 + $0x440] ss:$16 sps:$4 sm:$0xff]  }
  0xf9   : > { %2957 = vmatpush2.bf16.msra.mxu0 %v8516_v21  ;;  %v8595_v21 = vld [vmem:[%s12195_s1 + $0x48] ss:$16 sps:$4 sm:$0xff]  }
  0xfa   : > { %3000 = vmatpush2.bf16.msra.mxu1 %v8519_v23  ;;  %2958 = vmatprep.subr.bf16.mxu0 %v8524_v24  ;;  %v8600_v23 = vld [vmem:[%s12195_s1 + $0x424] ss:$16 sps:$4 sm:$0xff]   ;;  %v8603_v24 = vld [vmem:[%s12195_s1 + $0x2c] ss:$16 sps:$4 sm:$0xff]  }
  0xfb   : > { %3001 = vmatprep.subr.bf16.mxu1 %v8527_v26  ;;  %v8598_v26 = vld [vmem:[%s12195_s1 + $0x420] ss:$16 sps:$4 sm:$0xff]  }
  0xfd   : > { %2959 = vmatpush2.bf16.msra.mxu0 %v8522_v27  ;;  %v8601_v27 = vld [vmem:[%s12195_s1 + $0x28] ss:$16 sps:$4 sm:$0xff]  }
  0xfe   : > { %3002 = vmatpush2.bf16.msra.mxu1 %v8525_v28  ;;  %2960 = vmatprep.subr.bf16.mxu0 %v8530_v29  ;;  %v8606_v28 = vld [vmem:[%s12195_s1 + $0x404] ss:$16 sps:$4 sm:$0xff]   ;;  %v8609_v29 = vld [vmem:[%s12195_s1 + $0xc] ss:$16 sps:$4 sm:$0xff]  }
  0xff   : > { %3003 = vmatprep.subr.bf16.mxu1 %v8533_v33  ;;  %v8604_v33 = vld [vmem:[%s12195_s1 + $0x400] ss:$16 sps:$4 sm:$0xff]  }
 0x101   : > { %2961 = vmatpush2.bf16.msra.mxu0 %v8528_v48  ;;  %v8607_v48 = vld [vmem:[%s12195_s1 + $0x8] ss:$16 sps:$4 sm:$0xff]  }
 0x102   : > { %3004 = vmatpush2.bf16.msra.mxu1 %v8531_v34  ;;  %2962 = vmatprep.subr.bf16.mxu0 %v8536_v36  ;;  %v8612_v34 = vld [vmem:[%s12195_s1 + $0x5e4] ss:$16 sps:$4 sm:$0xff]   ;;  %v8615_v36 = vld [vmem:[%s12195_s1 + $0x1ec] ss:$16 sps:$4 sm:$0xff]  }
 0x103   : > { %3005 = vmatprep.subr.bf16.mxu1 %v8539_v37  ;;  %v8610_v37 = vld [vmem:[%s12195_s1 + $0x5e0] ss:$16 sps:$4 sm:$0xff]  }
 0x105   : > { %2963 = vmatpush2.bf16.msra.mxu0 %v8534_v38  ;;  %v8613_v38 = vld [vmem:[%s12195_s1 + $0x1e8] ss:$16 sps:$4 sm:$0xff]  }
 0x106   : > { %3006 = vmatpush2.bf16.msra.mxu1 %v8537_v39  ;;  %2964 = vmatprep.subr.bf16.mxu0 %v8542_v41  ;;  %v8618_v39 = vld [vmem:[%s12195_s1 + $0x5c4] ss:$16 sps:$4 sm:$0xff]   ;;  %v8621_v41 = vld [vmem:[%s12195_s1 + $0x1cc] ss:$16 sps:$4 sm:$0xff]  }
 0x107   : > { %3007 = vmatprep.subr.bf16.mxu1 %v8545_v62  ;;  %v8616_v62 = vld [vmem:[%s12195_s1 + $0x5c0] ss:$16 sps:$4 sm:$0xff]  }
 0x109   : > { %2965 = vmatpush2.bf16.msra.mxu0 %v8540_v42  ;;  %v8619_v42 = vld [vmem:[%s12195_s1 + $0x1c8] ss:$16 sps:$4 sm:$0xff]  }
 0x10a   : > { %3008 = vmatpush2.bf16.msra.mxu1 %v8543_v25  ;;  %2966 = vmatprep.subr.bf16.mxu0 %v8548_v4  ;;  %v8624_v25 = vld [vmem:[%s12195_s1 + $0x5a4] ss:$16 sps:$4 sm:$0xff]   ;;  %v8622_v4 = vld [vmem:[%s12195_s1 + $0x5a0] ss:$16 sps:$4 sm:$0xff]  }
 0x10b   : > { %3009 = vmatprep.subr.bf16.mxu1 %v8551_v45  ;;  %v8625_v45 = vld [vmem:[%s12195_s1 + $0x1a8] ss:$16 sps:$4 sm:$0xff]  }
 0x10d   : > { %2967 = vmatpush2.bf16.msra.mxu0 %v8546_v46  ;;  %v8630_v46 = vld [vmem:[%s12195_s1 + $0x584] ss:$16 sps:$4 sm:$0xff]  }
 0x10e   : > { %3010 = vmatpush2.bf16.msra.mxu1 %v8549_v32  ;;  %2968 = vmatprep.subr.bf16.mxu0 %v8554_v52  ;;  %v8633_v32 = vld [vmem:[%s12195_s1 + $0x18c] ss:$16 sps:$4 sm:$0xff]  }
 0x10f   : > { %3011 = vmatprep.subr.bf16.mxu1 %v8557_v55  ;;  %v8639_v52 = vld [vmem:[%s12195_s1 + $0x16c] ss:$16 sps:$4 sm:$0xff]   ;;  %v8634_v55 = vld [vmem:[%s12195_s1 + $0x560] ss:$16 sps:$4 sm:$0xff]  }
 0x111   : > { %2969 = vmatpush2.bf16.msra.mxu0 %v8552_v22  ;;  %v8637_v22 = vld [vmem:[%s12195_s1 + $0x168] ss:$16 sps:$4 sm:$0xff]  }
 0x112   : > { %3012 = vmatpush2.bf16.msra.mxu1 %v8555_v56  ;;  %3024 = vmatprep.subr.bf16.mxu0 %v8564_v53  ;;  %v8645_v56 = vld [vmem:[%s12195_s1 + $0x14c] ss:$16 sps:$4 sm:$0xff]   ;;  %v8648_v53 = vld [vmem:[%s12195_s1 + $0x524] ss:$16 sps:$4 sm:$0xff]  }
 0x113   : > { %3067 = vmatprep.subr.bf16.mxu1 %v8567_v59  ;;  %v8651_v59 = vld [vmem:[%s12195_s1 + $0x12c] ss:$16 sps:$4 sm:$0xff]  }
 0x114   : > { %2971 = vmatmul.mubr.bf16.vlgmr.msra.gmra.mxu0 %v10025_v40 }
 0x115   : > { %3014 = vmatmul.mubr.bf16.vlgmr.msra.gmra.mxu1 %v10086_v63  ;;  %3025 = vmatpush1.bf16.msra.mxu0 %v8562_v30  ;;  %v8646_v30 = vld [vmem:[%s12195_s1 + $0x520] ss:$16 sps:$4 sm:$0xff]  }
 0x116   : > { %3068 = vmatpush1.bf16.msra.mxu1 %v8565_v0  ;;  %3026 = vmatprep.subr.bf16.mxu0 %v8570_v1  ;;  %v6889_v0 = vcombine.low %v10059_v51, %v9053_v61  ;;  %v8654_v1 = vld [vmem:[%s12195_s1 + $0x504] ss:$16 sps:$4 sm:$0xff]   ;;  %v8655_v51 = vld [vmem:[%s12195_s1 + $0x108] ss:$16 sps:$4 sm:$0xff]  }
 0x117   : > { %3069 = vmatprep.subr.bf16.mxu1 %v8573_v2  ;;  %3056 = vmatprep.mubr.bf16.mxu0 %v10103_v3  ;;  %v8657_v2 = vld [vmem:[%s12195_s1 + $0x10c] ss:$16 sps:$4 sm:$0xff]  }
 0x118   : > { %3099 = vmatprep.mubr.bf16.mxu1 %v9827_v31  ;;  %v8585_v31 = vld [vmem:[%s12195_s1 + $0x8c] ss:$16 sps:$4 sm:$0xff]  }
 0x119   : > { %3027 = vmatpush1.bf16.msra.mxu0 %v8568_v5  ;;  %v8652_v5 = vld [vmem:[%s12195_s1 + $0x500] ss:$16 sps:$4 sm:$0xff]  }
 0x11a   : > { %3070 = vmatpush1.bf16.msra.mxu1 %v8571_v6  ;;  %3028 = vmatprep.subr.bf16.mxu0 %v8576_v7  ;;  %v313_v6 = vrot.slane %v6889_v0, 1  ;;  %v314_v7 = vrot.slane %v10041_v43, 1 }
 0x11b   : > { %3071 = vmatprep.subr.bf16.mxu1 %v8579_v8  ;;  %v8662_v8 = vld [vmem:[%s12195_s1 + $0x2ec] ss:$16 sps:$4 sm:$0xff]  }
 0x11c   : > { %v10294_v43 = vsel %vm312_vm1, %v313_v6, %v314_v7  ;;  %v8740_v6 = vld [vmem:[%s12195_s1 + $0x34c] ss:$16 sps:$4 sm:$0xff]  }
 0x11d   : > { %3029 = vmatpush1.bf16.msra.mxu0 %v8574_v9  ;;  %v8665_v9 = vld [vmem:[%s12195_s1 + $0x4ec] ss:$16 sps:$4 sm:$0xff]  }
 0x11e   : > { %3072 = vmatpush1.bf16.msra.mxu1 %v8577_v10  ;;  %3030 = vmatprep.subr.bf16.mxu0 %v8582_v11  ;;  %v8660_v10 = vld [vmem:[%s12195_s1 + $0x2e8] ss:$16 sps:$4 sm:$0xff]   ;;  %v8743_v7 = vld [vmem:[%s12195_s1 + $0x54c] ss:$16 sps:$4 sm:$0xff]  }
 0x11f   : > { %3073 = vmatprep.subr.bf16.mxu1 %v8585_v31  ;;  %v8663_v11 = vld [vmem:[%s12195_s1 + $0x4e8] ss:$16 sps:$4 sm:$0xff]   ;;  %v8668_v31 = vld [vmem:[%s12195_s1 + $0x2cc] ss:$16 sps:$4 sm:$0xff]  }
 0x121   : > { %3031 = vmatpush1.bf16.msra.mxu0 %v8580_v12  ;;  %v8671_v12 = vld [vmem:[%s12195_s1 + $0x4cc] ss:$16 sps:$4 sm:$0xff]  }
 0x122   : > { %3074 = vmatpush1.bf16.msra.mxu1 %v8583_v13  ;;  %3032 = vmatprep.subr.bf16.mxu0 %v8588_v14  ;;  %v8666_v13 = vld [vmem:[%s12195_s1 + $0x2c8] ss:$16 sps:$4 sm:$0xff]  }
 0x123   : > { %3075 = vmatprep.subr.bf16.mxu1 %v8591_v15  ;;  %v8669_v14 = vld [vmem:[%s12195_s1 + $0x4c8] ss:$16 sps:$4 sm:$0xff]   ;;  %v8674_v15 = vld [vmem:[%s12195_s1 + $0x2ac] ss:$16 sps:$4 sm:$0xff]  }
 0x125   : > { %3033 = vmatpush1.bf16.msra.mxu0 %v8586_v16  ;;  %v8677_v16 = vld [vmem:[%s12195_s1 + $0x4ac] ss:$16 sps:$4 sm:$0xff]  }
 0x126   : > { %3076 = vmatpush1.bf16.msra.mxu1 %v8589_v17  ;;  %3034 = vmatprep.subr.bf16.mxu0 %v8594_v18  ;;  %v8672_v17 = vld [vmem:[%s12195_s1 + $0x2a8] ss:$16 sps:$4 sm:$0xff]   ;;  %v8680_v18 = vld [vmem:[%s12195_s1 + $0x28c] ss:$16 sps:$4 sm:$0xff]  }
 0x127   : > { %3077 = vmatprep.subr.bf16.mxu1 %v8597_v19  ;;  %v8683_v19 = vld [vmem:[%s12195_s1 + $0x48c] ss:$16 sps:$4 sm:$0xff]  }
 0x129   : > { %3035 = vmatpush1.bf16.msra.mxu0 %v8592_v20  ;;  %v8686_v20 = vld [vmem:[%s12195_s1 + $0x26c] ss:$16 sps:$4 sm:$0xff]  }
 0x12a   : > { %3078 = vmatpush1.bf16.msra.mxu1 %v8595_v21  ;;  %3036 = vmatprep.subr.bf16.mxu0 %v8600_v23  ;;  %v8689_v21 = vld [vmem:[%s12195_s1 + $0x46c] ss:$16 sps:$4 sm:$0xff]   ;;  %v8684_v23 = vld [vmem:[%s12195_s1 + $0x268] ss:$16 sps:$4 sm:$0xff]  }
 0x12b   : > { %3079 = vmatprep.subr.bf16.mxu1 %v8603_v24  ;;  %v8687_v24 = vld [vmem:[%s12195_s1 + $0x468] ss:$16 sps:$4 sm:$0xff]  }
 0x12d   : > { %3037 = vmatpush1.bf16.msra.mxu0 %v8598_v26  ;;  %v8692_v26 = vld [vmem:[%s12195_s1 + $0x24c] ss:$16 sps:$4 sm:$0xff]  }
 0x12e   : > { %3080 = vmatpush1.bf16.msra.mxu1 %v8601_v27  ;;  %3038 = vmatprep.subr.bf16.mxu0 %v8606_v28  ;;  %v8695_v27 = vld [vmem:[%s12195_s1 + $0x44c] ss:$16 sps:$4 sm:$0xff]   ;;  %v8690_v28 = vld [vmem:[%s12195_s1 + $0x248] ss:$16 sps:$4 sm:$0xff]  }
 0x12f   : > { %3081 = vmatprep.subr.bf16.mxu1 %v8609_v29  ;;  %v8693_v29 = vld [vmem:[%s12195_s1 + $0x448] ss:$16 sps:$4 sm:$0xff]  }
 0x131   : > { %3039 = vmatpush1.bf16.msra.mxu0 %v8604_v33  ;;  %v8698_v33 = vld [vmem:[%s12195_s1 + $0x22c] ss:$16 sps:$4 sm:$0xff]  }
 0x132   : > { %3082 = vmatpush1.bf16.msra.mxu1 %v8607_v48  ;;  %3040 = vmatprep.subr.bf16.mxu0 %v8612_v34  ;;  %v8701_v48 = vld [vmem:[%s12195_s1 + $0x42c] ss:$16 sps:$4 sm:$0xff]   ;;  %v8696_v34 = vld [vmem:[%s12195_s1 + $0x228] ss:$16 sps:$4 sm:$0xff]  }
 0x133   : > { %3083 = vmatprep.subr.bf16.mxu1 %v8615_v36  ;;  %v8699_v36 = vld [vmem:[%s12195_s1 + $0x428] ss:$16 sps:$4 sm:$0xff]  }
 0x135   : > { %3041 = vmatpush2.bf16.msra.mxu0 %v8610_v37  ;;  %v8704_v37 = vld [vmem:[%s12195_s1 + $0x20c] ss:$16 sps:$4 sm:$0xff]  }
 0x136   : > { %3084 = vmatpush2.bf16.msra.mxu1 %v8613_v38  ;;  %3042 = vmatprep.subr.bf16.mxu0 %v8618_v39  ;;  %v8707_v38 = vld [vmem:[%s12195_s1 + $0x40c] ss:$16 sps:$4 sm:$0xff]   ;;  %v8702_v39 = vld [vmem:[%s12195_s1 + $0x208] ss:$16 sps:$4 sm:$0xff]  }
 0x137   : > { %3085 = vmatprep.subr.bf16.mxu1 %v8621_v41  ;;  %v8705_v41 = vld [vmem:[%s12195_s1 + $0x408] ss:$16 sps:$4 sm:$0xff]  }
 0x139   : > { %3043 = vmatpush2.bf16.msra.mxu0 %v8616_v62  ;;  %v8710_v62 = vld [vmem:[%s12195_s1 + $0x3ec] ss:$16 sps:$4 sm:$0xff]  }
 0x13a   : > { %3086 = vmatpush2.bf16.msra.mxu1 %v8619_v42  ;;  %3044 = vmatprep.subr.bf16.mxu0 %v8624_v25  ;;  %v8713_v42 = vld [vmem:[%s12195_s1 + $0x5ec] ss:$16 sps:$4 sm:$0xff]   ;;  %v8708_v25 = vld [vmem:[%s12195_s1 + $0x3e8] ss:$16 sps:$4 sm:$0xff]  }
 0x13b   : > { %3087 = vmatprep.subr.bf16.mxu1 %v8627_v44  ;;  %v8711_v44 = vld [vmem:[%s12195_s1 + $0x5e8] ss:$16 sps:$4 sm:$0xff]  }
 0x13d   : > { %3045 = vmatpush2.bf16.msra.mxu0 %v8622_v4  ;;  %v8716_v4 = vld [vmem:[%s12195_s1 + $0x3cc] ss:$16 sps:$4 sm:$0xff]  }
 0x13e   : > { %3088 = vmatpush2.bf16.msra.mxu1 %v8625_v45  ;;  %3046 = vmatprep.subr.bf16.mxu0 %v8630_v46  ;;  %v8719_v45 = vld [vmem:[%s12195_s1 + $0x5cc] ss:$16 sps:$4 sm:$0xff]   ;;  %v8714_v46 = vld [vmem:[%s12195_s1 + $0x3c8] ss:$16 sps:$4 sm:$0xff]  }
 0x13f   : > { %3089 = vmatprep.subr.bf16.mxu1 %v8633_v32  ;;  %v8717_v32 = vld [vmem:[%s12195_s1 + $0x5c8] ss:$16 sps:$4 sm:$0xff]  }
 0x141   : > { %3047 = vmatpush2.bf16.msra.mxu0 %v8628_v47  ;;  %v8722_v47 = vld [vmem:[%s12195_s1 + $0x3ac] ss:$16 sps:$4 sm:$0xff]  }
 0x142   : > { %3090 = vmatpush2.bf16.msra.mxu1 %v8631_v49  ;;  %3048 = vmatprep.subr.bf16.mxu0 %v8636_v50  ;;  %v8725_v49 = vld [vmem:[%s12195_s1 + $0x5ac] ss:$16 sps:$4 sm:$0xff]   ;;  %v10414_v50 = vpop.f32.mrf.mxu0 }
 0x143   : > { %3091 = vmatprep.subr.bf16.mxu1 %v8639_v52  ;;  %v10416_v52 = vpop.f32.mrf.mxu1 }
 0x145   : > { %3049 = vmatpush2.bf16.msra.mxu0 %v8634_v55  ;;  %v8720_v55 = vld [vmem:[%s12195_s1 + $0x3a8] ss:$16 sps:$4 sm:$0xff]  }
 0x146   : > { %3092 = vmatpush2.bf16.msra.mxu1 %v8637_v22  ;;  %3050 = vmatprep.subr.bf16.mxu0 %v8642_v35  ;;  %v8723_v22 = vld [vmem:[%s12195_s1 + $0x5a8] ss:$16 sps:$4 sm:$0xff]   ;;  %v8728_v35 = vld [vmem:[%s12195_s1 + $0x38c] ss:$16 sps:$4 sm:$0xff]  }
 0x147   : > { %3093 = vmatprep.subr.bf16.mxu1 %v8645_v56  ;;  %v8731_v56 = vld [vmem:[%s12195_s1 + $0x58c] ss:$16 sps:$4 sm:$0xff]  }
 0x149   : > { %3051 = vmatpush2.bf16.msra.mxu0 %v8640_v57  ;;  %v10430_v57 = vpop.f32.mrf.mxu0 }
 0x14a   : > { %3094 = vmatpush2.bf16.msra.mxu1 %v8643_v58  ;;  %3052 = vmatprep.subr.bf16.mxu0 %v8648_v53  ;;  %v10432_v58 = vpop.f32.mrf.mxu1  ;;  %v8726_v53 = vld [vmem:[%s12195_s1 + $0x388] ss:$16 sps:$4 sm:$0xff]  }
 0x14b   : > { %3095 = vmatprep.subr.bf16.mxu1 %v8651_v59  ;;  %v8729_v59 = vld [vmem:[%s12195_s1 + $0x588] ss:$16 sps:$4 sm:$0xff]   ;;  %v10446_v61 = vpop.f32.mrf.mxu0 }
 0x14c   : > { %v10448_v0 = vpop.f32.mrf.mxu1 }
 0x14d   : > { %3053 = vmatpush2.bf16.msra.mxu0 %v8646_v30  ;;  %v8734_v30 = vld [vmem:[%s12195_s1 + $0x36c] ss:$16 sps:$4 sm:$0xff]  }
 0x14e   : > { %3096 = vmatpush2.bf16.msra.mxu1 %v8649_v60  ;;  %3054 = vmatprep.subr.bf16.mxu0 %v8654_v1  ;;  %v8737_v60 = vld [vmem:[%s12195_s1 + $0x56c] ss:$16 sps:$4 sm:$0xff]   ;;  %v8732_v1 = vld [vmem:[%s12195_s1 + $0x368] ss:$16 sps:$4 sm:$0xff]  }
 0x14f   : > { %3097 = vmatprep.subr.bf16.mxu1 %v8657_v2  ;;  %v8735_v2 = vld [vmem:[%s12195_s1 + $0x568] ss:$16 sps:$4 sm:$0xff]  }
 0x151   : > { %3055 = vmatpush2.bf16.msra.mxu0 %v8652_v5  ;;  %v10457_v5 = vld [vmem:[%s9342_s12 + $0x18] sm:$0xff] }
 0x152   : > { %3098 = vmatpush2.bf16.msra.mxu1 %v8655_v51  ;;  %3110 = vmatprep.subr.bf16.mxu0 %v8662_v8  ;;  %v10460_v51 = vld [vmem:[%s9342_s12 + $0x10] sm:$0xff]  ;;  %v10468_v8 = vpop.f32.mrf.mxu0 }
 0x153   : > { %3153 = vmatprep.subr.bf16.mxu1 %v8665_v9  ;;  %v10470_v9 = vpop.f32.mrf.mxu1 }
 0x154   : > { %3057 = vmatmul.mubr.bf16.vlgmr.msra.gmra.mxu0 %v10294_v43 }
 0x155   : > { %3100 = vmatmul.mubr.bf16.vlgmr.msra.gmra.mxu1 %v10025_v40  ;;  %3111 = vmatpush1.bf16.msra.mxu0 %v8660_v10  ;;  %v8675_v40 = vld [vmem:[%s12195_s1 + $0x4a8] ss:$16 sps:$4 sm:$0xff]   ;;  %v7476_v10 = vcombine.high %v10460_v51, %v10457_v5 }
 0x156   : > { %3154 = vmatpush1.bf16.msra.mxu1 %v8663_v11  ;;  %3112 = vmatprep.subr.bf16.mxu0 %v8668_v31  ;;  %v8738_v11 = vld [vmem:[%s12195_s1 + $0x348] ss:$16 sps:$4 sm:$0xff]  }
 0x157   : > { %3155 = vmatprep.subr.bf16.mxu1 %v8671_v12  ;;  %3142 = vmatprep.mubr.bf16.mxu0 %v9887_v54  ;;  %v8678_v54 = vld [vmem:[%s12195_s1 + $0x288] ss:$16 sps:$4 sm:$0xff]   ;;  %v10481_v12 = vld [vmem:[%s9342_s12 + $0x20] sm:$0x11] }
 0x158   : > { %3185 = vmatprep.mubr.bf16.mxu1 %v10103_v3  ;;  %v8681_v3 = vld [vmem:[%s12195_s1 + $0x488] ss:$16 sps:$4 sm:$0xff]  }
 0x159   : > { %3113 = vmatpush1.bf16.msra.mxu0 %v8666_v13  ;;  %v8741_v31 = vld [vmem:[%s12195_s1 + $0x548] ss:$16 sps:$4 sm:$0xff]   ;;  %v10483_v13 = vpop.f32.mrf.mxu0 }
 0x15a   : > { %3156 = vmatpush1.bf16.msra.mxu1 %v8669_v14  ;;  %3114 = vmatprep.subr.bf16.mxu0 %v8674_v15  ;;  %v1883_v14 = vpop.f32.mrf.mxu1  ;;  %v8746_v15 = vld [vmem:[%s12195_s1 + $0x32c] ss:$16 sps:$4 sm:$0xff]  }
 0x15b   : > { %3157 = vmatprep.subr.bf16.mxu1 %v8677_v16  ;;  %v8749_v16 = vld [vmem:[%s12195_s1 + $0x52c] ss:$16 sps:$4 sm:$0xff]  }
 0x15d   : > { %3115 = vmatpush1.bf16.msra.mxu0 %v8672_v17  ;;  %v10493_v17 = vcombine.high %v10481_v12, %v10481_v12 }
 0x15e   : > { %3158 = vmatpush1.bf16.msra.mxu1 %v8675_v40  ;;  %3116 = vmatprep.subr.bf16.mxu0 %v8680_v18  ;;  %v3236_v40 = vshll.u32 %v7476_v10, 16  ;;  %v8744_v18 = vld [vmem:[%s12195_s1 + $0x328] ss:$16 sps:$4 sm:$0xff]  }
 0x15f   : > { %3159 = vmatprep.subr.bf16.mxu1 %v8683_v19  ;;  %v8747_v19 = vld [vmem:[%s12195_s1 + $0x528] ss:$16 sps:$4 sm:$0xff]  }
 0x161   : > { %3117 = vmatpush1.bf16.msra.mxu0 %v8678_v54  ;;  %v10501_v54 = vpop.f32.mrf.mxu0 }
 0x162   : > { %3160 = vmatpush1.bf16.msra.mxu1 %v8681_v3  ;;  %3118 = vmatprep.subr.bf16.mxu0 %v8686_v20  ;;  %v1885_v3 = vpop.f32.mrf.mxu1  ;;  %v8752_v20 = vld [vmem:[%s12195_s1 + $0x30c] ss:$16 sps:$4 sm:$0xff]  }
 0x163   : > { %3161 = vmatprep.subr.bf16.mxu1 %v8689_v21  ;;  %v8755_v21 = vld [vmem:[%s12195_s1 + $0x50c] ss:$16 sps:$4 sm:$0xff]  }
 0x165   : > { %3119 = vmatpush1.bf16.msra.mxu0 %v8684_v23  ;;  %v3234_v23 = vshrl.u32 %v7476_v10, 16  ;;  %v8776_v10 = vld [vmem:[%s12195_s1 + $0xc84] ss:$16 sps:$4 sm:$0xff]  }
 0x166   : > { %3162 = vmatpush1.bf16.msra.mxu1 %v8687_v24  ;;  %3120 = vmatprep.subr.bf16.mxu0 %v8692_v26  ;;  %v3238_v24 = vrot.slane %v3236_v40, 1  ;;  %v3241_v26 = vshll.u32 %v10493_v17, 16  ;;  %v8774_v40 = vld [vmem:[%s12195_s1 + $0xc80] ss:$16 sps:$4 sm:$0xff]  }
 0x167   : > { %3163 = vmatprep.subr.bf16.mxu1 %v8695_v27  ;;  %v8750_v27 = vld [vmem:[%s12195_s1 + $0x308] ss:$16 sps:$4 sm:$0xff]  }
 0x169   : > { %3121 = vmatpush1.bf16.msra.mxu0 %v8690_v28  ;;  %v8753_v28 = vld [vmem:[%s12195_s1 + $0x508] ss:$16 sps:$4 sm:$0xff]  }
 0x16a   : > { %3164 = vmatpush1.bf16.msra.mxu1 %v8693_v29  ;;  %3122 = vmatprep.subr.bf16.mxu0 %v8698_v33  ;;  %v10516_v29 = vpop.f32.mrf.mxu0  ;;  %v1887_v33 = vpop.f32.mrf.mxu1 }
 0x16b   : > { %3165 = vmatprep.subr.bf16.mxu1 %v8701_v48  ;;  %v8758_v48 = vld [vmem:[%s12195_s1 + $0xce4] ss:$16 sps:$4 sm:$0xff]  }
 0x16d   : > { %3123 = vmatpush1.bf16.msra.mxu0 %v8696_v34  ;;  %v8761_v34 = vld [vmem:[%s12195_s1 + $0xee4] ss:$16 sps:$4 sm:$0xff]  }
 0x16e   : > { %3166 = vmatpush1.bf16.msra.mxu1 %v8699_v36  ;;  %3124 = vmatprep.subr.bf16.mxu0 %v8704_v37  ;;  %v3239_v36 = vor.u32 %v3238_v24, %v3234_v23  ;;  %v3243_v37 = vrot.slane %v3241_v26, 1  ;;  %v8788_v23 = vld [vmem:[%s12195_s1 + $0xc44] ss:$16 sps:$4 sm:$0xff]   ;;  %v8786_v26 = vld [vmem:[%s12195_s1 + $0xc40] ss:$16 sps:$4 sm:$0xff]  }
 0x16f   : > { %3167 = vmatprep.subr.bf16.mxu1 %v8707_v38  ;;  %v8756_v38 = vld [vmem:[%s12195_s1 + $0xce0] ss:$16 sps:$4 sm:$0xff]   ;;  %v8791_v24 = vld [vmem:[%s12195_s1 + $0xe44] ss:$16 sps:$4 sm:$0xff]  }
 0x171   : > { %3125 = vmatpush1.bf16.msra.mxu0 %v8702_v39  ;;  %v8759_v39 = vld [vmem:[%s12195_s1 + $0xee0] ss:$16 sps:$4 sm:$0xff]  }
 0x172   : > { %3168 = vmatpush1.bf16.msra.mxu1 %v8705_v41  ;;  %3126 = vmatprep.subr.bf16.mxu0 %v8710_v62  ;;  %v10530_v41 = vpop.f32.mrf.mxu0  ;;  %v1889_v62 = vpop.f32.mrf.mxu1 }
 0x173   : > { %3169 = vmatprep.subr.bf16.mxu1 %v8713_v42  ;;  %v8764_v42 = vld [vmem:[%s12195_s1 + $0xcc4] ss:$16 sps:$4 sm:$0xff]  }
 0x175   : > { %3127 = vmatpush2.bf16.msra.mxu0 %v8708_v25  ;;  %v8767_v25 = vld [vmem:[%s12195_s1 + $0xec4] ss:$16 sps:$4 sm:$0xff]  }
 0x176   : > { %3170 = vmatpush2.bf16.msra.mxu1 %v8711_v44  ;;  %3128 = vmatprep.subr.bf16.mxu0 %v8716_v4  ;;  %v10539_v44 = vld [vmem:[%s9342_s12 + $0x10] sm:$0xff] }
 0x177   : > { %3171 = vmatprep.subr.bf16.mxu1 %v8719_v45  ;;  %v10543_v4 = vcombine.high %v10539_v44, %v10457_v5 }
 0x179   : > { %3129 = vmatpush2.bf16.msra.mxu0 %v8714_v46 }
 0x17a   : > { %3172 = vmatpush2.bf16.msra.mxu1 %v8717_v32  ;;  %3130 = vmatprep.subr.bf16.mxu0 %v8722_v47  ;;  %v10548_v32 = vsel %vm280_vm0, %v3239_v36, %v3243_v37  ;;  %v8800_v36 = vld [vmem:[%s12195_s1 + $0xc04] ss:$16 sps:$4 sm:$0xff]  }
 0x17b   : > { %3173 = vmatprep.subr.bf16.mxu1 %v8725_v49  ;;  %v8762_v49 = vld [vmem:[%s12195_s1 + $0xcc0] ss:$16 sps:$4 sm:$0xff]   ;;  %v8803_v37 = vld [vmem:[%s12195_s1 + $0xe04] ss:$16 sps:$4 sm:$0xff]  }
 0x17d   : > { %3131 = vmatpush2.bf16.msra.mxu0 %v8720_v55  ;;  %v8765_v55 = vld [vmem:[%s12195_s1 + $0xec0] ss:$16 sps:$4 sm:$0xff]  }
 0x17e   : > { %3174 = vmatpush2.bf16.msra.mxu1 %v8723_v22  ;;  %3132 = vmatprep.subr.bf16.mxu0 %v8728_v35 }
 0x17f   : > { %3175 = vmatprep.subr.bf16.mxu1 %v8731_v56 }
 0x181   : > { %3133 = vmatpush2.bf16.msra.mxu0 %v8726_v53 }
 0x182   : > { %3176 = vmatpush2.bf16.msra.mxu1 %v8729_v59  ;;  %3134 = vmatprep.subr.bf16.mxu0 %v8734_v30 }
 0x183   : > { %3177 = vmatprep.subr.bf16.mxu1 %v8737_v60 }
 0x185   : > { %3135 = vmatpush2.bf16.msra.mxu0 %v8732_v1 }
 0x186   : > { %3178 = vmatpush2.bf16.msra.mxu1 %v8735_v2  ;;  %3136 = vmatprep.subr.bf16.mxu0 %v8740_v6  ;;  %v8768_v2 = vld [vmem:[%s12195_s1 + $0xca0] ss:$16 sps:$4 sm:$0xff]  }
 0x187   : > { %3179 = vmatprep.subr.bf16.mxu1 %v8743_v7  ;;  %v8771_v6 = vld [vmem:[%s12195_s1 + $0xea0] ss:$16 sps:$4 sm:$0xff]  }
 0x189   : > { %3137 = vmatpush2.bf16.msra.mxu0 %v8738_v11  ;;  %v8779_v11 = vld [vmem:[%s12195_s1 + $0xe84] ss:$16 sps:$4 sm:$0xff]  }
 0x18a   : > { %3180 = vmatpush2.bf16.msra.mxu1 %v8741_v31  ;;  %3138 = vmatprep.subr.bf16.mxu0 %v8746_v15 }
 0x18b   : > { %3181 = vmatprep.subr.bf16.mxu1 %v8749_v16 }
 0x18d   : > { %3139 = vmatpush2.bf16.msra.mxu0 %v8744_v18  ;;  %v8777_v18 = vld [vmem:[%s12195_s1 + $0xe80] ss:$16 sps:$4 sm:$0xff]  }
 0x18e   : > { %3182 = vmatpush2.bf16.msra.mxu1 %v8747_v19  ;;  %3140 = vmatprep.subr.bf16.mxu0 %v8752_v20  ;;  %v8782_v19 = vld [vmem:[%s12195_s1 + $0xc64] ss:$16 sps:$4 sm:$0xff]   ;;  %v8780_v20 = vld [vmem:[%s12195_s1 + $0xc60] ss:$16 sps:$4 sm:$0xff]  }
 0x18f   : > { %3183 = vmatprep.subr.bf16.mxu1 %v8755_v21  ;;  %v8783_v21 = vld [vmem:[%s12195_s1 + $0xe60] ss:$16 sps:$4 sm:$0xff]  }
 0x191   : > { %3141 = vmatpush2.bf16.msra.mxu0 %v8750_v27  ;;  %v8789_v27 = vld [vmem:[%s12195_s1 + $0xe40] ss:$16 sps:$4 sm:$0xff]  }
 0x192   : > { %3184 = vmatpush2.bf16.msra.mxu1 %v8753_v28  ;;  %4413 = vmatprep.subr.bf16.mxu0 %v8758_v48  ;;  %v8794_v28 = vld [vmem:[%s12195_s1 + $0xc24] ss:$16 sps:$4 sm:$0xff]   ;;  %v8792_v48 = vld [vmem:[%s12195_s1 + $0xc20] ss:$16 sps:$4 sm:$0xff]  }
 0x193   : > { %4456 = vmatprep.subr.bf16.mxu1 %v8761_v34  ;;  %v8795_v34 = vld [vmem:[%s12195_s1 + $0xe20] ss:$16 sps:$4 sm:$0xff]  }
 0x194   : > { %v1926_v45 = vpop.f32.mrf.mxu0  ;;  %3143 = vmatmul.mubr.bf16.vlgmr.msra.gmra.mxu0 %v10086_v63  ;;  %v8770_v63 = vld [vmem:[%s12195_s1 + $0xca4] ss:$16 sps:$4 sm:$0xff]  }
 0x195   : > { %v1969_v46 = vpop.f32.mrf.mxu1  ;;  %3186 = vmatmul.mubr.bf16.vlgmr.msra.gmra.mxu1 %v10294_v43  ;;  %v1927_v47 = vadd.f32 %v1926_v45, %v1883_v14  ;;  %4414 = vmatpush1.bf16.msra.mxu0 %v8756_v38  ;;  %v8773_v43 = vld [vmem:[%s12195_s1 + $0xea4] ss:$16 sps:$4 sm:$0xff]   ;;  %v8798_v38 = vld [vmem:[%s12195_s1 + $0xc00] ss:$16 sps:$4 sm:$0xff]  }
 0x196   : > { %4457 = vmatpush1.bf16.msra.mxu1 %v8759_v39  ;;  %v1928_v22 = vpop.f32.mrf.mxu0  ;;  %4415 = vmatprep.subr.bf16.mxu0 %v8764_v42  ;;  %v8801_v39 = vld [vmem:[%s12195_s1 + $0xe00] ss:$16 sps:$4 sm:$0xff]   ;;  %v8809_v42 = vld [vmem:[%s12195_s1 + $0xfe4] ss:$16 sps:$4 sm:$0xff]  }
 0x197   : > { %v1971_v35 = vpop.f32.mrf.mxu1  ;;  %4458 = vmatprep.subr.bf16.mxu1 %v8767_v25  ;;  %v10562_v56 = vadd.f32 %v1969_v46, %v1927_v47  ;;  %v1929_v53 = vadd.f32 %v1928_v22, %v1885_v3  ;;  %4445 = vmatprep.mubr.bf16.mxu0 %v10543_v4  ;;  %v8785_v3 = vld [vmem:[%s12195_s1 + $0xe64] ss:$16 sps:$4 sm:$0xff]   ;;  %v8804_v25 = vld [vmem:[%s12195_s1 + $0xde0] ss:$16 sps:$4 sm:$0xff]  }
 0x198   : > { %4488 = vmatprep.mubr.bf16.mxu1 %v10548_v32  ;;  %v1930_v59 = vpop.f32.mrf.mxu0  ;;  %v8807_v45 = vld [vmem:[%s12195_s1 + $0xfe0] ss:$16 sps:$4 sm:$0xff]   ;;  %v8812_v46 = vld [vmem:[%s12195_s1 + $0xdc4] ss:$16 sps:$4 sm:$0xff]  }
 0x199   : > { %v1973_v30 = vpop.f32.mrf.mxu1  ;;  %v10566_v60 = vadd.f32 %v1971_v35, %v1929_v53  ;;  %v1931_v1 = vadd.f32 %v1930_v59, %v1887_v33  ;;  %4416 = vmatpush1.bf16.msra.mxu0 %v8762_v49  ;;  %v8797_v33 = vld [vmem:[%s12195_s1 + $0xe24] ss:$16 sps:$4 sm:$0xff]   ;;  %v8810_v49 = vld [vmem:[%s12195_s1 + $0xdc0] ss:$16 sps:$4 sm:$0xff]  }
 0x19a   : > { %4459 = vmatpush1.bf16.msra.mxu1 %v8765_v55  ;;  %v1932_v7 = vpop.f32.mrf.mxu0  ;;  %4417 = vmatprep.subr.bf16.mxu0 %v8770_v63  ;;  %v8815_v47 = vld [vmem:[%s12195_s1 + $0xfc4] ss:$16 sps:$4 sm:$0xff]   ;;  %v8813_v55 = vld [vmem:[%s12195_s1 + $0xfc0] ss:$16 sps:$4 sm:$0xff]  }
 0x19b   : > { %4460 = vmatprep.subr.bf16.mxu1 %v8773_v43  ;;  %v10580_v31 = vadd.f32 %v1973_v30, %v1931_v1  ;;  %v1933_v14 = vadd.f32 %v1932_v7, %v1889_v62  ;;  %v1975_v15 = vpop.f32.mrf.mxu1  ;;  %v8806_v62 = vld [vmem:[%s12195_s1 + $0xde4] ss:$16 sps:$4 sm:$0xff]   ;;  %v8816_v63 = vld [vmem:[%s12195_s1 + $0xda0] ss:$16 sps:$4 sm:$0xff]  }
 0x19c   : > { %v8818_v22 = vld [vmem:[%s12195_s1 + $0xda4] ss:$16 sps:$4 sm:$0xff]   ;;  %v8819_v43 = vld [vmem:[%s12195_s1 + $0xfa0] ss:$16 sps:$4 sm:$0xff]  }
 0x19d   : > { %v10582_v16 = vadd.f32 %v1975_v15, %v1933_v14  ;;  %4418 = vmatpush1.bf16.msra.mxu0 %v8768_v2  ;;  %v8821_v35 = vld [vmem:[%s12195_s1 + $0xfa4] ss:$16 sps:$4 sm:$0xff]   ;;  %v8822_v30 = vld [vmem:[%s12195_s1 + $0xd80] ss:$16 sps:$4 sm:$0xff]  }
 0x19e   : > { %4461 = vmatpush1.bf16.msra.mxu1 %v8771_v6  ;;  %4419 = vmatprep.subr.bf16.mxu0 %v8776_v10  ;;  %v8824_v53 = vld [vmem:[%s12195_s1 + $0xd84] ss:$16 sps:$4 sm:$0xff]   ;;  %v8825_v1 = vld [vmem:[%s12195_s1 + $0xf80] ss:$16 sps:$4 sm:$0xff]  }
 0x19f   : > { %4462 = vmatprep.subr.bf16.mxu1 %v8779_v11  ;;  %v8827_v59 = vld [vmem:[%s12195_s1 + $0xf84] ss:$16 sps:$4 sm:$0xff]   ;;  %v8828_v7 = vld [vmem:[%s12195_s1 + $0xd60] ss:$16 sps:$4 sm:$0xff]   ;;  %v7475_v11 = vcombine.low %v10460_v51, %v10457_v5 }
 0x1a0   : > { %v8830_v2 = vld [vmem:[%s12195_s1 + $0xd64] ss:$16 sps:$4 sm:$0xff]   ;;  %v8831_v10 = vld [vmem:[%s12195_s1 + $0xf60] ss:$16 sps:$4 sm:$0xff]  }
 0x1a1   : > { %4420 = vmatpush1.bf16.msra.mxu0 %v8774_v40  ;;  %v8833_v6 = vld [vmem:[%s12195_s1 + $0xf64] ss:$16 sps:$4 sm:$0xff]   ;;  %v8834_v40 = vld [vmem:[%s12195_s1 + $0xd40] ss:$16 sps:$4 sm:$0xff]  }
 0x1a2   : > { %4463 = vmatpush1.bf16.msra.mxu1 %v8777_v18  ;;  %4421 = vmatprep.subr.bf16.mxu0 %v8782_v19  ;;  %v8836_v14 = vld [vmem:[%s12195_s1 + $0xd44] ss:$16 sps:$4 sm:$0xff]   ;;  %v8837_v51 = vld [vmem:[%s12195_s1 + $0xf40] ss:$16 sps:$4 sm:$0xff]   ;;  %v10714_v18 = vcombine.low %v10481_v12, %v10481_v12  ;;  %v3224_v19 = vshll.u32 %v7475_v11, 16 }
 0x1a3   : > { %4464 = vmatprep.subr.bf16.mxu1 %v8785_v3  ;;  %v8839_v15 = vld [vmem:[%s12195_s1 + $0xf44] ss:$16 sps:$4 sm:$0xff]   ;;  %v8843_v12 = vld [vmem:[%s12195_s1 + $0xf20] ss:$16 sps:$4 sm:$0xff]  }
 0x1a4   : > { %v8842_v3 = vld [vmem:[%s12195_s1 + $0xd24] ss:$16 sps:$4 sm:$0xff]  }
 0x1a5   : > { %4422 = vmatpush1.bf16.msra.mxu0 %v8780_v20  ;;  %v8845_v20 = vld [vmem:[%s12195_s1 + $0xf24] ss:$16 sps:$4 sm:$0xff]  }
 0x1a6   : > { %4465 = vmatpush1.bf16.msra.mxu1 %v8783_v21  ;;  %4423 = vmatprep.subr.bf16.mxu0 %v8788_v23  ;;  %v8840_v21 = vld [vmem:[%s12195_s1 + $0xd20] ss:$16 sps:$4 sm:$0xff]   ;;  %v3222_v23 = vshrl.u32 %v7475_v11, 16  ;;  %v8885_v11 = vld [vmem:[%s12195_s1 + $0xc68] ss:$16 sps:$4 sm:$0xff]  }
 0x1a7   : > { %4466 = vmatprep.subr.bf16.mxu1 %v8791_v24  ;;  %v3226_v24 = vrot.slane %v3224_v19, 1  ;;  %v8896_v19 = vld [vmem:[%s12195_s1 + $0x1024] ss:$16 sps:$4 sm:$0xff]  }
 0x1a9   : > { %4424 = vmatpush1.bf16.msra.mxu0 %v8786_v26  ;;  %v3229_v26 = vshll.u32 %v10714_v18, 16 }
 0x1aa   : > { %4467 = vmatpush1.bf16.msra.mxu1 %v8789_v27  ;;  %4425 = vmatprep.subr.bf16.mxu0 %v8794_v28  ;;  %v10730_v27 = vld [vmem:[%s9342_s12 + $0x10] sm:$0xee]  ;;  %s9061_s12 = scalar_lea.vmem %s9060_s11, 128 }
 0x1ab   : > { %4468 = vmatprep.subr.bf16.mxu1 %v8797_v33  ;;  %v8848_v28 = vld [vmem:[%s12195_s1 + $0xd04] ss:$16 sps:$4 sm:$0xff]   ;;  %p9063_p1 = scmp.lt.s32.totalorder %s9061_s12, %s9055_s29 }
 0x1ac   : > { %v8851_v33 = vld [vmem:[%s12195_s1 + $0xf04] ss:$16 sps:$4 sm:$0xff]  }
 0x1ad   : > { %4426 = vmatpush1.bf16.msra.mxu0 %v8792_v48  ;;  %v7480_v48 = vcombine.high %v10730_v27, %v10457_v5  ;;  %p9064_p2 = por %p9063_p1, %p9062_p0 }
 0x1ae   : > { %4469 = vmatpush1.bf16.msra.mxu1 %v8795_v34  ;;  %4427 = vmatprep.subr.bf16.mxu0 %v8800_v36  ;;  %v8846_v34 = vld [vmem:[%s12195_s1 + $0xd00] ss:$16 sps:$4 sm:$0xff]  }
 0x1af   : > { %4470 = vmatprep.subr.bf16.mxu1 %v8803_v37  ;;  %v8849_v36 = vld [vmem:[%s12195_s1 + $0xf00] ss:$16 sps:$4 sm:$0xff]   ;;  %v3227_v37 = vor.u32 %v3226_v24, %v3222_v23  ;;  %v8905_v23 = vld [vmem:[%s12195_s1 + $0xc0c] ss:$16 sps:$4 sm:$0xff]   ;;  %p9065_p3 = pnand %p9064_p2, %p9058_p13 }
 0x1b0   : > { %v8900_v24 = vld [vmem:[%s12195_s1 + $0x1000] ss:$16 sps:$4 sm:$0xff]  }
 0x1b1   : > { %4428 = vmatpush1.bf16.msra.mxu0 %v8798_v38  ;;  %v3231_v38 = vrot.slane %v3229_v26, 1  ;;  %v8903_v26 = vld [vmem:[%s12195_s1 + $0xc08] ss:$16 sps:$4 sm:$0xff]  }
 0x1b2   : > { %4471 = vmatpush1.bf16.msra.mxu1 %v8801_v39  ;;  %4429 = vmatprep.subr.bf16.mxu0 %v8806_v62  ;;  %v8860_v39 = vld [vmem:[%s12195_s1 + $0x10e4] ss:$16 sps:$4 sm:$0xff]   ;;  %v8863_v62 = vld [vmem:[%s12195_s1 + $0xcec] ss:$16 sps:$4 sm:$0xff]  }
 0x1b3   : > { %4472 = vmatprep.subr.bf16.mxu1 %v8809_v42  ;;  %v10754_v42 = vcombine.low %v10539_v44, %v10457_v5  ;;  %v8866_v44 = vld [vmem:[%s12195_s1 + $0x10c4] ss:$16 sps:$4 sm:$0xff]  }
 0x1b5   : > { %4430 = vmatpush2.bf16.msra.mxu0 %v8804_v25  ;;  %v3255_v25 = vrot.slane %v7480_v48, 1  ;;  %v8906_v48 = vld [vmem:[%s12195_s1 + $0x11e0] ss:$16 sps:$4 sm:$0xff]  }
 0x1b6   : > { %4473 = vmatpush2.bf16.msra.mxu1 %v8807_v45  ;;  %4431 = vmatprep.subr.bf16.mxu0 %v8812_v46  ;;  %v3256_v45 = vrot.slane %v10493_v17, 1  ;;  %v10758_v46 = vsel %vm280_vm0, %v3227_v37, %v3231_v38  ;;  %v8869_v17 = vld [vmem:[%s12195_s1 + $0xccc] ss:$16 sps:$4 sm:$0xff]   ;;  %v8912_v38 = vld [vmem:[%s12195_s1 + $0x11c0] ss:$16 sps:$4 sm:$0xff]  }
 0x1b7   : > { %4474 = vmatprep.subr.bf16.mxu1 %v8815_v47  ;;  %v8858_v47 = vld [vmem:[%s12195_s1 + $0x10e0] ss:$16 sps:$4 sm:$0xff]   ;;  %v8917_v37 = vld [vmem:[%s12195_s1 + $0xdcc] ss:$16 sps:$4 sm:$0xff]  }
 0x1b9   : > { %4432 = vmatpush2.bf16.msra.mxu0 %v8810_v49  ;;  %v8861_v49 = vld [vmem:[%s12195_s1 + $0xce8] ss:$16 sps:$4 sm:$0xff]  }
 0x1ba   : > { %4475 = vmatpush2.bf16.msra.mxu1 %v8813_v55  ;;  %4433 = vmatprep.subr.bf16.mxu0 %v8818_v22  ;;  %v10775_v55 = vsel %vm312_vm1, %v3255_v25, %v3256_v45  ;;  %v8864_v22 = vld [vmem:[%s12195_s1 + $0x10c0] ss:$16 sps:$4 sm:$0xff]   ;;  %v8923_v25 = vld [vmem:[%s12195_s1 + $0xdac] ss:$16 sps:$4 sm:$0xff]  }
 0x1bb   : > { %4476 = vmatprep.subr.bf16.mxu1 %v8821_v35  ;;  %v8867_v35 = vld [vmem:[%s12195_s1 + $0xcc8] ss:$16 sps:$4 sm:$0xff]   ;;  %v8918_v45 = vld [vmem:[%s12195_s1 + $0x11a0] ss:$16 sps:$4 sm:$0xff]  }
 0x1bd   : > { %4434 = vmatpush2.bf16.msra.mxu0 %v8816_v63  ;;  %v8872_v63 = vld [vmem:[%s12195_s1 + $0x10a4] ss:$16 sps:$4 sm:$0xff]  }
 0x1be   : > { %4477 = vmatpush2.bf16.msra.mxu1 %v8819_v43  ;;  %4435 = vmatprep.subr.bf16.mxu0 %v8824_v53  ;;  %v8875_v43 = vld [vmem:[%s12195_s1 + $0xcac] ss:$16 sps:$4 sm:$0xff]   ;;  %v8870_v53 = vld [vmem:[%s12195_s1 + $0x10a0] ss:$16 sps:$4 sm:$0xff]  }
 0x1bf   : > { %4478 = vmatprep.subr.bf16.mxu1 %v8827_v59  ;;  %v8873_v59 = vld [vmem:[%s12195_s1 + $0xca8] ss:$16 sps:$4 sm:$0xff]  }
 0x1c1   : > { %4436 = vmatpush2.bf16.msra.mxu0 %v8822_v30  ;;  %v8878_v30 = vld [vmem:[%s12195_s1 + $0x1084] ss:$16 sps:$4 sm:$0xff]  }
 0x1c2   : > { %4479 = vmatpush2.bf16.msra.mxu1 %v8825_v1  ;;  %4437 = vmatprep.subr.bf16.mxu0 %v8830_v2  ;;  %v8876_v1 = vld [vmem:[%s12195_s1 + $0x1080] ss:$16 sps:$4 sm:$0xff]   ;;  %v8879_v2 = vld [vmem:[%s12195_s1 + $0xc88] ss:$16 sps:$4 sm:$0xff]  }
 0x1c3   : > { %4480 = vmatprep.subr.bf16.mxu1 %v8833_v6  ;;  %v8884_v6 = vld [vmem:[%s12195_s1 + $0x1064] ss:$16 sps:$4 sm:$0xff]  }
 0x1c5   : > { %4438 = vmatpush2.bf16.msra.mxu0 %v8828_v7  ;;  %v8887_v7 = vld [vmem:[%s12195_s1 + $0xc6c] ss:$16 sps:$4 sm:$0xff]  }
 0x1c6   : > { %4481 = vmatpush2.bf16.msra.mxu1 %v8831_v10  ;;  %4439 = vmatprep.subr.bf16.mxu0 %v8836_v14  ;;  %v8882_v10 = vld [vmem:[%s12195_s1 + $0x1060] ss:$16 sps:$4 sm:$0xff]   ;;  %v8890_v14 = vld [vmem:[%s12195_s1 + $0x1044] ss:$16 sps:$4 sm:$0xff]  }
 0x1c7   : > { %4482 = vmatprep.subr.bf16.mxu1 %v8839_v15  ;;  %v8893_v15 = vld [vmem:[%s12195_s1 + $0xc4c] ss:$16 sps:$4 sm:$0xff]  }
 0x1c9   : > { %4440 = vmatpush2.bf16.msra.mxu0 %v8834_v40  ;;  %v8888_v40 = vld [vmem:[%s12195_s1 + $0x1040] ss:$16 sps:$4 sm:$0xff]  }
 0x1ca   : > { %4483 = vmatpush2.bf16.msra.mxu1 %v8837_v51  ;;  %4441 = vmatprep.subr.bf16.mxu0 %v8842_v3  ;;  %v8891_v51 = vld [vmem:[%s12195_s1 + $0xc48] ss:$16 sps:$4 sm:$0xff]   ;;  %v8899_v3 = vld [vmem:[%s12195_s1 + $0xc2c] ss:$16 sps:$4 sm:$0xff]  }
 0x1cb   : > { %4484 = vmatprep.subr.bf16.mxu1 %v8845_v20  ;;  %v8894_v20 = vld [vmem:[%s12195_s1 + $0x1020] ss:$16 sps:$4 sm:$0xff]  }
 0x1cd   : > { %4442 = vmatpush2.bf16.msra.mxu0 %v8840_v21  ;;  %v8897_v21 = vld [vmem:[%s12195_s1 + $0xc28] ss:$16 sps:$4 sm:$0xff]  }
 0x1ce   : > { %4485 = vmatpush2.bf16.msra.mxu1 %v8843_v12  ;;  %4443 = vmatprep.subr.bf16.mxu0 %v8848_v28  ;;  %v8902_v12 = vld [vmem:[%s12195_s1 + $0x1004] ss:$16 sps:$4 sm:$0xff]  }
 0x1cf   : > { %4486 = vmatprep.subr.bf16.mxu1 %v8851_v33  ;;  %v8908_v28 = vld [vmem:[%s12195_s1 + $0x11e4] ss:$16 sps:$4 sm:$0xff]   ;;  %v8911_v33 = vld [vmem:[%s12195_s1 + $0xdec] ss:$16 sps:$4 sm:$0xff]  }
 0x1d1   : > { %4444 = vmatpush2.bf16.msra.mxu0 %v8846_v34  ;;  %v8909_v34 = vld [vmem:[%s12195_s1 + $0xde8] ss:$16 sps:$4 sm:$0xff]  }
 0x1d2   : > { %4487 = vmatpush2.bf16.msra.mxu1 %v8849_v36  ;;  %4499 = vmatprep.subr.bf16.mxu0 %v8860_v39  ;;  %v8914_v36 = vld [vmem:[%s12195_s1 + $0x11c4] ss:$16 sps:$4 sm:$0xff]   ;;  %v8915_v39 = vld [vmem:[%s12195_s1 + $0xdc8] ss:$16 sps:$4 sm:$0xff]  }
 0x1d3   : > { %4542 = vmatprep.subr.bf16.mxu1 %v8863_v62  ;;  %v8920_v62 = vld [vmem:[%s12195_s1 + $0x11a4] ss:$16 sps:$4 sm:$0xff]  }
 0x1d4   : > { %4446 = vmatmul.mubr.bf16.vlgmr.msra.gmra.mxu0 %v10754_v42 }
 0x1d5   : > { %4489 = vmatmul.mubr.bf16.vlgmr.msra.gmra.mxu1 %v10758_v46  ;;  %4500 = vmatpush1.bf16.msra.mxu0 %v8858_v47  ;;  %v8921_v47 = vld [vmem:[%s12195_s1 + $0xda8] ss:$16 sps:$4 sm:$0xff]  }
 0x1d6   : > { %4543 = vmatpush1.bf16.msra.mxu1 %v8861_v49  ;;  %4501 = vmatprep.subr.bf16.mxu0 %v8866_v44  ;;  %v8926_v49 = vld [vmem:[%s12195_s1 + $0x1184] ss:$16 sps:$4 sm:$0xff]   ;;  %v8929_v44 = vld [vmem:[%s12195_s1 + $0xd8c] ss:$16 sps:$4 sm:$0xff]  }
 0x1d7   : > { %4544 = vmatprep.subr.bf16.mxu1 %v8869_v17  ;;  %4531 = vmatprep.mubr.bf16.mxu0 %v10775_v55  ;;  %v8924_v17 = vld [vmem:[%s12195_s1 + $0x1180] ss:$16 sps:$4 sm:$0xff]  }
 0x1d8   : > { %4574 = vmatprep.mubr.bf16.mxu1 %v10543_v4  ;;  %v8881_v4 = vld [vmem:[%s12195_s1 + $0xc8c] ss:$16 sps:$4 sm:$0xff]  }
 0x1d9   : > { %4502 = vmatpush1.bf16.msra.mxu0 %v8864_v22  ;;  %v8927_v22 = vld [vmem:[%s12195_s1 + $0xd88] ss:$16 sps:$4 sm:$0xff]  }
 0x1da   : > { %4545 = vmatpush1.bf16.msra.mxu1 %v8867_v35  ;;  %4503 = vmatprep.subr.bf16.mxu0 %v8872_v63  ;;  %v8932_v35 = vld [vmem:[%s12195_s1 + $0x1164] ss:$16 sps:$4 sm:$0xff]   ;;  %v8935_v63 = vld [vmem:[%s12195_s1 + $0xd6c] ss:$16 sps:$4 sm:$0xff]  }
 0x1db   : > { %4546 = vmatprep.subr.bf16.mxu1 %v8875_v43  ;;  %v8930_v43 = vld [vmem:[%s12195_s1 + $0x1160] ss:$16 sps:$4 sm:$0xff]  }
 0x1dd   : > { %4504 = vmatpush1.bf16.msra.mxu0 %v8870_v53  ;;  %v8933_v53 = vld [vmem:[%s12195_s1 + $0xd68] ss:$16 sps:$4 sm:$0xff]  }
 0x1de   : > { %4547 = vmatpush1.bf16.msra.mxu1 %v8873_v59  ;;  %4505 = vmatprep.subr.bf16.mxu0 %v8878_v30  ;;  %v8938_v59 = vld [vmem:[%s12195_s1 + $0x1144] ss:$16 sps:$4 sm:$0xff]   ;;  %v8941_v30 = vld [vmem:[%s12195_s1 + $0xd4c] ss:$16 sps:$4 sm:$0xff]  }
 0x1df   : > { %4548 = vmatprep.subr.bf16.mxu1 %v8881_v4  ;;  %v8936_v4 = vld [vmem:[%s12195_s1 + $0x1140] ss:$16 sps:$4 sm:$0xff]  }
 0x1e1   : > { %4506 = vmatpush1.bf16.msra.mxu0 %v8876_v1  ;;  %v8939_v1 = vld [vmem:[%s12195_s1 + $0xd48] ss:$16 sps:$4 sm:$0xff]  }
 0x1e2   : > { %4549 = vmatpush1.bf16.msra.mxu1 %v8879_v2  ;;  %4507 = vmatprep.subr.bf16.mxu0 %v8884_v6  ;;  %v10929_v2 = vpop.f32.mrf.mxu1  ;;  %v8944_v6 = vld [vmem:[%s12195_s1 + $0x1124] ss:$16 sps:$4 sm:$0xff]  }
 0x1e3   : > { %4550 = vmatprep.subr.bf16.mxu1 %v8887_v7  ;;  %v8947_v7 = vld [vmem:[%s12195_s1 + $0xd2c] ss:$16 sps:$4 sm:$0xff]  }
 0x1e5   : > { %4508 = vmatpush1.bf16.msra.mxu0 %v8882_v10  ;;  %v8942_v10 = vld [vmem:[%s12195_s1 + $0x1120] ss:$16 sps:$4 sm:$0xff]  }
 0x1e6   : > { %4551 = vmatpush1.bf16.msra.mxu1 %v8885_v11  ;;  %4509 = vmatprep.subr.bf16.mxu0 %v8890_v14  ;;  %v8945_v11 = vld [vmem:[%s12195_s1 + $0xd28] ss:$16 sps:$4 sm:$0xff]   ;;  %v7479_v14 = vcombine.low %v10730_v27, %v10457_v5 }
 0x1e7   : > { %4552 = vmatprep.subr.bf16.mxu1 %v8893_v15  ;;  %v10945_v15 = vpop.f32.mrf.mxu1  ;;  %v8951_v5 = vld [vmem:[%s12195_s1 + $0xd08] ss:$16 sps:$4 sm:$0xff]  }
 0x1e8   : > { %v3252_v27 = vrot.slane %v7479_v14, 1  ;;  %v9001_v14 = vld [vmem:[%s12195_s1 + $0x1008] ss:$16 sps:$4 sm:$0xff]  }
 0x1e9   : > { %4510 = vmatpush1.bf16.msra.mxu0 %v8888_v40  ;;  %v8950_v40 = vld [vmem:[%s12195_s1 + $0x1104] ss:$16 sps:$4 sm:$0xff]  }
 0x1ea   : > { %4553 = vmatpush1.bf16.msra.mxu1 %v8891_v51  ;;  %4511 = vmatprep.subr.bf16.mxu0 %v8896_v19  ;;  %v8953_v51 = vld [vmem:[%s12195_s1 + $0xd0c] ss:$16 sps:$4 sm:$0xff]   ;;  %v8948_v19 = vld [vmem:[%s12195_s1 + $0x1100] ss:$16 sps:$4 sm:$0xff]  }
 0x1eb   : > { %4554 = vmatprep.subr.bf16.mxu1 %v8899_v3  ;;  %v3253_v3 = vrot.slane %v10714_v18, 1  ;;  %v8956_v18 = vld [vmem:[%s12195_s1 + $0xee8] ss:$16 sps:$4 sm:$0xff]  }
 0x1ed   : > { %4512 = vmatpush1.bf16.msra.mxu0 %v8894_v20  ;;  %v10960_v20 = vpop.f32.mrf.mxu1 }
 0x1ee   : > { %4555 = vmatpush1.bf16.msra.mxu1 %v8897_v21  ;;  %4513 = vmatprep.subr.bf16.mxu0 %v8902_v12  ;;  %v8958_v21 = vld [vmem:[%s12195_s1 + $0xeec] ss:$16 sps:$4 sm:$0xff]  }
 0x1ef   : > { %4556 = vmatprep.subr.bf16.mxu1 %v8905_v23  ;;  %v8961_v12 = vld [vmem:[%s12195_s1 + $0x10ec] ss:$16 sps:$4 sm:$0xff]   ;;  %v10969_v23 = vsel %vm312_vm1, %v3252_v27, %v3253_v3 }
 0x1f0   : > { %v9012_v27 = vld [vmem:[%s12195_s1 + $0xfcc] ss:$16 sps:$4 sm:$0xff]  }
 0x1f1   : > { %4514 = vmatpush1.bf16.msra.mxu0 %v8900_v24  ;;  %v8959_v24 = vld [vmem:[%s12195_s1 + $0x10e8] ss:$16 sps:$4 sm:$0xff]   ;;  %v9015_v3 = vld [vmem:[%s12195_s1 + $0x11cc] ss:$16 sps:$4 sm:$0xff]  }
 0x1f2   : > { %4557 = vmatpush1.bf16.msra.mxu1 %v8903_v26  ;;  %4515 = vmatprep.subr.bf16.mxu0 %v8908_v28  ;;  %v10977_v26 = vpop.f32.mrf.mxu1  ;;  %v8964_v28 = vld [vmem:[%s12195_s1 + $0xecc] ss:$16 sps:$4 sm:$0xff]  }
 0x1f3   : > { %4558 = vmatprep.subr.bf16.mxu1 %v8911_v33  ;;  %v8967_v33 = vld [vmem:[%s12195_s1 + $0x10cc] ss:$16 sps:$4 sm:$0xff]  }
 0x1f5   : > { %4516 = vmatpush2.bf16.msra.mxu0 %v8906_v48 }
 0x1f6   : > { %4559 = vmatpush2.bf16.msra.mxu1 %v8909_v34  ;;  %4517 = vmatprep.subr.bf16.mxu0 %v8914_v36  ;;  %v8962_v36 = vld [vmem:[%s12195_s1 + $0xec8] ss:$16 sps:$4 sm:$0xff]  }
 0x1f7   : > { %4560 = vmatprep.subr.bf16.mxu1 %v8917_v37  ;;  %v8965_v37 = vld [vmem:[%s12195_s1 + $0x10c8] ss:$16 sps:$4 sm:$0xff]  }
 0x1f9   : > { %4518 = vmatpush2.bf16.msra.mxu0 %v8912_v38 }
 0x1fa   : > { %4561 = vmatpush2.bf16.msra.mxu1 %v8915_v39  ;;  %4519 = vmatprep.subr.bf16.mxu0 %v8920_v62 }
 0x1fb   : > { %4562 = vmatprep.subr.bf16.mxu1 %v8923_v25 }
 0x1fd   : > { %4520 = vmatpush2.bf16.msra.mxu0 %v8918_v45  ;;  %v8968_v45 = vld [vmem:[%s12195_s1 + $0xea8] ss:$16 sps:$4 sm:$0xff]  }
 0x1fe   : > { %4563 = vmatpush2.bf16.msra.mxu1 %v8921_v47  ;;  %4521 = vmatprep.subr.bf16.mxu0 %v8926_v49  ;;  %v8971_v47 = vld [vmem:[%s12195_s1 + $0x10a8] ss:$16 sps:$4 sm:$0xff]  }
 0x1ff   : > { %4564 = vmatprep.subr.bf16.mxu1 %v8929_v44  ;;  %v8974_v49 = vld [vmem:[%s12195_s1 + $0xe88] ss:$16 sps:$4 sm:$0xff]  }
 0x200   : > { %v8977_v44 = vld [vmem:[%s12195_s1 + $0x1088] ss:$16 sps:$4 sm:$0xff]  }
 0x201   : > { %4522 = vmatpush2.bf16.msra.mxu0 %v8924_v17  ;;  %v8982_v17 = vld [vmem:[%s12195_s1 + $0xe6c] ss:$16 sps:$4 sm:$0xff]  }
 0x202   : > { %4565 = vmatpush2.bf16.msra.mxu1 %v8927_v22  ;;  %4523 = vmatprep.subr.bf16.mxu0 %v8932_v35  ;;  %v8980_v22 = vld [vmem:[%s12195_s1 + $0xe68] ss:$16 sps:$4 sm:$0xff]  }
 0x203   : > { %4566 = vmatprep.subr.bf16.mxu1 %v8935_v63  ;;  %v8983_v35 = vld [vmem:[%s12195_s1 + $0x1068] ss:$16 sps:$4 sm:$0xff]   ;;  %v8988_v63 = vld [vmem:[%s12195_s1 + $0xe4c] ss:$16 sps:$4 sm:$0xff]  }
 0x205   : > { %4524 = vmatpush2.bf16.msra.mxu0 %v8930_v43  ;;  %v8991_v43 = vld [vmem:[%s12195_s1 + $0x104c] ss:$16 sps:$4 sm:$0xff]  }
 0x206   : > { %4567 = vmatpush2.bf16.msra.mxu1 %v8933_v53  ;;  %4525 = vmatprep.subr.bf16.mxu0 %v8938_v59  ;;  %v8986_v53 = vld [vmem:[%s12195_s1 + $0xe48] ss:$16 sps:$4 sm:$0xff]  }
 0x207   : > { %4568 = vmatprep.subr.bf16.mxu1 %v8941_v30  ;;  %v8989_v59 = vld [vmem:[%s12195_s1 + $0x1048] ss:$16 sps:$4 sm:$0xff]   ;;  %v8994_v30 = vld [vmem:[%s12195_s1 + $0xe2c] ss:$16 sps:$4 sm:$0xff]  }
 0x209   : > { %4526 = vmatpush2.bf16.msra.mxu0 %v8936_v4  ;;  %v8997_v4 = vld [vmem:[%s12195_s1 + $0x102c] ss:$16 sps:$4 sm:$0xff]  }
 0x20a   : > { %4569 = vmatpush2.bf16.msra.mxu1 %v8939_v1  ;;  %4527 = vmatprep.subr.bf16.mxu0 %v8944_v6  ;;  %v8992_v1 = vld [vmem:[%s12195_s1 + $0xe28] ss:$16 sps:$4 sm:$0xff]  }
 0x20b   : > { %4570 = vmatprep.subr.bf16.mxu1 %v8947_v7  ;;  %v8995_v6 = vld [vmem:[%s12195_s1 + $0x1028] ss:$16 sps:$4 sm:$0xff]   ;;  %v9000_v7 = vld [vmem:[%s12195_s1 + $0xe0c] ss:$16 sps:$4 sm:$0xff]  }
 0x20d   : > { %4528 = vmatpush2.bf16.msra.mxu0 %v8942_v10  ;;  %v9003_v10 = vld [vmem:[%s12195_s1 + $0x100c] ss:$16 sps:$4 sm:$0xff]  }
 0x20e   : > { %4571 = vmatpush2.bf16.msra.mxu1 %v8945_v11  ;;  %4529 = vmatprep.subr.bf16.mxu0 %v8950_v40  ;;  %v8998_v11 = vld [vmem:[%s12195_s1 + $0xe08] ss:$16 sps:$4 sm:$0xff]   ;;  %v9006_v40 = vld [vmem:[%s12195_s1 + $0xfec] ss:$16 sps:$4 sm:$0xff]  }
 0x20f   : > { %4572 = vmatprep.subr.bf16.mxu1 %v8953_v51  ;;  %v9009_v51 = vld [vmem:[%s12195_s1 + $0x11ec] ss:$16 sps:$4 sm:$0xff]  }
 0x211   : > { %4530 = vmatpush2.bf16.msra.mxu0 %v8948_v19  ;;  %v9004_v19 = vld [vmem:[%s12195_s1 + $0xfe8] ss:$16 sps:$4 sm:$0xff]  }
 0x212   : > { %4573 = vmatpush2.bf16.msra.mxu1 %v8951_v5  ;;  %4585 = vmatprep.subr.bf16.mxu0 %v8958_v21  ;;  %v9007_v5 = vld [vmem:[%s12195_s1 + $0x11e8] ss:$16 sps:$4 sm:$0xff]  }
 0x213   : > { %4628 = vmatprep.subr.bf16.mxu1 %v8961_v12  ;;  %v9010_v21 = vld [vmem:[%s12195_s1 + $0xfc8] ss:$16 sps:$4 sm:$0xff]  }
 0x214   : > { %4532 = vmatmul.mubr.bf16.vlgmr.msra.gmra.mxu0 %v10969_v23  ;;  %v9013_v12 = vld [vmem:[%s12195_s1 + $0x11c8] ss:$16 sps:$4 sm:$0xff]  }
 0x215   : > { %v3101_v48 = vpop.f32.mrf.mxu1  ;;  %4575 = vmatmul.mubr.bf16.vlgmr.msra.gmra.mxu1 %v10754_v42  ;;  %4586 = vmatpush1.bf16.msra.mxu0 %v8956_v18  ;;  %v8970_v42 = vld [vmem:[%s12195_s1 + $0xeac] ss:$16 sps:$4 sm:$0xff]  }
 0x216   : > { %v10988_v34 = vadd.f32 %v3101_v48, %v10562_v56  ;;  %4629 = vmatpush1.bf16.msra.mxu1 %v8959_v24  ;;  %4587 = vmatprep.subr.bf16.mxu0 %v8964_v28  ;;  %v8973_v56 = vld [vmem:[%s12195_s1 + $0x10ac] ss:$16 sps:$4 sm:$0xff]   ;;  %v11109_v28 = vpop.f32.mrf.mxu0  ;;  %v9019_v48 = vld [vmem:[%s12195_s1 + $0x11a8] ss:$16 sps:$4 sm:$0xff]  }
 0x217   : > { %v3103_v38 = vpop.f32.mrf.mxu1  ;;  %4630 = vmatprep.subr.bf16.mxu1 %v8967_v33  ;;  %4617 = vmatprep.mubr.bf16.mxu0 %v10548_v32  ;;  %v8976_v32 = vld [vmem:[%s12195_s1 + $0xe8c] ss:$16 sps:$4 sm:$0xff]   ;;  %v9016_v33 = vld [vmem:[%s12195_s1 + $0xfa8] ss:$16 sps:$4 sm:$0xff]  }
 0x218   : > { %v11003_v39 = vadd.f32 %v3103_v38, %v10566_v60  ;;  %4660 = vmatprep.mubr.bf16.mxu1 %v10775_v55  ;;  %v9018_v18 = vld [vmem:[%s12195_s1 + $0xfac] ss:$16 sps:$4 sm:$0xff]   ;;  %v11123_v38 = vpop.f32.mrf.mxu0 }
 0x219   : > { %v3105_v62 = vpop.f32.mrf.mxu1  ;;  %4588 = vmatpush1.bf16.msra.mxu0 %v8962_v36  ;;  %v9021_v24 = vld [vmem:[%s12195_s1 + $0x11ac] ss:$16 sps:$4 sm:$0xff]  }
 0x21a   : > { %v11008_v25 = vadd.f32 %v3105_v62, %v10580_v31  ;;  %4631 = vmatpush1.bf16.msra.mxu1 %v8965_v37  ;;  %4589 = vmatprep.subr.bf16.mxu0 %v8970_v42  ;;  %v8979_v31 = vld [vmem:[%s12195_s1 + $0x108c] ss:$16 sps:$4 sm:$0xff]   ;;  %v9022_v42 = vld [vmem:[%s12195_s1 + $0xf88] ss:$16 sps:$4 sm:$0xff]  }
 0x21b   : > { %v3107_v60 = vpop.f32.mrf.mxu1  ;;  %4632 = vmatprep.subr.bf16.mxu1 %v8973_v56  ;;  %v9024_v36 = vld [vmem:[%s12195_s1 + $0xf8c] ss:$16 sps:$4 sm:$0xff]   ;;  %v9025_v56 = vld [vmem:[%s12195_s1 + $0x1188] ss:$16 sps:$4 sm:$0xff]  }
 0x21c   : > { %v11023_v55 = vadd.f32 %v3107_v60, %v10582_v16  ;;  %v8985_v16 = vld [vmem:[%s12195_s1 + $0x106c] ss:$16 sps:$4 sm:$0xff]   ;;  %v9028_v60 = vld [vmem:[%s12195_s1 + $0xf68] ss:$16 sps:$4 sm:$0xff]  }
 0x21d   : > { %4590 = vmatpush1.bf16.msra.mxu0 %v8968_v45  ;;  %v9027_v37 = vld [vmem:[%s12195_s1 + $0x118c] ss:$16 sps:$4 sm:$0xff]  }
 0x21e   : > { %4633 = vmatpush1.bf16.msra.mxu1 %v8971_v47  ;;  %4591 = vmatprep.subr.bf16.mxu0 %v8976_v32  ;;  %v9030_v62 = vld [vmem:[%s12195_s1 + $0xf6c] ss:$16 sps:$4 sm:$0xff]   ;;  %v11137_v47 = vpop.f32.mrf.mxu0  ;;  %v9031_v32 = vld [vmem:[%s12195_s1 + $0x1168] ss:$16 sps:$4 sm:$0xff]  }
 0x21f   : > { %4634 = vmatprep.subr.bf16.mxu1 %v8979_v31  ;;  %v9033_v45 = vld [vmem:[%s12195_s1 + $0x116c] ss:$16 sps:$4 sm:$0xff]  }
 0x220   : > { %v9036_v31 = vld [vmem:[%s12195_s1 + $0xf4c] ss:$16 sps:$4 sm:$0xff]  }
 0x221   : > { %4592 = vmatpush1.bf16.msra.mxu0 %v8974_v49  ;;  %v9039_v49 = vld [vmem:[%s12195_s1 + $0x114c] ss:$16 sps:$4 sm:$0xff]  }
 0x222   : > { %4635 = vmatpush1.bf16.msra.mxu1 %v8977_v44  ;;  %4593 = vmatprep.subr.bf16.mxu0 %v8982_v17  ;;  %v11151_v44 = vpop.f32.mrf.mxu0  ;;  %v9034_v17 = vld [vmem:[%s12195_s1 + $0xf48] ss:$16 sps:$4 sm:$0xff]  }
 0x223   : > { %4636 = vmatprep.subr.bf16.mxu1 %v8985_v16  ;;  %v9037_v16 = vld [vmem:[%s12195_s1 + $0x1148] ss:$16 sps:$4 sm:$0xff]  }
 0x225   : > { %4594 = vmatpush1.bf16.msra.mxu0 %v8980_v22  ;;  %v11159_v22 = vpop.f32.mrf.mxu0 }
 0x226   : > { %4637 = vmatpush1.bf16.msra.mxu1 %v8983_v35  ;;  %4595 = vmatprep.subr.bf16.mxu0 %v8988_v63  ;;  %v9042_v35 = vld [vmem:[%s12195_s1 + $0xf2c] ss:$16 sps:$4 sm:$0xff]  }
 0x227   : > { %4638 = vmatprep.subr.bf16.mxu1 %v8991_v43  ;;  %v9045_v63 = vld [vmem:[%s12195_s1 + $0x112c] ss:$16 sps:$4 sm:$0xff]   ;;  %v9040_v43 = vld [vmem:[%s12195_s1 + $0xf28] ss:$16 sps:$4 sm:$0xff]  }
 0x229   : > { %4596 = vmatpush1.bf16.msra.mxu0 %v8986_v53  ;;  %v9043_v53 = vld [vmem:[%s12195_s1 + $0x1128] ss:$16 sps:$4 sm:$0xff]  }
 0x22a   : > { %4639 = vmatpush1.bf16.msra.mxu1 %v8989_v59  ;;  %4597 = vmatprep.subr.bf16.mxu0 %v8994_v30  ;;  %v11173_v59 = vpop.f32.mrf.mxu0  ;;  %v9048_v30 = vld [vmem:[%s12195_s1 + $0xf0c] ss:$16 sps:$4 sm:$0xff]  }
 0x22b   : > { %4640 = vmatprep.subr.bf16.mxu1 %v8997_v4  ;;  %v9051_v4 = vld [vmem:[%s12195_s1 + $0x110c] ss:$16 sps:$4 sm:$0xff]  }
 0x22d   : > { %4598 = vmatpush1.bf16.msra.mxu0 %v8992_v1  ;;  %v4864_v1 = vld [vmem:[%s12197_s3 + $0x1c0] sm:$0xff] }
 0x22e   : > { %4641 = vmatpush1.bf16.msra.mxu1 %v8995_v6  ;;  %4599 = vmatprep.subr.bf16.mxu0 %v9000_v7  ;;  %v4868_v6 = vld [vmem:[%s12197_s3 + $0x1e0] sm:$0xff]  ;;  %v9046_v7 = vld [vmem:[%s12195_s1 + $0xf08] ss:$16 sps:$4 sm:$0xff]  }
 0x22f   : > { %4642 = vmatprep.subr.bf16.mxu1 %v9003_v10  ;;  %v9049_v10 = vld [vmem:[%s12195_s1 + $0x1108] ss:$16 sps:$4 sm:$0xff]  }
 0x231   : > { %4600 = vmatpush1.bf16.msra.mxu0 %v8998_v11  ;;  %v11193_v11 = vpop.f32.mrf.mxu0 }
 0x232   : > { %4643 = vmatpush1.bf16.msra.mxu1 %v9001_v14  ;;  %4601 = vmatprep.subr.bf16.mxu0 %v9006_v40  ;;  %v7922_v14 = vcombine.high %v4864_v1, %v4868_v6  ;;  %v4856_v40 = vld [vmem:[%s12197_s3 + $0x180] sm:$0xff] }
 0x233   : > { %4644 = vmatprep.subr.bf16.mxu1 %v9009_v51  ;;  %v4860_v51 = vld [vmem:[%s12197_s3 + $0x1a0] sm:$0xff] }
 0x235   : > { %4602 = vmatpush2.bf16.msra.mxu0 %v9004_v19  ;;  %v7921_v19 = vcombine.low %v4864_v1, %v4868_v6  ;;  %v4816_v6 = vld [vmem:[%s12197_s3 + $0x40] sm:$0xff] }
 0x236   : > { %4645 = vmatpush2.bf16.msra.mxu1 %v9007_v5  ;;  %4603 = vmatprep.subr.bf16.mxu0 %v9012_v27  ;;  %v11201_v5 = vpop.f32.mrf.mxu0  ;;  %v7914_v27 = vcombine.high %v4856_v40, %v4860_v51 }
 0x237   : > { %4646 = vmatprep.subr.bf16.mxu1 %v9015_v3  ;;  %v4848_v3 = vld [vmem:[%s12197_s3 + $0x140] sm:$0xff] }
 0x239   : > { %4604 = vmatpush2.bf16.msra.mxu0 %v9010_v21  ;;  %v4852_v21 = vld [vmem:[%s12197_s3 + $0x160] sm:$0xff] }
 0x23a   : > { %4647 = vmatpush2.bf16.msra.mxu1 %v9013_v12  ;;  %4605 = vmatprep.subr.bf16.mxu0 %v9018_v18 }
 0x23b   : > { %4648 = vmatprep.subr.bf16.mxu1 %v9021_v24 }
 0x23d   : > { %4606 = vmatpush2.bf16.msra.mxu0 %v9016_v33  ;;  %v7913_v33 = vcombine.low %v4856_v40, %v4860_v51  ;;  %v4808_v40 = vld [vmem:[%s12197_s3] sm:$0xff] }
 0x23e   : > { %4649 = vmatpush2.bf16.msra.mxu1 %v9019_v48  ;;  %4607 = vmatprep.subr.bf16.mxu0 %v9024_v36  ;;  %v4812_v51 = vld [vmem:[%s12197_s3 + $0x20] sm:$0xff] }
 0x23f   : > { %4650 = vmatprep.subr.bf16.mxu1 %v9027_v37  ;;  %v7906_v37 = vcombine.high %v4848_v3, %v4852_v21 }
 0x241   : > { %4608 = vmatpush2.bf16.msra.mxu0 %v9022_v42 }
 0x242   : > { %4651 = vmatpush2.bf16.msra.mxu1 %v9025_v56  ;;  %4609 = vmatprep.subr.bf16.mxu0 %v9030_v62  ;;  %v4840_v62 = vld [vmem:[%s12197_s3 + $0x100] sm:$0xff] }
 0x243   : > { %4652 = vmatprep.subr.bf16.mxu1 %v9033_v45 }
 0x245   : > { %4610 = vmatpush2.bf16.msra.mxu0 %v9028_v60 }
 0x246   : > { %4653 = vmatpush2.bf16.msra.mxu1 %v9031_v32  ;;  %4611 = vmatprep.subr.bf16.mxu0 %v9036_v31  ;;  %v7905_v32 = vcombine.low %v4848_v3, %v4852_v21  ;;  %v4928_v3 = vld [vmem:[%s12197_s3 + $0x3c0] sm:$0xff] }
 0x247   : > { %4654 = vmatprep.subr.bf16.mxu1 %v9039_v49  ;;  %v4932_v21 = vld [vmem:[%s12197_s3 + $0x3e0] sm:$0xff] }
 0x249   : > { %4612 = vmatpush2.bf16.msra.mxu0 %v9034_v17 }
 0x24a   : > { %4655 = vmatpush2.bf16.msra.mxu1 %v9037_v16  ;;  %4613 = vmatprep.subr.bf16.mxu0 %v9042_v35  ;;  %v4832_v16 = vld [vmem:[%s12197_s3 + $0xc0] sm:$0xff] }
 0x24b   : > { %4656 = vmatprep.subr.bf16.mxu1 %v9045_v63  ;;  %v4836_v35 = vld [vmem:[%s12197_s3 + $0xe0] sm:$0xff] }
 0x24d   : > { %4614 = vmatpush2.bf16.msra.mxu0 %v9040_v43 }
 0x24e   : > { %4657 = vmatpush2.bf16.msra.mxu1 %v9043_v53  ;;  %4615 = vmatprep.subr.bf16.mxu0 %v9048_v30  ;;  %v7890_v53 = vcombine.high %v4832_v16, %v4836_v35  ;;  %v4824_v30 = vld [vmem:[%s12197_s3 + $0x80] sm:$0xff] }
 0x24f   : > { %4658 = vmatprep.subr.bf16.mxu1 %v9051_v4  ;;  %v7889_v4 = vcombine.low %v4832_v16, %v4836_v35 }
 0x251   : > { %4616 = vmatpush2.bf16.msra.mxu0 %v9046_v7  ;;  %v4820_v7 = vld [vmem:[%s12197_s3 + $0x60] sm:$0xff] }
 0x252   : > { %4659 = vmatpush2.bf16.msra.mxu1 %v9049_v10  ;;  %6386 = vmatprep.subr.bf16.mxu0 %v7922_v14  ;;  %v7874_v14 = vcombine.high %v4816_v6, %v4820_v7 }
 0x254   : > { %v3144_v12 = vpop.f32.mrf.mxu0  ;;  %4618 = vmatmul.mubr.bf16.vlgmr.msra.gmra.mxu0 %v10758_v46  ;;  %v4844_v46 = vld [vmem:[%s12197_s3 + $0x120] sm:$0xff] }
 0x255   : > { %v3187_v18 = vpop.f32.mrf.mxu1  ;;  %4661 = vmatmul.mubr.bf16.vlgmr.msra.gmra.mxu1 %v10969_v23  ;;  %v3145_v24 = vadd.f32 %v3144_v12, %v10988_v34  ;;  %6387 = vmatpush1.bf16.msra.mxu0 %v7921_v19  ;;  %v7898_v49 = vcombine.high %v4840_v62, %v4844_v46  ;;  %v7873_v19 = vcombine.low %v4816_v6, %v4820_v7  ;;  %v11262_v12 = vld [vmem:[%s12197_s3 + $0x1c8] sm:$0xff] }
 0x256   : > { %v3146_v48 = vpop.f32.mrf.mxu0  ;;  %6388 = vmatprep.subr.bf16.mxu0 %v7914_v27  ;;  %v7866_v27 = vcombine.high %v4808_v40, %v4812_v51 }
 0x257   : > { %v3189_v36 = vpop.f32.mrf.mxu1  ;;  %v11212_v42 = vadd.f32 %v3187_v18, %v3145_v24  ;;  %v3147_v56 = vadd.f32 %v3146_v48, %v11003_v39  ;;  %v11267_v18 = vld [vmem:[%s12197_s3 + $0x1e8] sm:$0xff]  ;;  %v7865_v24 = vcombine.low %v4808_v40, %v4812_v51  ;;  %v7986_v48 = vcombine.high %v4928_v3, %v4932_v21  ;;  %v4972_v40 = vld [vmem:[%s12197_s3 + $0x520] sm:$0xff] }
 0x258   : > { %v3148_v23 = vpop.f32.mrf.mxu0  ;;  %v4896_v51 = vld [vmem:[%s12197_s3 + $0x2c0] sm:$0xff] }
 0x259   : > { %v3191_v34 = vpop.f32.mrf.mxu1  ;;  %v11221_v45 = vadd.f32 %v3189_v36, %v3147_v56  ;;  %v3149_v60 = vadd.f32 %v3148_v23, %v11008_v25  ;;  %6389 = vmatpush1.bf16.msra.mxu0 %v7913_v33  ;;  %v7897_v25 = vcombine.low %v4840_v62, %v4844_v46  ;;  %v7923_v33 = vcombine.low %v11262_v12, %v11267_v18  ;;  %v4992_v36 = vld [vmem:[%s12197_s3 + $0x5c0] sm:$0xff] }
 0x25a   : > { %v3150_v31 = vpop.f32.mrf.mxu0  ;;  %6390 = vmatprep.subr.bf16.mxu0 %v7906_v37  ;;  %v4996_v37 = vld [vmem:[%s12197_s3 + $0x5e0] sm:$0xff] }
 0x25b   : > { %v11224_v39 = vadd.f32 %v3191_v34, %v3149_v60  ;;  %v3151_v17 = vadd.f32 %v3150_v31, %v11023_v55  ;;  %v3193_v63 = vpop.f32.mrf.mxu1  ;;  %v4828_v55 = vld [vmem:[%s12197_s3 + $0xa0] sm:$0xff]  ;;  %v8050_v46 = vcombine.high %v4992_v36, %v4996_v37  ;;  %v8049_v23 = vcombine.low %v4992_v36, %v4996_v37 }
 0x25c   : > { %v7882_v1 = vcombine.high %v4824_v30, %v4828_v55  ;;  %v7881_v10 = vcombine.low %v4824_v30, %v4828_v55  ;;  %v4920_v56 = vld [vmem:[%s12197_s3 + $0x380] sm:$0xff]  ;;  %v7985_v34 = vcombine.low %v4928_v3, %v4932_v21 }
 0x25d   : > { %v11233_v43 = vadd.f32 %v3193_v63, %v3151_v17  ;;  %6391 = vmatpush1.bf16.msra.mxu0 %v7905_v32  ;;  %v4924_v62 = vld [vmem:[%s12197_s3 + $0x3a0] sm:$0xff]  ;;  %6427 = vmatprep.subr.bf16.mxu1 %v8050_v46 }
 0x25e   : > { %6392 = vmatprep.subr.bf16.mxu0 %v7898_v49  ;;  %v7978_v60 = vcombine.high %v4920_v56, %v4924_v62  ;;  %6428 = vmatpush1.bf16.msra.mxu1 %v8049_v23  ;;  %v4984_v32 = vld [vmem:[%s12197_s3 + $0x580] sm:$0xff]  ;;  %v7977_v63 = vcombine.low %v4920_v56, %v4924_v62 }
 0x25f   : > { %v4988_v31 = vld [vmem:[%s12197_s3 + $0x5a0] sm:$0xff] }
 0x260   : > { %v4912_v49 = vld [vmem:[%s12197_s3 + $0x340] sm:$0xff]  ;;  %v8042_v16 = vcombine.high %v4984_v32, %v4988_v31  ;;  %v8041_v35 = vcombine.low %v4984_v32, %v4988_v31 }
 0x261   : > { %6393 = vmatpush1.bf16.msra.mxu0 %v7897_v25  ;;  %v4916_v17 = vld [vmem:[%s12197_s3 + $0x360] sm:$0xff] }
 0x262   : > { %6394 = vmatprep.subr.bf16.mxu0 %v7890_v53  ;;  %6429 = vmatprep.subr.bf16.mxu1 %v8042_v16  ;;  %v7970_v25 = vcombine.high %v4912_v49, %v4916_v17  ;;  %v4976_v53 = vld [vmem:[%s12197_s3 + $0x540] sm:$0xff]  ;;  %v7969_v7 = vcombine.low %v4912_v49, %v4916_v17 }
 0x263   : > { %6430 = vmatpush1.bf16.msra.mxu1 %v8041_v35  ;;  %v4980_v30 = vld [vmem:[%s12197_s3 + $0x560] sm:$0xff] }
 0x264   : > { %v4904_v55 = vld [vmem:[%s12197_s3 + $0x300] sm:$0xff]  ;;  %v8033_v6 = vcombine.low %v4976_v53, %v4980_v30 }
 0x265   : > { %6395 = vmatpush1.bf16.msra.mxu0 %v7889_v4  ;;  %v4908_v4 = vld [vmem:[%s12197_s3 + $0x320] sm:$0xff] }
 0x266   : > { %6396 = vmatprep.subr.bf16.mxu0 %v7882_v1  ;;  %v8034_v1 = vcombine.high %v4976_v53, %v4980_v30  ;;  %v7961_v21 = vcombine.low %v4904_v55, %v4908_v4  ;;  %v4964_v36 = vld [vmem:[%s12197_s3 + $0x4e0] sm:$0xff] }
 0x267   : > { %v4888_v37 = vld [vmem:[%s12197_s3 + $0x280] sm:$0xff] }
 0x268   : > { %6431 = vmatprep.subr.bf16.mxu1 %v8034_v1  ;;  %v4892_v56 = vld [vmem:[%s12197_s3 + $0x2a0] sm:$0xff] }
 0x269   : > { %6397 = vmatpush1.bf16.msra.mxu0 %v7881_v10  ;;  %v7962_v10 = vcombine.high %v4904_v55, %v4908_v4  ;;  %6432 = vmatpush1.bf16.msra.mxu1 %v8033_v6  ;;  %v4956_v32 = vld [vmem:[%s12197_s3 + $0x4a0] sm:$0xff]  ;;  %v7945_v35 = vcombine.low %v4888_v37, %v4892_v56 }
 0x26a   : > { %6398 = vmatprep.subr.bf16.mxu0 %v7874_v14  ;;  %v4968_v14 = vld [vmem:[%s12197_s3 + $0x500] sm:$0xff] }
 0x26b   : > { %v8025_v3 = vcombine.low %v4968_v14, %v4972_v40  ;;  %v4880_v31 = vld [vmem:[%s12197_s3 + $0x240] sm:$0xff] }
 0x26c   : > { %v4884_v49 = vld [vmem:[%s12197_s3 + $0x260] sm:$0xff] }
 0x26d   : > { %6399 = vmatpush1.bf16.msra.mxu0 %v7873_v19  ;;  %v4900_v19 = vld [vmem:[%s12197_s3 + $0x2e0] sm:$0xff]  ;;  %v7937_v6 = vcombine.low %v4880_v31, %v4884_v49 }
 0x26e   : > { %6400 = vmatprep.subr.bf16.mxu0 %v7866_v27  ;;  %v8026_v27 = vcombine.high %v4968_v14, %v4972_v40  ;;  %v7953_v23 = vcombine.low %v4896_v51, %v4900_v19  ;;  %v4948_v53 = vld [vmem:[%s12197_s3 + $0x460] sm:$0xff] }
 0x26f   : > { %v4872_v30 = vld [vmem:[%s12197_s3 + $0x200] sm:$0xff] }
 0x270   : > { %6433 = vmatprep.subr.bf16.mxu1 %v8026_v27  ;;  %v4876_v55 = vld [vmem:[%s12197_s3 + $0x220] sm:$0xff]  ;;  %v7924_v27 = vcombine.high %v11262_v12, %v11267_v18  ;;  %v4833_v12 = vld [vmem:[%s12197_s3 + $0xc8] sm:$0xff] }
 0x271   : > { %6401 = vmatpush1.bf16.msra.mxu0 %v7865_v24  ;;  %v7954_v24 = vcombine.high %v4896_v51, %v4900_v19  ;;  %6434 = vmatpush1.bf16.msra.mxu1 %v8025_v3  ;;  %v4940_v14 = vld [vmem:[%s12197_s3 + $0x420] sm:$0xff]  ;;  %v7929_v19 = vcombine.low %v4872_v30, %v4876_v55  ;;  %v4837_v18 = vld [vmem:[%s12197_s3 + $0xe8] sm:$0xff] }
 0x272   : > { %6402 = vmatprep.subr.bf16.mxu0 %v7986_v48  ;;  %v4960_v48 = vld [vmem:[%s12197_s3 + $0x4c0] sm:$0xff] }
 0x273   : > { %v8018_v62 = vcombine.high %v4960_v48, %v4964_v36  ;;  %v8017_v46 = vcombine.low %v4960_v48, %v4964_v36  ;;  %v5056_v3 = vld [vmem:[%s12197_s3 + $0x7c0] sm:$0xff] }
 0x274   : > { %v5048_v36 = vld [vmem:[%s12197_s3 + $0x780] sm:$0xff] }
 0x275   : > { %6403 = vmatpush2.bf16.msra.mxu0 %v7985_v34  ;;  %6435 = vmatprep.subr.bf16.mxu1 %v8018_v62  ;;  %v7946_v34 = vcombine.high %v4888_v37, %v4892_v56  ;;  %v5052_v37 = vld [vmem:[%s12197_s3 + $0x7a0] sm:$0xff] }
 0x276   : > { %6404 = vmatprep.subr.bf16.mxu0 %v7978_v60  ;;  %6436 = vmatpush1.bf16.msra.mxu1 %v8017_v46  ;;  %v4952_v60 = vld [vmem:[%s12197_s3 + $0x480] sm:$0xff]  ;;  %v8106_v56 = vcombine.high %v5048_v36, %v5052_v37  ;;  %v8105_v62 = vcombine.low %v5048_v36, %v5052_v37  ;;  %v4681_v36 = vlaneseq }
 0x277   : > { %v8010_v17 = vcombine.high %v4952_v60, %v4956_v32  ;;  %v8009_v16 = vcombine.low %v4952_v60, %v4956_v32  ;;  %v5040_v46 = vld [vmem:[%s12197_s3 + $0x740] sm:$0xff] }
 0x278   : > { %v5032_v32 = vld [vmem:[%s12197_s3 + $0x700] sm:$0xff]  ;;  %vm4793_vm3 = vcmp.lt.s32.totalorder %v4681_v36, 512 }
 0x279   : > { %6405 = vmatpush2.bf16.msra.mxu0 %v7977_v63  ;;  %6437 = vmatprep.subr.bf16.mxu1 %v8010_v17  ;;  %v7938_v63 = vcombine.high %v4880_v31, %v4884_v49  ;;  %v5036_v31 = vld [vmem:[%s12197_s3 + $0x720] sm:$0xff] }
 0x27a   : > { %6406 = vmatprep.subr.bf16.mxu0 %v7970_v25  ;;  %6438 = vmatpush1.bf16.msra.mxu1 %v8009_v16  ;;  %v4944_v25 = vld [vmem:[%s12197_s3 + $0x440] sm:$0xff]  ;;  %v8090_v49 = vcombine.high %v5032_v32, %v5036_v31  ;;  %v8089_v17 = vcombine.low %v5032_v32, %v5036_v31 }
 0x27b   : > { %v8002_v4 = vcombine.high %v4944_v25, %v4948_v53  ;;  %v8001_v1 = vcombine.low %v4944_v25, %v4948_v53  ;;  %v5024_v16 = vld [vmem:[%s12197_s3 + $0x6c0] sm:$0xff] }
 0x27c   : > { %v5016_v53 = vld [vmem:[%s12197_s3 + $0x680] sm:$0xff] }
 0x27d   : > { %6407 = vmatpush2.bf16.msra.mxu0 %v7969_v7  ;;  %6439 = vmatprep.subr.bf16.mxu1 %v8002_v4  ;;  %v7930_v7 = vcombine.high %v4872_v30, %v4876_v55  ;;  %v5020_v30 = vld [vmem:[%s12197_s3 + $0x6a0] sm:$0xff] }
 0x27e   : > { %6408 = vmatprep.subr.bf16.mxu0 %v7962_v10  ;;  %6440 = vmatpush1.bf16.msra.mxu1 %v8001_v1  ;;  %v4936_v10 = vld [vmem:[%s12197_s3 + $0x400] sm:$0xff]  ;;  %v8074_v55 = vcombine.high %v5016_v53, %v5020_v30  ;;  %v8073_v4 = vcombine.low %v5016_v53, %v5020_v30 }
 0x27f   : > { %v7994_v40 = vcombine.high %v4936_v10, %v4940_v14  ;;  %v7993_v51 = vcombine.low %v4936_v10, %v4940_v14  ;;  %v5008_v1 = vld [vmem:[%s12197_s3 + $0x640] sm:$0xff] }
 0x280   : > { %v5000_v14 = vld [vmem:[%s12197_s3 + $0x600] sm:$0xff] }
 0x281   : > { %6409 = vmatpush2.bf16.msra.mxu0 %v7961_v21  ;;  %6441 = vmatprep.subr.bf16.mxu1 %v7994_v40  ;;  %v5060_v21 = vld [vmem:[%s12197_s3 + $0x7e0] sm:$0xff] }
 0x282   : > { %6410 = vmatprep.subr.bf16.mxu0 %v7954_v24  ;;  %6442 = vmatpush1.bf16.msra.mxu1 %v7993_v51  ;;  %v8114_v24 = vcombine.high %v5056_v3, %v5060_v21  ;;  %v8113_v48 = vcombine.low %v5056_v3, %v5060_v21  ;;  %v5004_v40 = vld [vmem:[%s12197_s3 + $0x620] sm:$0xff]  ;;  %v11419_v3 = vld [vmem:[%s12197_s3 + $0x5e8] sm:$0xff] }
 0x283   : > { %v8058_v51 = vcombine.high %v5000_v14, %v5004_v40 }
 0x284   : > { %6443 = vmatprep.subr.bf16.mxu1 %v8114_v24 }
 0x285   : > { %6411 = vmatpush2.bf16.msra.mxu0 %v7953_v23  ;;  %v5044_v23 = vld [vmem:[%s12197_s3 + $0x760] sm:$0xff] }
 0x286   : > { %6412 = vmatprep.subr.bf16.mxu0 %v7946_v34  ;;  %6444 = vmatpush2.bf16.msra.mxu1 %v8113_v48  ;;  %v8098_v34 = vcombine.high %v5040_v46, %v5044_v23  ;;  %v8097_v60 = vcombine.low %v5040_v46, %v5044_v23  ;;  %v1800_v46 = vadd.f32 %v10432_v58, %v10430_v57 }
 0x287   : > { %6445 = vmatprep.subr.bf16.mxu1 %v8106_v56 }
 0x288   : > { %v1843_v32 = vadd.f32 %v10501_v54, %v1800_v46  ;;  %v11447_v54 = vld [vmem:[%s12196_s2] sm:$0xf] }
 0x289   : > { %6413 = vmatpush2.bf16.msra.mxu0 %v7945_v35  ;;  %v5028_v35 = vld [vmem:[%s12197_s3 + $0x6e0] sm:$0xff] }
 0x28a   : > { %6414 = vmatprep.subr.bf16.mxu0 %v7938_v63  ;;  %6446 = vmatpush2.bf16.msra.mxu1 %v8105_v62  ;;  %v8082_v63 = vcombine.high %v5024_v16, %v5028_v35  ;;  %v8081_v25 = vcombine.low %v5024_v16, %v5028_v35  ;;  %v1798_v62 = vadd.f32 %v10416_v52, %v10414_v50 }
 0x28b   : > { %6447 = vmatprep.subr.bf16.mxu1 %v8098_v34  ;;  %v11431_v34 = vshrl.u32 %v4681_v36, 7  ;;  %v1804_v50 = vadd.f32 %v10470_v9, %v10468_v8  ;;  %v2975_v57 = vadd.f32 %v11123_v38, %v1843_v32  ;;  %v4838_v36 = vld [vmem:[%s12197_s3 + $0xf0] sm:$0xff] }
 0x28c   : > { %v1841_v23 = vadd.f32 %v10483_v13, %v1798_v62 }
 0x28d   : > { %6415 = vmatpush2.bf16.msra.mxu0 %v7937_v6  ;;  %v5012_v6 = vld [vmem:[%s12197_s3 + $0x660] sm:$0xff]  ;;  %v4683_v58 = vsub.s32 0, %v11431_v34  ;;  %v1847_v13 = vadd.f32 %v10530_v41, %v1804_v50  ;;  %v4687_v9 = vsub.s32 1, %v11431_v34 }
 0x28e   : > { %6416 = vmatprep.subr.bf16.mxu0 %v7930_v7  ;;  %6448 = vmatpush2.bf16.msra.mxu1 %v8097_v60  ;;  %v8066_v7 = vcombine.high %v5008_v1, %v5012_v6  ;;  %v8065_v10 = vcombine.low %v5008_v1, %v5012_v6  ;;  %v1802_v60 = vadd.f32 %v10448_v0, %v10446_v61 }
 0x28f   : > { %6449 = vmatprep.subr.bf16.mxu1 %v8090_v49  ;;  %v2979_v38 = vadd.f32 %v11151_v44, %v1847_v13  ;;  %v4688_v44 = vrot.slane %v11447_v54, %v4687_v9 }
 0x290   : > { %v1845_v52 = vadd.f32 %v10516_v29, %v1802_v60  ;;  %v3018_v29 = vadd.f32 %v10945_v15, %v2975_v57 }
 0x291   : > { %6417 = vmatpush2.bf16.msra.mxu0 %v7929_v19  ;;  %v8057_v19 = vcombine.low %v5000_v14, %v5004_v40 }
 0x292   : > { %6468 = vmatprep.subr.bf16.mxu0 %v7924_v27  ;;  %6450 = vmatpush2.bf16.msra.mxu1 %v8089_v17  ;;  %v11414_v27 = vld [vmem:[%s12197_s3 + $0x5c8] sm:$0xff]  ;;  %v2973_v17 = vadd.f32 %v11109_v28, %v1841_v23  ;;  %v2977_v16 = vadd.f32 %v11137_v47, %v1845_v52 }
 0x293   : > { %6451 = vmatprep.subr.bf16.mxu1 %v8082_v63  ;;  %v8052_v21 = vcombine.high %v11414_v27, %v11419_v3  ;;  %v8051_v24 = vcombine.low %v11414_v27, %v11419_v3  ;;  %v4969_v27 = vld [vmem:[%s12197_s3 + $0x508] sm:$0xff] }
 0x294   : > { %v4447_v48 = vpop.f32.mrf.mxu0  ;;  %v3016_v28 = vadd.f32 %v10929_v2, %v2973_v17  ;;  %v3020_v53 = vadd.f32 %v10960_v20, %v2977_v16  ;;  %v3061_v2 = vadd.f32 %v11173_v59, %v3018_v29  ;;  %v4973_v3 = vld [vmem:[%s12197_s3 + $0x528] sm:$0xff] }
 0x295   : > { %v4490_v37 = vpop.f32.mrf.mxu1 }
 0x296   : > { %6452 = vmatpush2.bf16.msra.mxu1 %v8081_v25  ;;  %v4449_v56 = vpop.f32.mrf.mxu0  ;;  %v4491_v8 = vadd.f32 %v4490_v37, %v4447_v48  ;;  %v3059_v41 = vadd.f32 %v11159_v22, %v3016_v28  ;;  %v4684_v25 = vrot.slane %v11447_v54, %v4683_v58  ;;  %v3022_v22 = vadd.f32 %v10977_v26, %v2979_v38  ;;  %v4857_v38 = vld [vmem:[%s12197_s3 + $0x188] sm:$0xff] }
 0x297   : > { %6453 = vmatprep.subr.bf16.mxu1 %v8074_v55  ;;  %v4492_v31 = vpop.f32.mrf.mxu1  ;;  %v3063_v6 = vadd.f32 %v11193_v11, %v3020_v53  ;;  %v4849_v53 = vld [vmem:[%s12197_s3 + $0x148] sm:$0xff] }
 0x298   : > { %v4451_v49 = vpop.f32.mrf.mxu0  ;;  %v4493_v47 = vadd.f32 %v4492_v31, %v4449_v56  ;;  %v3065_v59 = vadd.f32 %v11201_v5, %v3022_v22  ;;  %v7892_v22 = vcombine.high %v4833_v12, %v4837_v18 }
 0x299   : > { %v4494_v61 = vpop.f32.mrf.mxu1 }
 0x29a   : > { %6454 = vmatpush2.bf16.msra.mxu1 %v8073_v4  ;;  %v4453_v0 = vpop.f32.mrf.mxu0  ;;  %v4495_v4 = vadd.f32 %v4494_v61, %v4451_v49 }
 0x29b   : > { %6455 = vmatprep.subr.bf16.mxu1 %v8066_v7  ;;  %v4496_v30 = vpop.f32.mrf.mxu1 }
 0x29e   : > { %6456 = vmatpush2.bf16.msra.mxu1 %v8065_v10  ;;  %v4497_v10 = vadd.f32 %v4496_v30, %v4453_v0 }
 0x29f   : > { %6457 = vmatprep.subr.bf16.mxu1 %v8058_v51 }
 0x2a2   : > { %6458 = vmatpush2.bf16.msra.mxu1 %v8057_v19 }
 0x2a3   : > { %6509 = vmatprep.subr.bf16.mxu1 %v8052_v21 }
 0x2d4   : > { %v4533_v35 = vpop.f32.mrf.mxu0 }
 0x2d5   : > { %v4534_v63 = vadd.f32 %v4533_v35, %v4491_v8  ;;  %v4861_v35 = vld [vmem:[%s12197_s3 + $0x1a8] sm:$0xff] }
 0x2d6   : > { %v4535_v55 = vpop.f32.mrf.mxu0  ;;  %v7915_v30 = vcombine.low %v4857_v38, %v4861_v35 }
 0x2d7   : > { %v4671_v1 = vadd.f32 %v4534_v63, %v3059_v41  ;;  %v4536_v15 = vadd.f32 %v4535_v55, %v4493_v47 }
 0x2d8   : > { %v4537_v7 = vpop.f32.mrf.mxu0 }
 0x2d9   : > { %v4701_v14 = vadd.f32 %v4684_v25, %v4671_v1  ;;  %v4672_v40 = vadd.f32 %v4536_v15, %v3061_v2  ;;  %v4538_v20 = vadd.f32 %v4537_v7, %v4495_v4  ;;  %v4853_v2 = vld [vmem:[%s12197_s3 + $0x168] sm:$0xff] }
 0x2da   : > { %v4539_v51 = vpop.f32.mrf.mxu0  ;;  %v7908_v55 = vcombine.high %v4849_v53, %v4853_v2  ;;  %v4841_v4 = vld [vmem:[%s12197_s3 + $0x108] sm:$0xff]  ;;  %v7907_v15 = vcombine.low %v4849_v53, %v4853_v2 }
 0x2db   : > { %v4709_v19 = vmax.f32 %v4701_v14, 0.0  ;;  %v4702_v21 = vadd.f32 %v4688_v44, %v4672_v40  ;;  %v4675_v48 = vadd.f32 %v4538_v20, %v3063_v6  ;;  %v4540_v37 = vadd.f32 %v4539_v51, %v4497_v10  ;;  %v4845_v1 = vld [vmem:[%s12197_s3 + $0x128] sm:$0xff] }
 0x2dc   : > { %v4825_v6 = vld [vmem:[%s12197_s3 + $0x88] sm:$0xff]  ;;  %v7891_v10 = vcombine.low %v4833_v12, %v4837_v18 }
 0x2dd   : > { %v4710_v56 = vmax.f32 %v4702_v21, 0.0  ;;  %v4705_v62 = vadd.f32 %v4684_v25, %v4675_v48  ;;  %v4676_v46 = vadd.f32 %v4540_v37, %v3065_v59  ;;  %v4717_v23 = vmax.f32 %v4709_v19, 0.0  ;;  %v4829_v7 = vld [vmem:[%s12197_s3 + $0xa8] sm:$0xff] }
 0x2de   : > { %v7916_v25 = vcombine.high %v4857_v38, %v4861_v35  ;;  %v7884_v14 = vcombine.high %v4825_v6, %v4829_v7  ;;  %v4817_v40 = vld [vmem:[%s12197_s3 + $0x48] sm:$0xff]  ;;  %v7883_v59 = vcombine.low %v4825_v6, %v4829_v7  ;;  %v4695_v35 = vsub.s32 3, %v11431_v34 }
 0x2df   : > { %v4713_v60 = vmax.f32 %v4705_v62, 0.0  ;;  %v4706_v26 = vadd.f32 %v4688_v44, %v4676_v46  ;;  %v4718_v32 = vmax.f32 %v4710_v56, 0.0  ;;  %v7900_v44 = vcombine.high %v4841_v4, %v4845_v1  ;;  %v4821_v20 = vld [vmem:[%s12197_s3 + $0x68] sm:$0xff]  ;;  %v4576_v56 = vpop.f32.mrf.mxu1 }
 0x2e0   : > { %v7876_v51 = vcombine.high %v4817_v40, %v4821_v20  ;;  %v4809_v19 = vld [vmem:[%s12197_s3 + $0x8] sm:$0xff]  ;;  %v7875_v48 = vcombine.low %v4817_v40, %v4821_v20  ;;  %v4696_v18 = vrot.slane %v11447_v54, %v4695_v35 }
 0x2e1   : > { %v4721_v11 = vmax.f32 %v4717_v23, %v4713_v60  ;;  %v4714_v31 = vmax.f32 %v4706_v26, 0.0  ;;  %v4813_v21 = vld [vmem:[%s12197_s3 + $0x28] sm:$0xff]  ;;  %v4578_v26 = vpop.f32.mrf.mxu1 }
 0x2e2   : > { %v7868_v37 = vcombine.high %v4809_v19, %v4813_v21  ;;  %v4929_v62 = vld [vmem:[%s12197_s3 + $0x3c8] sm:$0xff]  ;;  %v7867_v23 = vcombine.low %v4809_v19, %v4813_v21 }
 0x2e3   : > { %v4729_v49 = vrot.slane %v4721_v11, 7  ;;  %v4722_v17 = vmax.f32 %v4718_v32, %v4714_v31  ;;  %v4742_v50 = vrot.slane %v4721_v11, 1  ;;  %v4933_v46 = vld [vmem:[%s12197_s3 + $0x3e8] sm:$0xff] }
 0x2e4   : > { %v7988_v60 = vcombine.high %v4929_v62, %v4933_v46  ;;  %v4921_v32 = vld [vmem:[%s12197_s3 + $0x388] sm:$0xff]  ;;  %v7987_v31 = vcombine.low %v4929_v62, %v4933_v46 }
 0x2e5   : > { %v4730_v52 = vrot.slane %v4722_v17, 7  ;;  %v4743_v5 = vrot.slane %v4722_v17, 1  ;;  %v4738_v57 = vsel %vm4737_vm2, 0.0, %v4729_v49  ;;  %v4750_v0 = vsel %vm4737_vm2, %v4742_v50, 0.0  ;;  %v4913_v50 = vld [vmem:[%s12197_s3 + $0x348] sm:$0xff] }
 0x2e6   : > { %v4754_v13 = vmax.f32 %v4721_v11, %v4738_v57  ;;  %v4925_v11 = vld [vmem:[%s12197_s3 + $0x3a8] sm:$0xff] }
 0x2e7   : > { %v4739_v16 = vsel %vm4737_vm2, 0.0, %v4730_v52  ;;  %v4751_v28 = vsel %vm4737_vm2, %v4743_v5, 0.0  ;;  %v7980_v49 = vcombine.high %v4921_v32, %v4925_v11  ;;  %v4917_v52 = vld [vmem:[%s12197_s3 + $0x368] sm:$0xff]  ;;  %v7979_v5 = vcombine.low %v4921_v32, %v4925_v11 }
 0x2e8   : > { %v4755_v61 = vmax.f32 %v4722_v17, %v4739_v16  ;;  %v11469_v8 = vmax.f32 %v4754_v13, %v4750_v0  ;;  %v4580_v17 = vpop.f32.mrf.mxu1  ;;  %v7972_v57 = vcombine.high %v4913_v50, %v4917_v52  ;;  %v4905_v16 = vld [vmem:[%s12197_s3 + $0x308] sm:$0xff]  ;;  %v4691_v0 = vsub.s32 2, %v11431_v34 }
 0x2e9   : > { %v4889_v20 = vld [vmem:[%s12197_s3 + $0x288] sm:$0xff] }
 0x2ea   : > { %v11471_v29 = vmax.f32 %v4755_v61, %v4751_v28  ;;  %v11487_v63 = vpack.c.bf16 %v11469_v8, %v11469_v8  ;;  %v4582_v13 = vpop.f32.mrf.mxu1  ;;  %v4909_v61 = vld [vmem:[%s12197_s3 + $0x328] sm:$0xff] }
 0x2eb   : > { %v7964_v2 = vcombine.high %v4905_v16, %v4909_v61  ;;  %v7963_v6 = vcombine.low %v4905_v16, %v4909_v61 }
 0x2ec   : > { %v11481_v41 = vpack.c.bf16 %v11471_v29, %v11471_v29  ;;  %v4766_v47 = vcombine.low %v11469_v8, %v11471_v29  ;;  %v4842_v8 = vld [vmem:[%s12197_s3 + $0x110] sm:$0xff] }
 0x2ed   : > { %v4846_v29 = vld [vmem:[%s12197_s3 + $0x130] sm:$0xff] }
 0x2ee   : > { %6418 = vmatprep.mubr.bf16.mxu0 %v11481_v41 }
 0x2ef   : > { %6419 = vmatmul.mubr.bf16.vlgmr.msra.gmra.mxu0 %v11487_v63 }
 0x2f0   : > { %6469 = vmatpush1.bf16.msra.mxu0 %v7923_v33  ;;  %6500 = vmatprep.mubr.bf16.mxu0 %v11481_v41  ;;  %v7899_v33 = vcombine.low %v4841_v4, %v4845_v1  ;;  %v4897_v4 = vld [vmem:[%s12197_s3 + $0x2c8] sm:$0xff] }
 0x2f1   : > { %6470 = vmatprep.subr.bf16.mxu0 %v7916_v25  ;;  %v7971_v25 = vcombine.low %v4913_v50, %v4917_v52  ;;  %v4901_v1 = vld [vmem:[%s12197_s3 + $0x2e8] sm:$0xff] }
 0x2f2   : > { %v7956_v40 = vcombine.high %v4897_v4, %v4901_v1 }
 0x2f4   : > { %6471 = vmatpush1.bf16.msra.mxu0 %v7915_v30 }
 0x2f5   : > { %6472 = vmatprep.subr.bf16.mxu0 %v7908_v55 }
 0x2f8   : > { %6473 = vmatpush1.bf16.msra.mxu0 %v7907_v15 }
 0x2f9   : > { %6474 = vmatprep.subr.bf16.mxu0 %v7900_v44  ;;  %v4692_v44 = vrot.slane %v11447_v54, %v4691_v0 }
 0x2fc   : > { %6475 = vmatpush1.bf16.msra.mxu0 %v7899_v33 }
 0x2fd   : > { %6476 = vmatprep.subr.bf16.mxu0 %v7892_v22 }
 0x300   : > { %6477 = vmatpush1.bf16.msra.mxu0 %v7891_v10 }
 0x301   : > { %6478 = vmatprep.subr.bf16.mxu0 %v7884_v14 }
 0x304   : > { %6479 = vmatpush1.bf16.msra.mxu0 %v7883_v59  ;;  %v4893_v59 = vld [vmem:[%s12197_s3 + $0x2a8] sm:$0xff] }
 0x305   : > { %6480 = vmatprep.subr.bf16.mxu0 %v7876_v51 }
 0x308   : > { %6481 = vmatpush1.bf16.msra.mxu0 %v7875_v48 }
 0x309   : > { %6482 = vmatprep.subr.bf16.mxu0 %v7868_v37 }
 0x30c   : > { %6483 = vmatpush1.bf16.msra.mxu0 %v7867_v23 }
 0x30d   : > { %6484 = vmatprep.subr.bf16.mxu0 %v7988_v60 }
 0x310   : > { %6485 = vmatpush2.bf16.msra.mxu0 %v7987_v31 }
 0x311   : > { %6486 = vmatprep.subr.bf16.mxu0 %v7980_v49  ;;  %v7947_v49 = vcombine.low %v4889_v20, %v4893_v59 }
 0x314   : > { %6487 = vmatpush2.bf16.msra.mxu0 %v7979_v5  ;;  %v4619_v28 = vpop.f32.mrf.mxu0  ;;  %v4873_v5 = vld [vmem:[%s12197_s3 + $0x208] sm:$0xff] }
 0x315   : > { %v4662_v38 = vpop.f32.mrf.mxu1  ;;  %v4620_v53 = vadd.f32 %v4619_v28, %v4576_v56  ;;  %6488 = vmatprep.subr.bf16.mxu0 %v7972_v57  ;;  %v7948_v56 = vcombine.high %v4889_v20, %v4893_v59  ;;  %v4877_v57 = vld [vmem:[%s12197_s3 + $0x228] sm:$0xff]  ;;  %v9117_v28 = vmov 1966171168  }
 0x316   : > { %v4621_v30 = vpop.f32.mrf.mxu0 }
 0x317   : > { %v4664_v55 = vpop.f32.mrf.mxu1  ;;  %v4663_v15 = vadd.f32 %v4662_v38, %v4620_v53  ;;  %v4622_v12 = vadd.f32 %v4621_v30, %v4578_v26  ;;  %v4881_v26 = vld [vmem:[%s12197_s3 + $0x248] sm:$0xff]  ;;  %v4769_v38 = vunpack.c.l.s4 %v9117_v28  ;;  %v4866_v30 = vld [vmem:[%s12197_s3 + $0x1d0] sm:$0xff] }
 0x318   : > { %6489 = vmatpush2.bf16.msra.mxu0 %v7971_v25  ;;  %v4623_v33 = vpop.f32.mrf.mxu0  ;;  %v4965_v28 = vld [vmem:[%s12197_s3 + $0x4e8] sm:$0xff] }
 0x319   : > { %v4666_v22 = vpop.f32.mrf.mxu1  ;;  %v4673_v7 = vadd.f32 %v4663_v15, %v11212_v42  ;;  %v4665_v10 = vadd.f32 %v4664_v55, %v4622_v12  ;;  %v4624_v14 = vadd.f32 %v4623_v33, %v4580_v17  ;;  %6490 = vmatprep.subr.bf16.mxu0 %v7964_v2  ;;  %v7955_v42 = vcombine.low %v4897_v4, %v4901_v1  ;;  %v4870_v55 = vld [vmem:[%s12197_s3 + $0x1f0] sm:$0xff] }
 0x31a   : > { %v4625_v51 = vpop.f32.mrf.mxu0  ;;  %v7932_v2 = vcombine.high %v4873_v5, %v4877_v57  ;;  %v7931_v12 = vcombine.low %v4873_v5, %v4877_v57  ;;  %v4770_v33 = vunpack.c.0.s8 %v4769_v38  ;;  %v7925_v59 = vcombine.low %v4866_v30, %v4870_v55  ;;  %v4826_v38 = vld [vmem:[%s12197_s3 + $0x90] sm:$0xff] }
 0x31b   : > { %v4703_v54 = vadd.f32 %v4692_v44, %v4673_v7  ;;  %v4674_v19 = vadd.f32 %v4665_v10, %v11221_v45  ;;  %v4667_v21 = vadd.f32 %v4666_v22, %v4624_v14  ;;  %v4626_v48 = vadd.f32 %v4625_v51, %v4582_v13  ;;  %v4668_v37 = vpop.f32.mrf.mxu1  ;;  %v4885_v45 = vld [vmem:[%s12197_s3 + $0x268] sm:$0xff]  ;;  %v4858_v10 = vld [vmem:[%s12197_s3 + $0x190] sm:$0xff] }
 0x31c   : > { %6491 = vmatpush2.bf16.msra.mxu0 %v7963_v6  ;;  %v7926_v22 = vcombine.high %v4866_v30, %v4870_v55  ;;  %v4862_v14 = vld [vmem:[%s12197_s3 + $0x1b0] sm:$0xff]  ;;  %v7902_v5 = vcombine.high %v4842_v8, %v4846_v29 }
 0x31d   : > { %v4711_v62 = vmax.f32 %v4703_v54, 0.0  ;;  %v4704_v46 = vadd.f32 %v4696_v18, %v4674_v19  ;;  %v4677_v23 = vadd.f32 %v4667_v21, %v11224_v39  ;;  %v4669_v60 = vadd.f32 %v4668_v37, %v4626_v48  ;;  %6492 = vmatprep.subr.bf16.mxu0 %v7956_v40  ;;  %v4985_v19 = vld [vmem:[%s12197_s3 + $0x588] sm:$0xff] }
 0x31e   : > { %v7940_v39 = vcombine.high %v4881_v26, %v4885_v45  ;;  %v4989_v21 = vld [vmem:[%s12197_s3 + $0x5a8] sm:$0xff]  ;;  %v11614_v48 = vsub.s32 %v4770_v33, %v11431_v34  ;;  %v7918_v37 = vcombine.high %v4858_v10, %v4862_v14 }
 0x31f   : > { %v4712_v32 = vmax.f32 %v4704_v46, 0.0  ;;  %v4707_v11 = vadd.f32 %v4692_v44, %v4677_v23  ;;  %v4678_v31 = vadd.f32 %v4669_v60, %v11233_v43  ;;  %v4719_v17 = vmax.f32 %v4711_v62, 0.0  ;;  %v4850_v62 = vld [vmem:[%s12197_s3 + $0x150] sm:$0xff] }
 0x320   : > { %6493 = vmatpush2.bf16.msra.mxu0 %v7955_v42  ;;  %v7939_v43 = vcombine.low %v4881_v26, %v4885_v45  ;;  %v4854_v46 = vld [vmem:[%s12197_s3 + $0x170] sm:$0xff]  ;;  %v7917_v23 = vcombine.low %v4858_v10, %v4862_v14  ;;  %v8044_v60 = vcombine.high %v4985_v19, %v4989_v21  ;;  %v4774_v45 = vrot.slane %v4766_v47, %v11614_v48 }
 0x321   : > { %v4715_v50 = vmax.f32 %v4707_v11, 0.0  ;;  %v4708_v52 = vadd.f32 %v4696_v18, %v4678_v31  ;;  %6494 = vmatprep.subr.bf16.mxu0 %v7948_v56  ;;  %v4720_v13 = vmax.f32 %v4712_v32, 0.0  ;;  %v7910_v11 = vcombine.high %v4850_v62, %v4854_v46  ;;  %v4977_v31 = vld [vmem:[%s12197_s3 + $0x548] sm:$0xff]  ;;  %v4810_v10 = vld [vmem:[%s12197_s3 + $0x10] sm:$0xff] }
 0x322   : > { %v4814_v14 = vld [vmem:[%s12197_s3 + $0x30] sm:$0xff] }
 0x323   : > { %v4723_v16 = vmax.f32 %v4719_v17, %v4715_v50  ;;  %v4716_v61 = vmax.f32 %v4708_v52, 0.0  ;;  %v8043_v17 = vcombine.low %v4985_v19, %v4989_v21  ;;  %v7909_v50 = vcombine.low %v4850_v62, %v4854_v46  ;;  %v4941_v19 = vld [vmem:[%s12197_s3 + $0x428] sm:$0xff]  ;;  %v4930_v21 = vld [vmem:[%s12197_s3 + $0x3d0] sm:$0xff] }
 0x324   : > { %6495 = vmatpush2.bf16.msra.mxu0 %v7947_v49  ;;  %v4981_v49 = vld [vmem:[%s12197_s3 + $0x568] sm:$0xff]  ;;  %v7869_v62 = vcombine.low %v4810_v10, %v4814_v14 }
 0x325   : > { %v4731_v25 = vrot.slane %v4723_v16, 7  ;;  %v4724_v53 = vmax.f32 %v4720_v13, %v4716_v61  ;;  %6496 = vmatprep.subr.bf16.mxu0 %v7940_v39  ;;  %v4744_v4 = vrot.slane %v4723_v16, 1  ;;  %v8036_v52 = vcombine.high %v4977_v31, %v4981_v49 }
 0x326   : > { %v8035_v57 = vcombine.low %v4977_v31, %v4981_v49  ;;  %v7901_v13 = vcombine.low %v4842_v8, %v4846_v29 }
 0x327   : > { %v4732_v1 = vrot.slane %v4724_v53, 7  ;;  %v4745_v15 = vrot.slane %v4724_v53, 1  ;;  %v4740_v44 = vsel %vm4737_vm2, 0.0, %v4731_v25  ;;  %v4752_v20 = vsel %vm4737_vm2, %v4744_v4, 0.0  ;;  %v4830_v25 = vld [vmem:[%s12197_s3 + $0xb0] sm:$0xff]  ;;  %v4953_v4 = vld [vmem:[%s12197_s3 + $0x488] sm:$0xff] }
 0x328   : > { %6497 = vmatpush2.bf16.msra.mxu0 %v7939_v43  ;;  %v4756_v18 = vmax.f32 %v4723_v16, %v4740_v44  ;;  %v8028_v16 = vcombine.high %v4969_v27, %v4973_v3  ;;  %v4961_v43 = vld [vmem:[%s12197_s3 + $0x4c8] sm:$0xff]  ;;  %v7886_v55 = vcombine.high %v4826_v38, %v4830_v25  ;;  %v4822_v44 = vld [vmem:[%s12197_s3 + $0x70] sm:$0xff] }
 0x329   : > { %6498 = vmatprep.subr.bf16.mxu0 %v7932_v2  ;;  %v4741_v6 = vsel %vm4737_vm2, 0.0, %v4732_v1  ;;  %v4753_v40 = vsel %vm4737_vm2, %v4745_v15, 0.0  ;;  %v8020_v30 = vcombine.high %v4961_v43, %v4965_v28  ;;  %v4957_v1 = vld [vmem:[%s12197_s3 + $0x4a8] sm:$0xff]  ;;  %v4818_v15 = vld [vmem:[%s12197_s3 + $0x50] sm:$0xff] }
 0x32a   : > { %v4757_v7 = vmax.f32 %v4724_v53, %v4741_v6  ;;  %v4760_v54 = vmax.f32 %v4756_v18, %v4752_v20  ;;  %v8027_v53 = vcombine.low %v4969_v27, %v4973_v3  ;;  %v7885_v18 = vcombine.low %v4826_v38, %v4830_v25  ;;  %v4945_v6 = vld [vmem:[%s12197_s3 + $0x448] sm:$0xff] }
 0x32b   : > { %v8012_v33 = vcombine.high %v4953_v4, %v4957_v1  ;;  %v7877_v20 = vcombine.low %v4818_v15, %v4822_v44  ;;  %v5033_v38 = vld [vmem:[%s12197_s3 + $0x708] sm:$0xff] }
 0x32c   : > { %6499 = vmatpush2.bf16.msra.mxu0 %v7931_v12  ;;  %v4761_v51 = vmax.f32 %v4757_v7, %v4753_v40  ;;  %v11627_v26 = vpack.c.bf16 %v4760_v54, %v4760_v54  ;;  %v8019_v12 = vcombine.low %v4961_v43, %v4965_v28  ;;  %v4949_v7 = vld [vmem:[%s12197_s3 + $0x468] sm:$0xff]  ;;  %v8011_v40 = vcombine.low %v4953_v4, %v4957_v1 }
 0x32d   : > { %6550 = vmatprep.subr.bf16.mxu0 %v7926_v22  ;;  %v7878_v22 = vcombine.high %v4818_v15, %v4822_v44  ;;  %v5037_v25 = vld [vmem:[%s12197_s3 + $0x728] sm:$0xff] }
 0x32e   : > { %v11617_v42 = vpack.c.bf16 %v4761_v51, %v4761_v51  ;;  %v4767_v56 = vcombine.low %v4760_v54, %v4761_v51  ;;  %v7870_v51 = vcombine.high %v4810_v10, %v4814_v14  ;;  %v4937_v54 = vld [vmem:[%s12197_s3 + $0x408] sm:$0xff]  ;;  %v8092_v4 = vcombine.high %v5033_v38, %v5037_v25 }
 0x32f   : > { %6501 = vmatmul.mubr.bf16.vlgmr.msra.gmra.mxu0 %v11487_v63  ;;  %v7996_v46 = vcombine.high %v4937_v54, %v4941_v19  ;;  %v7995_v31 = vcombine.low %v4937_v54, %v4941_v19  ;;  %v5025_v15 = vld [vmem:[%s12197_s3 + $0x6c8] sm:$0xff] }
 0x330   : > { %6551 = vmatpush1.bf16.msra.mxu0 %v7925_v59  ;;  %6582 = vmatprep.mubr.bf16.mxu0 %v11481_v41  ;;  %v4781_v32 = vrot.slane %v4767_v56, %v11614_v48  ;;  %v8004_v59 = vcombine.high %v4945_v6, %v4949_v7  ;;  %v8003_v56 = vcombine.low %v4945_v6, %v4949_v7  ;;  %v5029_v44 = vld [vmem:[%s12197_s3 + $0x6e8] sm:$0xff] }
 0x331   : > { %6459 = vmatprep.mubr.bf16.mxu1 %v11617_v42  ;;  %6552 = vmatprep.subr.bf16.mxu0 %v7918_v37  ;;  %v4934_v37 = vld [vmem:[%s12197_s3 + $0x3f0] sm:$0xff]  ;;  %v8084_v6 = vcombine.high %v5025_v15, %v5029_v44  ;;  %v5017_v10 = vld [vmem:[%s12197_s3 + $0x688] sm:$0xff] }
 0x332   : > { %6460 = vmatmul.mubr.bf16.vlgmr.msra.gmra.mxu1 %v11627_v26  ;;  %v4782_v47 = vcombine.low %v4774_v45, %v4781_v32  ;;  %v5061_v45 = vld [vmem:[%s12197_s3 + $0x7e8] sm:$0xff]  ;;  %v4922_v32 = vld [vmem:[%s12197_s3 + $0x390] sm:$0xff]  ;;  %v7989_v49 = vcombine.low %v4930_v21, %v4934_v37 }
 0x333   : > { %6510 = vmatpush1.bf16.msra.mxu1 %v8051_v24  ;;  %6541 = vmatprep.mubr.bf16.mxu1 %v11617_v42  ;;  %v4834_v24 = vld [vmem:[%s12197_s3 + $0xd0] sm:$0xff]  ;;  %v5021_v14 = vld [vmem:[%s12197_s3 + $0x6a8] sm:$0xff] }
 0x334   : > { %6553 = vmatpush1.bf16.msra.mxu0 %v7917_v23  ;;  %6511 = vmatprep.subr.bf16.mxu1 %v8044_v60  ;;  %v4789_v39 = vrot.slane %v4782_v47, %v11614_v48  ;;  %v7894_v61 = vcombine.high %v4834_v24, %v4838_v36  ;;  %v7893_v2 = vcombine.low %v4834_v24, %v4838_v36  ;;  %v5057_v60 = vld [vmem:[%s12197_s3 + $0x7c8] sm:$0xff] }
 0x335   : > { %6554 = vmatprep.subr.bf16.mxu0 %v7910_v11  ;;  %v7990_v23 = vcombine.high %v4930_v21, %v4934_v37  ;;  %v4926_v11 = vld [vmem:[%s12197_s3 + $0x3b0] sm:$0xff]  ;;  %v8116_v8 = vcombine.high %v5057_v60, %v5061_v45  ;;  %v5049_v47 = vld [vmem:[%s12197_s3 + $0x788] sm:$0xff]  ;;  %v8076_v54 = vcombine.high %v5017_v10, %v5021_v14 }
 0x336   : > { %4795 = vst.msk [vmem:[%s245_s15] sm:$0xf] %vm4793_vm3, %v4789_v39  ;;  %v7982_v29 = vcombine.high %v4922_v32, %v4926_v11  ;;  %v8115_v39 = vcombine.low %v5057_v60, %v5061_v45  ;;  %v5041_v24 = vld [vmem:[%s12197_s3 + $0x748] sm:$0xff] }
 0x337   : > { %6512 = vmatpush1.bf16.msra.mxu1 %v8043_v17  ;;  %v5053_v17 = vld [vmem:[%s12197_s3 + $0x7a8] sm:$0xff] }
 0x338   : > { %6555 = vmatpush1.bf16.msra.mxu0 %v7909_v50  ;;  %6513 = vmatprep.subr.bf16.mxu1 %v8036_v52  ;;  %v4914_v50 = vld [vmem:[%s12197_s3 + $0x350] sm:$0xff]  ;;  %v8108_v27 = vcombine.high %v5049_v47, %v5053_v17  ;;  %v5045_v36 = vld [vmem:[%s12197_s3 + $0x768] sm:$0xff] }
 0x339   : > { %6556 = vmatprep.subr.bf16.mxu0 %v7902_v5  ;;  %v4918_v52 = vld [vmem:[%s12197_s3 + $0x370] sm:$0xff]  ;;  %v7981_v5 = vcombine.low %v4922_v32, %v4926_v11  ;;  %v8100_v43 = vcombine.high %v5041_v24, %v5045_v36  ;;  %v5009_v21 = vld [vmem:[%s12197_s3 + $0x648] sm:$0xff] }
 0x33a   : > { %v7974_v3 = vcombine.high %v4914_v50, %v4918_v52  ;;  %v5013_v37 = vld [vmem:[%s12197_s3 + $0x668] sm:$0xff] }
 0x33b   : > { %6514 = vmatpush1.bf16.msra.mxu1 %v8035_v57  ;;  %v4906_v57 = vld [vmem:[%s12197_s3 + $0x310] sm:$0xff]  ;;  %v8068_v60 = vcombine.high %v5009_v21, %v5013_v37  ;;  %v5001_v32 = vld [vmem:[%s12197_s3 + $0x608] sm:$0xff] }
 0x33c   : > { %6557 = vmatpush1.bf16.msra.mxu0 %v7901_v13  ;;  %6515 = vmatprep.subr.bf16.mxu1 %v8028_v16  ;;  %v4910_v13 = vld [vmem:[%s12197_s3 + $0x330] sm:$0xff]  ;;  %v8107_v16 = vcombine.low %v5049_v47, %v5053_v17  ;;  %v5005_v11 = vld [vmem:[%s12197_s3 + $0x628] sm:$0xff] }
 0x33d   : > { %6558 = vmatprep.subr.bf16.mxu0 %v7894_v61  ;;  %v7973_v61 = vcombine.low %v4914_v50, %v4918_v52  ;;  %v7966_v28 = vcombine.high %v4906_v57, %v4910_v13  ;;  %v8060_v47 = vcombine.high %v5001_v32, %v5005_v11  ;;  %v4994_v50 = vld [vmem:[%s12197_s3 + $0x5d0] sm:$0xff] }
 0x33e   : > { %v4998_v52 = vld [vmem:[%s12197_s3 + $0x5f0] sm:$0xff] }
 0x33f   : > { %6516 = vmatpush1.bf16.msra.mxu1 %v8027_v53  ;;  %v4898_v53 = vld [vmem:[%s12197_s3 + $0x2d0] sm:$0xff] }
 0x340   : > { %6559 = vmatpush1.bf16.msra.mxu0 %v7893_v2  ;;  %6517 = vmatprep.subr.bf16.mxu1 %v8020_v30  ;;  %v4902_v2 = vld [vmem:[%s12197_s3 + $0x2f0] sm:$0xff]  ;;  %v8099_v30 = vcombine.low %v5041_v24, %v5045_v36  ;;  %v8054_v24 = vcombine.high %v4994_v50, %v4998_v52 }
 0x341   : > { %6560 = vmatprep.subr.bf16.mxu0 %v7886_v55  ;;  %v7965_v55 = vcombine.low %v4906_v57, %v4910_v13  ;;  %v7958_v1 = vcombine.high %v4898_v53, %v4902_v2  ;;  %v4986_v57 = vld [vmem:[%s12197_s3 + $0x590] sm:$0xff] }
 0x342   : > { %v4990_v13 = vld [vmem:[%s12197_s3 + $0x5b0] sm:$0xff] }
 0x343   : > { %6518 = vmatpush1.bf16.msra.mxu1 %v8019_v12  ;;  %v4890_v12 = vld [vmem:[%s12197_s3 + $0x290] sm:$0xff] }
 0x344   : > { %6561 = vmatpush1.bf16.msra.mxu0 %v7885_v18  ;;  %6519 = vmatprep.subr.bf16.mxu1 %v8012_v33  ;;  %v4894_v18 = vld [vmem:[%s12197_s3 + $0x2b0] sm:$0xff]  ;;  %v8091_v33 = vcombine.low %v5033_v38, %v5037_v25  ;;  %v8046_v38 = vcombine.high %v4986_v57, %v4990_v13 }
 0x345   : > { %6562 = vmatprep.subr.bf16.mxu0 %v7878_v22  ;;  %v7957_v22 = vcombine.low %v4898_v53, %v4902_v2  ;;  %v7950_v7 = vcombine.high %v4890_v12, %v4894_v18  ;;  %v4978_v53 = vld [vmem:[%s12197_s3 + $0x550] sm:$0xff] }
 0x346   : > { %v4982_v2 = vld [vmem:[%s12197_s3 + $0x570] sm:$0xff] }
 0x347   : > { %6520 = vmatpush1.bf16.msra.mxu1 %v8011_v40  ;;  %v4882_v40 = vld [vmem:[%s12197_s3 + $0x250] sm:$0xff] }
 0x348   : > { %6563 = vmatpush1.bf16.msra.mxu0 %v7877_v20  ;;  %6521 = vmatprep.subr.bf16.mxu1 %v8004_v59  ;;  %v4886_v20 = vld [vmem:[%s12197_s3 + $0x270] sm:$0xff]  ;;  %v8083_v59 = vcombine.low %v5025_v15, %v5029_v44 }
 0x349   : > { %6564 = vmatprep.subr.bf16.mxu0 %v7870_v51  ;;  %v7949_v51 = vcombine.low %v4890_v12, %v4894_v18  ;;  %v7942_v19 = vcombine.high %v4882_v40, %v4886_v20  ;;  %v4970_v44 = vld [vmem:[%s12197_s3 + $0x510] sm:$0xff]  ;;  %v4835_v18 = vld [vmem:[%s12197_s3 + $0xd8] sm:$0xff] }
 0x34a   : > { %v4974_v12 = vld [vmem:[%s12197_s3 + $0x530] sm:$0xff] }
 0x34b   : > { %6522 = vmatpush1.bf16.msra.mxu1 %v8003_v56  ;;  %v4874_v56 = vld [vmem:[%s12197_s3 + $0x210] sm:$0xff] }
 0x34c   : > { %6565 = vmatpush1.bf16.msra.mxu0 %v7869_v62  ;;  %6523 = vmatprep.subr.bf16.mxu1 %v7996_v46  ;;  %v4878_v62 = vld [vmem:[%s12197_s3 + $0x230] sm:$0xff]  ;;  %v8075_v46 = vcombine.low %v5017_v10, %v5021_v14 }
 0x34d   : > { %6566 = vmatprep.subr.bf16.mxu0 %v7990_v23  ;;  %v7941_v23 = vcombine.low %v4882_v40, %v4886_v20  ;;  %v7934_v45 = vcombine.high %v4874_v56, %v4878_v62  ;;  %v4962_v14 = vld [vmem:[%s12197_s3 + $0x4d0] sm:$0xff]  ;;  %v4827_v20 = vld [vmem:[%s12197_s3 + $0x98] sm:$0xff] }
 0x34e   : > { %v4966_v40 = vld [vmem:[%s12197_s3 + $0x4f0] sm:$0xff] }
 0x34f   : > { %6524 = vmatpush1.bf16.msra.mxu1 %v7995_v31  ;;  %v4867_v31 = vld [vmem:[%s12197_s3 + $0x1d8] sm:$0xff] }
 0x350   : > { %6567 = vmatpush2.bf16.msra.mxu0 %v7989_v49  ;;  %6525 = vmatprep.subr.bf16.mxu1 %v8116_v8  ;;  %v4871_v49 = vld [vmem:[%s12197_s3 + $0x1f8] sm:$0xff]  ;;  %v8067_v8 = vcombine.low %v5009_v21, %v5013_v37  ;;  %v4954_v37 = vld [vmem:[%s12197_s3 + $0x490] sm:$0xff] }
 0x351   : > { %6568 = vmatprep.subr.bf16.mxu0 %v7982_v29  ;;  %v7933_v29 = vcombine.low %v4874_v56, %v4878_v62  ;;  %v7928_v17 = vcombine.high %v4867_v31, %v4871_v49  ;;  %v4958_v56 = vld [vmem:[%s12197_s3 + $0x4b0] sm:$0xff]  ;;  %v4819_v62 = vld [vmem:[%s12197_s3 + $0x58] sm:$0xff] }
 0x353   : > { %6526 = vmatpush2.bf16.msra.mxu1 %v8115_v39  ;;  %v4859_v39 = vld [vmem:[%s12197_s3 + $0x198] sm:$0xff] }
 0x354   : > { %6569 = vmatpush2.bf16.msra.mxu0 %v7981_v5  ;;  %6527 = vmatprep.subr.bf16.mxu1 %v8108_v27  ;;  %v4863_v5 = vld [vmem:[%s12197_s3 + $0x1b8] sm:$0xff]  ;;  %v8059_v27 = vcombine.low %v5001_v32, %v5005_v11  ;;  %v4946_v11 = vld [vmem:[%s12197_s3 + $0x450] sm:$0xff] }
 0x355   : > { %6570 = vmatprep.subr.bf16.mxu0 %v7974_v3  ;;  %v7927_v3 = vcombine.low %v4867_v31, %v4871_v49  ;;  %v7920_v36 = vcombine.high %v4859_v39, %v4863_v5  ;;  %v4950_v31 = vld [vmem:[%s12197_s3 + $0x470] sm:$0xff]  ;;  %v4811_v49 = vld [vmem:[%s12197_s3 + $0x18] sm:$0xff] }
 0x357   : > { %6528 = vmatpush2.bf16.msra.mxu1 %v8107_v16  ;;  %v4851_v16 = vld [vmem:[%s12197_s3 + $0x158] sm:$0xff] }
 0x358   : > { %6571 = vmatpush2.bf16.msra.mxu0 %v7973_v61  ;;  %6529 = vmatprep.subr.bf16.mxu1 %v8100_v43  ;;  %v4855_v61 = vld [vmem:[%s12197_s3 + $0x178] sm:$0xff]  ;;  %v8053_v43 = vcombine.low %v4994_v50, %v4998_v52  ;;  %v4938_v52 = vld [vmem:[%s12197_s3 + $0x410] sm:$0xff] }
 0x359   : > { %6572 = vmatprep.subr.bf16.mxu0 %v7966_v28  ;;  %v7919_v28 = vcombine.low %v4859_v39, %v4863_v5  ;;  %v7912_v25 = vcombine.high %v4851_v16, %v4855_v61  ;;  %v4942_v39 = vld [vmem:[%s12197_s3 + $0x430] sm:$0xff]  ;;  %v4931_v5 = vld [vmem:[%s12197_s3 + $0x3d8] sm:$0xff] }
 0x35b   : > { %6530 = vmatpush2.bf16.msra.mxu1 %v8099_v30  ;;  %v4843_v30 = vld [vmem:[%s12197_s3 + $0x118] sm:$0xff] }
 0x35c   : > { %6573 = vmatpush2.bf16.msra.mxu0 %v7965_v55  ;;  %6531 = vmatprep.subr.bf16.mxu1 %v8092_v4  ;;  %v8045_v55 = vcombine.low %v4986_v57, %v4990_v13  ;;  %v7911_v4 = vcombine.low %v4851_v16, %v4855_v61  ;;  %v5058_v13 = vld [vmem:[%s12197_s3 + $0x7d0] sm:$0xff]  ;;  %v4923_v61 = vld [vmem:[%s12197_s3 + $0x398] sm:$0xff] }
 0x35d   : > { %6574 = vmatprep.subr.bf16.mxu0 %v7958_v1  ;;  %v8038_v1 = vcombine.high %v4978_v53, %v4982_v2  ;;  %v5062_v16 = vld [vmem:[%s12197_s3 + $0x7f0] sm:$0xff] }
 0x35f   : > { %6532 = vmatpush2.bf16.msra.mxu1 %v8091_v33  ;;  %v4839_v33 = vld [vmem:[%s12197_s3 + $0xf8] sm:$0xff] }
 0x360   : > { %6575 = vmatpush2.bf16.msra.mxu0 %v7957_v22  ;;  %6533 = vmatprep.subr.bf16.mxu1 %v8084_v6  ;;  %v8037_v22 = vcombine.low %v4978_v53, %v4982_v2  ;;  %v7896_v10 = vcombine.high %v4835_v18, %v4839_v33  ;;  %v5050_v2 = vld [vmem:[%s12197_s3 + $0x790] sm:$0xff] }
 0x361   : > { %6576 = vmatprep.subr.bf16.mxu0 %v7950_v7  ;;  %v8030_v7 = vcombine.high %v4970_v44, %v4974_v12 }
 0x363   : > { %6534 = vmatpush2.bf16.msra.mxu1 %v8083_v59  ;;  %v4831_v59 = vld [vmem:[%s12197_s3 + $0xb8] sm:$0xff] }
 0x364   : > { %6577 = vmatpush2.bf16.msra.mxu0 %v7949_v51  ;;  %6535 = vmatprep.subr.bf16.mxu1 %v8076_v54  ;;  %v8029_v51 = vcombine.low %v4970_v44, %v4974_v12  ;;  %v7895_v54 = vcombine.low %v4835_v18, %v4839_v33  ;;  %v7888_v21 = vcombine.high %v4827_v20, %v4831_v59  ;;  %v5042_v12 = vld [vmem:[%s12197_s3 + $0x750] sm:$0xff]  ;;  %v4907_v33 = vld [vmem:[%s12197_s3 + $0x318] sm:$0xff] }
 0x365   : > { %6578 = vmatprep.subr.bf16.mxu0 %v7942_v19  ;;  %v8022_v19 = vcombine.high %v4962_v14, %v4966_v40  ;;  %v5046_v18 = vld [vmem:[%s12197_s3 + $0x770] sm:$0xff] }
 0x367   : > { %6536 = vmatpush2.bf16.msra.mxu1 %v8075_v46  ;;  %v4823_v46 = vld [vmem:[%s12197_s3 + $0x78] sm:$0xff] }
 0x368   : > { %6579 = vmatpush2.bf16.msra.mxu0 %v7941_v23  ;;  %6537 = vmatprep.subr.bf16.mxu1 %v8068_v60  ;;  %v8021_v23 = vcombine.low %v4962_v14, %v4966_v40  ;;  %v7887_v60 = vcombine.low %v4827_v20, %v4831_v59  ;;  %v7880_v32 = vcombine.high %v4819_v62, %v4823_v46  ;;  %v5034_v40 = vld [vmem:[%s12197_s3 + $0x710] sm:$0xff]  ;;  %v4899_v59 = vld [vmem:[%s12197_s3 + $0x2d8] sm:$0xff] }
 0x369   : > { %6580 = vmatprep.subr.bf16.mxu0 %v7934_v45  ;;  %v8014_v45 = vcombine.high %v4954_v37, %v4958_v56  ;;  %v5038_v20 = vld [vmem:[%s12197_s3 + $0x730] sm:$0xff] }
 0x36b   : > { %6538 = vmatpush2.bf16.msra.mxu1 %v8067_v8  ;;  %v4815_v8 = vld [vmem:[%s12197_s3 + $0x38] sm:$0xff] }
 0x36c   : > { %6581 = vmatpush2.bf16.msra.mxu0 %v7933_v29  ;;  %6539 = vmatprep.subr.bf16.mxu1 %v8060_v47  ;;  %v8013_v29 = vcombine.low %v4954_v37, %v4958_v56  ;;  %v7879_v47 = vcombine.low %v4819_v62, %v4823_v46  ;;  %v7872_v50 = vcombine.high %v4811_v49, %v4815_v8  ;;  %v5026_v56 = vld [vmem:[%s12197_s3 + $0x6d0] sm:$0xff]  ;;  %v4891_v46 = vld [vmem:[%s12197_s3 + $0x298] sm:$0xff] }
 0x36d   : > { %6632 = vmatprep.subr.bf16.mxu0 %v7928_v17  ;;  %v8006_v17 = vcombine.high %v4946_v11, %v4950_v31  ;;  %v5030_v62 = vld [vmem:[%s12197_s3 + $0x6f0] sm:$0xff] }
 0x36f   : > { %6540 = vmatpush2.bf16.msra.mxu1 %v8059_v27  ;;  %6583 = vmatmul.mubr.bf16.vlgmr.msra.gmra.mxu0 %v11487_v63  ;;  %v4935_v27 = vld [vmem:[%s12197_s3 + $0x3f8] sm:$0xff] }
 0x370   : > { %6633 = vmatpush1.bf16.msra.mxu0 %v7927_v3  ;;  %6664 = vmatprep.mubr.bf16.mxu0 %v11481_v41  ;;  %v4847_v41 = vld [vmem:[%s12197_s3 + $0x138] sm:$0xff]  ;;  %v8005_v3 = vcombine.low %v4946_v11, %v4950_v31  ;;  %v7992_v57 = vcombine.high %v4931_v5, %v4935_v27  ;;  %v5018_v31 = vld [vmem:[%s12197_s3 + $0x690] sm:$0xff] }
 0x371   : > { %6591 = vmatprep.subr.bf16.mxu1 %v8054_v24  ;;  %6634 = vmatprep.subr.bf16.mxu0 %v7920_v36  ;;  %v7904_v15 = vcombine.high %v4843_v30, %v4847_v41  ;;  %v7903_v6 = vcombine.low %v4843_v30, %v4847_v41  ;;  %v7871_v24 = vcombine.low %v4811_v49, %v4815_v8  ;;  %v5054_v30 = vld [vmem:[%s12197_s3 + $0x7b0] sm:$0xff]  ;;  %v4915_v41 = vld [vmem:[%s12197_s3 + $0x358] sm:$0xff] }
 0x372   : > { %6542 = vmatmul.mubr.bf16.vlgmr.msra.gmra.mxu1 %v11627_v26  ;;  %v7998_v36 = vcombine.high %v4938_v52, %v4942_v39  ;;  %v5022_v49 = vld [vmem:[%s12197_s3 + $0x6b0] sm:$0xff]  ;;  %v4883_v8 = vld [vmem:[%s12197_s3 + $0x258] sm:$0xff] }
 0x373   : > { %6592 = vmatpush1.bf16.msra.mxu1 %v8053_v43  ;;  %6623 = vmatprep.mubr.bf16.mxu1 %v11617_v42  ;;  %v4927_v43 = vld [vmem:[%s12197_s3 + $0x3b8] sm:$0xff] }
 0x374   : > { %6635 = vmatpush1.bf16.msra.mxu0 %v7919_v28  ;;  %6593 = vmatprep.subr.bf16.mxu1 %v8046_v38  ;;  %v7997_v28 = vcombine.low %v4938_v52, %v4942_v39  ;;  %v7991_v38 = vcombine.low %v4931_v5, %v4935_v27  ;;  %v7984_v53 = vcombine.high %v4923_v61, %v4927_v43  ;;  %v5010_v39 = vld [vmem:[%s12197_s3 + $0x650] sm:$0xff]  ;;  %v4875_v27 = vld [vmem:[%s12197_s3 + $0x218] sm:$0xff] }
 0x375   : > { %6636 = vmatprep.subr.bf16.mxu0 %v7912_v25  ;;  %v8118_v25 = vcombine.high %v5058_v13, %v5062_v16  ;;  %v5014_v5 = vld [vmem:[%s12197_s3 + $0x670] sm:$0xff] }
 0x377   : > { %6594 = vmatpush1.bf16.msra.mxu1 %v8045_v55  ;;  %v4919_v55 = vld [vmem:[%s12197_s3 + $0x378] sm:$0xff] }
 0x378   : > { %6637 = vmatpush1.bf16.msra.mxu0 %v7911_v4  ;;  %6595 = vmatprep.subr.bf16.mxu1 %v8038_v1  ;;  %v8117_v4 = vcombine.low %v5058_v13, %v5062_v16  ;;  %v7983_v1 = vcombine.low %v4923_v61, %v4927_v43  ;;  %v7976_v44 = vcombine.high %v4915_v41, %v4919_v55  ;;  %v5002_v16 = vld [vmem:[%s12197_s3 + $0x610] sm:$0xff] }
 0x379   : > { %6638 = vmatprep.subr.bf16.mxu0 %v7904_v15  ;;  %v8110_v15 = vcombine.high %v5050_v2, %v5054_v30  ;;  %v5006_v61 = vld [vmem:[%s12197_s3 + $0x630] sm:$0xff]  ;;  %v8069_v43 = vcombine.low %v5010_v39, %v5014_v5 }
 0x37b   : > { %6596 = vmatpush1.bf16.msra.mxu1 %v8037_v22  ;;  %v4911_v22 = vld [vmem:[%s12197_s3 + $0x338] sm:$0xff] }
 0x37c   : > { %6639 = vmatpush1.bf16.msra.mxu0 %v7903_v6  ;;  %6597 = vmatprep.subr.bf16.mxu1 %v8030_v7  ;;  %v8109_v6 = vcombine.low %v5050_v2, %v5054_v30  ;;  %v7975_v7 = vcombine.low %v4915_v41, %v4919_v55  ;;  %v7968_v14 = vcombine.high %v4907_v33, %v4911_v22  ;;  %v4987_v41 = vld [vmem:[%s12197_s3 + $0x598] sm:$0xff] }
 0x37d   : > { %6640 = vmatprep.subr.bf16.mxu0 %v7896_v10  ;;  %v8102_v10 = vcombine.high %v5042_v12, %v5046_v18  ;;  %v8061_v2 = vcombine.low %v5002_v16, %v5006_v61  ;;  %v4991_v55 = vld [vmem:[%s12197_s3 + $0x5b8] sm:$0xff] }
 0x37f   : > { %6598 = vmatpush1.bf16.msra.mxu1 %v8029_v51  ;;  %v4903_v51 = vld [vmem:[%s12197_s3 + $0x2f8] sm:$0xff] }
 0x380   : > { %6641 = vmatpush1.bf16.msra.mxu0 %v7895_v54  ;;  %6599 = vmatprep.subr.bf16.mxu1 %v8022_v19  ;;  %v8101_v54 = vcombine.low %v5042_v12, %v5046_v18  ;;  %v7967_v19 = vcombine.low %v4907_v33, %v4911_v22  ;;  %v7960_v37 = vcombine.high %v4899_v59, %v4903_v51  ;;  %v4979_v12 = vld [vmem:[%s12197_s3 + $0x558] sm:$0xff] }
 0x381   : > { %6642 = vmatprep.subr.bf16.mxu0 %v7888_v21  ;;  %v8094_v21 = vcombine.high %v5034_v40, %v5038_v20  ;;  %v4983_v18 = vld [vmem:[%s12197_s3 + $0x578] sm:$0xff]  ;;  %v8047_v33 = vcombine.low %v4987_v41, %v4991_v55 }
 0x382   : > { %v8040_v22 = vcombine.high %v4979_v12, %v4983_v18 }
 0x383   : > { %6600 = vmatpush1.bf16.msra.mxu1 %v8021_v23  ;;  %v4895_v23 = vld [vmem:[%s12197_s3 + $0x2b8] sm:$0xff] }
 0x384   : > { %6643 = vmatpush1.bf16.msra.mxu0 %v7887_v60  ;;  %6601 = vmatprep.subr.bf16.mxu1 %v8014_v45  ;;  %v8093_v60 = vcombine.low %v5034_v40, %v5038_v20  ;;  %v7959_v45 = vcombine.low %v4899_v59, %v4903_v51  ;;  %v7952_v11 = vcombine.high %v4891_v46, %v4895_v23  ;;  %v4967_v20 = vld [vmem:[%s12197_s3 + $0x4f8] sm:$0xff] }
 0x385   : > { %6644 = vmatprep.subr.bf16.mxu0 %v7880_v32  ;;  %v8086_v32 = vcombine.high %v5026_v56, %v5030_v62 }
 0x387   : > { %6602 = vmatpush1.bf16.msra.mxu1 %v8013_v29  ;;  %v4887_v29 = vld [vmem:[%s12197_s3 + $0x278] sm:$0xff] }
 0x388   : > { %6645 = vmatpush1.bf16.msra.mxu0 %v7879_v47  ;;  %6603 = vmatprep.subr.bf16.mxu1 %v8006_v17  ;;  %v8085_v47 = vcombine.low %v5026_v56, %v5030_v62  ;;  %v7951_v17 = vcombine.low %v4891_v46, %v4895_v23  ;;  %v7944_v52 = vcombine.high %v4883_v8, %v4887_v29  ;;  %v4947_v56 = vld [vmem:[%s12197_s3 + $0x458] sm:$0xff] }
 0x389   : > { %6646 = vmatprep.subr.bf16.mxu0 %v7872_v50  ;;  %v8078_v50 = vcombine.high %v5018_v31, %v5022_v49  ;;  %v4951_v62 = vld [vmem:[%s12197_s3 + $0x478] sm:$0xff] }
 0x38a   : > { %v8008_v23 = vcombine.high %v4947_v56, %v4951_v62 }
 0x38b   : > { %6604 = vmatpush1.bf16.msra.mxu1 %v8005_v3  ;;  %v4879_v3 = vld [vmem:[%s12197_s3 + $0x238] sm:$0xff] }
 0x38c   : > { %6647 = vmatpush1.bf16.msra.mxu0 %v7871_v24  ;;  %6605 = vmatprep.subr.bf16.mxu1 %v7998_v36  ;;  %v8077_v24 = vcombine.low %v5018_v31, %v5022_v49  ;;  %v7943_v36 = vcombine.low %v4883_v8, %v4887_v29  ;;  %v7936_v13 = vcombine.high %v4875_v27, %v4879_v3  ;;  %v5059_v31 = vld [vmem:[%s12197_s3 + $0x7d8] sm:$0xff] }
 0x38d   : > { %6648 = vmatprep.subr.bf16.mxu0 %v7992_v57  ;;  %v8070_v57 = vcombine.high %v5010_v39, %v5014_v5  ;;  %v5063_v49 = vld [vmem:[%s12197_s3 + $0x7f8] sm:$0xff] }
 0x38e   : > { %v8120_v29 = vcombine.high %v5059_v31, %v5063_v49  ;;  %v5043_v39 = vld [vmem:[%s12197_s3 + $0x758] sm:$0xff] }
 0x38f   : > { %6606 = vmatpush1.bf16.msra.mxu1 %v7997_v28  ;;  %v7935_v28 = vcombine.low %v4875_v27, %v4879_v3  ;;  %v5047_v5 = vld [vmem:[%s12197_s3 + $0x778] sm:$0xff] }
 0x390   : > { %6649 = vmatpush2.bf16.msra.mxu0 %v7991_v38  ;;  %6607 = vmatprep.subr.bf16.mxu1 %v8118_v25  ;;  %v8062_v38 = vcombine.high %v5002_v16, %v5006_v61  ;;  %v4995_v25 = vld [vmem:[%s12197_s3 + $0x5d8] sm:$0xff]  ;;  %v8104_v3 = vcombine.high %v5043_v39, %v5047_v5 }
 0x391   : > { %6650 = vmatprep.subr.bf16.mxu0 %v7984_v53  ;;  %v4999_v53 = vld [vmem:[%s12197_s3 + $0x5f8] sm:$0xff] }
 0x392   : > { %v8056_v30 = vcombine.high %v4995_v25, %v4999_v53  ;;  %v5027_v16 = vld [vmem:[%s12197_s3 + $0x6d8] sm:$0xff] }
 0x393   : > { %6608 = vmatpush2.bf16.msra.mxu1 %v8117_v4  ;;  %v5031_v61 = vld [vmem:[%s12197_s3 + $0x6f8] sm:$0xff] }
 0x394   : > { %6651 = vmatpush2.bf16.msra.mxu0 %v7983_v1  ;;  %6609 = vmatprep.subr.bf16.mxu1 %v8110_v15  ;;  %v8055_v1 = vcombine.low %v4995_v25, %v4999_v53  ;;  %v8048_v15 = vcombine.high %v4987_v41, %v4991_v55  ;;  %v5023_v25 = vld [vmem:[%s12197_s3 + $0x6b8] sm:$0xff]  ;;  %v8087_v53 = vcombine.low %v5027_v16, %v5031_v61 }
 0x395   : > { %6652 = vmatprep.subr.bf16.mxu0 %v7976_v44  ;;  %v5015_v41 = vld [vmem:[%s12197_s3 + $0x678] sm:$0xff] }
 0x397   : > { %6610 = vmatpush2.bf16.msra.mxu1 %v8109_v6 }
 0x398   : > { %6653 = vmatpush2.bf16.msra.mxu0 %v7975_v7  ;;  %6611 = vmatprep.subr.bf16.mxu1 %v8102_v10  ;;  %v4971_v7 = vld [vmem:[%s12197_s3 + $0x518] sm:$0xff] }
 0x399   : > { %6654 = vmatprep.subr.bf16.mxu0 %v7968_v14  ;;  %v4975_v10 = vld [vmem:[%s12197_s3 + $0x538] sm:$0xff]  ;;  %v8039_v14 = vcombine.low %v4979_v12, %v4983_v18 }
 0x39a   : > { %v8032_v40 = vcombine.high %v4971_v7, %v4975_v10  ;;  %v8031_v59 = vcombine.low %v4971_v7, %v4975_v10  ;;  %v5007_v12 = vld [vmem:[%s12197_s3 + $0x638] sm:$0xff] }
 0x39b   : > { %6612 = vmatpush2.bf16.msra.mxu1 %v8101_v54  ;;  %v4955_v54 = vld [vmem:[%s12197_s3 + $0x498] sm:$0xff] }
 0x39c   : > { %6655 = vmatpush2.bf16.msra.mxu0 %v7967_v19  ;;  %6613 = vmatprep.subr.bf16.mxu1 %v8094_v21  ;;  %v4959_v19 = vld [vmem:[%s12197_s3 + $0x4b8] sm:$0xff] }
 0x39d   : > { %6656 = vmatprep.subr.bf16.mxu0 %v7960_v37  ;;  %v8016_v37 = vcombine.high %v4955_v54, %v4959_v19  ;;  %v8015_v46 = vcombine.low %v4955_v54, %v4959_v19 }
 0x39f   : > { %6614 = vmatpush2.bf16.msra.mxu1 %v8093_v60  ;;  %v4939_v60 = vld [vmem:[%s12197_s3 + $0x418] sm:$0xff] }
 0x3a0   : > { %6657 = vmatpush2.bf16.msra.mxu0 %v7959_v45  ;;  %6615 = vmatprep.subr.bf16.mxu1 %v8086_v32  ;;  %v4943_v45 = vld [vmem:[%s12197_s3 + $0x438] sm:$0xff]  ;;  %v8007_v32 = vcombine.low %v4947_v56, %v4951_v62 }
 0x3a1   : > { %6658 = vmatprep.subr.bf16.mxu0 %v7952_v11  ;;  %v8000_v11 = vcombine.high %v4939_v60, %v4943_v45  ;;  %v7999_v8 = vcombine.low %v4939_v60, %v4943_v45 }
 0x3a3   : > { %6616 = vmatpush2.bf16.msra.mxu1 %v8085_v47  ;;  %v5051_v47 = vld [vmem:[%s12197_s3 + $0x798] sm:$0xff] }
 0x3a4   : > { %6659 = vmatpush2.bf16.msra.mxu0 %v7951_v17  ;;  %6617 = vmatprep.subr.bf16.mxu1 %v8078_v50  ;;  %v5055_v17 = vld [vmem:[%s12197_s3 + $0x7b8] sm:$0xff]  ;;  %v8119_v50 = vcombine.low %v5059_v31, %v5063_v49 }
 0x3a5   : > { %6660 = vmatprep.subr.bf16.mxu0 %v7944_v52  ;;  %v8112_v52 = vcombine.high %v5051_v47, %v5055_v17  ;;  %v8111_v27 = vcombine.low %v5051_v47, %v5055_v17 }
 0x3a7   : > { %6618 = vmatpush2.bf16.msra.mxu1 %v8077_v24  ;;  %v5035_v24 = vld [vmem:[%s12197_s3 + $0x718] sm:$0xff] }
 0x3a8   : > { %6661 = vmatpush2.bf16.msra.mxu0 %v7943_v36  ;;  %6619 = vmatprep.subr.bf16.mxu1 %v8070_v57  ;;  %v5039_v36 = vld [vmem:[%s12197_s3 + $0x738] sm:$0xff]  ;;  %v8103_v57 = vcombine.low %v5043_v39, %v5047_v5 }
 0x3a9   : > { %6662 = vmatprep.subr.bf16.mxu0 %v7936_v13  ;;  %v8096_v13 = vcombine.high %v5035_v24, %v5039_v36 }
 0x3ab   : > { %6620 = vmatpush2.bf16.msra.mxu1 %v8069_v43  ;;  %v8095_v43 = vcombine.low %v5035_v24, %v5039_v36 }
 0x3ac   : > { %6663 = vmatpush2.bf16.msra.mxu0 %v7935_v28  ;;  %6621 = vmatprep.subr.bf16.mxu1 %v8062_v38  ;;  %v8088_v28 = vcombine.high %v5027_v16, %v5031_v61  ;;  %v5019_v38 = vld [vmem:[%s12197_s3 + $0x698] sm:$0xff] }
 0x3ad   : > { %v8079_v55 = vcombine.low %v5019_v38, %v5023_v25 }
 0x3af   : > { %6622 = vmatpush2.bf16.msra.mxu1 %v8061_v2  ;;  %6665 = vmatmul.mubr.bf16.vlgmr.msra.gmra.mxu0 %v11487_v63  ;;  %v12020_v4 = vpop.f32.mrf.mxu0  ;;  %v8080_v2 = vcombine.high %v5019_v38, %v5023_v25 }
 0x3b0   : > { %6673 = vmatprep.subr.bf16.mxu1 %v8056_v30  ;;  %v5011_v30 = vld [vmem:[%s12197_s3 + $0x658] sm:$0xff] }
 0x3b1   : > { %v12022_v44 = vpop.f32.mrf.mxu0  ;;  %v8071_v18 = vcombine.low %v5011_v30, %v5015_v41 }
 0x3b2   : > { %6624 = vmatmul.mubr.bf16.vlgmr.msra.gmra.mxu1 %v11627_v26 }
 0x3b3   : > { %6674 = vmatpush1.bf16.msra.mxu1 %v8055_v1  ;;  %6705 = vmatprep.mubr.bf16.mxu1 %v11617_v42  ;;  %v6424_v63 = vpop.f32.mrf.mxu0  ;;  %v4963_v42 = vld [vmem:[%s12197_s3 + $0x4d8] sm:$0xff]  ;;  %v8072_v1 = vcombine.high %v5011_v30, %v5015_v41 }
 0x3b4   : > { %6675 = vmatprep.subr.bf16.mxu1 %v8048_v15  ;;  %v8024_v51 = vcombine.high %v4963_v42, %v4967_v20  ;;  %v8023_v21 = vcombine.low %v4963_v42, %v4967_v20  ;;  %v5003_v15 = vld [vmem:[%s12197_s3 + $0x618] sm:$0xff] }
 0x3b5   : > { %v6425_v6 = vpop.f32.mrf.mxu0  ;;  %v8064_v63 = vcombine.high %v5003_v15, %v5007_v12 }
 0x3b7   : > { %6676 = vmatpush1.bf16.msra.mxu1 %v8047_v33  ;;  %v12113_v33 = vld [vmem:[%s12198_s4] sm:$0xff] }
 0x3b8   : > { %6677 = vmatprep.subr.bf16.mxu1 %v8040_v22  ;;  %v8063_v22 = vcombine.low %v5003_v15, %v5007_v12  ;;  %v6349_v6 = vrot.slane %v12113_v33, %v4683_v58  ;;  %v6353_v7 = vrot.slane %v12113_v33, %v4687_v9  ;;  %v6357_v9 = vrot.slane %v12113_v33, %v4691_v0 }
 0x3ba   : > { %v6423_v20 = vadd.f32 %v12022_v44, %v6353_v7 }
 0x3bb   : > { %6678 = vmatpush1.bf16.msra.mxu1 %v8039_v14  ;;  %v6421_v14 = vadd.f32 %v12020_v4, %v6349_v6  ;;  %v6361_v4 = vrot.slane %v12113_v33, %v4695_v35 }
 0x3bc   : > { %6679 = vmatprep.subr.bf16.mxu1 %v8032_v40 }
 0x3bf   : > { %6680 = vmatpush1.bf16.msra.mxu1 %v8031_v59 }
 0x3c0   : > { %6681 = vmatprep.subr.bf16.mxu1 %v8024_v51 }
 0x3c3   : > { %6682 = vmatpush1.bf16.msra.mxu1 %v8023_v21 }
 0x3c4   : > { %6683 = vmatprep.subr.bf16.mxu1 %v8016_v37 }
 0x3c7   : > { %6684 = vmatpush1.bf16.msra.mxu1 %v8015_v46 }
 0x3c8   : > { %6685 = vmatprep.subr.bf16.mxu1 %v8008_v23 }
 0x3cb   : > { %6686 = vmatpush1.bf16.msra.mxu1 %v8007_v32 }
 0x3cc   : > { %6687 = vmatprep.subr.bf16.mxu1 %v8000_v11 }
 0x3cf   : > { %6688 = vmatpush1.bf16.msra.mxu1 %v7999_v8 }
 0x3d0   : > { %6689 = vmatprep.subr.bf16.mxu1 %v8120_v29 }
 0x3d3   : > { %6690 = vmatpush2.bf16.msra.mxu1 %v8119_v50 }
 0x3d4   : > { %6691 = vmatprep.subr.bf16.mxu1 %v8112_v52 }
 0x3d7   : > { %6692 = vmatpush2.bf16.msra.mxu1 %v8111_v27 }
 0x3d8   : > { %6693 = vmatprep.subr.bf16.mxu1 %v8104_v3 }
 0x3db   : > { %6694 = vmatpush2.bf16.msra.mxu1 %v8103_v57 }
 0x3dc   : > { %6695 = vmatprep.subr.bf16.mxu1 %v8096_v13 }
 0x3df   : > { %6696 = vmatpush2.bf16.msra.mxu1 %v8095_v43 }
 0x3e0   : > { %6697 = vmatprep.subr.bf16.mxu1 %v8088_v28 }
 0x3e3   : > { %6698 = vmatpush2.bf16.msra.mxu1 %v8087_v53 }
 0x3e4   : > { %6699 = vmatprep.subr.bf16.mxu1 %v8080_v2 }
 0x3e7   : > { %6700 = vmatpush2.bf16.msra.mxu1 %v8079_v55 }
 0x3e8   : > { %6701 = vmatprep.subr.bf16.mxu1 %v8072_v1 }
 0x3eb   : > { %6702 = vmatpush2.bf16.msra.mxu1 %v8071_v18 }
 0x3ec   : > { %6703 = vmatprep.subr.bf16.mxu1 %v8064_v63 }
 0x3ef   : > { %6704 = vmatpush2.bf16.msra.mxu1 %v8063_v22  ;;  %v6502_v10 = vpop.f32.mrf.mxu0 }
 0x3f0   : > { %v6503_v62 = vadd.f32 %v6502_v10, %v6357_v9 }
 0x3f1   : > { %v6504_v40 = vpop.f32.mrf.mxu0 }
 0x3f2   : > { %6706 = vmatmul.mubr.bf16.vlgmr.msra.gmra.mxu1 %v11627_v26  ;;  %v6461_v42 = vpop.f32.mrf.mxu1  ;;  %v6505_v23 = vadd.f32 %v6504_v40, %v6361_v4 }
 0x3f3   : > { %v6462_v59 = vadd.f32 %v6461_v42, %v6421_v14  ;;  %v6506_v51 = vpop.f32.mrf.mxu0 }
 0x3f4   : > { %v6463_v54 = vpop.f32.mrf.mxu1 }
 0x3f5   : > { %v6464_v19 = vadd.f32 %v6463_v54, %v6423_v20  ;;  %v6507_v21 = vpop.f32.mrf.mxu0 }
 0x3f6   : > { %v6465_v58 = vpop.f32.mrf.mxu1 }
 0x3f7   : > { %v6722_v37 = vcombine.low %v6462_v59, %v6464_v19 }
 0x3f8   : > { %v6466_v56 = vpop.f32.mrf.mxu1 }
 0x3f9   : > { %v12131_v29 = vrot.slane %v6722_v37, %v11614_v48 }
 0x42f   : > { %v6584_v26 = vpop.f32.mrf.mxu0 }
 0x431   : > { %v6586_v44 = vpop.f32.mrf.mxu0 }
 0x432   : > { %v6543_v46 = vpop.f32.mrf.mxu1 }
 0x433   : > { %v6544_v60 = vadd.f32 %v6543_v46, %v6503_v62  ;;  %v6588_v45 = vpop.f32.mrf.mxu0 }
 0x434   : > { %v6545_v32 = vpop.f32.mrf.mxu1 }
 0x435   : > { %v6546_v11 = vadd.f32 %v6545_v32, %v6505_v23  ;;  %v6589_v31 = vpop.f32.mrf.mxu0 }
 0x436   : > { %v6547_v49 = vpop.f32.mrf.mxu1 }
 0x437   : > { %v6723_v0 = vcombine.low %v6544_v60, %v6546_v11 }
 0x438   : > { %v6548_v8 = vpop.f32.mrf.mxu1 }
 0x439   : > { %v12134_v35 = vrot.slane %v6723_v0, %v11614_v48 }
 0x43b   : > { %v6754_v47 = vcombine.low %v12131_v29, %v12134_v35 }
 0x43c   : > { %9068 = shalt.err (!%p9065_p3)
}
 0x43d   : > { %s9069_s25 = scalar_lea.hbm %s6790_s20, 64  ;;  %s9073_s15 = scalar_lea.hbm %s12199_s5, 128 }
 0x43e   : > { %p9070_p4 = scmp.ne.s32.totalorder %s6790_s20, %s9069_s25  ;;  %p9074_p9 = scmp.lt.s32.totalorder %s6790_s20, %s12199_s5 }
 0x43f   : > { %p9075_p10 = scmp.lt.s32.totalorder %s9073_s15, %s9069_s25 }
 0x440   : > { %p9071_p7 = pnand %p9070_p4, %p9192_p5 }
 0x441   : > { %p9076_p11 = por %p9075_p10, %p9074_p9 }
 0x442   : > { %p9072_p8 = pneg %p9071_p7 }
 0x444   : > { %p9077_p12 = pnand %p9076_p11, %p9072_p8 }
 0x446   : > { %9080 = shalt.err (!%p9077_p12)
}
 0x447   : > { %8128 = dma.vmem_to_hbm [thread:$0]  (%p9192_p5), %s6793_s17, 64, %s6790_s20, %s6774_s28   ;;  %v6364_v17 = vsub.s32 4, %v11431_v34  ;;  %v6368_v50 = vsub.s32 5, %v11431_v34  ;;  %v6372_v53 = vsub.s32 6, %v11431_v34  ;;  %v6376_v2 = vsub.s32 7, %v11431_v34 }
 0x448   : > { %s6884_s7 = sshll.u32 %s9312_s26, 3  ;;  %v6762_v34 = vrot.slane %v6754_v47, %v11614_v48 }
 0x449   : > { %v6365_v52 = vrot.slane %v12113_v33, %v6364_v17  ;;  %v6369_v39 = vrot.slane %v12113_v33, %v6368_v50  ;;  %v6373_v30 = vrot.slane %v12113_v33, %v6372_v53  ;;  %v6377_v41 = vrot.slane %v12113_v33, %v6376_v2  ;;  %s260_s13 = scalar_lea.vmem %s12200_s6, %s6884_s7 }
 0x44b   : > { %v6585_v27 = vadd.f32 %v6584_v26, %v6365_v52  ;;  %v6587_v36 = vadd.f32 %v6586_v44, %v6369_v39 }
 0x46f   : > { %v6666_v5 = vpop.f32.mrf.mxu0 }
 0x470   : > { %v6667_v1 = vadd.f32 %v6666_v5, %v6373_v30 }
 0x471   : > { %v6668_v3 = vpop.f32.mrf.mxu0 }
 0x472   : > { %v6625_v24 = vpop.f32.mrf.mxu1  ;;  %v6669_v15 = vadd.f32 %v6668_v3, %v6377_v41 }
 0x473   : > { %v6626_v57 = vadd.f32 %v6625_v24, %v6585_v27  ;;  %v6670_v13 = vpop.f32.mrf.mxu0 }
 0x474   : > { %v6627_v16 = vpop.f32.mrf.mxu1 }
 0x475   : > { %v6628_v61 = vadd.f32 %v6627_v16, %v6587_v36  ;;  %v6671_v43 = vpop.f32.mrf.mxu0 }
 0x476   : > { %v6629_v28 = vpop.f32.mrf.mxu1 }
 0x477   : > { %v6724_v38 = vcombine.low %v6626_v57, %v6628_v61 }
 0x478   : > { %v6630_v25 = vpop.f32.mrf.mxu1 }
 0x479   : > { %v6746_v10 = vrot.slane %v6724_v38, %v11614_v48 }
 0x4b2   : > { %v6707_v55 = vpop.f32.mrf.mxu1 }
 0x4b3   : > { %v6708_v18 = vadd.f32 %v6707_v55, %v6667_v1 }
 0x4b4   : > { %v6709_v12 = vpop.f32.mrf.mxu1 }
 0x4b5   : > { %v6710_v63 = vadd.f32 %v6709_v12, %v6669_v15 }
 0x4b6   : > { %v6711_v22 = vpop.f32.mrf.mxu1 }
 0x4b7   : > { %v6725_v6 = vcombine.low %v6708_v18, %v6710_v63 }
 0x4b8   : > { %v6712_v7 = vpop.f32.mrf.mxu1 }
 0x4b9   : > { %v6753_v14 = vrot.slane %v6725_v6, %v11614_v48 }
 0x4bb   : > { %v6755_v40 = vcombine.low %v6746_v10, %v6753_v14 }
 0x4bd   : > { %v6769_v33 = vrot.slane %v6755_v40, %v11614_v48 }
 0x4bf   : > { %v6770_v42 = vcombine.low %v6762_v34, %v6769_v33 }
 0x4c1   : > { %6772 = vst [vmem:[%s260_s13] sm:$0xff] %v6770_v42 }
 0x4c2 PF: > { %p8134_p5 = scmp.ge.s32.totalorder %s9115_s24, 2  ;;  %s6807_s26 = sand.u32 1, %s9103_s21  }
 0x4c3   : > { %s6808_s20 = scalar_lea.sflag [#allocation3], %s6807_s26 }
 0x4c4   : > { %p8131_p13 = pnand %p8134_p5, %p9196_p6 }
 0x4c6   : > { %p8132_p0 = pneg %p8131_p13 }
 0x4c8   : > { %9098 = dma.done.wait (%p8132_p0), %s6808_s20, 64  }
 0x4c9   : > { %9100 = vsyncadd (%p8132_p0), %s6808_s20, 4294967232  ;;  %p17_p1 = scmp.ge.s32.totalorder %s9179_s27, 4   ;;  %s12203_s21 = smov %s9107_s22 }
 0x4ca   : > { %s12204_s22 = smov %s9111_s23  ;;  %s12205_s23 = smov %s9190_s30 }
 0x4cb   : > { %s12206_s24 = smov %s9179_s27  ;;  %19 = sbr.rel (!%p17_p1) target bundleno = 3 (0x3), region = 89 }
 0x4d0   :  { %6820 = vsyncpa [#allocation3], 1 }
 0x4d1   :  { %6822 = vsyncpa [#allocation3 + $0x1], 1 }

</bundles_post_ra>
